<compile_context>
chip_gen: v7x
topology: tpu7x:2x2x1
jax: 0.10.0
libtpu: 0.0.40
codegen_flags: <defaults>
</compile_context>

<pallas_src>
import jax
import jax.numpy as jnp
from jax import lax
from jax.experimental import pallas as pl
from jax.experimental.pallas import tpu as pltpu


def _sigmoid(x):
    # Exact identity sigmoid(x) == 0.5*(tanh(0.5x)+1); keeps the transcendental
    # on the EUP instead of an exp+divide on the VALU path.
    return 0.5 * (jnp.tanh(0.5 * x) + 1.0)


# -----------------------------------------------------------------------------
# Pallas kernel: chunked GRU recurrence (final hidden state out)
# -----------------------------------------------------------------------------
def gru_kernel(x_ref, wih_ref, whh_ref, bgi_ref, bhn_ref, hout_ref,
               h_ref, gi_ref):
    # x_ref   : (Tc, Bt, D)      bf16  time-major hidden-state chunk
    # wih_ref : (D, 3H)          bf16  input->gates weights (gate order r,z,n)
    # whh_ref : (H, 3H)          bf16  hidden->gates weights
    # bgi_ref : (1, 3H)          f32   b_ih + [b_hr, b_hz, 0] (folded biases)
    # bhn_ref : (1, H)           f32   b_hn
    # hout_ref: (Bt, H)          f32   final hidden state for this batch tile
    # h_ref   : VMEM (Bt, H)     f32   hidden-state carry across time chunks
    # gi_ref  : VMEM (Tc, Bt, 3H) bf16 pre-computed input-side gate pre-acts
    Tc, Bt, D = x_ref.shape
    H = whh_ref.shape[0]
    ti = pl.program_id(1)
    nt = pl.num_programs(1)

    @pl.when(ti == 0)
    def _init():
        h_ref[...] = jnp.zeros_like(h_ref)

    # ---- hoisted input projection: ONE MXU-sized matmul per chunk -----------
    # (Tc*Bt, D) @ (D, 3H) instead of Tc tiny (Bt, D) matmuls inside the loop.
    x2d = x_ref[...].reshape(Tc * Bt, D)
    gi = jnp.dot(x2d, wih_ref[...], preferred_element_type=jnp.float32)
    # Bias folded in (f32), stored bf16 (halves the largest scratch).  The
    # leading-dim index gi_ref[t] below is an aligned full-tile access, so the
    # (Tc, Bt, 3H) layout is kept (safer than a dynamic sublane slice of a
    # packed 2-D scratch for arbitrary Bt).
    gi_ref[...] = (gi + bgi_ref[...]).reshape(Tc, Bt, 3 * H).astype(gi_ref.dtype)

    # ---- loop-invariant broadcast hoisted out of the recurrence --------------
    b_hn = jnp.broadcast_to(bhn_ref[...], (Bt, H))

    def step(t, h):
        gi_t = gi_ref[t].astype(jnp.float32)                        # (Bt, 3H)
        gh = jnp.dot(h.astype(jnp.bfloat16), whh_ref[...],
                     preferred_element_type=jnp.float32)            # (Bt, 3H)
        # Fused r/z: one add + one sigmoid over the contiguous 2H slab.
        rz = _sigmoid(gi_t[:, :2 * H] + gh[:, :2 * H])
        r, z = rz[:, :H], rz[:, H:]
        n = jnp.tanh(gi_t[:, 2 * H:] + r * (gh[:, 2 * H:] + b_hn))
        return n + z * (h - n)          # == (1 - z) * n + z * h

    # Deep unroll only while vreg pressure is low (small Bt); a single (Bt,3H)
    # f32 gh already exceeds the 64-vreg file at Bt>=128, so unroll=4 there.
    unroll = True if (Tc <= 16 and Bt <= 64) else 4
    h = lax.fori_loop(0, Tc, step, h_ref[...], unroll=unroll)
    h_ref[...] = h

    @pl.when(ti == nt - 1)
    def _finalize():
        hout_ref[...] = h


# -----------------------------------------------------------------------------
# Chip-aware tile / VMEM selection
# -----------------------------------------------------------------------------
def _tpu_caps():
    """Return (vmem_capacity_bytes, mxu_rows, parallel_cores) with fallbacks."""
    vmem_cap = 64 * 1024 * 1024      # conservative default (v7x per-TensorCore)
    mxu_rows = 256                   # v6e / v7x MXU M dimension
    cores = 1
    try:
        vmem_cap = int(pltpu.get_tpu_info().vmem_capacity_bytes)
    except Exception:
        pass
    try:
        kind = jax.devices()[0].device_kind.lower()
        if ("v5 lite" in kind) or ("v5e" in kind) or ("v5lite" in kind):
            mxu_rows = 128
            vmem_cap = min(vmem_cap, 128 * 1024 * 1024)
        elif "v7" in kind:
            cores = 2
            vmem_cap = min(vmem_cap, 64 * 1024 * 1024)
    except Exception:
        pass
    return vmem_cap, mxu_rows, cores


def _pick_time_chunk(T, vmem_cap):
    cap = 32 if vmem_cap >= 96 * 1024 * 1024 else 16   # shrink Tc, not Bt, on v7x
    for c in range(min(T, cap), 0, -1):
        if T % c == 0:
            return c
    return T


def _pick_batch_tile(B, mxu_rows, cores):
    cap = mxu_rows                      # Bt is the MXU M dim of the per-step matmul
    if cores > 1 and B >= 16:
        cap = min(cap, max(8, B // cores))   # keep >=2 tiles: feed both TensorCores
    if B <= cap or B % 8 != 0:
        return B
    top = min(cap, B)
    for c in range(top - top % 8, 7, -8):
        if B % c == 0:
            return c
    return B


# -----------------------------------------------------------------------------
# Wrapper: bias folding, BlockSpecs, compiler params
# -----------------------------------------------------------------------------
def gru_pallas(hidden_states_tm, wih, whh, bih, bhh, *,
               single_buffer_weights=True):
    """hidden_states_tm: (T, B, D) time-major -> final GRU hidden state (B, H) f32."""
    T, B, D = hidden_states_tm.shape
    H = whh.shape[0]

    vmem_cap, mxu_rows, cores = _tpu_caps()
    Tc = _pick_time_chunk(T, vmem_cap)
    Bt = _pick_batch_tile(B, mxu_rows, cores)
    assert T % Tc == 0 and B % Bt == 0
    nb, nt = B // Bt, T // Tc

    # Fold b_ih and the r/z parts of b_hh into the input-side bias; b_hn must
    # stay inside the r * (...) term of the n gate (torch.nn.GRU semantics).
    b_gi = (bih + jnp.concatenate(
        [bhh[:, :2 * H], jnp.zeros((1, H), bih.dtype)], axis=1)).astype(jnp.float32)
    b_hn = bhh[:, 2 * H:].astype(jnp.float32)

    # bf16 activations + weights for the MXU matmuls (f32 accumulation in-kernel).
    x_bf = hidden_states_tm.astype(jnp.bfloat16)
    wih_bf = wih.astype(jnp.bfloat16)
    whh_bf = whh.astype(jnp.bfloat16)

    weight_bytes = (D * 3 * H + H * 3 * H) * 2 + (3 * H + H) * 4
    wbuf = 1 if single_buffer_weights else 2
    vmem_est = (2 * Tc * Bt * D * 2          # double-buffered bf16 input chunk
                + Tc * Bt * 3 * H * 2        # bf16 gi scratch
                + Bt * H * 4                 # h carry
                + wbuf * weight_bytes        # weights / folded biases
                + 2 * Bt * H * 4)            # output block
    vmem_limit = int(min(max(2 * vmem_est, 32 * 1024 * 1024), 0.75 * vmem_cap))
    vmem_limit = max(vmem_limit, int(1.25 * vmem_est))   # never starve the kernel

    cost = pl.CostEstimate(
        flops=2 * T * B * D * 3 * H + 2 * T * B * H * 3 * H,
        transcendentals=3 * T * B * H,
        bytes_accessed=T * B * D * 2 + weight_bytes + B * H * 4,
    )

    def const_spec(shape):
        # Loop-invariant operands: never re-fetched, so single-buffer them to
        # return VMEM to the activation tiles.
        if single_buffer_weights:
            return pl.BlockSpec(shape, lambda bi, ti: (0,) * len(shape),
                                pipeline_mode=pl.Buffered(1))
        return pl.BlockSpec(shape, lambda bi, ti: (0,) * len(shape))

    grid_spec = pltpu.PrefetchScalarGridSpec(
        num_scalar_prefetch=0,
        grid=(nb, nt),
        in_specs=[
            pl.BlockSpec((Tc, Bt, D), lambda bi, ti: (ti, bi, 0)),   # x chunk
            const_spec((D, 3 * H)),                                   # wih
            const_spec((H, 3 * H)),                                   # whh
            const_spec((1, 3 * H)),                                   # b_gi
            const_spec((1, H)),                                       # b_hn
        ],
        out_specs=pl.BlockSpec((Bt, H), lambda bi, ti: (bi, 0)),
        scratch_shapes=[
            pltpu.VMEM((Bt, H), jnp.float32),            # h carry
            pltpu.VMEM((Tc, Bt, 3 * H), jnp.bfloat16),   # gi for the chunk
        ],
    )

    return pl.pallas_call(
        gru_kernel,
        out_shape=jax.ShapeDtypeStruct((B, H), jnp.float32),
        grid_spec=grid_spec,
        compiler_params=pltpu.CompilerParams(
            dimension_semantics=("parallel", "arbitrary"),
            vmem_limit_bytes=vmem_limit),
        cost_estimate=cost,
    )(x_bf, wih_bf, whh_bf, b_gi, b_hn)


# -----------------------------------------------------------------------------
# Pure-JAX reference (same math as torch.nn.GRU + nn.Linear), f32 throughout
# -----------------------------------------------------------------------------
def gru_fc_ref(hidden_states, wih, whh, bih, bhh, wfc, bfc):
    B, T, D = hidden_states.shape
    H = whh.shape[0]

    def step(h, x_t):
        gi = x_t @ wih + bih
        gh = h @ whh + bhh
        r = jax.nn.sigmoid(gi[:, 0:H] + gh[:, 0:H])
        z = jax.nn.sigmoid(gi[:, H:2 * H] + gh[:, H:2 * H])
        n = jnp.tanh(gi[:, 2 * H:3 * H] + r * gh[:, 2 * H:3 * H])
        return (1.0 - z) * n + z * h, None

    h0 = jnp.zeros((B, H), jnp.float32)
    h_T, _ = lax.scan(step, h0, jnp.transpose(hidden_states, (1, 0, 2)))
    return h_T @ wfc + bfc


# -----------------------------------------------------------------------------
# Frozen-RoBERTa stand-in (glue, plain JAX), emits TIME-MAJOR activations so no
# full (B,T,D) HBM transpose is needed before the kernel.
# -----------------------------------------------------------------------------
# TODO(synk): the full RoBERTa encoder (12 frozen transformer layers) is an
# external feature extractor in the PyTorch module and is not reproduced here;
# a deterministic embedding lookup stands in for `last_hidden_state`.
def fake_roberta_time_major(input_ids, attention_mask, embed_table):
    hs = jnp.take(embed_table, input_ids.T, axis=0)                 # (T, B, D)
    return hs * attention_mask.T[..., None].astype(jnp.float32)


# -----------------------------------------------------------------------------
# Full forward (mirrors RoBERTaGRU.forward)
# -----------------------------------------------------------------------------
def make_forward(single_buffer_weights=True):
    @jax.jit
    def forward(input_ids, attention_mask, params):
        hs_tm = fake_roberta_time_major(input_ids, attention_mask, params["embed"])
        h_T = gru_pallas(hs_tm,
                         params["wih"], params["whh"],
                         params["bih"], params["bhh"],
                         single_buffer_weights=single_buffer_weights)
        # Lane-sparse O=2 head in plain JAX (trivially cheap, f32, avoids masked
        # 2-lane stores inside the kernel).
        return h_T @ params["wfc"] + params["bfc"]
    return forward


if __name__ == "__main__":
    # Small shapes consistent with the module: D=768 (RoBERTa), H=256, O=2.
    B, T, D, H, O = 8, 8, 768, 256, 2
    VOCAB = 64

    key = jax.random.PRNGKey(0)
    keys = jax.random.split(key, 9)
    bound = 1.0 / jnp.sqrt(jnp.float32(H))  # torch.nn.GRU / Linear init scale

    params = {
        "embed": jax.random.normal(keys[0], (VOCAB, D), jnp.float32) * 0.02,
        "wih": jax.random.uniform(keys[1], (D, 3 * H), jnp.float32, -bound, bound),
        "whh": jax.random.uniform(keys[2], (H, 3 * H), jnp.float32, -bound, bound),
        "bih": jax.random.uniform(keys[3], (1, 3 * H), jnp.float32, -bound, bound),
        "bhh": jax.random.uniform(keys[4], (1, 3 * H), jnp.float32, -bound, bound),
        "wfc": jax.random.uniform(keys[5], (H, O), jnp.float32, -bound, bound),
        "bfc": jax.random.uniform(keys[6], (1, O), jnp.float32, -bound, bound),
    }

    input_ids = jax.random.randint(keys[7], (B, T), 0, VOCAB, dtype=jnp.int32)
    attention_mask = jnp.ones((B, T), dtype=jnp.int32)

    forward = make_forward(single_buffer_weights=True)
    try:
        logits = jax.block_until_ready(forward(input_ids, attention_mask, params))
    except Exception:
        # Fallback if this jax version rejects single-buffered (Buffered(1))
        # constant-operand BlockSpecs: rebuild with default double buffering.
        forward = make_forward(single_buffer_weights=False)
        logits = jax.block_until_ready(forward(input_ids, attention_mask, params))

    # Sanity check against the f32 pure-JAX reference (kernel uses bf16
    # activations/matmuls, so tolerance is relaxed accordingly).
    hs_btd = (jnp.take(params["embed"], input_ids, axis=0)
              * attention_mask[..., None].astype(jnp.float32))
    ref = gru_fc_ref(hs_btd, params["wih"], params["whh"], params["bih"],
                     params["bhh"], params["wfc"], params["bfc"])
    assert logits.shape == (B, O)
    assert jnp.allclose(logits, ref, atol=3e-2, rtol=3e-2), (logits, ref)

    print("KERNEL_OK")
</pallas_src>

<mosaic_0001>
module attributes {stable_mosaic.version = 11 : i64} {
  func.func @gru_kernel(%arg0: i32, %arg1: i32, %arg2: memref<8x8x768xbf16, #tpu.memory_space<vmem>>, %arg3: memref<768x768xbf16, #tpu.memory_space<vmem>>, %arg4: memref<256x768xbf16, #tpu.memory_space<vmem>>, %arg5: memref<1x768xf32, #tpu.memory_space<vmem>>, %arg6: memref<1x256xf32, #tpu.memory_space<vmem>>, %arg7: memref<8x256xf32, #tpu.memory_space<vmem>>, %arg8: memref<8x256xf32, #tpu.memory_space<vmem>>, %arg9: memref<8x8x768xbf16, #tpu.memory_space<vmem>>) attributes {dimension_semantics = [#tpu.dimension_semantics<parallel>, #tpu.dimension_semantics<arbitrary>], iteration_bounds = array<i64: 1, 1>, scalar_prefetch = 0 : i64, scratch_operands = 2 : i64, tpu.core_type = #tpu.core_type<tc>, window_params = [{transform_indices = @transform_0, window_bounds = array<i64: 8, 8, 768>}, {pipeline_mode = #tpu.pipeline_mode<synchronous>, transform_indices = @transform_1, window_bounds = array<i64: 768, 768>}, {pipeline_mode = #tpu.pipeline_mode<synchronous>, transform_indices = @transform_2, window_bounds = array<i64: 256, 768>}, {pipeline_mode = #tpu.pipeline_mode<synchronous>, transform_indices = @transform_3, window_bounds = array<i64: 1, 768>}, {pipeline_mode = #tpu.pipeline_mode<synchronous>, transform_indices = @transform_4, window_bounds = array<i64: 1, 256>}, {transform_indices = @transform_5, window_bounds = array<i64: 8, 256>}]} {
    %c0_i32 = arith.constant 0 : i32
    %0 = arith.cmpi eq, %arg1, %c0_i32 : i32
    %1 = arith.extui %0 : i1 to i32
    %c0_i32_0 = arith.constant 0 : i32
    %2 = arith.cmpi ne, %1, %c0_i32_0 : i32
    scf.if %2 {
      %cst_83 = arith.constant 0.000000e+00 : f32
      %245 = vector.broadcast %cst_83 : f32 to vector<8x256xf32>
      %c0_84 = arith.constant 0 : index
      %c0_85 = arith.constant 0 : index
      %246 = vector.load %arg8[%c0_84, %c0_85] : memref<8x256xf32, #tpu.memory_space<vmem>>, vector<8x256xf32>
      tpu.vector_store %arg8[%c0_84, %c0_85], %245 {strides = array<i32>} : memref<8x256xf32, #tpu.memory_space<vmem>>, vector<8x256xf32>,
    } else {
    }
    %c0 = arith.constant 0 : index
    %c0_1 = arith.constant 0 : index
    %c0_2 = arith.constant 0 : index
    %3 = vector.load %arg2[%c0, %c0_1, %c0_2] : memref<8x8x768xbf16, #tpu.memory_space<vmem>>, vector<8x8x768xbf16>
    %4 = vector.shape_cast %3 : vector<8x8x768xbf16> to vector<64x768xbf16>
    %c0_3 = arith.constant 0 : index
    %c0_4 = arith.constant 0 : index
    %5 = vector.load %arg3[%c0_3, %c0_4] : memref<768x768xbf16, #tpu.memory_space<vmem>>, vector<768x768xbf16>
    %cst = arith.constant dense<0.000000e+00> : vector<64x768xf32>
    %6 = tpu.matmul %4, %5, %cst {dimension_numbers = #tpu.dot_dimension_numbers<[1], [0], [0], [1], [0, 0, 1, 1], [], []>} : vector<64x768xbf16>, vector<768x768xbf16>, vector<64x768xf32> -> vector<64x768xf32>
    %c0_5 = arith.constant 0 : index
    %c0_6 = arith.constant 0 : index
    %7 = vector.load %arg5[%c0_5, %c0_6] : memref<1x768xf32, #tpu.memory_space<vmem>>, vector<1x768xf32>
    %8 = vector.broadcast %7 : vector<1x768xf32> to vector<64x768xf32>
    %9 = arith.addf %6, %8 : vector<64x768xf32>
    %10 = vector.shape_cast %9 : vector<64x768xf32> to vector<8x8x768xf32>
    %11 = arith.truncf %10 : vector<8x8x768xf32> to vector<8x8x768xbf16>
    %c0_7 = arith.constant 0 : index
    %c0_8 = arith.constant 0 : index
    %c0_9 = arith.constant 0 : index
    %12 = vector.load %arg9[%c0_7, %c0_8, %c0_9] : memref<8x8x768xbf16, #tpu.memory_space<vmem>>, vector<8x8x768xbf16>
    tpu.vector_store %arg9[%c0_7, %c0_8, %c0_9], %11 {strides = array<i32>} : memref<8x8x768xbf16, #tpu.memory_space<vmem>>, vector<8x8x768xbf16>,
    %c0_10 = arith.constant 0 : index
    %c0_11 = arith.constant 0 : index
    %13 = vector.load %arg6[%c0_10, %c0_11] : memref<1x256xf32, #tpu.memory_space<vmem>>, vector<1x256xf32>
    %14 = vector.shape_cast %13 : vector<1x256xf32> to vector<1x256xf32>
    %15 = vector.broadcast %14 : vector<1x256xf32> to vector<8x256xf32>
    %c0_12 = arith.constant 0 : index
    %c0_13 = arith.constant 0 : index
    %16 = vector.load %arg8[%c0_12, %c0_13] : memref<8x256xf32, #tpu.memory_space<vmem>>, vector<8x256xf32>
    %c0_i32_14 = arith.constant 0 : i32
    %17 = arith.index_cast %c0_i32_14 : i32 to index
    %c0_15 = arith.constant 0 : index
    %c0_16 = arith.constant 0 : index
    %18 = vector.load %arg9[%17, %c0_15, %c0_16] : memref<8x8x768xbf16, #tpu.memory_space<vmem>>, vector<1x8x768xbf16>
    %19 = vector.shape_cast %18 : vector<1x8x768xbf16> to vector<8x768xbf16>
    %20 = arith.extf %19 : vector<8x768xbf16> to vector<8x768xf32>
    %21 = arith.truncf %16 : vector<8x256xf32> to vector<8x256xbf16>
    %c0_17 = arith.constant 0 : index
    %c0_18 = arith.constant 0 : index
    %22 = vector.load %arg4[%c0_17, %c0_18] : memref<256x768xbf16, #tpu.memory_space<vmem>>, vector<256x768xbf16>
    %cst_19 = arith.constant dense<0.000000e+00> : vector<8x768xf32>
    %23 = tpu.matmul %21, %22, %cst_19 {dimension_numbers = #tpu.dot_dimension_numbers<[1], [0], [0], [1], [0, 0, 1, 1], [], []>} : vector<8x256xbf16>, vector<256x768xbf16>, vector<8x768xf32> -> vector<8x768xf32>
    %24 = vector.extract_strided_slice %20 {offsets = [0, 0], sizes = [8, 512], strides = [1, 1]} : vector<8x768xf32> to vector<8x512xf32>
    %25 = vector.extract_strided_slice %23 {offsets = [0, 0], sizes = [8, 512], strides = [1, 1]} : vector<8x768xf32> to vector<8x512xf32>
    %26 = arith.addf %24, %25 : vector<8x512xf32>
    %cst_20 = arith.constant 5.000000e-01 : f32
    %27 = vector.broadcast %cst_20 : f32 to vector<8x512xf32>
    %28 = arith.mulf %27, %26 : vector<8x512xf32>
    %29 = math.tanh %28 : vector<8x512xf32>
    %cst_21 = arith.constant 1.000000e+00 : f32
    %30 = vector.broadcast %cst_21 : f32 to vector<8x512xf32>
    %31 = arith.addf %29, %30 : vector<8x512xf32>
    %cst_22 = arith.constant 5.000000e-01 : f32
    %32 = vector.broadcast %cst_22 : f32 to vector<8x512xf32>
    %33 = arith.mulf %32, %31 : vector<8x512xf32>
    %34 = vector.extract_strided_slice %33 {offsets = [0, 0], sizes = [8, 256], strides = [1, 1]} : vector<8x512xf32> to vector<8x256xf32>
    %35 = vector.extract_strided_slice %33 {offsets = [0, 256], sizes = [8, 256], strides = [1, 1]} : vector<8x512xf32> to vector<8x256xf32>
    %36 = vector.extract_strided_slice %20 {offsets = [0, 512], sizes = [8, 256], strides = [1, 1]} : vector<8x768xf32> to vector<8x256xf32>
    %37 = vector.extract_strided_slice %23 {offsets = [0, 512], sizes = [8, 256], strides = [1, 1]} : vector<8x768xf32> to vector<8x256xf32>
    %38 = arith.addf %37, %15 : vector<8x256xf32>
    %39 = arith.mulf %34, %38 : vector<8x256xf32>
    %40 = arith.addf %36, %39 : vector<8x256xf32>
    %41 = math.tanh %40 : vector<8x256xf32>
    %42 = arith.subf %16, %41 : vector<8x256xf32>
    %43 = arith.mulf %35, %42 : vector<8x256xf32>
    %44 = arith.addf %41, %43 : vector<8x256xf32>
    %c1_i32 = arith.constant 1 : i32
    %45 = arith.index_cast %c1_i32 : i32 to index
    %c0_23 = arith.constant 0 : index
    %c0_24 = arith.constant 0 : index
    %46 = vector.load %arg9[%45, %c0_23, %c0_24] : memref<8x8x768xbf16, #tpu.memory_space<vmem>>, vector<1x8x768xbf16>
    %47 = vector.shape_cast %46 : vector<1x8x768xbf16> to vector<8x768xbf16>
    %48 = arith.extf %47 : vector<8x768xbf16> to vector<8x768xf32>
    %49 = arith.truncf %44 : vector<8x256xf32> to vector<8x256xbf16>
    %c0_25 = arith.constant 0 : index
    %c0_26 = arith.constant 0 : index
    %50 = vector.load %arg4[%c0_25, %c0_26] : memref<256x768xbf16, #tpu.memory_space<vmem>>, vector<256x768xbf16>
    %cst_27 = arith.constant dense<0.000000e+00> : vector<8x768xf32>
    %51 = tpu.matmul %49, %50, %cst_27 {dimension_numbers = #tpu.dot_dimension_numbers<[1], [0], [0], [1], [0, 0, 1, 1], [], []>} : vector<8x256xbf16>, vector<256x768xbf16>, vector<8x768xf32> -> vector<8x768xf32>
    %52 = vector.extract_strided_slice %48 {offsets = [0, 0], sizes = [8, 512], strides = [1, 1]} : vector<8x768xf32> to vector<8x512xf32>
    %53 = vector.extract_strided_slice %51 {offsets = [0, 0], sizes = [8, 512], strides = [1, 1]} : vector<8x768xf32> to vector<8x512xf32>
    %54 = arith.addf %52, %53 : vector<8x512xf32>
    %cst_28 = arith.constant 5.000000e-01 : f32
    %55 = vector.broadcast %cst_28 : f32 to vector<8x512xf32>
    %56 = arith.mulf %55, %54 : vector<8x512xf32>
    %57 = math.tanh %56 : vector<8x512xf32>
    %cst_29 = arith.constant 1.000000e+00 : f32
    %58 = vector.broadcast %cst_29 : f32 to vector<8x512xf32>
    %59 = arith.addf %57, %58 : vector<8x512xf32>
    %cst_30 = arith.constant 5.000000e-01 : f32
    %60 = vector.broadcast %cst_30 : f32 to vector<8x512xf32>
    %61 = arith.mulf %60, %59 : vector<8x512xf32>
    %62 = vector.extract_strided_slice %61 {offsets = [0, 0], sizes = [8, 256], strides = [1, 1]} : vector<8x512xf32> to vector<8x256xf32>
    %63 = vector.extract_strided_slice %61 {offsets = [0, 256], sizes = [8, 256], strides = [1, 1]} : vector<8x512xf32> to vector<8x256xf32>
    %64 = vector.extract_strided_slice %48 {offsets = [0, 512], sizes = [8, 256], strides = [1, 1]} : vector<8x768xf32> to vector<8x256xf32>
    %65 = vector.extract_strided_slice %51 {offsets = [0, 512], sizes = [8, 256], strides = [1, 1]} : vector<8x768xf32> to vector<8x256xf32>
    %66 = arith.addf %65, %15 : vector<8x256xf32>
    %67 = arith.mulf %62, %66 : vector<8x256xf32>
    %68 = arith.addf %64, %67 : vector<8x256xf32>
    %69 = math.tanh %68 : vector<8x256xf32>
    %70 = arith.subf %44, %69 : vector<8x256xf32>
    %71 = arith.mulf %63, %70 : vector<8x256xf32>
    %72 = arith.addf %69, %71 : vector<8x256xf32>
    %c2_i32 = arith.constant 2 : i32
    %73 = arith.index_cast %c2_i32 : i32 to index
    %c0_31 = arith.constant 0 : index
    %c0_32 = arith.constant 0 : index
    %74 = vector.load %arg9[%73, %c0_31, %c0_32] : memref<8x8x768xbf16, #tpu.memory_space<vmem>>, vector<1x8x768xbf16>
    %75 = vector.shape_cast %74 : vector<1x8x768xbf16> to vector<8x768xbf16>
    %76 = arith.extf %75 : vector<8x768xbf16> to vector<8x768xf32>
    %77 = arith.truncf %72 : vector<8x256xf32> to vector<8x256xbf16>
    %c0_33 = arith.constant 0 : index
    %c0_34 = arith.constant 0 : index
    %78 = vector.load %arg4[%c0_33, %c0_34] : memref<256x768xbf16, #tpu.memory_space<vmem>>, vector<256x768xbf16>
    %cst_35 = arith.constant dense<0.000000e+00> : vector<8x768xf32>
    %79 = tpu.matmul %77, %78, %cst_35 {dimension_numbers = #tpu.dot_dimension_numbers<[1], [0], [0], [1], [0, 0, 1, 1], [], []>} : vector<8x256xbf16>, vector<256x768xbf16>, vector<8x768xf32> -> vector<8x768xf32>
    %80 = vector.extract_strided_slice %76 {offsets = [0, 0], sizes = [8, 512], strides = [1, 1]} : vector<8x768xf32> to vector<8x512xf32>
    %81 = vector.extract_strided_slice %79 {offsets = [0, 0], sizes = [8, 512], strides = [1, 1]} : vector<8x768xf32> to vector<8x512xf32>
    %82 = arith.addf %80, %81 : vector<8x512xf32>
    %cst_36 = arith.constant 5.000000e-01 : f32
    %83 = vector.broadcast %cst_36 : f32 to vector<8x512xf32>
    %84 = arith.mulf %83, %82 : vector<8x512xf32>
    %85 = math.tanh %84 : vector<8x512xf32>
    %cst_37 = arith.constant 1.000000e+00 : f32
    %86 = vector.broadcast %cst_37 : f32 to vector<8x512xf32>
    %87 = arith.addf %85, %86 : vector<8x512xf32>
    %cst_38 = arith.constant 5.000000e-01 : f32
    %88 = vector.broadcast %cst_38 : f32 to vector<8x512xf32>
    %89 = arith.mulf %88, %87 : vector<8x512xf32>
    %90 = vector.extract_strided_slice %89 {offsets = [0, 0], sizes = [8, 256], strides = [1, 1]} : vector<8x512xf32> to vector<8x256xf32>
    %91 = vector.extract_strided_slice %89 {offsets = [0, 256], sizes = [8, 256], strides = [1, 1]} : vector<8x512xf32> to vector<8x256xf32>
    %92 = vector.extract_strided_slice %76 {offsets = [0, 512], sizes = [8, 256], strides = [1, 1]} : vector<8x768xf32> to vector<8x256xf32>
    %93 = vector.extract_strided_slice %79 {offsets = [0, 512], sizes = [8, 256], strides = [1, 1]} : vector<8x768xf32> to vector<8x256xf32>
    %94 = arith.addf %93, %15 : vector<8x256xf32>
    %95 = arith.mulf %90, %94 : vector<8x256xf32>
    %96 = arith.addf %92, %95 : vector<8x256xf32>
    %97 = math.tanh %96 : vector<8x256xf32>
    %98 = arith.subf %72, %97 : vector<8x256xf32>
    %99 = arith.mulf %91, %98 : vector<8x256xf32>
    %100 = arith.addf %97, %99 : vector<8x256xf32>
    %c3_i32 = arith.constant 3 : i32
    %101 = arith.index_cast %c3_i32 : i32 to index
    %c0_39 = arith.constant 0 : index
    %c0_40 = arith.constant 0 : index
    %102 = vector.load %arg9[%101, %c0_39, %c0_40] : memref<8x8x768xbf16, #tpu.memory_space<vmem>>, vector<1x8x768xbf16>
    %103 = vector.shape_cast %102 : vector<1x8x768xbf16> to vector<8x768xbf16>
    %104 = arith.extf %103 : vector<8x768xbf16> to vector<8x768xf32>
    %105 = arith.truncf %100 : vector<8x256xf32> to vector<8x256xbf16>
    %c0_41 = arith.constant 0 : index
    %c0_42 = arith.constant 0 : index
    %106 = vector.load %arg4[%c0_41, %c0_42] : memref<256x768xbf16, #tpu.memory_space<vmem>>, vector<256x768xbf16>
    %cst_43 = arith.constant dense<0.000000e+00> : vector<8x768xf32>
    %107 = tpu.matmul %105, %106, %cst_43 {dimension_numbers = #tpu.dot_dimension_numbers<[1], [0], [0], [1], [0, 0, 1, 1], [], []>} : vector<8x256xbf16>, vector<256x768xbf16>, vector<8x768xf32> -> vector<8x768xf32>
    %108 = vector.extract_strided_slice %104 {offsets = [0, 0], sizes = [8, 512], strides = [1, 1]} : vector<8x768xf32> to vector<8x512xf32>
    %109 = vector.extract_strided_slice %107 {offsets = [0, 0], sizes = [8, 512], strides = [1, 1]} : vector<8x768xf32> to vector<8x512xf32>
    %110 = arith.addf %108, %109 : vector<8x512xf32>
    %cst_44 = arith.constant 5.000000e-01 : f32
    %111 = vector.broadcast %cst_44 : f32 to vector<8x512xf32>
    %112 = arith.mulf %111, %110 : vector<8x512xf32>
    %113 = math.tanh %112 : vector<8x512xf32>
    %cst_45 = arith.constant 1.000000e+00 : f32
    %114 = vector.broadcast %cst_45 : f32 to vector<8x512xf32>
    %115 = arith.addf %113, %114 : vector<8x512xf32>
    %cst_46 = arith.constant 5.000000e-01 : f32
    %116 = vector.broadcast %cst_46 : f32 to vector<8x512xf32>
    %117 = arith.mulf %116, %115 : vector<8x512xf32>
    %118 = vector.extract_strided_slice %117 {offsets = [0, 0], sizes = [8, 256], strides = [1, 1]} : vector<8x512xf32> to vector<8x256xf32>
    %119 = vector.extract_strided_slice %117 {offsets = [0, 256], sizes = [8, 256], strides = [1, 1]} : vector<8x512xf32> to vector<8x256xf32>
    %120 = vector.extract_strided_slice %104 {offsets = [0, 512], sizes = [8, 256], strides = [1, 1]} : vector<8x768xf32> to vector<8x256xf32>
    %121 = vector.extract_strided_slice %107 {offsets = [0, 512], sizes = [8, 256], strides = [1, 1]} : vector<8x768xf32> to vector<8x256xf32>
    %122 = arith.addf %121, %15 : vector<8x256xf32>
    %123 = arith.mulf %118, %122 : vector<8x256xf32>
    %124 = arith.addf %120, %123 : vector<8x256xf32>
    %125 = math.tanh %124 : vector<8x256xf32>
    %126 = arith.subf %100, %125 : vector<8x256xf32>
    %127 = arith.mulf %119, %126 : vector<8x256xf32>
    %128 = arith.addf %125, %127 : vector<8x256xf32>
    %c4_i32 = arith.constant 4 : i32
    %129 = arith.index_cast %c4_i32 : i32 to index
    %c0_47 = arith.constant 0 : index
    %c0_48 = arith.constant 0 : index
    %130 = vector.load %arg9[%129, %c0_47, %c0_48] : memref<8x8x768xbf16, #tpu.memory_space<vmem>>, vector<1x8x768xbf16>
    %131 = vector.shape_cast %130 : vector<1x8x768xbf16> to vector<8x768xbf16>
    %132 = arith.extf %131 : vector<8x768xbf16> to vector<8x768xf32>
    %133 = arith.truncf %128 : vector<8x256xf32> to vector<8x256xbf16>
    %c0_49 = arith.constant 0 : index
    %c0_50 = arith.constant 0 : index
    %134 = vector.load %arg4[%c0_49, %c0_50] : memref<256x768xbf16, #tpu.memory_space<vmem>>, vector<256x768xbf16>
    %cst_51 = arith.constant dense<0.000000e+00> : vector<8x768xf32>
    %135 = tpu.matmul %133, %134, %cst_51 {dimension_numbers = #tpu.dot_dimension_numbers<[1], [0], [0], [1], [0, 0, 1, 1], [], []>} : vector<8x256xbf16>, vector<256x768xbf16>, vector<8x768xf32> -> vector<8x768xf32>
    %136 = vector.extract_strided_slice %132 {offsets = [0, 0], sizes = [8, 512], strides = [1, 1]} : vector<8x768xf32> to vector<8x512xf32>
    %137 = vector.extract_strided_slice %135 {offsets = [0, 0], sizes = [8, 512], strides = [1, 1]} : vector<8x768xf32> to vector<8x512xf32>
    %138 = arith.addf %136, %137 : vector<8x512xf32>
    %cst_52 = arith.constant 5.000000e-01 : f32
    %139 = vector.broadcast %cst_52 : f32 to vector<8x512xf32>
    %140 = arith.mulf %139, %138 : vector<8x512xf32>
    %141 = math.tanh %140 : vector<8x512xf32>
    %cst_53 = arith.constant 1.000000e+00 : f32
    %142 = vector.broadcast %cst_53 : f32 to vector<8x512xf32>
    %143 = arith.addf %141, %142 : vector<8x512xf32>
    %cst_54 = arith.constant 5.000000e-01 : f32
    %144 = vector.broadcast %cst_54 : f32 to vector<8x512xf32>
    %145 = arith.mulf %144, %143 : vector<8x512xf32>
    %146 = vector.extract_strided_slice %145 {offsets = [0, 0], sizes = [8, 256], strides = [1, 1]} : vector<8x512xf32> to vector<8x256xf32>
    %147 = vector.extract_strided_slice %145 {offsets = [0, 256], sizes = [8, 256], strides = [1, 1]} : vector<8x512xf32> to vector<8x256xf32>
    %148 = vector.extract_strided_slice %132 {offsets = [0, 512], sizes = [8, 256], strides = [1, 1]} : vector<8x768xf32> to vector<8x256xf32>
    %149 = vector.extract_strided_slice %135 {offsets = [0, 512], sizes = [8, 256], strides = [1, 1]} : vector<8x768xf32> to vector<8x256xf32>
    %150 = arith.addf %149, %15 : vector<8x256xf32>
    %151 = arith.mulf %146, %150 : vector<8x256xf32>
    %152 = arith.addf %148, %151 : vector<8x256xf32>
    %153 = math.tanh %152 : vector<8x256xf32>
    %154 = arith.subf %128, %153 : vector<8x256xf32>
    %155 = arith.mulf %147, %154 : vector<8x256xf32>
    %156 = arith.addf %153, %155 : vector<8x256xf32>
    %c5_i32 = arith.constant 5 : i32
    %157 = arith.index_cast %c5_i32 : i32 to index
    %c0_55 = arith.constant 0 : index
    %c0_56 = arith.constant 0 : index
    %158 = vector.load %arg9[%157, %c0_55, %c0_56] : memref<8x8x768xbf16, #tpu.memory_space<vmem>>, vector<1x8x768xbf16>
    %159 = vector.shape_cast %158 : vector<1x8x768xbf16> to vector<8x768xbf16>
    %160 = arith.extf %159 : vector<8x768xbf16> to vector<8x768xf32>
    %161 = arith.truncf %156 : vector<8x256xf32> to vector<8x256xbf16>
    %c0_57 = arith.constant 0 : index
    %c0_58 = arith.constant 0 : index
    %162 = vector.load %arg4[%c0_57, %c0_58] : memref<256x768xbf16, #tpu.memory_space<vmem>>, vector<256x768xbf16>
    %cst_59 = arith.constant dense<0.000000e+00> : vector<8x768xf32>
    %163 = tpu.matmul %161, %162, %cst_59 {dimension_numbers = #tpu.dot_dimension_numbers<[1], [0], [0], [1], [0, 0, 1, 1], [], []>} : vector<8x256xbf16>, vector<256x768xbf16>, vector<8x768xf32> -> vector<8x768xf32>
    %164 = vector.extract_strided_slice %160 {offsets = [0, 0], sizes = [8, 512], strides = [1, 1]} : vector<8x768xf32> to vector<8x512xf32>
    %165 = vector.extract_strided_slice %163 {offsets = [0, 0], sizes = [8, 512], strides = [1, 1]} : vector<8x768xf32> to vector<8x512xf32>
    %166 = arith.addf %164, %165 : vector<8x512xf32>
    %cst_60 = arith.constant 5.000000e-01 : f32
    %167 = vector.broadcast %cst_60 : f32 to vector<8x512xf32>
    %168 = arith.mulf %167, %166 : vector<8x512xf32>
    %169 = math.tanh %168 : vector<8x512xf32>
    %cst_61 = arith.constant 1.000000e+00 : f32
    %170 = vector.broadcast %cst_61 : f32 to vector<8x512xf32>
    %171 = arith.addf %169, %170 : vector<8x512xf32>
    %cst_62 = arith.constant 5.000000e-01 : f32
    %172 = vector.broadcast %cst_62 : f32 to vector<8x512xf32>
    %173 = arith.mulf %172, %171 : vector<8x512xf32>
    %174 = vector.extract_strided_slice %173 {offsets = [0, 0], sizes = [8, 256], strides = [1, 1]} : vector<8x512xf32> to vector<8x256xf32>
    %175 = vector.extract_strided_slice %173 {offsets = [0, 256], sizes = [8, 256], strides = [1, 1]} : vector<8x512xf32> to vector<8x256xf32>
    %176 = vector.extract_strided_slice %160 {offsets = [0, 512], sizes = [8, 256], strides = [1, 1]} : vector<8x768xf32> to vector<8x256xf32>
    %177 = vector.extract_strided_slice %163 {offsets = [0, 512], sizes = [8, 256], strides = [1, 1]} : vector<8x768xf32> to vector<8x256xf32>
    %178 = arith.addf %177, %15 : vector<8x256xf32>
    %179 = arith.mulf %174, %178 : vector<8x256xf32>
    %180 = arith.addf %176, %179 : vector<8x256xf32>
    %181 = math.tanh %180 : vector<8x256xf32>
    %182 = arith.subf %156, %181 : vector<8x256xf32>
    %183 = arith.mulf %175, %182 : vector<8x256xf32>
    %184 = arith.addf %181, %183 : vector<8x256xf32>
    %c6_i32 = arith.constant 6 : i32
    %185 = arith.index_cast %c6_i32 : i32 to index
    %c0_63 = arith.constant 0 : index
    %c0_64 = arith.constant 0 : index
    %186 = vector.load %arg9[%185, %c0_63, %c0_64] : memref<8x8x768xbf16, #tpu.memory_space<vmem>>, vector<1x8x768xbf16>
    %187 = vector.shape_cast %186 : vector<1x8x768xbf16> to vector<8x768xbf16>
    %188 = arith.extf %187 : vector<8x768xbf16> to vector<8x768xf32>
    %189 = arith.truncf %184 : vector<8x256xf32> to vector<8x256xbf16>
    %c0_65 = arith.constant 0 : index
    %c0_66 = arith.constant 0 : index
    %190 = vector.load %arg4[%c0_65, %c0_66] : memref<256x768xbf16, #tpu.memory_space<vmem>>, vector<256x768xbf16>
    %cst_67 = arith.constant dense<0.000000e+00> : vector<8x768xf32>
    %191 = tpu.matmul %189, %190, %cst_67 {dimension_numbers = #tpu.dot_dimension_numbers<[1], [0], [0], [1], [0, 0, 1, 1], [], []>} : vector<8x256xbf16>, vector<256x768xbf16>, vector<8x768xf32> -> vector<8x768xf32>
    %192 = vector.extract_strided_slice %188 {offsets = [0, 0], sizes = [8, 512], strides = [1, 1]} : vector<8x768xf32> to vector<8x512xf32>
    %193 = vector.extract_strided_slice %191 {offsets = [0, 0], sizes = [8, 512], strides = [1, 1]} : vector<8x768xf32> to vector<8x512xf32>
    %194 = arith.addf %192, %193 : vector<8x512xf32>
    %cst_68 = arith.constant 5.000000e-01 : f32
    %195 = vector.broadcast %cst_68 : f32 to vector<8x512xf32>
    %196 = arith.mulf %195, %194 : vector<8x512xf32>
    %197 = math.tanh %196 : vector<8x512xf32>
    %cst_69 = arith.constant 1.000000e+00 : f32
    %198 = vector.broadcast %cst_69 : f32 to vector<8x512xf32>
    %199 = arith.addf %197, %198 : vector<8x512xf32>
    %cst_70 = arith.constant 5.000000e-01 : f32
    %200 = vector.broadcast %cst_70 : f32 to vector<8x512xf32>
    %201 = arith.mulf %200, %199 : vector<8x512xf32>
    %202 = vector.extract_strided_slice %201 {offsets = [0, 0], sizes = [8, 256], strides = [1, 1]} : vector<8x512xf32> to vector<8x256xf32>
    %203 = vector.extract_strided_slice %201 {offsets = [0, 256], sizes = [8, 256], strides = [1, 1]} : vector<8x512xf32> to vector<8x256xf32>
    %204 = vector.extract_strided_slice %188 {offsets = [0, 512], sizes = [8, 256], strides = [1, 1]} : vector<8x768xf32> to vector<8x256xf32>
    %205 = vector.extract_strided_slice %191 {offsets = [0, 512], sizes = [8, 256], strides = [1, 1]} : vector<8x768xf32> to vector<8x256xf32>
    %206 = arith.addf %205, %15 : vector<8x256xf32>
    %207 = arith.mulf %202, %206 : vector<8x256xf32>
    %208 = arith.addf %204, %207 : vector<8x256xf32>
    %209 = math.tanh %208 : vector<8x256xf32>
    %210 = arith.subf %184, %209 : vector<8x256xf32>
    %211 = arith.mulf %203, %210 : vector<8x256xf32>
    %212 = arith.addf %209, %211 : vector<8x256xf32>
    %c7_i32 = arith.constant 7 : i32
    %213 = arith.index_cast %c7_i32 : i32 to index
    %c0_71 = arith.constant 0 : index
    %c0_72 = arith.constant 0 : index
    %214 = vector.load %arg9[%213, %c0_71, %c0_72] : memref<8x8x768xbf16, #tpu.memory_space<vmem>>, vector<1x8x768xbf16>
    %215 = vector.shape_cast %214 : vector<1x8x768xbf16> to vector<8x768xbf16>
    %216 = arith.extf %215 : vector<8x768xbf16> to vector<8x768xf32>
    %217 = arith.truncf %212 : vector<8x256xf32> to vector<8x256xbf16>
    %c0_73 = arith.constant 0 : index
    %c0_74 = arith.constant 0 : index
    %218 = vector.load %arg4[%c0_73, %c0_74] : memref<256x768xbf16, #tpu.memory_space<vmem>>, vector<256x768xbf16>
    %cst_75 = arith.constant dense<0.000000e+00> : vector<8x768xf32>
    %219 = tpu.matmul %217, %218, %cst_75 {dimension_numbers = #tpu.dot_dimension_numbers<[1], [0], [0], [1], [0, 0, 1, 1], [], []>} : vector<8x256xbf16>, vector<256x768xbf16>, vector<8x768xf32> -> vector<8x768xf32>
    %220 = vector.extract_strided_slice %216 {offsets = [0, 0], sizes = [8, 512], strides = [1, 1]} : vector<8x768xf32> to vector<8x512xf32>
    %221 = vector.extract_strided_slice %219 {offsets = [0, 0], sizes = [8, 512], strides = [1, 1]} : vector<8x768xf32> to vector<8x512xf32>
    %222 = arith.addf %220, %221 : vector<8x512xf32>
    %cst_76 = arith.constant 5.000000e-01 : f32
    %223 = vector.broadcast %cst_76 : f32 to vector<8x512xf32>
    %224 = arith.mulf %223, %222 : vector<8x512xf32>
    %225 = math.tanh %224 : vector<8x512xf32>
    %cst_77 = arith.constant 1.000000e+00 : f32
    %226 = vector.broadcast %cst_77 : f32 to vector<8x512xf32>
    %227 = arith.addf %225, %226 : vector<8x512xf32>
    %cst_78 = arith.constant 5.000000e-01 : f32
    %228 = vector.broadcast %cst_78 : f32 to vector<8x512xf32>
    %229 = arith.mulf %228, %227 : vector<8x512xf32>
    %230 = vector.extract_strided_slice %229 {offsets = [0, 0], sizes = [8, 256], strides = [1, 1]} : vector<8x512xf32> to vector<8x256xf32>
    %231 = vector.extract_strided_slice %229 {offsets = [0, 256], sizes = [8, 256], strides = [1, 1]} : vector<8x512xf32> to vector<8x256xf32>
    %232 = vector.extract_strided_slice %216 {offsets = [0, 512], sizes = [8, 256], strides = [1, 1]} : vector<8x768xf32> to vector<8x256xf32>
    %233 = vector.extract_strided_slice %219 {offsets = [0, 512], sizes = [8, 256], strides = [1, 1]} : vector<8x768xf32> to vector<8x256xf32>
    %234 = arith.addf %233, %15 : vector<8x256xf32>
    %235 = arith.mulf %230, %234 : vector<8x256xf32>
    %236 = arith.addf %232, %235 : vector<8x256xf32>
    %237 = math.tanh %236 : vector<8x256xf32>
    %238 = arith.subf %212, %237 : vector<8x256xf32>
    %239 = arith.mulf %231, %238 : vector<8x256xf32>
    %240 = arith.addf %237, %239 : vector<8x256xf32>
    %c8_i32 = arith.constant 8 : i32
    %c0_79 = arith.constant 0 : index
    %c0_80 = arith.constant 0 : index
    %241 = vector.load %arg8[%c0_79, %c0_80] : memref<8x256xf32, #tpu.memory_space<vmem>>, vector<8x256xf32>
    tpu.vector_store %arg8[%c0_79, %c0_80], %240 {strides = array<i32>} : memref<8x256xf32, #tpu.memory_space<vmem>>, vector<8x256xf32>,
    %c0_i32_81 = arith.constant 0 : i32
    %242 = arith.cmpi eq, %arg1, %c0_i32_81 : i32
    %243 = arith.extui %242 : i1 to i32
    %c0_i32_82 = arith.constant 0 : i32
    %244 = arith.cmpi ne, %243, %c0_i32_82 : i32
    scf.if %244 {
      %c0_83 = arith.constant 0 : index
      %c0_84 = arith.constant 0 : index
      %245 = vector.load %arg7[%c0_83, %c0_84] : memref<8x256xf32, #tpu.memory_space<vmem>>, vector<8x256xf32>
      tpu.vector_store %arg7[%c0_83, %c0_84], %240 {strides = array<i32>} : memref<8x256xf32, #tpu.memory_space<vmem>>, vector<8x256xf32>,
    } else {
    }
    return
  }
  func.func @transform_0(%arg0: i32, %arg1: i32) -> (i32, i32, i32) {
    %c0_i32 = arith.constant 0 : i32
    %c0_i32_0 = arith.constant 0 : i32
    return %arg1, %arg0, %c0_i32 : i32, i32, i32
  }
  func.func @transform_1(%arg0: i32, %arg1: i32) -> (i32, i32) {
    %c0_i32 = arith.constant 0 : i32
    %c0_i32_0 = arith.constant 0 : i32
    %c0_i32_1 = arith.constant 0 : i32
    return %c0_i32, %c0_i32_0 : i32, i32
  }
  func.func @transform_2(%arg0: i32, %arg1: i32) -> (i32, i32) {
    %c0_i32 = arith.constant 0 : i32
    %c0_i32_0 = arith.constant 0 : i32
    %c0_i32_1 = arith.constant 0 : i32
    return %c0_i32, %c0_i32_0 : i32, i32
  }
  func.func @transform_3(%arg0: i32, %arg1: i32) -> (i32, i32) {
    %c0_i32 = arith.constant 0 : i32
    %c0_i32_0 = arith.constant 0 : i32
    %c0_i32_1 = arith.constant 0 : i32
    return %c0_i32, %c0_i32_0 : i32, i32
  }
  func.func @transform_4(%arg0: i32, %arg1: i32) -> (i32, i32) {
    %c0_i32 = arith.constant 0 : i32
    %c0_i32_0 = arith.constant 0 : i32
    %c0_i32_1 = arith.constant 0 : i32
    return %c0_i32, %c0_i32_0 : i32, i32
  }
  func.func @transform_5(%arg0: i32, %arg1: i32) -> (i32, i32) {
    %c0_i32 = arith.constant 0 : i32
    %c0_i32_0 = arith.constant 0 : i32
    return %arg0, %c0_i32 : i32, i32
  }
}

module attributes {stable_mosaic.version = 11 : i64} {
  func.func @gru_kernel(%arg0: i32, %arg1: i32, %arg2: memref<8x8x768xbf16, #tpu.memory_space<vmem>>, %arg3: memref<768x768xbf16, #tpu.memory_space<vmem>>, %arg4: memref<256x768xbf16, #tpu.memory_space<vmem>>, %arg5: memref<1x768xf32, #tpu.memory_space<vmem>>, %arg6: memref<1x256xf32, #tpu.memory_space<vmem>>, %arg7: memref<8x256xf32, #tpu.memory_space<vmem>>, %arg8: memref<8x256xf32, #tpu.memory_space<vmem>>, %arg9: memref<8x8x768xbf16, #tpu.memory_space<vmem>>) attributes {dimension_semantics = [#tpu.dimension_semantics<parallel>, #tpu.dimension_semantics<arbitrary>], iteration_bounds = array<i64: 1, 1>, scalar_prefetch = 0 : i64, scratch_operands = 2 : i64, tpu.core_type = #tpu.core_type<tc>, window_params = [{transform_indices = @transform_0, window_bounds = array<i64: 8, 8, 768>}, {pipeline_mode = #tpu.pipeline_mode<synchronous>, transform_indices = @transform_1, window_bounds = array<i64: 768, 768>}, {pipeline_mode = #tpu.pipeline_mode<synchronous>, transform_indices = @transform_2, window_bounds = array<i64: 256, 768>}, {pipeline_mode = #tpu.pipeline_mode<synchronous>, transform_indices = @transform_3, window_bounds = array<i64: 1, 768>}, {pipeline_mode = #tpu.pipeline_mode<synchronous>, transform_indices = @transform_4, window_bounds = array<i64: 1, 256>}, {transform_indices = @transform_5, window_bounds = array<i64: 8, 256>}]} {
    %c0_i32 = arith.constant 0 : i32
    %0 = arith.cmpi eq, %arg1, %c0_i32 : i32
    %1 = arith.extui %0 : i1 to i32
    %c0_i32_0 = arith.constant 0 : i32
    %2 = arith.cmpi ne, %1, %c0_i32_0 : i32
    scf.if %2 {
      %cst_83 = arith.constant 0.000000e+00 : f32
      %245 = vector.broadcast %cst_83 : f32 to vector<8x256xf32>
      %c0_84 = arith.constant 0 : index
      %c0_85 = arith.constant 0 : index
      %246 = vector.load %arg8[%c0_84, %c0_85] : memref<8x256xf32, #tpu.memory_space<vmem>>, vector<8x256xf32>
      tpu.vector_store %arg8[%c0_84, %c0_85], %245 {strides = array<i32>} : memref<8x256xf32, #tpu.memory_space<vmem>>, vector<8x256xf32>,
    } else {
    }
    %c0 = arith.constant 0 : index
    %c0_1 = arith.constant 0 : index
    %c0_2 = arith.constant 0 : index
    %3 = vector.load %arg2[%c0, %c0_1, %c0_2] : memref<8x8x768xbf16, #tpu.memory_space<vmem>>, vector<8x8x768xbf16>
    %4 = vector.shape_cast %3 : vector<8x8x768xbf16> to vector<64x768xbf16>
    %c0_3 = arith.constant 0 : index
    %c0_4 = arith.constant 0 : index
    %5 = vector.load %arg3[%c0_3, %c0_4] : memref<768x768xbf16, #tpu.memory_space<vmem>>, vector<768x768xbf16>
    %cst = arith.constant dense<0.000000e+00> : vector<64x768xf32>
    %6 = tpu.matmul %4, %5, %cst {dimension_numbers = #tpu.dot_dimension_numbers<[1], [0], [0], [1], [0, 0, 1, 1], [], []>} : vector<64x768xbf16>, vector<768x768xbf16>, vector<64x768xf32> -> vector<64x768xf32>
    %c0_5 = arith.constant 0 : index
    %c0_6 = arith.constant 0 : index
    %7 = vector.load %arg5[%c0_5, %c0_6] : memref<1x768xf32, #tpu.memory_space<vmem>>, vector<1x768xf32>
    %8 = vector.broadcast %7 : vector<1x768xf32> to vector<64x768xf32>
    %9 = arith.addf %6, %8 : vector<64x768xf32>
    %10 = vector.shape_cast %9 : vector<64x768xf32> to vector<8x8x768xf32>
    %11 = arith.truncf %10 : vector<8x8x768xf32> to vector<8x8x768xbf16>
    %c0_7 = arith.constant 0 : index
    %c0_8 = arith.constant 0 : index
    %c0_9 = arith.constant 0 : index
    %12 = vector.load %arg9[%c0_7, %c0_8, %c0_9] : memref<8x8x768xbf16, #tpu.memory_space<vmem>>, vector<8x8x768xbf16>
    tpu.vector_store %arg9[%c0_7, %c0_8, %c0_9], %11 {strides = array<i32>} : memref<8x8x768xbf16, #tpu.memory_space<vmem>>, vector<8x8x768xbf16>,
    %c0_10 = arith.constant 0 : index
    %c0_11 = arith.constant 0 : index
    %13 = vector.load %arg6[%c0_10, %c0_11] : memref<1x256xf32, #tpu.memory_space<vmem>>, vector<1x256xf32>
    %14 = vector.shape_cast %13 : vector<1x256xf32> to vector<1x256xf32>
    %15 = vector.broadcast %14 : vector<1x256xf32> to vector<8x256xf32>
    %c0_12 = arith.constant 0 : index
    %c0_13 = arith.constant 0 : index
    %16 = vector.load %arg8[%c0_12, %c0_13] : memref<8x256xf32, #tpu.memory_space<vmem>>, vector<8x256xf32>
    %c0_i32_14 = arith.constant 0 : i32
    %17 = arith.index_cast %c0_i32_14 : i32 to index
    %c0_15 = arith.constant 0 : index
    %c0_16 = arith.constant 0 : index
    %18 = vector.load %arg9[%17, %c0_15, %c0_16] : memref<8x8x768xbf16, #tpu.memory_space<vmem>>, vector<1x8x768xbf16>
    %19 = vector.shape_cast %18 : vector<1x8x768xbf16> to vector<8x768xbf16>
    %20 = arith.extf %19 : vector<8x768xbf16> to vector<8x768xf32>
    %21 = arith.truncf %16 : vector<8x256xf32> to vector<8x256xbf16>
    %c0_17 = arith.constant 0 : index
    %c0_18 = arith.constant 0 : index
    %22 = vector.load %arg4[%c0_17, %c0_18] : memref<256x768xbf16, #tpu.memory_space<vmem>>, vector<256x768xbf16>
    %cst_19 = arith.constant dense<0.000000e+00> : vector<8x768xf32>
    %23 = tpu.matmul %21, %22, %cst_19 {dimension_numbers = #tpu.dot_dimension_numbers<[1], [0], [0], [1], [0, 0, 1, 1], [], []>} : vector<8x256xbf16>, vector<256x768xbf16>, vector<8x768xf32> -> vector<8x768xf32>
    %24 = vector.extract_strided_slice %20 {offsets = [0, 0], sizes = [8, 512], strides = [1, 1]} : vector<8x768xf32> to vector<8x512xf32>
    %25 = vector.extract_strided_slice %23 {offsets = [0, 0], sizes = [8, 512], strides = [1, 1]} : vector<8x768xf32> to vector<8x512xf32>
    %26 = arith.addf %24, %25 : vector<8x512xf32>
    %cst_20 = arith.constant 5.000000e-01 : f32
    %27 = vector.broadcast %cst_20 : f32 to vector<8x512xf32>
    %28 = arith.mulf %27, %26 : vector<8x512xf32>
    %29 = math.tanh %28 : vector<8x512xf32>
    %cst_21 = arith.constant 1.000000e+00 : f32
    %30 = vector.broadcast %cst_21 : f32 to vector<8x512xf32>
    %31 = arith.addf %29, %30 : vector<8x512xf32>
    %cst_22 = arith.constant 5.000000e-01 : f32
    %32 = vector.broadcast %cst_22 : f32 to vector<8x512xf32>
    %33 = arith.mulf %32, %31 : vector<8x512xf32>
    %34 = vector.extract_strided_slice %33 {offsets = [0, 0], sizes = [8, 256], strides = [1, 1]} : vector<8x512xf32> to vector<8x256xf32>
    %35 = vector.extract_strided_slice %33 {offsets = [0, 256], sizes = [8, 256], strides = [1, 1]} : vector<8x512xf32> to vector<8x256xf32>
    %36 = vector.extract_strided_slice %20 {offsets = [0, 512], sizes = [8, 256], strides = [1, 1]} : vector<8x768xf32> to vector<8x256xf32>
    %37 = vector.extract_strided_slice %23 {offsets = [0, 512], sizes = [8, 256], strides = [1, 1]} : vector<8x768xf32> to vector<8x256xf32>
    %38 = arith.addf %37, %15 : vector<8x256xf32>
    %39 = arith.mulf %34, %38 : vector<8x256xf32>
    %40 = arith.addf %36, %39 : vector<8x256xf32>
    %41 = math.tanh %40 : vector<8x256xf32>
    %42 = arith.subf %16, %41 : vector<8x256xf32>
    %43 = arith.mulf %35, %42 : vector<8x256xf32>
    %44 = arith.addf %41, %43 : vector<8x256xf32>
    %c1_i32 = arith.constant 1 : i32
    %45 = arith.index_cast %c1_i32 : i32 to index
    %c0_23 = arith.constant 0 : index
    %c0_24 = arith.constant 0 : index
    %46 = vector.load %arg9[%45, %c0_23, %c0_24] : memref<8x8x768xbf16, #tpu.memory_space<vmem>>, vector<1x8x768xbf16>
    %47 = vector.shape_cast %46 : vector<1x8x768xbf16> to vector<8x768xbf16>
    %48 = arith.extf %47 : vector<8x768xbf16> to vector<8x768xf32>
    %49 = arith.truncf %44 : vector<8x256xf32> to vector<8x256xbf16>
    %c0_25 = arith.constant 0 : index
    %c0_26 = arith.constant 0 : index
    %50 = vector.load %arg4[%c0_25, %c0_26] : memref<256x768xbf16, #tpu.memory_space<vmem>>, vector<256x768xbf16>
    %cst_27 = arith.constant dense<0.000000e+00> : vector<8x768xf32>
    %51 = tpu.matmul %49, %50, %cst_27 {dimension_numbers = #tpu.dot_dimension_numbers<[1], [0], [0], [1], [0, 0, 1, 1], [], []>} : vector<8x256xbf16>, vector<256x768xbf16>, vector<8x768xf32> -> vector<8x768xf32>
    %52 = vector.extract_strided_slice %48 {offsets = [0, 0], sizes = [8, 512], strides = [1, 1]} : vector<8x768xf32> to vector<8x512xf32>
    %53 = vector.extract_strided_slice %51 {offsets = [0, 0], sizes = [8, 512], strides = [1, 1]} : vector<8x768xf32> to vector<8x512xf32>
    %54 = arith.addf %52, %53 : vector<8x512xf32>
    %cst_28 = arith.constant 5.000000e-01 : f32
    %55 = vector.broadcast %cst_28 : f32 to vector<8x512xf32>
    %56 = arith.mulf %55, %54 : vector<8x512xf32>
    %57 = math.tanh %56 : vector<8x512xf32>
    %cst_29 = arith.constant 1.000000e+00 : f32
    %58 = vector.broadcast %cst_29 : f32 to vector<8x512xf32>
    %59 = arith.addf %57, %58 : vector<8x512xf32>
    %cst_30 = arith.constant 5.000000e-01 : f32
    %60 = vector.broadcast %cst_30 : f32 to vector<8x512xf32>
    %61 = arith.mulf %60, %59 : vector<8x512xf32>
    %62 = vector.extract_strided_slice %61 {offsets = [0, 0], sizes = [8, 256], strides = [1, 1]} : vector<8x512xf32> to vector<8x256xf32>
    %63 = vector.extract_strided_slice %61 {offsets = [0, 256], sizes = [8, 256], strides = [1, 1]} : vector<8x512xf32> to vector<8x256xf32>
    %64 = vector.extract_strided_slice %48 {offsets = [0, 512], sizes = [8, 256], strides = [1, 1]} : vector<8x768xf32> to vector<8x256xf32>
    %65 = vector.extract_strided_slice %51 {offsets = [0, 512], sizes = [8, 256], strides = [1, 1]} : vector<8x768xf32> to vector<8x256xf32>
    %66 = arith.addf %65, %15 : vector<8x256xf32>
    %67 = arith.mulf %62, %66 : vector<8x256xf32>
    %68 = arith.addf %64, %67 : vector<8x256xf32>
    %69 = math.tanh %68 : vector<8x256xf32>
    %70 = arith.subf %44, %69 : vector<8x256xf32>
    %71 = arith.mulf %63, %70 : vector<8x256xf32>
    %72 = arith.addf %69, %71 : vector<8x256xf32>
    %c2_i32 = arith.constant 2 : i32
    %73 = arith.index_cast %c2_i32 : i32 to index
    %c0_31 = arith.constant 0 : index
    %c0_32 = arith.constant 0 : index
    %74 = vector.load %arg9[%73, %c0_31, %c0_32] : memref<8x8x768xbf16, #tpu.memory_space<vmem>>, vector<1x8x768xbf16>
    %75 = vector.shape_cast %74 : vector<1x8x768xbf16> to vector<8x768xbf16>
    %76 = arith.extf %75 : vector<8x768xbf16> to vector<8x768xf32>
    %77 = arith.truncf %72 : vector<8x256xf32> to vector<8x256xbf16>
    %c0_33 = arith.constant 0 : index
    %c0_34 = arith.constant 0 : index
    %78 = vector.load %arg4[%c0_33, %c0_34] : memref<256x768xbf16, #tpu.memory_space<vmem>>, vector<256x768xbf16>
    %cst_35 = arith.constant dense<0.000000e+00> : vector<8x768xf32>
    %79 = tpu.matmul %77, %78, %cst_35 {dimension_numbers = #tpu.dot_dimension_numbers<[1], [0], [0], [1], [0, 0, 1, 1], [], []>} : vector<8x256xbf16>, vector<256x768xbf16>, vector<8x768xf32> -> vector<8x768xf32>
    %80 = vector.extract_strided_slice %76 {offsets = [0, 0], sizes = [8, 512], strides = [1, 1]} : vector<8x768xf32> to vector<8x512xf32>
    %81 = vector.extract_strided_slice %79 {offsets = [0, 0], sizes = [8, 512], strides = [1, 1]} : vector<8x768xf32> to vector<8x512xf32>
    %82 = arith.addf %80, %81 : vector<8x512xf32>
    %cst_36 = arith.constant 5.000000e-01 : f32
    %83 = vector.broadcast %cst_36 : f32 to vector<8x512xf32>
    %84 = arith.mulf %83, %82 : vector<8x512xf32>
    %85 = math.tanh %84 : vector<8x512xf32>
    %cst_37 = arith.constant 1.000000e+00 : f32
    %86 = vector.broadcast %cst_37 : f32 to vector<8x512xf32>
    %87 = arith.addf %85, %86 : vector<8x512xf32>
    %cst_38 = arith.constant 5.000000e-01 : f32
    %88 = vector.broadcast %cst_38 : f32 to vector<8x512xf32>
    %89 = arith.mulf %88, %87 : vector<8x512xf32>
    %90 = vector.extract_strided_slice %89 {offsets = [0, 0], sizes = [8, 256], strides = [1, 1]} : vector<8x512xf32> to vector<8x256xf32>
    %91 = vector.extract_strided_slice %89 {offsets = [0, 256], sizes = [8, 256], strides = [1, 1]} : vector<8x512xf32> to vector<8x256xf32>
    %92 = vector.extract_strided_slice %76 {offsets = [0, 512], sizes = [8, 256], strides = [1, 1]} : vector<8x768xf32> to vector<8x256xf32>
    %93 = vector.extract_strided_slice %79 {offsets = [0, 512], sizes = [8, 256], strides = [1, 1]} : vector<8x768xf32> to vector<8x256xf32>
    %94 = arith.addf %93, %15 : vector<8x256xf32>
    %95 = arith.mulf %90, %94 : vector<8x256xf32>
    %96 = arith.addf %92, %95 : vector<8x256xf32>
    %97 = math.tanh %96 : vector<8x256xf32>
    %98 = arith.subf %72, %97 : vector<8x256xf32>
    %99 = arith.mulf %91, %98 : vector<8x256xf32>
    %100 = arith.addf %97, %99 : vector<8x256xf32>
    %c3_i32 = arith.constant 3 : i32
    %101 = arith.index_cast %c3_i32 : i32 to index
    %c0_39 = arith.constant 0 : index
    %c0_40 = arith.constant 0 : index
    %102 = vector.load %arg9[%101, %c0_39, %c0_40] : memref<8x8x768xbf16, #tpu.memory_space<vmem>>, vector<1x8x768xbf16>
    %103 = vector.shape_cast %102 : vector<1x8x768xbf16> to vector<8x768xbf16>
    %104 = arith.extf %103 : vector<8x768xbf16> to vector<8x768xf32>
    %105 = arith.truncf %100 : vector<8x256xf32> to vector<8x256xbf16>
    %c0_41 = arith.constant 0 : index
    %c0_42 = arith.constant 0 : index
    %106 = vector.load %arg4[%c0_41, %c0_42] : memref<256x768xbf16, #tpu.memory_space<vmem>>, vector<256x768xbf16>
    %cst_43 = arith.constant dense<0.000000e+00> : vector<8x768xf32>
    %107 = tpu.matmul %105, %106, %cst_43 {dimension_numbers = #tpu.dot_dimension_numbers<[1], [0], [0], [1], [0, 0, 1, 1], [], []>} : vector<8x256xbf16>, vector<256x768xbf16>, vector<8x768xf32> -> vector<8x768xf32>
    %108 = vector.extract_strided_slice %104 {offsets = [0, 0], sizes = [8, 512], strides = [1, 1]} : vector<8x768xf32> to vector<8x512xf32>
    %109 = vector.extract_strided_slice %107 {offsets = [0, 0], sizes = [8, 512], strides = [1, 1]} : vector<8x768xf32> to vector<8x512xf32>
    %110 = arith.addf %108, %109 : vector<8x512xf32>
    %cst_44 = arith.constant 5.000000e-01 : f32
    %111 = vector.broadcast %cst_44 : f32 to vector<8x512xf32>
    %112 = arith.mulf %111, %110 : vector<8x512xf32>
    %113 = math.tanh %112 : vector<8x512xf32>
    %cst_45 = arith.constant 1.000000e+00 : f32
    %114 = vector.broadcast %cst_45 : f32 to vector<8x512xf32>
    %115 = arith.addf %113, %114 : vector<8x512xf32>
    %cst_46 = arith.constant 5.000000e-01 : f32
    %116 = vector.broadcast %cst_46 : f32 to vector<8x512xf32>
    %117 = arith.mulf %116, %115 : vector<8x512xf32>
    %118 = vector.extract_strided_slice %117 {offsets = [0, 0], sizes = [8, 256], strides = [1, 1]} : vector<8x512xf32> to vector<8x256xf32>
    %119 = vector.extract_strided_slice %117 {offsets = [0, 256], sizes = [8, 256], strides = [1, 1]} : vector<8x512xf32> to vector<8x256xf32>
    %120 = vector.extract_strided_slice %104 {offsets = [0, 512], sizes = [8, 256], strides = [1, 1]} : vector<8x768xf32> to vector<8x256xf32>
    %121 = vector.extract_strided_slice %107 {offsets = [0, 512], sizes = [8, 256], strides = [1, 1]} : vector<8x768xf32> to vector<8x256xf32>
    %122 = arith.addf %121, %15 : vector<8x256xf32>
    %123 = arith.mulf %118, %122 : vector<8x256xf32>
    %124 = arith.addf %120, %123 : vector<8x256xf32>
    %125 = math.tanh %124 : vector<8x256xf32>
    %126 = arith.subf %100, %125 : vector<8x256xf32>
    %127 = arith.mulf %119, %126 : vector<8x256xf32>
    %128 = arith.addf %125, %127 : vector<8x256xf32>
    %c4_i32 = arith.constant 4 : i32
    %129 = arith.index_cast %c4_i32 : i32 to index
    %c0_47 = arith.constant 0 : index
    %c0_48 = arith.constant 0 : index
    %130 = vector.load %arg9[%129, %c0_47, %c0_48] : memref<8x8x768xbf16, #tpu.memory_space<vmem>>, vector<1x8x768xbf16>
    %131 = vector.shape_cast %130 : vector<1x8x768xbf16> to vector<8x768xbf16>
    %132 = arith.extf %131 : vector<8x768xbf16> to vector<8x768xf32>
    %133 = arith.truncf %128 : vector<8x256xf32> to vector<8x256xbf16>
    %c0_49 = arith.constant 0 : index
    %c0_50 = arith.constant 0 : index
    %134 = vector.load %arg4[%c0_49, %c0_50] : memref<256x768xbf16, #tpu.memory_space<vmem>>, vector<256x768xbf16>
    %cst_51 = arith.constant dense<0.000000e+00> : vector<8x768xf32>
    %135 = tpu.matmul %133, %134, %cst_51 {dimension_numbers = #tpu.dot_dimension_numbers<[1], [0], [0], [1], [0, 0, 1, 1], [], []>} : vector<8x256xbf16>, vector<256x768xbf16>, vector<8x768xf32> -> vector<8x768xf32>
    %136 = vector.extract_strided_slice %132 {offsets = [0, 0], sizes = [8, 512], strides = [1, 1]} : vector<8x768xf32> to vector<8x512xf32>
    %137 = vector.extract_strided_slice %135 {offsets = [0, 0], sizes = [8, 512], strides = [1, 1]} : vector<8x768xf32> to vector<8x512xf32>
    %138 = arith.addf %136, %137 : vector<8x512xf32>
    %cst_52 = arith.constant 5.000000e-01 : f32
    %139 = vector.broadcast %cst_52 : f32 to vector<8x512xf32>
    %140 = arith.mulf %139, %138 : vector<8x512xf32>
    %141 = math.tanh %140 : vector<8x512xf32>
    %cst_53 = arith.constant 1.000000e+00 : f32
    %142 = vector.broadcast %cst_53 : f32 to vector<8x512xf32>
    %143 = arith.addf %141, %142 : vector<8x512xf32>
    %cst_54 = arith.constant 5.000000e-01 : f32
    %144 = vector.broadcast %cst_54 : f32 to vector<8x512xf32>
    %145 = arith.mulf %144, %143 : vector<8x512xf32>
    %146 = vector.extract_strided_slice %145 {offsets = [0, 0], sizes = [8, 256], strides = [1, 1]} : vector<8x512xf32> to vector<8x256xf32>
    %147 = vector.extract_strided_slice %145 {offsets = [0, 256], sizes = [8, 256], strides = [1, 1]} : vector<8x512xf32> to vector<8x256xf32>
    %148 = vector.extract_strided_slice %132 {offsets = [0, 512], sizes = [8, 256], strides = [1, 1]} : vector<8x768xf32> to vector<8x256xf32>
    %149 = vector.extract_strided_slice %135 {offsets = [0, 512], sizes = [8, 256], strides = [1, 1]} : vector<8x768xf32> to vector<8x256xf32>
    %150 = arith.addf %149, %15 : vector<8x256xf32>
    %151 = arith.mulf %146, %150 : vector<8x256xf32>
    %152 = arith.addf %148, %151 : vector<8x256xf32>
    %153 = math.tanh %152 : vector<8x256xf32>
    %154 = arith.subf %128, %153 : vector<8x256xf32>
    %155 = arith.mulf %147, %154 : vector<8x256xf32>
    %156 = arith.addf %153, %155 : vector<8x256xf32>
    %c5_i32 = arith.constant 5 : i32
    %157 = arith.index_cast %c5_i32 : i32 to index
    %c0_55 = arith.constant 0 : index
    %c0_56 = arith.constant 0 : index
    %158 = vector.load %arg9[%157, %c0_55, %c0_56] : memref<8x8x768xbf16, #tpu.memory_space<vmem>>, vector<1x8x768xbf16>
    %159 = vector.shape_cast %158 : vector<1x8x768xbf16> to vector<8x768xbf16>
    %160 = arith.extf %159 : vector<8x768xbf16> to vector<8x768xf32>
    %161 = arith.truncf %156 : vector<8x256xf32> to vector<8x256xbf16>
    %c0_57 = arith.constant 0 : index
    %c0_58 = arith.constant 0 : index
    %162 = vector.load %arg4[%c0_57, %c0_58] : memref<256x768xbf16, #tpu.memory_space<vmem>>, vector<256x768xbf16>
    %cst_59 = arith.constant dense<0.000000e+00> : vector<8x768xf32>
    %163 = tpu.matmul %161, %162, %cst_59 {dimension_numbers = #tpu.dot_dimension_numbers<[1], [0], [0], [1], [0, 0, 1, 1], [], []>} : vector<8x256xbf16>, vector<256x768xbf16>, vector<8x768xf32> -> vector<8x768xf32>
    %164 = vector.extract_strided_slice %160 {offsets = [0, 0], sizes = [8, 512], strides = [1, 1]} : vector<8x768xf32> to vector<8x512xf32>
    %165 = vector.extract_strided_slice %163 {offsets = [0, 0], sizes = [8, 512], strides = [1, 1]} : vector<8x768xf32> to vector<8x512xf32>
    %166 = arith.addf %164, %165 : vector<8x512xf32>
    %cst_60 = arith.constant 5.000000e-01 : f32
    %167 = vector.broadcast %cst_60 : f32 to vector<8x512xf32>
    %168 = arith.mulf %167, %166 : vector<8x512xf32>
    %169 = math.tanh %168 : vector<8x512xf32>
    %cst_61 = arith.constant 1.000000e+00 : f32
    %170 = vector.broadcast %cst_61 : f32 to vector<8x512xf32>
    %171 = arith.addf %169, %170 : vector<8x512xf32>
    %cst_62 = arith.constant 5.000000e-01 : f32
    %172 = vector.broadcast %cst_62 : f32 to vector<8x512xf32>
    %173 = arith.mulf %172, %171 : vector<8x512xf32>
    %174 = vector.extract_strided_slice %173 {offsets = [0, 0], sizes = [8, 256], strides = [1, 1]} : vector<8x512xf32> to vector<8x256xf32>
    %175 = vector.extract_strided_slice %173 {offsets = [0, 256], sizes = [8, 256], strides = [1, 1]} : vector<8x512xf32> to vector<8x256xf32>
    %176 = vector.extract_strided_slice %160 {offsets = [0, 512], sizes = [8, 256], strides = [1, 1]} : vector<8x768xf32> to vector<8x256xf32>
    %177 = vector.extract_strided_slice %163 {offsets = [0, 512], sizes = [8, 256], strides = [1, 1]} : vector<8x768xf32> to vector<8x256xf32>
    %178 = arith.addf %177, %15 : vector<8x256xf32>
    %179 = arith.mulf %174, %178 : vector<8x256xf32>
    %180 = arith.addf %176, %179 : vector<8x256xf32>
    %181 = math.tanh %180 : vector<8x256xf32>
    %182 = arith.subf %156, %181 : vector<8x256xf32>
    %183 = arith.mulf %175, %182 : vector<8x256xf32>
    %184 = arith.addf %181, %183 : vector<8x256xf32>
    %c6_i32 = arith.constant 6 : i32
    %185 = arith.index_cast %c6_i32 : i32 to index
    %c0_63 = arith.constant 0 : index
    %c0_64 = arith.constant 0 : index
    %186 = vector.load %arg9[%185, %c0_63, %c0_64] : memref<8x8x768xbf16, #tpu.memory_space<vmem>>, vector<1x8x768xbf16>
    %187 = vector.shape_cast %186 : vector<1x8x768xbf16> to vector<8x768xbf16>
    %188 = arith.extf %187 : vector<8x768xbf16> to vector<8x768xf32>
    %189 = arith.truncf %184 : vector<8x256xf32> to vector<8x256xbf16>
    %c0_65 = arith.constant 0 : index
    %c0_66 = arith.constant 0 : index
    %190 = vector.load %arg4[%c0_65, %c0_66] : memref<256x768xbf16, #tpu.memory_space<vmem>>, vector<256x768xbf16>
    %cst_67 = arith.constant dense<0.000000e+00> : vector<8x768xf32>
    %191 = tpu.matmul %189, %190, %cst_67 {dimension_numbers = #tpu.dot_dimension_numbers<[1], [0], [0], [1], [0, 0, 1, 1], [], []>} : vector<8x256xbf16>, vector<256x768xbf16>, vector<8x768xf32> -> vector<8x768xf32>
    %192 = vector.extract_strided_slice %188 {offsets = [0, 0], sizes = [8, 512], strides = [1, 1]} : vector<8x768xf32> to vector<8x512xf32>
    %193 = vector.extract_strided_slice %191 {offsets = [0, 0], sizes = [8, 512], strides = [1, 1]} : vector<8x768xf32> to vector<8x512xf32>
    %194 = arith.addf %192, %193 : vector<8x512xf32>
    %cst_68 = arith.constant 5.000000e-01 : f32
    %195 = vector.broadcast %cst_68 : f32 to vector<8x512xf32>
    %196 = arith.mulf %195, %194 : vector<8x512xf32>
    %197 = math.tanh %196 : vector<8x512xf32>
    %cst_69 = arith.constant 1.000000e+00 : f32
    %198 = vector.broadcast %cst_69 : f32 to vector<8x512xf32>
    %199 = arith.addf %197, %198 : vector<8x512xf32>
    %cst_70 = arith.constant 5.000000e-01 : f32
    %200 = vector.broadcast %cst_70 : f32 to vector<8x512xf32>
    %201 = arith.mulf %200, %199 : vector<8x512xf32>
    %202 = vector.extract_strided_slice %201 {offsets = [0, 0], sizes = [8, 256], strides = [1, 1]} : vector<8x512xf32> to vector<8x256xf32>
    %203 = vector.extract_strided_slice %201 {offsets = [0, 256], sizes = [8, 256], strides = [1, 1]} : vector<8x512xf32> to vector<8x256xf32>
    %204 = vector.extract_strided_slice %188 {offsets = [0, 512], sizes = [8, 256], strides = [1, 1]} : vector<8x768xf32> to vector<8x256xf32>
    %205 = vector.extract_strided_slice %191 {offsets = [0, 512], sizes = [8, 256], strides = [1, 1]} : vector<8x768xf32> to vector<8x256xf32>
    %206 = arith.addf %205, %15 : vector<8x256xf32>
    %207 = arith.mulf %202, %206 : vector<8x256xf32>
    %208 = arith.addf %204, %207 : vector<8x256xf32>
    %209 = math.tanh %208 : vector<8x256xf32>
    %210 = arith.subf %184, %209 : vector<8x256xf32>
    %211 = arith.mulf %203, %210 : vector<8x256xf32>
    %212 = arith.addf %209, %211 : vector<8x256xf32>
    %c7_i32 = arith.constant 7 : i32
    %213 = arith.index_cast %c7_i32 : i32 to index
    %c0_71 = arith.constant 0 : index
    %c0_72 = arith.constant 0 : index
    %214 = vector.load %arg9[%213, %c0_71, %c0_72] : memref<8x8x768xbf16, #tpu.memory_space<vmem>>, vector<1x8x768xbf16>
    %215 = vector.shape_cast %214 : vector<1x8x768xbf16> to vector<8x768xbf16>
    %216 = arith.extf %215 : vector<8x768xbf16> to vector<8x768xf32>
    %217 = arith.truncf %212 : vector<8x256xf32> to vector<8x256xbf16>
    %c0_73 = arith.constant 0 : index
    %c0_74 = arith.constant 0 : index
    %218 = vector.load %arg4[%c0_73, %c0_74] : memref<256x768xbf16, #tpu.memory_space<vmem>>, vector<256x768xbf16>
    %cst_75 = arith.constant dense<0.000000e+00> : vector<8x768xf32>
    %219 = tpu.matmul %217, %218, %cst_75 {dimension_numbers = #tpu.dot_dimension_numbers<[1], [0], [0], [1], [0, 0, 1, 1], [], []>} : vector<8x256xbf16>, vector<256x768xbf16>, vector<8x768xf32> -> vector<8x768xf32>
    %220 = vector.extract_strided_slice %216 {offsets = [0, 0], sizes = [8, 512], strides = [1, 1]} : vector<8x768xf32> to vector<8x512xf32>
    %221 = vector.extract_strided_slice %219 {offsets = [0, 0], sizes = [8, 512], strides = [1, 1]} : vector<8x768xf32> to vector<8x512xf32>
    %222 = arith.addf %220, %221 : vector<8x512xf32>
    %cst_76 = arith.constant 5.000000e-01 : f32
    %223 = vector.broadcast %cst_76 : f32 to vector<8x512xf32>
    %224 = arith.mulf %223, %222 : vector<8x512xf32>
    %225 = math.tanh %224 : vector<8x512xf32>
    %cst_77 = arith.constant 1.000000e+00 : f32
    %226 = vector.broadcast %cst_77 : f32 to vector<8x512xf32>
    %227 = arith.addf %225, %226 : vector<8x512xf32>
    %cst_78 = arith.constant 5.000000e-01 : f32
    %228 = vector.broadcast %cst_78 : f32 to vector<8x512xf32>
    %229 = arith.mulf %228, %227 : vector<8x512xf32>
    %230 = vector.extract_strided_slice %229 {offsets = [0, 0], sizes = [8, 256], strides = [1, 1]} : vector<8x512xf32> to vector<8x256xf32>
    %231 = vector.extract_strided_slice %229 {offsets = [0, 256], sizes = [8, 256], strides = [1, 1]} : vector<8x512xf32> to vector<8x256xf32>
    %232 = vector.extract_strided_slice %216 {offsets = [0, 512], sizes = [8, 256], strides = [1, 1]} : vector<8x768xf32> to vector<8x256xf32>
    %233 = vector.extract_strided_slice %219 {offsets = [0, 512], sizes = [8, 256], strides = [1, 1]} : vector<8x768xf32> to vector<8x256xf32>
    %234 = arith.addf %233, %15 : vector<8x256xf32>
    %235 = arith.mulf %230, %234 : vector<8x256xf32>
    %236 = arith.addf %232, %235 : vector<8x256xf32>
    %237 = math.tanh %236 : vector<8x256xf32>
    %238 = arith.subf %212, %237 : vector<8x256xf32>
    %239 = arith.mulf %231, %238 : vector<8x256xf32>
    %240 = arith.addf %237, %239 : vector<8x256xf32>
    %c8_i32 = arith.constant 8 : i32
    %c0_79 = arith.constant 0 : index
    %c0_80 = arith.constant 0 : index
    %241 = vector.load %arg8[%c0_79, %c0_80] : memref<8x256xf32, #tpu.memory_space<vmem>>, vector<8x256xf32>
    tpu.vector_store %arg8[%c0_79, %c0_80], %240 {strides = array<i32>} : memref<8x256xf32, #tpu.memory_space<vmem>>, vector<8x256xf32>,
    %c0_i32_81 = arith.constant 0 : i32
    %242 = arith.cmpi eq, %arg1, %c0_i32_81 : i32
    %243 = arith.extui %242 : i1 to i32
    %c0_i32_82 = arith.constant 0 : i32
    %244 = arith.cmpi ne, %243, %c0_i32_82 : i32
    scf.if %244 {
      %c0_83 = arith.constant 0 : index
      %c0_84 = arith.constant 0 : index
      %245 = vector.load %arg7[%c0_83, %c0_84] : memref<8x256xf32, #tpu.memory_space<vmem>>, vector<8x256xf32>
      tpu.vector_store %arg7[%c0_83, %c0_84], %240 {strides = array<i32>} : memref<8x256xf32, #tpu.memory_space<vmem>>, vector<8x256xf32>,
    } else {
    }
    return
  }
  func.func @transform_0(%arg0: i32, %arg1: i32) -> (i32, i32, i32) {
    %c0_i32 = arith.constant 0 : i32
    %c0_i32_0 = arith.constant 0 : i32
    return %arg1, %arg0, %c0_i32 : i32, i32, i32
  }
  func.func @transform_1(%arg0: i32, %arg1: i32) -> (i32, i32) {
    %c0_i32 = arith.constant 0 : i32
    %c0_i32_0 = arith.constant 0 : i32
    %c0_i32_1 = arith.constant 0 : i32
    return %c0_i32, %c0_i32_0 : i32, i32
  }
  func.func @transform_2(%arg0: i32, %arg1: i32) -> (i32, i32) {
    %c0_i32 = arith.constant 0 : i32
    %c0_i32_0 = arith.constant 0 : i32
    %c0_i32_1 = arith.constant 0 : i32
    return %c0_i32, %c0_i32_0 : i32, i32
  }
  func.func @transform_3(%arg0: i32, %arg1: i32) -> (i32, i32) {
    %c0_i32 = arith.constant 0 : i32
    %c0_i32_0 = arith.constant 0 : i32
    %c0_i32_1 = arith.constant 0 : i32
    return %c0_i32, %c0_i32_0 : i32, i32
  }
  func.func @transform_4(%arg0: i32, %arg1: i32) -> (i32, i32) {
    %c0_i32 = arith.constant 0 : i32
    %c0_i32_0 = arith.constant 0 : i32
    %c0_i32_1 = arith.constant 0 : i32
    return %c0_i32, %c0_i32_0 : i32, i32
  }
  func.func @transform_5(%arg0: i32, %arg1: i32) -> (i32, i32) {
    %c0_i32 = arith.constant 0 : i32
    %c0_i32_0 = arith.constant 0 : i32
    return %arg0, %c0_i32 : i32, i32
  }
}

</mosaic_0001>

<bundles_post_ra>
// kernel: forward.1
= control target key start
LH: loop header
LB: loop body
LE: loop exit
PB: predicated region body
PF: predicated region fallthrough
CT: control target
= control target key end

     0   :  { %s9795_s1 = inlined_call_operand.vmem [shape: bf16[768,768], index: 1, kind: input, shape index: {}]   ;;  %s9796_s0 = inlined_call_operand.vmem [shape: bf16[8,8,768], index: 0, kind: input, shape index: {}]   ;;  %s9797_s2 = inlined_call_operand.vmem [shape: bf16[256,768], index: 2, kind: input, shape index: {}]   ;;  %s9798_s3 = inlined_call_operand.vmem [shape: f32[1,768], index: 3, kind: input, shape index: {}]   ;;  %s9799_s4 = inlined_call_operand.vmem [shape: f32[1,256], index: 4, kind: input, shape index: {}]   ;;  %s9800_s5 = inlined_call_operand.vmem [shape: f32[8,256], index: 5, kind: output, shape index: {}]  }
   0x1   :  { %v5356_v0 = vld [vmem:[%s9795_s1 + $0x4] ss:$24 sps:$4 sm:$0xff]   ;;  %v5360_v2 = vld [vmem:[%s9795_s1] ss:$24 sps:$4 sm:$0xff]   ;;  %v5362_v4 = vld [vmem:[%s9795_s1 + $0x34] ss:$24 sps:$4 sm:$0xff]  }
   0x2   :  { %v5358_v1 = vld [vmem:[%s9795_s1 + $0xc] ss:$24 sps:$4 sm:$0xff]   ;;  %1930 = vmatprep.subr.bf16.mxu0 %v5356_v0  ;;  %v5361_v3 = vld [vmem:[%s9795_s1 + $0x8] ss:$24 sps:$4 sm:$0xff]   ;;  %v5364_v5 = vld [vmem:[%s9795_s1 + $0x3c] ss:$24 sps:$4 sm:$0xff]  }
   0x3   :  { %2149 = vmatprep.subr.bf16.mxu1 %v5358_v1  ;;  %1931 = vmatpush1.bf16.msra.mxu0 %v5360_v2  ;;  %v5366_v6 = vld [vmem:[%s9795_s1 + $0x30] ss:$24 sps:$4 sm:$0xff]   ;;  %v5368_v8 = vld [vmem:[%s9795_s1 + $0x64] ss:$24 sps:$4 sm:$0xff]   ;;  %v5372_v10 = vld [vmem:[%s9795_s1 + $0x60] ss:$24 sps:$4 sm:$0xff]  }
   0x4   :  { %2150 = vmatpush1.bf16.msra.mxu1 %v5361_v3  ;;  %1932 = vmatprep.subr.bf16.mxu0 %v5362_v4  ;;  %v5367_v7 = vld [vmem:[%s9795_s1 + $0x38] ss:$24 sps:$4 sm:$0xff]   ;;  %v5370_v9 = vld [vmem:[%s9795_s1 + $0x6c] ss:$24 sps:$4 sm:$0xff]   ;;  %v5373_v11 = vld [vmem:[%s9795_s1 + $0x68] ss:$24 sps:$4 sm:$0xff]  }
   0x5   :  { %2151 = vmatprep.subr.bf16.mxu1 %v5364_v5  ;;  %v5374_v12 = vld [vmem:[%s9795_s1 + $0x94] ss:$24 sps:$4 sm:$0xff]   ;;  %v5378_v14 = vld [vmem:[%s9795_s1 + $0x90] ss:$24 sps:$4 sm:$0xff]   ;;  %v5380_v16 = vld [vmem:[%s9795_s1 + $0xc4] ss:$24 sps:$4 sm:$0xff]  }
   0x6   :  { %v5376_v13 = vld [vmem:[%s9795_s1 + $0x9c] ss:$24 sps:$4 sm:$0xff]   ;;  %v5379_v15 = vld [vmem:[%s9795_s1 + $0x98] ss:$24 sps:$4 sm:$0xff]   ;;  %v5382_v17 = vld [vmem:[%s9795_s1 + $0xcc] ss:$24 sps:$4 sm:$0xff]  }
   0x7   :  { %1933 = vmatpush1.bf16.msra.mxu0 %v5366_v6  ;;  %v5384_v18 = vld [vmem:[%s9795_s1 + $0xc0] ss:$24 sps:$4 sm:$0xff]   ;;  %v5386_v20 = vld [vmem:[%s9795_s1 + $0xf4] ss:$24 sps:$4 sm:$0xff]   ;;  %v5390_v22 = vld [vmem:[%s9795_s1 + $0xf0] ss:$24 sps:$4 sm:$0xff]  }
   0x8   :  { %2152 = vmatpush1.bf16.msra.mxu1 %v5367_v7  ;;  %1934 = vmatprep.subr.bf16.mxu0 %v5368_v8  ;;  %v5385_v19 = vld [vmem:[%s9795_s1 + $0xc8] ss:$24 sps:$4 sm:$0xff]   ;;  %v5388_v21 = vld [vmem:[%s9795_s1 + $0xfc] ss:$24 sps:$4 sm:$0xff]   ;;  %v5391_v23 = vld [vmem:[%s9795_s1 + $0xf8] ss:$24 sps:$4 sm:$0xff]  }
   0x9   :  { %2153 = vmatprep.subr.bf16.mxu1 %v5370_v9  ;;  %v5392_v24 = vld [vmem:[%s9795_s1 + $0x124] ss:$24 sps:$4 sm:$0xff]   ;;  %v5396_v26 = vld [vmem:[%s9795_s1 + $0x120] ss:$24 sps:$4 sm:$0xff]   ;;  %v5398_v28 = vld [vmem:[%s9795_s1 + $0x154] ss:$24 sps:$4 sm:$0xff]  }
   0xa   :  { %v5394_v25 = vld [vmem:[%s9795_s1 + $0x12c] ss:$24 sps:$4 sm:$0xff]   ;;  %v5397_v27 = vld [vmem:[%s9795_s1 + $0x128] ss:$24 sps:$4 sm:$0xff]   ;;  %v5400_v29 = vld [vmem:[%s9795_s1 + $0x15c] ss:$24 sps:$4 sm:$0xff]  }
   0xb   :  { %1935 = vmatpush1.bf16.msra.mxu0 %v5372_v10  ;;  %v5402_v30 = vld [vmem:[%s9795_s1 + $0x150] ss:$24 sps:$4 sm:$0xff]   ;;  %v5404_v32 = vld [vmem:[%s9795_s1 + $0x184] ss:$24 sps:$4 sm:$0xff]   ;;  %v5408_v34 = vld [vmem:[%s9795_s1 + $0x180] ss:$24 sps:$4 sm:$0xff]  }
   0xc   :  { %2154 = vmatpush1.bf16.msra.mxu1 %v5373_v11  ;;  %1936 = vmatprep.subr.bf16.mxu0 %v5374_v12  ;;  %v5403_v31 = vld [vmem:[%s9795_s1 + $0x158] ss:$24 sps:$4 sm:$0xff]   ;;  %v5406_v33 = vld [vmem:[%s9795_s1 + $0x18c] ss:$24 sps:$4 sm:$0xff]   ;;  %v5409_v35 = vld [vmem:[%s9795_s1 + $0x188] ss:$24 sps:$4 sm:$0xff]  }
   0xd   :  { %2155 = vmatprep.subr.bf16.mxu1 %v5376_v13  ;;  %v5410_v36 = vld [vmem:[%s9795_s1 + $0x1b4] ss:$24 sps:$4 sm:$0xff]   ;;  %v5414_v38 = vld [vmem:[%s9795_s1 + $0x1b0] ss:$24 sps:$4 sm:$0xff]   ;;  %v5416_v40 = vld [vmem:[%s9795_s1 + $0x1e4] ss:$24 sps:$4 sm:$0xff]  }
   0xe   :  { %v5412_v37 = vld [vmem:[%s9795_s1 + $0x1bc] ss:$24 sps:$4 sm:$0xff]   ;;  %v5415_v39 = vld [vmem:[%s9795_s1 + $0x1b8] ss:$24 sps:$4 sm:$0xff]   ;;  %v5418_v41 = vld [vmem:[%s9795_s1 + $0x1ec] ss:$24 sps:$4 sm:$0xff]  }
   0xf   :  { %1937 = vmatpush1.bf16.msra.mxu0 %v5378_v14  ;;  %v5420_v42 = vld [vmem:[%s9795_s1 + $0x1e0] ss:$24 sps:$4 sm:$0xff]   ;;  %v5422_v44 = vld [vmem:[%s9795_s1 + $0x214] ss:$24 sps:$4 sm:$0xff]   ;;  %v5426_v46 = vld [vmem:[%s9795_s1 + $0x210] ss:$24 sps:$4 sm:$0xff]  }
  0x10   :  { %2156 = vmatpush1.bf16.msra.mxu1 %v5379_v15  ;;  %1938 = vmatprep.subr.bf16.mxu0 %v5380_v16  ;;  %v5421_v43 = vld [vmem:[%s9795_s1 + $0x1e8] ss:$24 sps:$4 sm:$0xff]   ;;  %v5424_v45 = vld [vmem:[%s9795_s1 + $0x21c] ss:$24 sps:$4 sm:$0xff]   ;;  %v5427_v48 = vld [vmem:[%s9795_s1 + $0x218] ss:$24 sps:$4 sm:$0xff]  }
  0x11   :  { %2157 = vmatprep.subr.bf16.mxu1 %v5382_v17  ;;  %v5452_v47 = vld [vmem:[%s9796_s0 + $0x4] ss:$24 sps:$4 sm:$0xff]   ;;  %v5432_v51 = vld [vmem:[%s9795_s1 + $0x240] ss:$24 sps:$4 sm:$0xff]   ;;  %v5434_v53 = vld [vmem:[%s9795_s1 + $0x274] ss:$24 sps:$4 sm:$0xff]  }
  0x12   :  { %v5428_v49 = vld [vmem:[%s9795_s1 + $0x244] ss:$24 sps:$4 sm:$0xff]   ;;  %1962 = vmatprep.mubr.bf16.mxu0 %v5452_v47  ;;  %2181 = vmatprep.mubr.bf16.mxu1 %v5452_v47  ;;  %v5433_v52 = vld [vmem:[%s9795_s1 + $0x248] ss:$24 sps:$4 sm:$0xff]   ;;  %v5439_v56 = vld [vmem:[%s9795_s1 + $0x278] ss:$24 sps:$4 sm:$0xff]  }
  0x13   :  { %1939 = vmatpush1.bf16.msra.mxu0 %v5384_v18  ;;  %v5430_v50 = vld [vmem:[%s9795_s1 + $0x24c] ss:$24 sps:$4 sm:$0xff]   ;;  %v5436_v54 = vld [vmem:[%s9795_s1 + $0x27c] ss:$24 sps:$4 sm:$0xff]   ;;  %v5438_v55 = vld [vmem:[%s9795_s1 + $0x270] ss:$24 sps:$4 sm:$0xff]  }
  0x14   :  { %2158 = vmatpush1.bf16.msra.mxu1 %v5385_v19  ;;  %1940 = vmatprep.subr.bf16.mxu0 %v5386_v20  ;;  %v5440_v57 = vld [vmem:[%s9795_s1 + $0x2a4] ss:$24 sps:$4 sm:$0xff]   ;;  %v5444_v59 = vld [vmem:[%s9795_s1 + $0x2a0] ss:$24 sps:$4 sm:$0xff]   ;;  %v5446_v61 = vld [vmem:[%s9795_s1 + $0x2d4] ss:$24 sps:$4 sm:$0xff]  }
  0x15   :  { %2159 = vmatprep.subr.bf16.mxu1 %v5388_v21  ;;  %v5442_v58 = vld [vmem:[%s9795_s1 + $0x2ac] ss:$24 sps:$4 sm:$0xff]   ;;  %v5445_v60 = vld [vmem:[%s9795_s1 + $0x2a8] ss:$24 sps:$4 sm:$0xff]   ;;  %v5448_v62 = vld [vmem:[%s9795_s1 + $0x2dc] ss:$24 sps:$4 sm:$0xff]  }
  0x16   :  { %v5450_v63 = vld [vmem:[%s9795_s1 + $0x2d0] ss:$24 sps:$4 sm:$0xff]   ;;  %v5456_v1 = vld [vmem:[%s9795_s1 + $0x304] ss:$24 sps:$4 sm:$0xff]   ;;  %v5454_v3 = vld [vmem:[%s9795_s1 + $0x300] ss:$24 sps:$4 sm:$0xff]  }
  0x17   :  { %1941 = vmatpush1.bf16.msra.mxu0 %v5390_v22  ;;  %v5451_v0 = vld [vmem:[%s9795_s1 + $0x2d8] ss:$24 sps:$4 sm:$0xff]   ;;  %v5459_v2 = vld [vmem:[%s9795_s1 + $0x30c] ss:$24 sps:$4 sm:$0xff]   ;;  %v5457_v4 = vld [vmem:[%s9795_s1 + $0x308] ss:$24 sps:$4 sm:$0xff]  }
  0x18   :  { %2160 = vmatpush1.bf16.msra.mxu1 %v5391_v23  ;;  %1942 = vmatprep.subr.bf16.mxu0 %v5392_v24  ;;  %v5460_v5 = vld [vmem:[%s9796_s0] ss:$24 sps:$4 sm:$0xff]   ;;  %v5463_v6 = vld [vmem:[%s9795_s1 + $0x334] ss:$24 sps:$4 sm:$0xff]   ;;  %v5461_v8 = vld [vmem:[%s9795_s1 + $0x330] ss:$24 sps:$4 sm:$0xff]  }
  0x19   :  { %2161 = vmatprep.subr.bf16.mxu1 %v5394_v25  ;;  %v5466_v7 = vld [vmem:[%s9795_s1 + $0x33c] ss:$24 sps:$4 sm:$0xff]   ;;  %v5464_v9 = vld [vmem:[%s9795_s1 + $0x338] ss:$24 sps:$4 sm:$0xff]   ;;  %v5472_v11 = vld [vmem:[%s9795_s1 + $0x36c] ss:$24 sps:$4 sm:$0xff]  }
  0x1a   :  { %v5469_v10 = vld [vmem:[%s9795_s1 + $0x364] ss:$24 sps:$4 sm:$0xff]   ;;  %v5467_v12 = vld [vmem:[%s9795_s1 + $0x360] ss:$24 sps:$4 sm:$0xff]   ;;  %v5515_v13 = vld [vmem:[%s9796_s0 + $0x34] ss:$24 sps:$4 sm:$0xff]  }
  0x1b   :  { %1943 = vmatpush1.bf16.msra.mxu0 %v5396_v26  ;;  %v5470_v14 = vld [vmem:[%s9795_s1 + $0x368] ss:$24 sps:$4 sm:$0xff]   ;;  %v5475_v15 = vld [vmem:[%s9795_s1 + $0x394] ss:$24 sps:$4 sm:$0xff]   ;;  %v5476_v19 = vld [vmem:[%s9795_s1 + $0x398] ss:$24 sps:$4 sm:$0xff]  }
  0x1c   :  { %2162 = vmatpush1.bf16.msra.mxu1 %v5397_v27  ;;  %1944 = vmatprep.subr.bf16.mxu0 %v5398_v28  ;;  %v5478_v16 = vld [vmem:[%s9795_s1 + $0x39c] ss:$24 sps:$4 sm:$0xff]   ;;  %v5523_v17 = vld [vmem:[%s9796_s0 + $0x30] ss:$24 sps:$4 sm:$0xff]   ;;  %v5484_v21 = vld [vmem:[%s9795_s1 + $0x3cc] ss:$24 sps:$4 sm:$0xff]  }
  0x1d   :  { %2163 = vmatprep.subr.bf16.mxu1 %v5400_v29  ;;  %v5473_v18 = vld [vmem:[%s9795_s1 + $0x390] ss:$24 sps:$4 sm:$0xff]   ;;  %v5481_v20 = vld [vmem:[%s9795_s1 + $0x3c4] ss:$24 sps:$4 sm:$0xff]   ;;  %v5479_v23 = vld [vmem:[%s9795_s1 + $0x3c0] ss:$24 sps:$4 sm:$0xff]  }
  0x1e   :  { %v5530_v22 = vld [vmem:[%s9796_s0 + $0x64] ss:$24 sps:$4 sm:$0xff]   ;;  %v5482_v24 = vld [vmem:[%s9795_s1 + $0x3c8] ss:$24 sps:$4 sm:$0xff]   ;;  %v5487_v25 = vld [vmem:[%s9795_s1 + $0x3f4] ss:$24 sps:$4 sm:$0xff]  }
  0x1f   :  { %1945 = vmatpush1.bf16.msra.mxu0 %v5402_v30  ;;  %v5490_v26 = vld [vmem:[%s9795_s1 + $0x3fc] ss:$24 sps:$4 sm:$0xff]   ;;  %v5485_v27 = vld [vmem:[%s9795_s1 + $0x3f0] ss:$24 sps:$4 sm:$0xff]   ;;  %v5538_v28 = vld [vmem:[%s9796_s0 + $0x60] ss:$24 sps:$4 sm:$0xff]  }
  0x20   :  { %2164 = vmatpush1.bf16.msra.mxu1 %v5403_v31  ;;  %1946 = vmatprep.subr.bf16.mxu0 %v5404_v32  ;;  %v5488_v29 = vld [vmem:[%s9795_s1 + $0x3f8] ss:$24 sps:$4 sm:$0xff]   ;;  %v5493_v30 = vld [vmem:[%s9795_s1 + $0x424] ss:$24 sps:$4 sm:$0xff]   ;;  %v5545_v31 = vld [vmem:[%s9796_s0 + $0x94] ss:$24 sps:$4 sm:$0xff]  }
  0x21   :  { %2165 = vmatprep.subr.bf16.mxu1 %v5406_v33  ;;  %v5496_v32 = vld [vmem:[%s9795_s1 + $0x42c] ss:$24 sps:$4 sm:$0xff]   ;;  %v5491_v33 = vld [vmem:[%s9795_s1 + $0x420] ss:$24 sps:$4 sm:$0xff]   ;;  %v5509_v47 = vld [vmem:[%s9795_s1 + $0x4b0] ss:$24 sps:$4 sm:$0xff]  }
  0x23   :  { %1947 = vmatpush1.bf16.msra.mxu0 %v5408_v34  ;;  %v5494_v34 = vld [vmem:[%s9795_s1 + $0x428] ss:$24 sps:$4 sm:$0xff]  }
  0x24   :  { %2166 = vmatpush1.bf16.msra.mxu1 %v5409_v35  ;;  %1948 = vmatprep.subr.bf16.mxu0 %v5410_v36  ;;  %v5499_v35 = vld [vmem:[%s9795_s1 + $0x454] ss:$24 sps:$4 sm:$0xff]  }
  0x25   :  { %2167 = vmatprep.subr.bf16.mxu1 %v5412_v37  ;;  %v5502_v36 = vld [vmem:[%s9795_s1 + $0x45c] ss:$24 sps:$4 sm:$0xff]   ;;  %v5497_v37 = vld [vmem:[%s9795_s1 + $0x450] ss:$24 sps:$4 sm:$0xff]  }
  0x27   :  { %1949 = vmatpush1.bf16.msra.mxu0 %v5414_v38  ;;  %v5553_v38 = vld [vmem:[%s9796_s0 + $0x90] ss:$24 sps:$4 sm:$0xff]  }
  0x28   :  { %2168 = vmatpush1.bf16.msra.mxu1 %v5415_v39  ;;  %1950 = vmatprep.subr.bf16.mxu0 %v5416_v40  ;;  %v5500_v39 = vld [vmem:[%s9795_s1 + $0x458] ss:$24 sps:$4 sm:$0xff]   ;;  %v5562_v40 = vld [vmem:[%s9796_s0 + $0xc] ss:$24 sps:$4 sm:$0xff]  }
  0x29   :  { %2169 = vmatprep.subr.bf16.mxu1 %v5418_v41  ;;  %v5505_v41 = vld [vmem:[%s9795_s1 + $0x484] ss:$24 sps:$4 sm:$0xff]  }
  0x2b   :  { %1951 = vmatpush1.bf16.msra.mxu0 %v5420_v42  ;;  %v5508_v42 = vld [vmem:[%s9795_s1 + $0x48c] ss:$24 sps:$4 sm:$0xff]  }
  0x2c   :  { %2170 = vmatpush1.bf16.msra.mxu1 %v5421_v43  ;;  %1952 = vmatprep.subr.bf16.mxu0 %v5422_v44  ;;  %v5503_v43 = vld [vmem:[%s9795_s1 + $0x480] ss:$24 sps:$4 sm:$0xff]  }
  0x2d   :  { %2171 = vmatprep.subr.bf16.mxu1 %v5424_v45  ;;  %v5506_v44 = vld [vmem:[%s9795_s1 + $0x488] ss:$24 sps:$4 sm:$0xff]   ;;  %v5511_v45 = vld [vmem:[%s9795_s1 + $0x4b4] ss:$24 sps:$4 sm:$0xff]  }
  0x2f   :  { %1953 = vmatpush1.bf16.msra.mxu0 %v5426_v46  ;;  %v5514_v46 = vld [vmem:[%s9795_s1 + $0x4bc] ss:$24 sps:$4 sm:$0xff]  }
  0x30   :  { %2172 = vmatpush1.bf16.msra.mxu1 %v5427_v48  ;;  %1954 = vmatprep.subr.bf16.mxu0 %v5428_v49  ;;  %v5512_v48 = vld [vmem:[%s9795_s1 + $0x4b8] ss:$24 sps:$4 sm:$0xff]   ;;  %v5519_v49 = vld [vmem:[%s9795_s1 + $0x4e4] ss:$24 sps:$4 sm:$0xff]  }
  0x31   :  { %2173 = vmatprep.subr.bf16.mxu1 %v5430_v50  ;;  %v5522_v50 = vld [vmem:[%s9795_s1 + $0x4ec] ss:$24 sps:$4 sm:$0xff]  }
  0x33   :  { %1955 = vmatpush1.bf16.msra.mxu0 %v5432_v51  ;;  %v5517_v51 = vld [vmem:[%s9795_s1 + $0x4e0] ss:$24 sps:$4 sm:$0xff]  }
  0x34   :  { %2174 = vmatpush1.bf16.msra.mxu1 %v5433_v52  ;;  %1956 = vmatprep.subr.bf16.mxu0 %v5434_v53  ;;  %v5520_v52 = vld [vmem:[%s9795_s1 + $0x4e8] ss:$24 sps:$4 sm:$0xff]   ;;  %v5526_v53 = vld [vmem:[%s9795_s1 + $0x514] ss:$24 sps:$4 sm:$0xff]  }
  0x35   :  { %2175 = vmatprep.subr.bf16.mxu1 %v5436_v54  ;;  %v5529_v54 = vld [vmem:[%s9795_s1 + $0x51c] ss:$24 sps:$4 sm:$0xff]  }
  0x37   :  { %1957 = vmatpush1.bf16.msra.mxu0 %v5438_v55  ;;  %v5524_v55 = vld [vmem:[%s9795_s1 + $0x510] ss:$24 sps:$4 sm:$0xff]  }
  0x38   :  { %2176 = vmatpush1.bf16.msra.mxu1 %v5439_v56  ;;  %1958 = vmatprep.subr.bf16.mxu0 %v5440_v57  ;;  %v5527_v56 = vld [vmem:[%s9795_s1 + $0x518] ss:$24 sps:$4 sm:$0xff]   ;;  %v5534_v57 = vld [vmem:[%s9795_s1 + $0x544] ss:$24 sps:$4 sm:$0xff]  }
  0x39   :  { %2177 = vmatprep.subr.bf16.mxu1 %v5442_v58  ;;  %v5537_v58 = vld [vmem:[%s9795_s1 + $0x54c] ss:$24 sps:$4 sm:$0xff]  }
  0x3b   :  { %1959 = vmatpush1.bf16.msra.mxu0 %v5444_v59  ;;  %v5532_v59 = vld [vmem:[%s9795_s1 + $0x540] ss:$24 sps:$4 sm:$0xff]  }
  0x3c   :  { %2178 = vmatpush1.bf16.msra.mxu1 %v5445_v60  ;;  %1960 = vmatprep.subr.bf16.mxu0 %v5446_v61  ;;  %v5535_v60 = vld [vmem:[%s9795_s1 + $0x548] ss:$24 sps:$4 sm:$0xff]   ;;  %v5541_v61 = vld [vmem:[%s9795_s1 + $0x574] ss:$24 sps:$4 sm:$0xff]  }
  0x3d   :  { %2179 = vmatprep.subr.bf16.mxu1 %v5448_v62  ;;  %v5544_v62 = vld [vmem:[%s9795_s1 + $0x57c] ss:$24 sps:$4 sm:$0xff]  }
  0x3f   :  { %1961 = vmatpush1.bf16.msra.mxu0 %v5450_v63  ;;  %v5539_v63 = vld [vmem:[%s9795_s1 + $0x570] ss:$24 sps:$4 sm:$0xff]  }
  0x40   :  { %2180 = vmatpush1.bf16.msra.mxu1 %v5451_v0  ;;  %2003 = vmatprep.subr.bf16.mxu0 %v5456_v1  ;;  %v5542_v0 = vld [vmem:[%s9795_s1 + $0x578] ss:$24 sps:$4 sm:$0xff]   ;;  %v5549_v1 = vld [vmem:[%s9795_s1 + $0x5a4] ss:$24 sps:$4 sm:$0xff]  }
  0x41   :  { %2222 = vmatprep.subr.bf16.mxu1 %v5459_v2  ;;  %v5552_v2 = vld [vmem:[%s9795_s1 + $0x5ac] ss:$24 sps:$4 sm:$0xff]  }
  0x42   :  { %1963 = vmatmul.mubr.bf16.vlgmr.msra.gmra.mrb[0].mxu0 %v5460_v5 }
  0x43   :  { %2182 = vmatmul.mubr.bf16.vlgmr.msra.gmra.mrb[0].mxu1 %v5460_v5  ;;  %2004 = vmatpush1.bf16.msra.mxu0 %v5454_v3  ;;  %v5547_v3 = vld [vmem:[%s9795_s1 + $0x5a0] ss:$24 sps:$4 sm:$0xff]   ;;  %v5556_v5 = vld [vmem:[%s9795_s1 + $0x5d4] ss:$24 sps:$4 sm:$0xff]  }
  0x44   :  { %2223 = vmatpush1.bf16.msra.mxu1 %v5457_v4  ;;  %2005 = vmatprep.subr.bf16.mxu0 %v5463_v6  ;;  %v5550_v4 = vld [vmem:[%s9795_s1 + $0x5a8] ss:$24 sps:$4 sm:$0xff]   ;;  %v5559_v6 = vld [vmem:[%s9795_s1 + $0x5dc] ss:$24 sps:$4 sm:$0xff]  }
  0x45   :  { %2224 = vmatprep.subr.bf16.mxu1 %v5466_v7  ;;  %1972 = vmatprep.mubr.bf16.mxu0 %v5515_v13  ;;  %v5554_v7 = vld [vmem:[%s9795_s1 + $0x5d0] ss:$24 sps:$4 sm:$0xff]  }
  0x46   :  { %2191 = vmatprep.mubr.bf16.mxu1 %v5515_v13  ;;  %v5566_v13 = vld [vmem:[%s9795_s1 + $0x608] ss:$24 sps:$4 sm:$0xff]  }
  0x47   :  { %2006 = vmatpush1.bf16.msra.mxu0 %v5461_v8  ;;  %v5557_v8 = vld [vmem:[%s9795_s1 + $0x5d8] ss:$24 sps:$4 sm:$0xff]  }
  0x48   :  { %2225 = vmatpush1.bf16.msra.mxu1 %v5464_v9  ;;  %2007 = vmatprep.subr.bf16.mxu0 %v5469_v10  ;;  %v5565_v9 = vld [vmem:[%s9795_s1 + $0x604] ss:$24 sps:$4 sm:$0xff]  }
  0x49   :  { %2226 = vmatprep.subr.bf16.mxu1 %v5472_v11  ;;  %v5568_v10 = vld [vmem:[%s9795_s1 + $0x60c] ss:$24 sps:$4 sm:$0xff]   ;;  %v5560_v11 = vld [vmem:[%s9796_s0 + $0x8] ss:$24 sps:$4 sm:$0xff]  }
  0x4a   :  { %1973 = vmatmul.mubr.bf16.gmra.mrb[4].mxu0 %v5523_v17 }
  0x4b   :  { %2008 = vmatpush1.bf16.msra.mxu0 %v5467_v12  ;;  %2192 = vmatmul.mubr.bf16.gmra.mrb[4].mxu1 %v5523_v17  ;;  %v5563_v12 = vld [vmem:[%s9795_s1 + $0x600] ss:$24 sps:$4 sm:$0xff]   ;;  %v5569_v17 = vld [vmem:[%s9795_s1 + $0x630] ss:$24 sps:$4 sm:$0xff]  }
  0x4c   :  { %2227 = vmatpush1.bf16.msra.mxu1 %v5470_v14  ;;  %2009 = vmatprep.subr.bf16.mxu0 %v5475_v15  ;;  %v5571_v14 = vld [vmem:[%s9795_s1 + $0x634] ss:$24 sps:$4 sm:$0xff]  }
  0x4d   :  { %2228 = vmatprep.subr.bf16.mxu1 %v5478_v16  ;;  %1982 = vmatprep.mubr.bf16.mxu0 %v5530_v22  ;;  %v5574_v15 = vld [vmem:[%s9795_s1 + $0x63c] ss:$24 sps:$4 sm:$0xff]  }
  0x4e   :  { %2201 = vmatprep.mubr.bf16.mxu1 %v5530_v22  ;;  %v5623_v16 = vld [vmem:[%s9796_s0 + $0x3c] ss:$24 sps:$4 sm:$0xff]   ;;  %v5578_v22 = vld [vmem:[%s9795_s1 + $0x668] ss:$24 sps:$4 sm:$0xff]  }
  0x4f   :  { %2010 = vmatpush1.bf16.msra.mxu0 %v5473_v18  ;;  %v5572_v18 = vld [vmem:[%s9795_s1 + $0x638] ss:$24 sps:$4 sm:$0xff]  }
  0x50   :  { %2229 = vmatpush1.bf16.msra.mxu1 %v5476_v19  ;;  %2011 = vmatprep.subr.bf16.mxu0 %v5481_v20  ;;  %v5577_v19 = vld [vmem:[%s9795_s1 + $0x664] ss:$24 sps:$4 sm:$0xff]  }
  0x51   :  { %2230 = vmatprep.subr.bf16.mxu1 %v5484_v21  ;;  %v5580_v20 = vld [vmem:[%s9795_s1 + $0x66c] ss:$24 sps:$4 sm:$0xff]   ;;  %v5575_v21 = vld [vmem:[%s9795_s1 + $0x660] ss:$24 sps:$4 sm:$0xff]  }
  0x52   :  { %1983 = vmatmul.mubr.bf16.gmra.mrb[8].mxu0 %v5538_v28 }
  0x53   :  { %2012 = vmatpush1.bf16.msra.mxu0 %v5479_v23  ;;  %2202 = vmatmul.mubr.bf16.gmra.mrb[8].mxu1 %v5538_v28  ;;  %v5625_v23 = vld [vmem:[%s9796_s0 + $0x38] ss:$24 sps:$4 sm:$0xff]  }
  0x54   :  { %2231 = vmatpush1.bf16.msra.mxu1 %v5482_v24  ;;  %2013 = vmatprep.subr.bf16.mxu0 %v5487_v25  ;;  %v5583_v24 = vld [vmem:[%s9795_s1 + $0x694] ss:$24 sps:$4 sm:$0xff]   ;;  %v5584_v28 = vld [vmem:[%s9795_s1 + $0x698] ss:$24 sps:$4 sm:$0xff]  }
  0x55   :  { %2232 = vmatprep.subr.bf16.mxu1 %v5490_v26  ;;  %1992 = vmatprep.mubr.bf16.mxu0 %v5545_v31  ;;  %v5586_v25 = vld [vmem:[%s9795_s1 + $0x69c] ss:$24 sps:$4 sm:$0xff]   ;;  %v5638_v26 = vld [vmem:[%s9796_s0 + $0x6c] ss:$24 sps:$4 sm:$0xff]  }
  0x56   :  { %2211 = vmatprep.mubr.bf16.mxu1 %v5545_v31  ;;  %v5587_v31 = vld [vmem:[%s9795_s1 + $0x6c0] ss:$24 sps:$4 sm:$0xff]  }
  0x57   :  { %2014 = vmatpush1.bf16.msra.mxu0 %v5485_v27  ;;  %v5581_v27 = vld [vmem:[%s9795_s1 + $0x690] ss:$24 sps:$4 sm:$0xff]  }
  0x58   :  { %2233 = vmatpush1.bf16.msra.mxu1 %v5488_v29  ;;  %2015 = vmatprep.subr.bf16.mxu0 %v5493_v30  ;;  %v5589_v29 = vld [vmem:[%s9795_s1 + $0x6c4] ss:$24 sps:$4 sm:$0xff]  }
  0x59   :  { %2234 = vmatprep.subr.bf16.mxu1 %v5496_v32  ;;  %v5592_v30 = vld [vmem:[%s9795_s1 + $0x6cc] ss:$24 sps:$4 sm:$0xff]   ;;  %v5590_v32 = vld [vmem:[%s9795_s1 + $0x6c8] ss:$24 sps:$4 sm:$0xff]  }
  0x5a   :  { %1993 = vmatmul.mubr.bf16.gmra.mrb[12].mxu0 %v5553_v38 }
  0x5b   :  { %2016 = vmatpush1.bf16.msra.mxu0 %v5491_v33  ;;  %2212 = vmatmul.mubr.bf16.gmra.mrb[12].mxu1 %v5553_v38  ;;  %v5640_v33 = vld [vmem:[%s9796_s0 + $0x68] ss:$24 sps:$4 sm:$0xff]   ;;  %v5596_v38 = vld [vmem:[%s9795_s1 + $0x6f8] ss:$24 sps:$4 sm:$0xff]  }
  0x5c   :  { %2235 = vmatpush1.bf16.msra.mxu1 %v5494_v34  ;;  %2017 = vmatprep.subr.bf16.mxu0 %v5499_v35  ;;  %v5595_v34 = vld [vmem:[%s9795_s1 + $0x6f4] ss:$24 sps:$4 sm:$0xff]  }
  0x5d   :  { %2236 = vmatprep.subr.bf16.mxu1 %v5502_v36  ;;  %2035 = vmatprep.mubr.bf16.mxu0 %v5562_v40  ;;  %v5598_v35 = vld [vmem:[%s9795_s1 + $0x6fc] ss:$24 sps:$4 sm:$0xff]  }
  0x5e   :  { %2254 = vmatprep.mubr.bf16.mxu1 %v5562_v40  ;;  %v5653_v36 = vld [vmem:[%s9796_s0 + $0x9c] ss:$24 sps:$4 sm:$0xff]   ;;  %v5604_v40 = vld [vmem:[%s9795_s1 + $0x72c] ss:$24 sps:$4 sm:$0xff]  }
  0x5f   :  { %2018 = vmatpush1.bf16.msra.mxu0 %v5497_v37  ;;  %v5593_v37 = vld [vmem:[%s9795_s1 + $0x6f0] ss:$24 sps:$4 sm:$0xff]  }
  0x60   :  { %2237 = vmatpush1.bf16.msra.mxu1 %v5500_v39  ;;  %2019 = vmatprep.subr.bf16.mxu0 %v5505_v41  ;;  %v5601_v39 = vld [vmem:[%s9795_s1 + $0x724] ss:$24 sps:$4 sm:$0xff]   ;;  %v5599_v41 = vld [vmem:[%s9795_s1 + $0x720] ss:$24 sps:$4 sm:$0xff]  }
  0x61   :  { %2238 = vmatprep.subr.bf16.mxu1 %v5508_v42  ;;  %v5602_v42 = vld [vmem:[%s9795_s1 + $0x728] ss:$24 sps:$4 sm:$0xff]  }
  0x63   :  { %2020 = vmatpush1.bf16.msra.mxu0 %v5503_v43  ;;  %v5655_v43 = vld [vmem:[%s9796_s0 + $0x98] ss:$24 sps:$4 sm:$0xff]  }
  0x64   :  { %2239 = vmatpush1.bf16.msra.mxu1 %v5506_v44  ;;  %2021 = vmatprep.subr.bf16.mxu0 %v5511_v45  ;;  %v5607_v44 = vld [vmem:[%s9795_s1 + $0x754] ss:$24 sps:$4 sm:$0xff]  }
  0x65   :  { %2240 = vmatprep.subr.bf16.mxu1 %v5514_v46  ;;  %v5610_v45 = vld [vmem:[%s9795_s1 + $0x75c] ss:$24 sps:$4 sm:$0xff]  }
  0x66   :  { %v5670_v46 = vld [vmem:[%s9796_s0 + $0x14] ss:$24 sps:$4 sm:$0xff]  }
  0x67   :  { %2022 = vmatpush1.bf16.msra.mxu0 %v5509_v47  ;;  %v5605_v47 = vld [vmem:[%s9795_s1 + $0x750] ss:$24 sps:$4 sm:$0xff]  }
  0x68   :  { %2241 = vmatpush1.bf16.msra.mxu1 %v5512_v48  ;;  %2023 = vmatprep.subr.bf16.mxu0 %v5519_v49  ;;  %v5608_v48 = vld [vmem:[%s9795_s1 + $0x758] ss:$24 sps:$4 sm:$0xff]   ;;  %v5613_v49 = vld [vmem:[%s9795_s1 + $0x784] ss:$24 sps:$4 sm:$0xff]  }
  0x69   :  { %2242 = vmatprep.subr.bf16.mxu1 %v5522_v50  ;;  %v5616_v50 = vld [vmem:[%s9795_s1 + $0x78c] ss:$24 sps:$4 sm:$0xff]  }
  0x6b   :  { %2024 = vmatpush1.bf16.msra.mxu0 %v5517_v51  ;;  %v5611_v51 = vld [vmem:[%s9795_s1 + $0x780] ss:$24 sps:$4 sm:$0xff]  }
  0x6c   :  { %2243 = vmatpush1.bf16.msra.mxu1 %v5520_v52  ;;  %2025 = vmatprep.subr.bf16.mxu0 %v5526_v53  ;;  %v5614_v52 = vld [vmem:[%s9795_s1 + $0x788] ss:$24 sps:$4 sm:$0xff]   ;;  %v5619_v53 = vld [vmem:[%s9795_s1 + $0x7b4] ss:$24 sps:$4 sm:$0xff]  }
  0x6d   :  { %2244 = vmatprep.subr.bf16.mxu1 %v5529_v54  ;;  %v5622_v54 = vld [vmem:[%s9795_s1 + $0x7bc] ss:$24 sps:$4 sm:$0xff]  }
  0x6f   :  { %2026 = vmatpush1.bf16.msra.mxu0 %v5524_v55  ;;  %v5617_v55 = vld [vmem:[%s9795_s1 + $0x7b0] ss:$24 sps:$4 sm:$0xff]  }
  0x70   :  { %2245 = vmatpush1.bf16.msra.mxu1 %v5527_v56  ;;  %2027 = vmatprep.subr.bf16.mxu0 %v5534_v57  ;;  %v5620_v56 = vld [vmem:[%s9795_s1 + $0x7b8] ss:$24 sps:$4 sm:$0xff]   ;;  %v5628_v57 = vld [vmem:[%s9795_s1 + $0x7e4] ss:$24 sps:$4 sm:$0xff]  }
  0x71   :  { %2246 = vmatprep.subr.bf16.mxu1 %v5537_v58  ;;  %v5631_v58 = vld [vmem:[%s9795_s1 + $0x7ec] ss:$24 sps:$4 sm:$0xff]  }
  0x73   :  { %2028 = vmatpush1.bf16.msra.mxu0 %v5532_v59  ;;  %v5626_v59 = vld [vmem:[%s9795_s1 + $0x7e0] ss:$24 sps:$4 sm:$0xff]  }
  0x74   :  { %2247 = vmatpush1.bf16.msra.mxu1 %v5535_v60  ;;  %2029 = vmatprep.subr.bf16.mxu0 %v5541_v61  ;;  %v5629_v60 = vld [vmem:[%s9795_s1 + $0x7e8] ss:$24 sps:$4 sm:$0xff]   ;;  %v5634_v61 = vld [vmem:[%s9795_s1 + $0x814] ss:$24 sps:$4 sm:$0xff]  }
  0x75   :  { %2248 = vmatprep.subr.bf16.mxu1 %v5544_v62  ;;  %v5637_v62 = vld [vmem:[%s9795_s1 + $0x81c] ss:$24 sps:$4 sm:$0xff]  }
  0x77   :  { %2030 = vmatpush1.bf16.msra.mxu0 %v5539_v63  ;;  %v5632_v63 = vld [vmem:[%s9795_s1 + $0x810] ss:$24 sps:$4 sm:$0xff]  }
  0x78   :  { %2249 = vmatpush1.bf16.msra.mxu1 %v5542_v0  ;;  %2031 = vmatprep.subr.bf16.mxu0 %v5549_v1  ;;  %v5635_v0 = vld [vmem:[%s9795_s1 + $0x818] ss:$24 sps:$4 sm:$0xff]   ;;  %v5643_v1 = vld [vmem:[%s9795_s1 + $0x844] ss:$24 sps:$4 sm:$0xff]  }
  0x79   :  { %2250 = vmatprep.subr.bf16.mxu1 %v5552_v2  ;;  %v5646_v2 = vld [vmem:[%s9795_s1 + $0x84c] ss:$24 sps:$4 sm:$0xff]  }
  0x7b   :  { %2032 = vmatpush1.bf16.msra.mxu0 %v5547_v3  ;;  %v5641_v3 = vld [vmem:[%s9795_s1 + $0x840] ss:$24 sps:$4 sm:$0xff]  }
  0x7c   :  { %2251 = vmatpush1.bf16.msra.mxu1 %v5550_v4  ;;  %2033 = vmatprep.subr.bf16.mxu0 %v5556_v5  ;;  %v5644_v4 = vld [vmem:[%s9795_s1 + $0x848] ss:$24 sps:$4 sm:$0xff]   ;;  %v5649_v5 = vld [vmem:[%s9795_s1 + $0x874] ss:$24 sps:$4 sm:$0xff]  }
  0x7d   :  { %2252 = vmatprep.subr.bf16.mxu1 %v5559_v6  ;;  %v5652_v6 = vld [vmem:[%s9795_s1 + $0x87c] ss:$24 sps:$4 sm:$0xff]  }
  0x7f   :  { %2034 = vmatpush1.bf16.msra.mxu0 %v5554_v7  ;;  %v5647_v7 = vld [vmem:[%s9795_s1 + $0x870] ss:$24 sps:$4 sm:$0xff]  }
  0x80   :  { %2253 = vmatpush1.bf16.msra.mxu1 %v5557_v8  ;;  %2076 = vmatprep.subr.bf16.mxu0 %v5565_v9  ;;  %v5650_v8 = vld [vmem:[%s9795_s1 + $0x878] ss:$24 sps:$4 sm:$0xff]   ;;  %v5658_v9 = vld [vmem:[%s9795_s1 + $0x8a4] ss:$24 sps:$4 sm:$0xff]  }
  0x81   :  { %2295 = vmatprep.subr.bf16.mxu1 %v5568_v10  ;;  %v5661_v10 = vld [vmem:[%s9795_s1 + $0x8ac] ss:$24 sps:$4 sm:$0xff]  }
  0x82   :  { %2036 = vmatmul.mubr.bf16.vlgmr.msra.gmra.mrb[0].mxu0 %v5560_v11 }
  0x83   :  { %2255 = vmatmul.mubr.bf16.vlgmr.msra.gmra.mrb[0].mxu1 %v5560_v11  ;;  %2077 = vmatpush1.bf16.msra.mxu0 %v5563_v12  ;;  %v5656_v11 = vld [vmem:[%s9795_s1 + $0x8a0] ss:$24 sps:$4 sm:$0xff]  }
  0x84   :  { %2296 = vmatpush1.bf16.msra.mxu1 %v5566_v13  ;;  %2078 = vmatprep.subr.bf16.mxu0 %v5571_v14  ;;  %v5659_v12 = vld [vmem:[%s9795_s1 + $0x8a8] ss:$24 sps:$4 sm:$0xff]   ;;  %v5664_v13 = vld [vmem:[%s9795_s1 + $0x8d4] ss:$24 sps:$4 sm:$0xff]  }
  0x85   :  { %2297 = vmatprep.subr.bf16.mxu1 %v5574_v15  ;;  %2045 = vmatprep.mubr.bf16.mxu0 %v5623_v16  ;;  %v5667_v14 = vld [vmem:[%s9795_s1 + $0x8dc] ss:$24 sps:$4 sm:$0xff]   ;;  %v5662_v15 = vld [vmem:[%s9795_s1 + $0x8d0] ss:$24 sps:$4 sm:$0xff]  }
  0x86   :  { %2264 = vmatprep.mubr.bf16.mxu1 %v5623_v16  ;;  %v5665_v16 = vld [vmem:[%s9795_s1 + $0x8d8] ss:$24 sps:$4 sm:$0xff]  }
  0x87   :  { %2079 = vmatpush1.bf16.msra.mxu0 %v5569_v17  ;;  %v5673_v17 = vld [vmem:[%s9795_s1 + $0x14] ss:$24 sps:$4 sm:$0xff]  }
  0x88   :  { %2298 = vmatpush1.bf16.msra.mxu1 %v5572_v18  ;;  %2080 = vmatprep.subr.bf16.mxu0 %v5577_v19  ;;  %v5674_v18 = vld [vmem:[%s9797_s2 + $0x4] ss:$24 sps:$4 sm:$0xff]   ;;  %v5668_v19 = vld [vmem:[%s9796_s0 + $0x10] ss:$24 sps:$4 sm:$0xff]  }
  0x89   :  { %2299 = vmatprep.subr.bf16.mxu1 %v5580_v20  ;;  %v5671_v20 = vld [vmem:[%s9795_s1 + $0x10] ss:$24 sps:$4 sm:$0xff]  }
  0x8a   :  { %2046 = vmatmul.mubr.bf16.gmra.mrb[4].mxu0 %v5625_v23 }
  0x8b   :  { %2265 = vmatmul.mubr.bf16.gmra.mrb[4].mxu1 %v5625_v23  ;;  %2081 = vmatpush1.bf16.msra.mxu0 %v5575_v21  ;;  %v5676_v21 = vld [vmem:[%s9797_s2] ss:$24 sps:$4 sm:$0xff]   ;;  %v5680_v23 = vld [vmem:[%s9797_s2 + $0x34] ss:$24 sps:$4 sm:$0xff]  }
  0x8c   :  { %2300 = vmatpush1.bf16.msra.mxu1 %v5578_v22  ;;  %2082 = vmatprep.subr.bf16.mxu0 %v5583_v24  ;;  %v5679_v22 = vld [vmem:[%s9795_s1 + $0x44] ss:$24 sps:$4 sm:$0xff]  }
  0x8d   :  { %2301 = vmatprep.subr.bf16.mxu1 %v5586_v25  ;;  %2055 = vmatprep.mubr.bf16.mxu0 %v5638_v26  ;;  %v5683_v24 = vld [vmem:[%s9796_s0 + $0x44] ss:$24 sps:$4 sm:$0xff]   ;;  %v5677_v25 = vld [vmem:[%s9795_s1 + $0x40] ss:$24 sps:$4 sm:$0xff]  }
  0x8e   :  { %2274 = vmatprep.mubr.bf16.mxu1 %v5638_v26  ;;  %v5682_v26 = vld [vmem:[%s9797_s2 + $0x30] ss:$24 sps:$4 sm:$0xff]  }
  0x8f   :  { %2083 = vmatpush1.bf16.msra.mxu0 %v5581_v27  ;;  %v5688_v27 = vld [vmem:[%s9795_s1 + $0x74] ss:$24 sps:$4 sm:$0xff]  }
  0x90   :  { %2302 = vmatpush1.bf16.msra.mxu1 %v5584_v28  ;;  %2084 = vmatprep.subr.bf16.mxu0 %v5589_v29  ;;  %v5689_v28 = vld [vmem:[%s9797_s2 + $0x64] ss:$24 sps:$4 sm:$0xff]   ;;  %v5685_v29 = vld [vmem:[%s9796_s0 + $0x40] ss:$24 sps:$4 sm:$0xff]  }
  0x91   :  { %2303 = vmatprep.subr.bf16.mxu1 %v5592_v30  ;;  %v5686_v30 = vld [vmem:[%s9795_s1 + $0x70] ss:$24 sps:$4 sm:$0xff]  }
  0x92   :  { %2056 = vmatmul.mubr.bf16.gmra.mrb[8].mxu0 %v5640_v33 }
  0x93   :  { %2275 = vmatmul.mubr.bf16.gmra.mrb[8].mxu1 %v5640_v33  ;;  %2085 = vmatpush1.bf16.msra.mxu0 %v5587_v31  ;;  %v5691_v31 = vld [vmem:[%s9797_s2 + $0x60] ss:$24 sps:$4 sm:$0xff]   ;;  %v5695_v33 = vld [vmem:[%s9797_s2 + $0x94] ss:$24 sps:$4 sm:$0xff]  }
  0x94   :  { %2304 = vmatpush1.bf16.msra.mxu1 %v5590_v32  ;;  %2086 = vmatprep.subr.bf16.mxu0 %v5595_v34  ;;  %v5694_v32 = vld [vmem:[%s9795_s1 + $0xa4] ss:$24 sps:$4 sm:$0xff]   ;;  %v5698_v34 = vld [vmem:[%s9796_s0 + $0x74] ss:$24 sps:$4 sm:$0xff]  }
  0x95   :  { %2305 = vmatprep.subr.bf16.mxu1 %v5598_v35  ;;  %2065 = vmatprep.mubr.bf16.mxu0 %v5653_v36  ;;  %v5692_v35 = vld [vmem:[%s9795_s1 + $0xa0] ss:$24 sps:$4 sm:$0xff]  }
  0x96   :  { %2284 = vmatprep.mubr.bf16.mxu1 %v5653_v36  ;;  %v5697_v36 = vld [vmem:[%s9797_s2 + $0x90] ss:$24 sps:$4 sm:$0xff]  }
  0x97   :  { %2087 = vmatpush1.bf16.msra.mxu0 %v5593_v37  ;;  %v5703_v37 = vld [vmem:[%s9795_s1 + $0xd4] ss:$24 sps:$4 sm:$0xff]  }
  0x98   :  { %2306 = vmatpush1.bf16.msra.mxu1 %v5596_v38  ;;  %2088 = vmatprep.subr.bf16.mxu0 %v5601_v39  ;;  %v5704_v38 = vld [vmem:[%s9797_s2 + $0xc4] ss:$24 sps:$4 sm:$0xff]   ;;  %v5700_v39 = vld [vmem:[%s9796_s0 + $0x70] ss:$24 sps:$4 sm:$0xff]  }
  0x99   :  { %2307 = vmatprep.subr.bf16.mxu1 %v5604_v40  ;;  %v5701_v40 = vld [vmem:[%s9795_s1 + $0xd0] ss:$24 sps:$4 sm:$0xff]  }
  0x9a   :  { %2066 = vmatmul.mubr.bf16.gmra.mrb[12].mxu0 %v5655_v43 }
  0x9b   :  { %2285 = vmatmul.mubr.bf16.gmra.mrb[12].mxu1 %v5655_v43  ;;  %2089 = vmatpush1.bf16.msra.mxu0 %v5599_v41  ;;  %v5706_v41 = vld [vmem:[%s9797_s2 + $0xc0] ss:$24 sps:$4 sm:$0xff]   ;;  %v7017_v43 = vld [vmem:[%s9797_s2 + $0xf4] ss:$24 sps:$4 sm:$0xff]  }
  0x9c   :  { %2308 = vmatpush1.bf16.msra.mxu1 %v5602_v42  ;;  %2090 = vmatprep.subr.bf16.mxu0 %v5607_v44  ;;  %v5709_v42 = vld [vmem:[%s9795_s1 + $0x104] ss:$24 sps:$4 sm:$0xff]  }
  0x9d   :  { %2309 = vmatprep.subr.bf16.mxu1 %v5610_v45  ;;  %2108 = vmatprep.mubr.bf16.mxu0 %v5670_v46  ;;  %v7022_v44 = vld [vmem:[%s9796_s0 + $0xa4] ss:$24 sps:$4 sm:$0xff]   ;;  %v5707_v45 = vld [vmem:[%s9795_s1 + $0x100] ss:$24 sps:$4 sm:$0xff]  }
  0x9e   :  { %2327 = vmatprep.mubr.bf16.mxu1 %v5670_v46  ;;  %v5712_v46 = vld [vmem:[%s9797_s2 + $0xf0] ss:$24 sps:$4 sm:$0xff]  }
  0x9f   :  { %2091 = vmatpush1.bf16.msra.mxu0 %v5605_v47  ;;  %v5718_v47 = vld [vmem:[%s9795_s1 + $0x134] ss:$24 sps:$4 sm:$0xff]  }
  0xa0   :  { %2310 = vmatpush1.bf16.msra.mxu1 %v5608_v48  ;;  %2092 = vmatprep.subr.bf16.mxu0 %v5613_v49  ;;  %v7037_v48 = vld [vmem:[%s9797_s2 + $0x124] ss:$24 sps:$4 sm:$0xff]   ;;  %v7044_v49 = vld [vmem:[%s9796_s0 + $0xa0] ss:$24 sps:$4 sm:$0xff]  }
  0xa1   :  { %2311 = vmatprep.subr.bf16.mxu1 %v5616_v50  ;;  %v5716_v50 = vld [vmem:[%s9795_s1 + $0x130] ss:$24 sps:$4 sm:$0xff]  }
  0xa3   :  { %2093 = vmatpush1.bf16.msra.mxu0 %v5611_v51  ;;  %v7052_v51 = vld [vmem:[%s9797_s2 + $0x120] ss:$24 sps:$4 sm:$0xff]  }
  0xa4   :  { %2312 = vmatpush1.bf16.msra.mxu1 %v5614_v52  ;;  %2094 = vmatprep.subr.bf16.mxu0 %v5619_v53  ;;  %v5724_v52 = vld [vmem:[%s9795_s1 + $0x164] ss:$24 sps:$4 sm:$0xff]   ;;  %v7061_v53 = vld [vmem:[%s9797_s2 + $0x154] ss:$24 sps:$4 sm:$0xff]  }
  0xa5   :  { %2313 = vmatprep.subr.bf16.mxu1 %v5622_v54  ;;  %v5722_v54 = vld [vmem:[%s9795_s1 + $0x160] ss:$24 sps:$4 sm:$0xff]  }
  0xa7   :  { %2095 = vmatpush1.bf16.msra.mxu0 %v5617_v55  ;;  %v7071_v55 = vld [vmem:[%s9797_s2 + $0x150] ss:$24 sps:$4 sm:$0xff]  }
  0xa8   :  { %2314 = vmatpush1.bf16.msra.mxu1 %v5620_v56  ;;  %2096 = vmatprep.subr.bf16.mxu0 %v5628_v57  ;;  %v5730_v56 = vld [vmem:[%s9795_s1 + $0x194] ss:$24 sps:$4 sm:$0xff]   ;;  %v7081_v57 = vld [vmem:[%s9797_s2 + $0x184] ss:$24 sps:$4 sm:$0xff]  }
  0xa9   :  { %2315 = vmatprep.subr.bf16.mxu1 %v5631_v58  ;;  %v9801_v58 = vmov 0.0|0.0  }
  0xab   :  { %2097 = vmatpush1.bf16.msra.mxu0 %v5626_v59  ;;  %v6064_v59 = vld [vmem:[%s9796_s0 + $0x4] ss:$24 sps:$4 sm:$0xff]  }
  0xac   :  { %2316 = vmatpush1.bf16.msra.mxu1 %v5629_v60  ;;  %2098 = vmatprep.subr.bf16.mxu0 %v5634_v61  ;;  %v5728_v60 = vld [vmem:[%s9795_s1 + $0x190] ss:$24 sps:$4 sm:$0xff]   ;;  %v7093_v61 = vld [vmem:[%s9797_s2 + $0x180] ss:$24 sps:$4 sm:$0xff]  }
  0xad   :  { %2317 = vmatprep.subr.bf16.mxu1 %v5637_v62  ;;  %v5736_v62 = vld [vmem:[%s9795_s1 + $0x1c4] ss:$24 sps:$4 sm:$0xff]  }
  0xaf   :  { %2099 = vmatpush1.bf16.msra.mxu0 %v5632_v63  ;;  %v7103_v63 = vld [vmem:[%s9797_s2 + $0x1b4] ss:$24 sps:$4 sm:$0xff]  }
  0xb0   :  { %2318 = vmatpush1.bf16.msra.mxu1 %v5635_v0  ;;  %2100 = vmatprep.subr.bf16.mxu0 %v5643_v1  ;;  %v5734_v0 = vld [vmem:[%s9795_s1 + $0x1c0] ss:$24 sps:$4 sm:$0xff]   ;;  %v7111_v1 = vld [vmem:[%s9797_s2 + $0x1b0] ss:$24 sps:$4 sm:$0xff]  }
  0xb1   :  { %2319 = vmatprep.subr.bf16.mxu1 %v5646_v2  ;;  %v5742_v2 = vld [vmem:[%s9795_s1 + $0x1f4] ss:$24 sps:$4 sm:$0xff]  }
  0xb3   :  { %2101 = vmatpush1.bf16.msra.mxu0 %v5641_v3  ;;  %v7121_v3 = vld [vmem:[%s9797_s2 + $0x1e4] ss:$24 sps:$4 sm:$0xff]  }
  0xb4   :  { %2320 = vmatpush1.bf16.msra.mxu1 %v5644_v4  ;;  %2102 = vmatprep.subr.bf16.mxu0 %v5649_v5  ;;  %v5740_v4 = vld [vmem:[%s9795_s1 + $0x1f0] ss:$24 sps:$4 sm:$0xff]   ;;  %v7129_v5 = vld [vmem:[%s9797_s2 + $0x1e0] ss:$24 sps:$4 sm:$0xff]  }
  0xb5   :  { %2321 = vmatprep.subr.bf16.mxu1 %v5652_v6  ;;  %v5748_v6 = vld [vmem:[%s9795_s1 + $0x224] ss:$24 sps:$4 sm:$0xff]  }
  0xb7   :  { %2103 = vmatpush1.bf16.msra.mxu0 %v5647_v7  ;;  %v7139_v7 = vld [vmem:[%s9797_s2 + $0x214] ss:$24 sps:$4 sm:$0xff]  }
  0xb8   :  { %2322 = vmatpush1.bf16.msra.mxu1 %v5650_v8  ;;  %2104 = vmatprep.subr.bf16.mxu0 %v5658_v9  ;;  %v5746_v8 = vld [vmem:[%s9795_s1 + $0x220] ss:$24 sps:$4 sm:$0xff]   ;;  %v7147_v9 = vld [vmem:[%s9797_s2 + $0x210] ss:$24 sps:$4 sm:$0xff]  }
  0xb9   :  { %2323 = vmatprep.subr.bf16.mxu1 %v5661_v10  ;;  %v5754_v10 = vld [vmem:[%s9795_s1 + $0x254] ss:$24 sps:$4 sm:$0xff]  }
  0xbb   :  { %2105 = vmatpush1.bf16.msra.mxu0 %v5656_v11  ;;  %v7157_v11 = vld [vmem:[%s9797_s2 + $0x244] ss:$24 sps:$4 sm:$0xff]  }
  0xbc   :  { %2324 = vmatpush1.bf16.msra.mxu1 %v5659_v12  ;;  %2106 = vmatprep.subr.bf16.mxu0 %v5664_v13  ;;  %v5752_v12 = vld [vmem:[%s9795_s1 + $0x250] ss:$24 sps:$4 sm:$0xff]   ;;  %v7165_v13 = vld [vmem:[%s9797_s2 + $0x240] ss:$24 sps:$4 sm:$0xff]  }
  0xbd   :  { %2325 = vmatprep.subr.bf16.mxu1 %v5667_v14  ;;  %v5760_v14 = vld [vmem:[%s9795_s1 + $0x284] ss:$24 sps:$4 sm:$0xff]  }
  0xbf   :  { %2107 = vmatpush1.bf16.msra.mxu0 %v5662_v15  ;;  %v7175_v15 = vld [vmem:[%s9797_s2 + $0x274] ss:$24 sps:$4 sm:$0xff]  }
  0xc0   :  { %2326 = vmatpush1.bf16.msra.mxu1 %v5665_v16  ;;  %2368 = vmatprep.subr.bf16.mxu0 %v5673_v17  ;;  %v5758_v16 = vld [vmem:[%s9795_s1 + $0x280] ss:$24 sps:$4 sm:$0xff]   ;;  %v7183_v17 = vld [vmem:[%s9797_s2 + $0x270] ss:$24 sps:$4 sm:$0xff]  }
  0xc1   :  { %3404 = vmatprep.subr.bf16.mxu1 %v5674_v18  ;;  %v5766_v18 = vld [vmem:[%s9795_s1 + $0x2b4] ss:$24 sps:$4 sm:$0xff]  }
  0xc2   :  { %2109 = vmatmul.mubr.bf16.vlgmr.msra.gmra.mrb[0].mxu0 %v5668_v19 }
  0xc3   :  { %2328 = vmatmul.mubr.bf16.vlgmr.msra.gmra.mrb[0].mxu1 %v5668_v19  ;;  %2369 = vmatpush1.bf16.msra.mxu0 %v5671_v20  ;;  %v7193_v19 = vld [vmem:[%s9797_s2 + $0x2a4] ss:$24 sps:$4 sm:$0xff]   ;;  %v5764_v20 = vld [vmem:[%s9795_s1 + $0x2b0] ss:$24 sps:$4 sm:$0xff]  }
  0xc4   :  { %3405 = vmatpush1.bf16.msra.mxu1 %v5676_v21  ;;  %2370 = vmatprep.subr.bf16.mxu0 %v5679_v22  ;;  %v7201_v21 = vld [vmem:[%s9797_s2 + $0x2a0] ss:$24 sps:$4 sm:$0xff]   ;;  %v5772_v22 = vld [vmem:[%s9795_s1 + $0x2e4] ss:$24 sps:$4 sm:$0xff]  }
  0xc5   :  { %3406 = vmatprep.subr.bf16.mxu1 %v5680_v23  ;;  %2118 = vmatprep.mubr.bf16.mxu0 %v5683_v24  ;;  %v7211_v23 = vld [vmem:[%s9797_s2 + $0x2d4] ss:$24 sps:$4 sm:$0xff]  }
  0xc6   :  { %2337 = vmatprep.mubr.bf16.mxu1 %v5683_v24  ;;  %v5770_v24 = vld [vmem:[%s9795_s1 + $0x2e0] ss:$24 sps:$4 sm:$0xff]  }
  0xc7   :  { %2371 = vmatpush1.bf16.msra.mxu0 %v5677_v25  ;;  %v7219_v25 = vld [vmem:[%s9797_s2 + $0x2d0] ss:$24 sps:$4 sm:$0xff]  }
  0xc8   :  { %3407 = vmatpush1.bf16.msra.mxu1 %v5682_v26  ;;  %2372 = vmatprep.subr.bf16.mxu0 %v5688_v27  ;;  %v5778_v26 = vld [vmem:[%s9795_s1 + $0x314] ss:$24 sps:$4 sm:$0xff]  }
  0xc9   :  { %3408 = vmatprep.subr.bf16.mxu1 %v5689_v28  ;;  %v7229_v27 = vld [vmem:[%s9797_s2 + $0xc] ss:$24 sps:$4 sm:$0xff]   ;;  %v5776_v28 = vld [vmem:[%s9795_s1 + $0x310] ss:$24 sps:$4 sm:$0xff]  }
  0xca   :  { %2119 = vmatmul.mubr.bf16.gmra.mrb[4].mxu0 %v5685_v29 }
  0xcb   :  { %2338 = vmatmul.mubr.bf16.gmra.mrb[4].mxu1 %v5685_v29  ;;  %2373 = vmatpush1.bf16.msra.mxu0 %v5686_v30  ;;  %v7237_v29 = vld [vmem:[%s9797_s2 + $0x8] ss:$24 sps:$4 sm:$0xff]   ;;  %v5784_v30 = vld [vmem:[%s9795_s1 + $0x344] ss:$24 sps:$4 sm:$0xff]  }
  0xcc   :  { %3409 = vmatpush1.bf16.msra.mxu1 %v5691_v31  ;;  %2374 = vmatprep.subr.bf16.mxu0 %v5694_v32  ;;  %v7247_v31 = vld [vmem:[%s9797_s2 + $0x3c] ss:$24 sps:$4 sm:$0xff]   ;;  %v6065_v32 = vld [vmem:[%s9796_s0] ss:$24 sps:$4 sm:$0xff]  }
  0xcd   :  { %3410 = vmatprep.subr.bf16.mxu1 %v5695_v33  ;;  %2128 = vmatprep.mubr.bf16.mxu0 %v5698_v34  ;;  %v5782_v33 = vld [vmem:[%s9795_s1 + $0x340] ss:$24 sps:$4 sm:$0xff]  }
  0xce   :  { %2347 = vmatprep.mubr.bf16.mxu1 %v5698_v34  ;;  %v7259_v34 = vld [vmem:[%s9797_s2 + $0x38] ss:$24 sps:$4 sm:$0xff]  }
  0xcf   :  { %2375 = vmatpush1.bf16.msra.mxu0 %v5692_v35  ;;  %v5790_v35 = vld [vmem:[%s9795_s1 + $0x374] ss:$24 sps:$4 sm:$0xff]  }
  0xd0   :  { %3411 = vmatpush1.bf16.msra.mxu1 %v5697_v36  ;;  %2376 = vmatprep.subr.bf16.mxu0 %v5703_v37  ;;  %v7269_v36 = vld [vmem:[%s9797_s2 + $0x6c] ss:$24 sps:$4 sm:$0xff]  }
  0xd1   :  { %3412 = vmatprep.subr.bf16.mxu1 %v5704_v38  ;;  %v6066_v37 = vld [vmem:[%s9796_s0 + $0x34] ss:$24 sps:$4 sm:$0xff]   ;;  %v5788_v38 = vld [vmem:[%s9795_s1 + $0x370] ss:$24 sps:$4 sm:$0xff]  }
  0xd2   :  { %2129 = vmatmul.mubr.bf16.gmra.mrb[8].mxu0 %v5700_v39 }
  0xd3   :  { %2348 = vmatmul.mubr.bf16.gmra.mrb[8].mxu1 %v5700_v39  ;;  %2377 = vmatpush1.bf16.msra.mxu0 %v5701_v40  ;;  %v7281_v39 = vld [vmem:[%s9797_s2 + $0x68] ss:$24 sps:$4 sm:$0xff]   ;;  %v5796_v40 = vld [vmem:[%s9795_s1 + $0x3a4] ss:$24 sps:$4 sm:$0xff]  }
  0xd4   :  { %3413 = vmatpush1.bf16.msra.mxu1 %v5706_v41  ;;  %2378 = vmatprep.subr.bf16.mxu0 %v5709_v42  ;;  %v7291_v41 = vld [vmem:[%s9797_s2 + $0x9c] ss:$24 sps:$4 sm:$0xff]   ;;  %v5794_v42 = vld [vmem:[%s9795_s1 + $0x3a0] ss:$24 sps:$4 sm:$0xff]  }
  0xd5   :  { %3414 = vmatprep.subr.bf16.mxu1 %v7017_v43  ;;  %2138 = vmatprep.mubr.bf16.mxu0 %v7022_v44 }
  0xd6   :  { %2357 = vmatprep.mubr.bf16.mxu1 %v7022_v44 }
  0xd7   :  { %2379 = vmatpush1.bf16.msra.mxu0 %v5707_v45  ;;  %v7299_v45 = vld [vmem:[%s9797_s2 + $0x98] ss:$24 sps:$4 sm:$0xff]  }
  0xd8   :  { %3415 = vmatpush1.bf16.msra.mxu1 %v5712_v46  ;;  %2380 = vmatprep.subr.bf16.mxu0 %v5718_v47  ;;  %v6067_v46 = vld [vmem:[%s9796_s0 + $0x30] ss:$24 sps:$4 sm:$0xff]   ;;  %v5802_v47 = vld [vmem:[%s9795_s1 + $0x3d4] ss:$24 sps:$4 sm:$0xff]  }
  0xd9   :  { %3416 = vmatprep.subr.bf16.mxu1 %v7037_v48 }
  0xda   :  { %2139 = vmatmul.mubr.bf16.gmra.mrb[12].mxu0 %v7044_v49 }
  0xdb   :  { %2358 = vmatmul.mubr.bf16.gmra.mrb[12].mxu1 %v7044_v49  ;;  %2381 = vmatpush1.bf16.msra.mxu0 %v5716_v50  ;;  %v7312_v50 = vld [vmem:[%s9797_s2 + $0xcc] ss:$24 sps:$4 sm:$0xff]  }
  0xdc   :  { %3417 = vmatpush1.bf16.msra.mxu1 %v7052_v51  ;;  %2382 = vmatprep.subr.bf16.mxu0 %v5724_v52  ;;  %v6068_v52 = vld [vmem:[%s9796_s0 + $0x64] ss:$24 sps:$4 sm:$0xff]  }
  0xdd   :  { %3418 = vmatprep.subr.bf16.mxu1 %v7061_v53  ;;  %3436 = vmatprep.mubr.bf16.mxu1 %v9801_v58 }
  0xde   :  { %2400 = vmatprep.mubr.bf16.mxu0 %v6064_v59  ;;  %v5808_v59 = vld [vmem:[%s9795_s1 + $0x404] ss:$24 sps:$4 sm:$0xff]  }
  0xdf   :  { %2383 = vmatpush1.bf16.msra.mxu0 %v5722_v54  ;;  %v5800_v54 = vld [vmem:[%s9795_s1 + $0x3d0] ss:$24 sps:$4 sm:$0xff]  }
  0xe0   :  { %3419 = vmatpush1.bf16.msra.mxu1 %v7071_v55  ;;  %2384 = vmatprep.subr.bf16.mxu0 %v5730_v56  ;;  %v7324_v56 = vld [vmem:[%s9797_s2 + $0xc8] ss:$24 sps:$4 sm:$0xff]  }
  0xe1   :  { %3420 = vmatprep.subr.bf16.mxu1 %v7081_v57 }
  0xe3   :  { %2385 = vmatpush1.bf16.msra.mxu0 %v5728_v60  ;;  %v7333_v60 = vld [vmem:[%s9797_s2 + $0xfc] ss:$24 sps:$4 sm:$0xff]  }
  0xe4   :  { %3421 = vmatpush1.bf16.msra.mxu1 %v7093_v61  ;;  %2386 = vmatprep.subr.bf16.mxu0 %v5736_v62  ;;  %v6069_v62 = vld [vmem:[%s9796_s0 + $0x60] ss:$24 sps:$4 sm:$0xff]  }
  0xe5   :  { %3422 = vmatprep.subr.bf16.mxu1 %v7103_v63 }
  0xe7   :  { %2387 = vmatpush1.bf16.msra.mxu0 %v5734_v0  ;;  %v5806_v0 = vld [vmem:[%s9795_s1 + $0x400] ss:$24 sps:$4 sm:$0xff]  }
  0xe8   :  { %3423 = vmatpush1.bf16.msra.mxu1 %v7111_v1  ;;  %2388 = vmatprep.subr.bf16.mxu0 %v5742_v2  ;;  %v7345_v2 = vld [vmem:[%s9797_s2 + $0xf8] ss:$24 sps:$4 sm:$0xff]  }
  0xe9   :  { %3424 = vmatprep.subr.bf16.mxu1 %v7121_v3 }
  0xeb   :  { %2389 = vmatpush1.bf16.msra.mxu0 %v5740_v4  ;;  %v5814_v4 = vld [vmem:[%s9795_s1 + $0x434] ss:$24 sps:$4 sm:$0xff]  }
  0xec   :  { %3425 = vmatpush1.bf16.msra.mxu1 %v7129_v5  ;;  %2390 = vmatprep.subr.bf16.mxu0 %v5748_v6  ;;  %v7354_v6 = vld [vmem:[%s9797_s2 + $0x12c] ss:$24 sps:$4 sm:$0xff]  }
  0xed   :  { %3426 = vmatprep.subr.bf16.mxu1 %v7139_v7 }
  0xef   :  { %2391 = vmatpush1.bf16.msra.mxu0 %v5746_v8  ;;  %v6070_v8 = vld [vmem:[%s9796_s0 + $0x94] ss:$24 sps:$4 sm:$0xff]  }
  0xf0   :  { %3427 = vmatpush1.bf16.msra.mxu1 %v7147_v9  ;;  %2392 = vmatprep.subr.bf16.mxu0 %v5754_v10  ;;  %v5812_v10 = vld [vmem:[%s9795_s1 + $0x430] ss:$24 sps:$4 sm:$0xff]  }
  0xf1   :  { %3428 = vmatprep.subr.bf16.mxu1 %v7157_v11 }
  0xf3   :  { %2393 = vmatpush1.bf16.msra.mxu0 %v5752_v12  ;;  %v7366_v12 = vld [vmem:[%s9797_s2 + $0x128] ss:$24 sps:$4 sm:$0xff]  }
  0xf4   :  { %3429 = vmatpush1.bf16.msra.mxu1 %v7165_v13  ;;  %2394 = vmatprep.subr.bf16.mxu0 %v5760_v14  ;;  %v5820_v14 = vld [vmem:[%s9795_s1 + $0x464] ss:$24 sps:$4 sm:$0xff]  }
  0xf5   :  { %3430 = vmatprep.subr.bf16.mxu1 %v7175_v15 }
  0xf7   :  { %2395 = vmatpush1.bf16.msra.mxu0 %v5758_v16  ;;  %v7375_v16 = vld [vmem:[%s9797_s2 + $0x15c] ss:$24 sps:$4 sm:$0xff]  }
  0xf8   :  { %3431 = vmatpush1.bf16.msra.mxu1 %v7183_v17  ;;  %2396 = vmatprep.subr.bf16.mxu0 %v5766_v18  ;;  %v6071_v18 = vld [vmem:[%s9796_s0 + $0x90] ss:$24 sps:$4 sm:$0xff]  }
  0xf9   :  { %3432 = vmatprep.subr.bf16.mxu1 %v7193_v19 }
  0xfb   :  { %2397 = vmatpush1.bf16.msra.mxu0 %v5764_v20  ;;  %v5818_v20 = vld [vmem:[%s9795_s1 + $0x460] ss:$24 sps:$4 sm:$0xff]  }
  0xfc   :  { %3433 = vmatpush1.bf16.msra.mxu1 %v7201_v21  ;;  %2398 = vmatprep.subr.bf16.mxu0 %v5772_v22  ;;  %v7387_v22 = vld [vmem:[%s9797_s2 + $0x158] ss:$24 sps:$4 sm:$0xff]  }
  0xfd   :  { %3434 = vmatprep.subr.bf16.mxu1 %v7211_v23 }
  0xff   :  { %2399 = vmatpush1.bf16.msra.mxu0 %v5770_v24  ;;  %v5826_v24 = vld [vmem:[%s9795_s1 + $0x494] ss:$24 sps:$4 sm:$0xff]  }
 0x100   :  { %3435 = vmatpush1.bf16.msra.mxu1 %v7219_v25  ;;  %2441 = vmatprep.subr.bf16.mxu0 %v5778_v26  ;;  %v7396_v26 = vld [vmem:[%s9797_s2 + $0x18c] ss:$24 sps:$4 sm:$0xff]  }
 0x101   :  { %3445 = vmatprep.subr.bf16.mxu1 %v7229_v27 }
 0x102   :  { %2401 = vmatmul.mubr.bf16.vlgmr.msra.gmra.mrb[16].mxu0 %v6065_v32  ;;  %v7408_v32 = vld [vmem:[%s9797_s2 + $0x188] ss:$24 sps:$4 sm:$0xff]  }
 0x103   :  { %3437 = vmatmul.mubr.bf16.vlgmr.msra.gmra.mrb[16].mxu1 %v9801_v58  ;;  %2442 = vmatpush1.bf16.msra.mxu0 %v5776_v28  ;;  %v6072_v28 = vld [vmem:[%s9796_s0 + $0xc] ss:$24 sps:$4 sm:$0xff]  }
 0x104   :  { %3446 = vmatpush1.bf16.msra.mxu1 %v7237_v29  ;;  %2443 = vmatprep.subr.bf16.mxu0 %v5784_v30  ;;  %v5824_v30 = vld [vmem:[%s9795_s1 + $0x490] ss:$24 sps:$4 sm:$0xff]  }
 0x105   :  { %3447 = vmatprep.subr.bf16.mxu1 %v7247_v31  ;;  %2410 = vmatprep.mubr.bf16.mxu0 %v6066_v37  ;;  %v5830_v37 = vld [vmem:[%s9795_s1 + $0x4c0] ss:$24 sps:$4 sm:$0xff]  }
 0x106   :  { %3477 = vmatprep.mubr.bf16.mxu1 %v9801_v58 }
 0x107   :  { %2444 = vmatpush1.bf16.msra.mxu0 %v5782_v33  ;;  %v5832_v33 = vld [vmem:[%s9795_s1 + $0x4c4] ss:$24 sps:$4 sm:$0xff]  }
 0x108   :  { %3448 = vmatpush1.bf16.msra.mxu1 %v7259_v34  ;;  %2445 = vmatprep.subr.bf16.mxu0 %v5790_v35  ;;  %v7417_v35 = vld [vmem:[%s9797_s2 + $0x1bc] ss:$24 sps:$4 sm:$0xff]  }
 0x109   :  { %3449 = vmatprep.subr.bf16.mxu1 %v7269_v36 }
 0x10a   :  { %2411 = vmatmul.mubr.bf16.gmra.mrb[20].mxu0 %v6067_v46  ;;  %v5836_v46 = vld [vmem:[%s9795_s1 + $0x4f0] ss:$24 sps:$4 sm:$0xff]  }
 0x10b   :  { %2446 = vmatpush1.bf16.msra.mxu0 %v5788_v38  ;;  %2420 = vmatprep.mubr.bf16.mxu0 %v6068_v52  ;;  %v7426_v38 = vld [vmem:[%s9797_s2 + $0x1b8] ss:$24 sps:$4 sm:$0xff]   ;;  %v5844_v52 = vld [vmem:[%s9795_s1 + $0x524] ss:$24 sps:$4 sm:$0xff]  }
 0x10c   :  { %3450 = vmatpush1.bf16.msra.mxu1 %v7281_v39  ;;  %2447 = vmatprep.subr.bf16.mxu0 %v5796_v40  ;;  %v5838_v40 = vld [vmem:[%s9795_s1 + $0x4f4] ss:$24 sps:$4 sm:$0xff]  }
 0x10d   :  { %3451 = vmatprep.subr.bf16.mxu1 %v7291_v41 }
 0x10f   :  { %2448 = vmatpush1.bf16.msra.mxu0 %v5794_v42  ;;  %v7435_v42 = vld [vmem:[%s9797_s2 + $0x1ec] ss:$24 sps:$4 sm:$0xff]  }
 0x110   :  { %3452 = vmatpush1.bf16.msra.mxu1 %v7299_v45  ;;  %2449 = vmatprep.subr.bf16.mxu0 %v5802_v47  ;;  %v7444_v47 = vld [vmem:[%s9797_s2 + $0x1e8] ss:$24 sps:$4 sm:$0xff]  }
 0x111   :  { %3453 = vmatprep.subr.bf16.mxu1 %v7312_v50 }
 0x112   :  { %2421 = vmatmul.mubr.bf16.gmra.mrb[24].mxu0 %v6069_v62  ;;  %v7462_v62 = vld [vmem:[%s9797_s2 + $0x218] ss:$24 sps:$4 sm:$0xff]  }
 0x113   :  { %2450 = vmatpush1.bf16.msra.mxu0 %v5800_v54  ;;  %2430 = vmatprep.mubr.bf16.mxu0 %v6070_v8  ;;  %v7453_v54 = vld [vmem:[%s9797_s2 + $0x21c] ss:$24 sps:$4 sm:$0xff]   ;;  %v5848_v8 = vld [vmem:[%s9795_s1 + $0x550] ss:$24 sps:$4 sm:$0xff]  }
 0x114   :  { %3454 = vmatpush1.bf16.msra.mxu1 %v7324_v56  ;;  %2451 = vmatprep.subr.bf16.mxu0 %v5808_v59  ;;  %v5842_v59 = vld [vmem:[%s9795_s1 + $0x520] ss:$24 sps:$4 sm:$0xff]  }
 0x115   :  { %3455 = vmatprep.subr.bf16.mxu1 %v7333_v60 }
 0x117   :  { %2452 = vmatpush1.bf16.msra.mxu0 %v5806_v0  ;;  %v5850_v0 = vld [vmem:[%s9795_s1 + $0x554] ss:$24 sps:$4 sm:$0xff]  }
 0x118   :  { %3456 = vmatpush1.bf16.msra.mxu1 %v7345_v2  ;;  %2453 = vmatprep.subr.bf16.mxu0 %v5814_v4  ;;  %v7471_v4 = vld [vmem:[%s9797_s2 + $0x24c] ss:$24 sps:$4 sm:$0xff]  }
 0x119   :  { %3457 = vmatprep.subr.bf16.mxu1 %v7354_v6 }
 0x11a   :  { %2431 = vmatmul.mubr.bf16.gmra.mrb[28].mxu0 %v6071_v18  ;;  %v7489_v18 = vld [vmem:[%s9797_s2 + $0x27c] ss:$24 sps:$4 sm:$0xff]  }
 0x11b   :  { %2454 = vmatpush1.bf16.msra.mxu0 %v5812_v10  ;;  %2473 = vmatprep.mubr.bf16.mxu0 %v6072_v28  ;;  %v7480_v10 = vld [vmem:[%s9797_s2 + $0x248] ss:$24 sps:$4 sm:$0xff]   ;;  %v5862_v28 = vld [vmem:[%s9795_s1 + $0x5b4] ss:$24 sps:$4 sm:$0xff]  }
 0x11c   :  { %3458 = vmatpush1.bf16.msra.mxu1 %v7366_v12  ;;  %2455 = vmatprep.subr.bf16.mxu0 %v5820_v14  ;;  %v5856_v14 = vld [vmem:[%s9795_s1 + $0x584] ss:$24 sps:$4 sm:$0xff]  }
 0x11d   :  { %3459 = vmatprep.subr.bf16.mxu1 %v7375_v16 }
 0x11f   :  { %2456 = vmatpush1.bf16.msra.mxu0 %v5818_v20  ;;  %v5854_v20 = vld [vmem:[%s9795_s1 + $0x580] ss:$24 sps:$4 sm:$0xff]  }
 0x120   :  { %3460 = vmatpush1.bf16.msra.mxu1 %v7387_v22  ;;  %2457 = vmatprep.subr.bf16.mxu0 %v5826_v24  ;;  %v7498_v24 = vld [vmem:[%s9797_s2 + $0x278] ss:$24 sps:$4 sm:$0xff]  }
 0x121   :  { %3461 = vmatprep.subr.bf16.mxu1 %v7396_v26 }
 0x123   :  { %2458 = vmatpush1.bf16.msra.mxu0 %v5824_v30  ;;  %v7507_v30 = vld [vmem:[%s9797_s2 + $0x2ac] ss:$24 sps:$4 sm:$0xff]  }
 0x124   :  { %3462 = vmatpush1.bf16.msra.mxu1 %v7408_v32  ;;  %2459 = vmatprep.subr.bf16.mxu0 %v5832_v33  ;;  %v5860_v33 = vld [vmem:[%s9795_s1 + $0x5b0] ss:$24 sps:$4 sm:$0xff]  }
 0x125   :  { %3463 = vmatprep.subr.bf16.mxu1 %v7417_v35 }
 0x127   :  { %2460 = vmatpush1.bf16.msra.mxu0 %v5830_v37  ;;  %v7516_v37 = vld [vmem:[%s9797_s2 + $0x2a8] ss:$24 sps:$4 sm:$0xff]  }
 0x128   :  { %3464 = vmatpush1.bf16.msra.mxu1 %v7426_v38  ;;  %2461 = vmatprep.subr.bf16.mxu0 %v5838_v40  ;;  %v5868_v40 = vld [vmem:[%s9795_s1 + $0x5e4] ss:$24 sps:$4 sm:$0xff]  }
 0x129   :  { %3465 = vmatprep.subr.bf16.mxu1 %v7435_v42 }
 0x12b   :  { %2462 = vmatpush1.bf16.msra.mxu0 %v5836_v46  ;;  %v7525_v46 = vld [vmem:[%s9797_s2 + $0x2dc] ss:$24 sps:$4 sm:$0xff]  }
 0x12c   :  { %3466 = vmatpush1.bf16.msra.mxu1 %v7444_v47  ;;  %2463 = vmatprep.subr.bf16.mxu0 %v5844_v52  ;;  %v5866_v52 = vld [vmem:[%s9795_s1 + $0x5e0] ss:$24 sps:$4 sm:$0xff]  }
 0x12d   :  { %3467 = vmatprep.subr.bf16.mxu1 %v7453_v54 }
 0x12f   :  { %2464 = vmatpush1.bf16.msra.mxu0 %v5842_v59  ;;  %v7534_v59 = vld [vmem:[%s9797_s2 + $0x2d8] ss:$24 sps:$4 sm:$0xff]  }
 0x130   :  { %3468 = vmatpush1.bf16.msra.mxu1 %v7462_v62  ;;  %2465 = vmatprep.subr.bf16.mxu0 %v5850_v0  ;;  %v5874_v0 = vld [vmem:[%s9795_s1 + $0x614] ss:$24 sps:$4 sm:$0xff]  }
 0x131   :  { %3469 = vmatprep.subr.bf16.mxu1 %v7471_v4 }
 0x133   :  { %2466 = vmatpush1.bf16.msra.mxu0 %v5848_v8  ;;  %v7543_v8 = vld [vmem:[%s9797_s2 + $0x14] ss:$24 sps:$4 sm:$0xff]  }
 0x134   :  { %3470 = vmatpush1.bf16.msra.mxu1 %v7480_v10  ;;  %2467 = vmatprep.subr.bf16.mxu0 %v5856_v14  ;;  %10024 = vst [vmem:[#allocation4_spill] sm:$0xff] %v7543_v8  ;;  %v5872_v14 = vld [vmem:[%s9795_s1 + $0x610] ss:$24 sps:$4 sm:$0xff]  }
 0x135   :  { %3471 = vmatprep.subr.bf16.mxu1 %v7489_v18 }
 0x137   :  { %2468 = vmatpush1.bf16.msra.mxu0 %v5854_v20  ;;  %v7552_v20 = vld [vmem:[%s9797_s2 + $0x10] ss:$24 sps:$4 sm:$0xff]  }
 0x138   :  { %3472 = vmatpush1.bf16.msra.mxu1 %v7498_v24  ;;  %2469 = vmatprep.subr.bf16.mxu0 %v5862_v28  ;;  %10025 = vst [vmem:[#allocation5_spill] sm:$0xff] %v7552_v20  ;;  %v5880_v28 = vld [vmem:[%s9795_s1 + $0x644] ss:$24 sps:$4 sm:$0xff]  }
 0x139   :  { %3473 = vmatprep.subr.bf16.mxu1 %v7507_v30 }
 0x13b   :  { %2470 = vmatpush1.bf16.msra.mxu0 %v5860_v33  ;;  %v7561_v33 = vld [vmem:[%s9797_s2 + $0x44] ss:$24 sps:$4 sm:$0xff]  }
 0x13c   :  { %3474 = vmatpush1.bf16.msra.mxu1 %v7516_v37  ;;  %2471 = vmatprep.subr.bf16.mxu0 %v5868_v40  ;;  %10026 = vst [vmem:[#allocation6_spill] sm:$0xff] %v7561_v33  ;;  %v6073_v40 = vld [vmem:[%s9796_s0 + $0x8] ss:$24 sps:$4 sm:$0xff]  }
 0x13d   :  { %3475 = vmatprep.subr.bf16.mxu1 %v7525_v46 }
 0x13f   :  { %2472 = vmatpush1.bf16.msra.mxu0 %v5866_v52  ;;  %v5878_v52 = vld [vmem:[%s9795_s1 + $0x640] ss:$24 sps:$4 sm:$0xff]  }
 0x140   :  { %3476 = vmatpush1.bf16.msra.mxu1 %v7534_v59  ;;  %2514 = vmatprep.subr.bf16.mxu0 %v5874_v0  ;;  %v7574_v0 = vld [vmem:[%s9797_s2 + $0x40] ss:$24 sps:$4 sm:$0xff]  }
 0x141   :  { %3486 = vmatprep.subr.bf16.mxu1 %v7543_v8  ;;  %10027 = vst [vmem:[#allocation7_spill] sm:$0xff] %v7574_v0  ;;  %v5898_v8 = vld [vmem:[%s9795_s1 + $0x6d4] ss:$24 sps:$4 sm:$0xff]  }
 0x142   :  { %2474 = vmatmul.mubr.bf16.vlgmr.msra.gmra.mrb[16].mxu0 %v6073_v40  ;;  %v6074_v40 = vld [vmem:[%s9796_s0 + $0x3c] ss:$24 sps:$4 sm:$0xff]  }
 0x143   :  { %3478 = vmatmul.mubr.bf16.vlgmr.msra.gmra.mrb[20].mxu1 %v9801_v58  ;;  %2515 = vmatpush1.bf16.msra.mxu0 %v5872_v14  ;;  %v5886_v58 = vld [vmem:[%s9795_s1 + $0x674] ss:$24 sps:$4 sm:$0xff]  }
 0x144   :  { %3487 = vmatpush1.bf16.msra.mxu1 %v7552_v20  ;;  %2516 = vmatprep.subr.bf16.mxu0 %v5880_v28  ;;  %v7583_v14 = vld [vmem:[%s9797_s2 + $0x74] ss:$24 sps:$4 sm:$0xff]   ;;  %v10029_v20 = vmov 0.0|0.0   ;;  %v5884_v28 = vld [vmem:[%s9795_s1 + $0x670] ss:$24 sps:$4 sm:$0xff]  }
 0x145   :  { %3488 = vmatprep.subr.bf16.mxu1 %v7561_v33  ;;  %10028 = vst [vmem:[#allocation8_spill] sm:$0xff] %v7583_v14  ;;  %2483 = vmatprep.mubr.bf16.mxu0 %v6074_v40  ;;  %v7596_v33 = vld [vmem:[%s9797_s2 + $0x70] ss:$24 sps:$4 sm:$0xff]   ;;  %v5892_v40 = vld [vmem:[%s9795_s1 + $0x6a4] ss:$24 sps:$4 sm:$0xff]  }
 0x146   :  { %3518 = vmatprep.mubr.bf16.mxu1 %v10029_v20  ;;  %10030 = vst [vmem:[#allocation9_spill] sm:$0xff] %v7596_v33 }
 0x147   :  { %2517 = vmatpush1.bf16.msra.mxu0 %v5878_v52  ;;  %v7605_v52 = vld [vmem:[%s9797_s2 + $0xa4] ss:$24 sps:$4 sm:$0xff]  }
 0x148   :  { %3489 = vmatpush1.bf16.msra.mxu1 %v7574_v0  ;;  %2518 = vmatprep.subr.bf16.mxu0 %v5886_v58  ;;  %10031 = vst [vmem:[#allocation10_spill] sm:$0xff] %v7605_v52  ;;  %v6075_v0 = vld [vmem:[%s9796_s0 + $0x38] ss:$24 sps:$4 sm:$0xff]  }
 0x149   :  { %3490 = vmatprep.subr.bf16.mxu1 %v7583_v14  ;;  %v5890_v58 = vld [vmem:[%s9795_s1 + $0x6a0] ss:$24 sps:$4 sm:$0xff]  }
 0x14a   :  { %2484 = vmatmul.mubr.bf16.gmra.mrb[20].mxu0 %v6075_v0  ;;  %v7617_v14 = vld [vmem:[%s9797_s2 + $0xa0] ss:$24 sps:$4 sm:$0xff]   ;;  %v7626_v0 = vld [vmem:[%s9797_s2 + $0xd4] ss:$24 sps:$4 sm:$0xff]  }
 0x14b   :  { %2519 = vmatpush1.bf16.msra.mxu0 %v5884_v28  ;;  %10032 = vst [vmem:[#allocation11_spill] sm:$0xff] %v7617_v14  ;;  %10033 = vst [vmem:[#allocation12_spill] sm:$0xff] %v7626_v0  ;;  %v6076_v28 = vld [vmem:[%s9796_s0 + $0x6c] ss:$24 sps:$4 sm:$0xff]  }
 0x14c   :  { %3491 = vmatpush1.bf16.msra.mxu1 %v7596_v33  ;;  %2520 = vmatprep.subr.bf16.mxu0 %v5892_v40  ;;  %v5896_v40 = vld [vmem:[%s9795_s1 + $0x6d0] ss:$24 sps:$4 sm:$0xff]   ;;  %v5904_v33 = vld [vmem:[%s9795_s1 + $0x704] ss:$24 sps:$4 sm:$0xff]  }
 0x14d   :  { %3492 = vmatprep.subr.bf16.mxu1 %v7605_v52  ;;  %2493 = vmatprep.mubr.bf16.mxu0 %v6076_v28  ;;  %v7638_v52 = vld [vmem:[%s9797_s2 + $0xd0] ss:$24 sps:$4 sm:$0xff]  }
 0x14e   :  { %10034 = vst [vmem:[#allocation13_spill] sm:$0xff] %v7638_v52  ;;  %v6077_v28 = vld [vmem:[%s9796_s0 + $0x68] ss:$24 sps:$4 sm:$0xff]  }
 0x14f   :  { %2521 = vmatpush1.bf16.msra.mxu0 %v5890_v58  ;;  %v7647_v58 = vld [vmem:[%s9797_s2 + $0x104] ss:$24 sps:$4 sm:$0xff]  }
 0x150   :  { %3493 = vmatpush1.bf16.msra.mxu1 %v7617_v14  ;;  %2522 = vmatprep.subr.bf16.mxu0 %v5898_v8  ;;  %10035 = vst [vmem:[#allocation14_spill] sm:$0xff] %v7647_v58  ;;  %v5902_v8 = vld [vmem:[%s9795_s1 + $0x700] ss:$24 sps:$4 sm:$0xff]   ;;  %v5910_v14 = vld [vmem:[%s9795_s1 + $0x734] ss:$24 sps:$4 sm:$0xff]  }
 0x151   :  { %3494 = vmatprep.subr.bf16.mxu1 %v7626_v0  ;;  %v7659_v0 = vld [vmem:[%s9797_s2 + $0x100] ss:$24 sps:$4 sm:$0xff]  }
 0x152   :  { %2494 = vmatmul.mubr.bf16.gmra.mrb[24].mxu0 %v6077_v28  ;;  %10036 = vst [vmem:[#allocation15_spill] sm:$0xff] %v7659_v0  ;;  %v6078_v28 = vld [vmem:[%s9796_s0 + $0x9c] ss:$24 sps:$4 sm:$0xff]  }
 0x153   :  { %2523 = vmatpush1.bf16.msra.mxu0 %v5896_v40  ;;  %v7668_v40 = vld [vmem:[%s9797_s2 + $0x134] ss:$24 sps:$4 sm:$0xff]   ;;  %2503 = vmatprep.mubr.bf16.mxu0 %v6078_v28  ;;  %v6079_v28 = vld [vmem:[%s9796_s0 + $0x98] ss:$24 sps:$4 sm:$0xff]  }
 0x154   :  { %3495 = vmatpush1.bf16.msra.mxu1 %v7638_v52  ;;  %2524 = vmatprep.subr.bf16.mxu0 %v5904_v33  ;;  %10037 = vst [vmem:[#allocation16_spill] sm:$0xff] %v7668_v40  ;;  %v5908_v33 = vld [vmem:[%s9795_s1 + $0x730] ss:$24 sps:$4 sm:$0xff]   ;;  %v5916_v52 = vld [vmem:[%s9795_s1 + $0x764] ss:$24 sps:$4 sm:$0xff]  }
 0x155   :  { %3496 = vmatprep.subr.bf16.mxu1 %v7647_v58  ;;  %v7680_v58 = vld [vmem:[%s9797_s2 + $0x130] ss:$24 sps:$4 sm:$0xff]  }
 0x156   :  { %10038 = vst [vmem:[#allocation17_spill] sm:$0xff] %v7680_v58 }
 0x157   :  { %2525 = vmatpush1.bf16.msra.mxu0 %v5902_v8  ;;  %v7689_v8 = vld [vmem:[%s9797_s2 + $0x164] ss:$24 sps:$4 sm:$0xff]  }
 0x158   :  { %3497 = vmatpush1.bf16.msra.mxu1 %v7659_v0  ;;  %2526 = vmatprep.subr.bf16.mxu0 %v5910_v14  ;;  %10039 = vst [vmem:[#allocation18_spill] sm:$0xff] %v7689_v8  ;;  %v5914_v14 = vld [vmem:[%s9795_s1 + $0x760] ss:$24 sps:$4 sm:$0xff]   ;;  %v5922_v0 = vld [vmem:[%s9795_s1 + $0x794] ss:$24 sps:$4 sm:$0xff]  }
 0x159   :  { %3498 = vmatprep.subr.bf16.mxu1 %v7668_v40  ;;  %v7701_v40 = vld [vmem:[%s9797_s2 + $0x160] ss:$24 sps:$4 sm:$0xff]  }
 0x15a   :  { %2504 = vmatmul.mubr.bf16.gmra.mrb[28].mxu0 %v6079_v28  ;;  %10040 = vst [vmem:[#allocation19_spill] sm:$0xff] %v7701_v40  ;;  %v6080_v28 = vld [vmem:[%s9796_s0 + $0x14] ss:$24 sps:$4 sm:$0xff]  }
 0x15b   :  { %2527 = vmatpush1.bf16.msra.mxu0 %v5908_v33  ;;  %v7710_v33 = vld [vmem:[%s9797_s2 + $0x194] ss:$24 sps:$4 sm:$0xff]   ;;  %2546 = vmatprep.mubr.bf16.mxu0 %v6080_v28  ;;  %v5926_v28 = vld [vmem:[%s9795_s1 + $0x7c0] ss:$24 sps:$4 sm:$0xff]  }
 0x15c   :  { %3499 = vmatpush1.bf16.msra.mxu1 %v7680_v58  ;;  %2528 = vmatprep.subr.bf16.mxu0 %v5916_v52  ;;  %10041 = vst [vmem:[#allocation20_spill] sm:$0xff] %v7710_v33  ;;  %v5920_v52 = vld [vmem:[%s9795_s1 + $0x790] ss:$24 sps:$4 sm:$0xff]   ;;  %v5928_v58 = vld [vmem:[%s9795_s1 + $0x7c4] ss:$24 sps:$4 sm:$0xff]  }
 0x15d   :  { %3500 = vmatprep.subr.bf16.mxu1 %v7689_v8  ;;  %v7722_v8 = vld [vmem:[%s9797_s2 + $0x190] ss:$24 sps:$4 sm:$0xff]  }
 0x15e   :  { %10042 = vst [vmem:[#allocation21_spill] sm:$0xff] %v7722_v8 }
 0x15f   :  { %2529 = vmatpush1.bf16.msra.mxu0 %v5914_v14  ;;  %v7731_v14 = vld [vmem:[%s9797_s2 + $0x1c4] ss:$24 sps:$4 sm:$0xff]  }
 0x160   :  { %3501 = vmatpush1.bf16.msra.mxu1 %v7701_v40  ;;  %2530 = vmatprep.subr.bf16.mxu0 %v5922_v0  ;;  %10043 = vst [vmem:[#allocation22_spill] sm:$0xff] %v7731_v14  ;;  %v7740_v0 = vld [vmem:[%s9797_s2 + $0x1c0] ss:$24 sps:$4 sm:$0xff]  }
 0x161   :  { %3502 = vmatprep.subr.bf16.mxu1 %v7710_v33  ;;  %10044 = vst [vmem:[#allocation23_spill] sm:$0xff] %v7740_v0  ;;  %v5934_v33 = vld [vmem:[%s9795_s1 + $0x7f4] ss:$24 sps:$4 sm:$0xff]  }
 0x163   :  { %2531 = vmatpush1.bf16.msra.mxu0 %v5920_v52  ;;  %v7749_v52 = vld [vmem:[%s9797_s2 + $0x1f4] ss:$24 sps:$4 sm:$0xff]  }
 0x164   :  { %3503 = vmatpush1.bf16.msra.mxu1 %v7722_v8  ;;  %2532 = vmatprep.subr.bf16.mxu0 %v5928_v58  ;;  %10045 = vst [vmem:[#allocation24_spill] sm:$0xff] %v7749_v52  ;;  %v5932_v8 = vld [vmem:[%s9795_s1 + $0x7f0] ss:$24 sps:$4 sm:$0xff]  }
 0x165   :  { %3504 = vmatprep.subr.bf16.mxu1 %v7731_v14  ;;  %v7758_v58 = vld [vmem:[%s9797_s2 + $0x1f0] ss:$24 sps:$4 sm:$0xff]   ;;  %v5940_v14 = vld [vmem:[%s9795_s1 + $0x824] ss:$24 sps:$4 sm:$0xff]  }
 0x166   :  { %10046 = vst [vmem:[#allocation25_spill] sm:$0xff] %v7758_v58 }
 0x167   :  { %2533 = vmatpush1.bf16.msra.mxu0 %v5926_v28  ;;  %v7767_v28 = vld [vmem:[%s9797_s2 + $0x224] ss:$24 sps:$4 sm:$0xff]  }
 0x168   :  { %3505 = vmatpush1.bf16.msra.mxu1 %v7740_v0  ;;  %2534 = vmatprep.subr.bf16.mxu0 %v5934_v33  ;;  %10047 = vst [vmem:[#allocation26_spill] sm:$0xff] %v7767_v28  ;;  %v5938_v0 = vld [vmem:[%s9795_s1 + $0x820] ss:$24 sps:$4 sm:$0xff]  }
 0x169   :  { %3506 = vmatprep.subr.bf16.mxu1 %v7749_v52  ;;  %v7776_v33 = vld [vmem:[%s9797_s2 + $0x220] ss:$24 sps:$4 sm:$0xff]   ;;  %v5946_v52 = vld [vmem:[%s9795_s1 + $0x854] ss:$24 sps:$4 sm:$0xff]  }
 0x16a   :  { %10048 = vst [vmem:[#allocation27_spill] sm:$0xff] %v7776_v33 }
 0x16b   :  { %2535 = vmatpush1.bf16.msra.mxu0 %v5932_v8  ;;  %v7785_v8 = vld [vmem:[%s9797_s2 + $0x254] ss:$24 sps:$4 sm:$0xff]  }
 0x16c   :  { %3507 = vmatpush1.bf16.msra.mxu1 %v7758_v58  ;;  %2536 = vmatprep.subr.bf16.mxu0 %v5940_v14  ;;  %10049 = vst [vmem:[#allocation28_spill] sm:$0xff] %v7785_v8  ;;  %v5944_v58 = vld [vmem:[%s9795_s1 + $0x850] ss:$24 sps:$4 sm:$0xff]  }
 0x16d   :  { %3508 = vmatprep.subr.bf16.mxu1 %v7767_v28  ;;  %v7794_v14 = vld [vmem:[%s9797_s2 + $0x250] ss:$24 sps:$4 sm:$0xff]   ;;  %v5952_v28 = vld [vmem:[%s9795_s1 + $0x884] ss:$24 sps:$4 sm:$0xff]  }
 0x16e   :  { %10050 = vst [vmem:[#allocation29_spill] sm:$0xff] %v7794_v14 }
 0x16f   :  { %2537 = vmatpush1.bf16.msra.mxu0 %v5938_v0  ;;  %v7803_v0 = vld [vmem:[%s9797_s2 + $0x284] ss:$24 sps:$4 sm:$0xff]  }
 0x170   :  { %3509 = vmatpush1.bf16.msra.mxu1 %v7776_v33  ;;  %2538 = vmatprep.subr.bf16.mxu0 %v5946_v52  ;;  %10051 = vst [vmem:[#allocation30_spill] sm:$0xff] %v7803_v0  ;;  %v5950_v33 = vld [vmem:[%s9795_s1 + $0x880] ss:$24 sps:$4 sm:$0xff]  }
 0x171   :  { %3510 = vmatprep.subr.bf16.mxu1 %v7785_v8  ;;  %v7812_v52 = vld [vmem:[%s9797_s2 + $0x280] ss:$24 sps:$4 sm:$0xff]   ;;  %v5958_v8 = vld [vmem:[%s9795_s1 + $0x8b4] ss:$24 sps:$4 sm:$0xff]  }
 0x172   :  { %10052 = vst [vmem:[#allocation31_spill] sm:$0xff] %v7812_v52 }
 0x173   :  { %2539 = vmatpush1.bf16.msra.mxu0 %v5944_v58  ;;  %v7821_v58 = vld [vmem:[%s9797_s2 + $0x2b4] ss:$24 sps:$4 sm:$0xff]  }
 0x174   :  { %3511 = vmatpush1.bf16.msra.mxu1 %v7794_v14  ;;  %2540 = vmatprep.subr.bf16.mxu0 %v5952_v28  ;;  %10053 = vst [vmem:[#allocation32_spill] sm:$0xff] %v7821_v58  ;;  %v5956_v14 = vld [vmem:[%s9795_s1 + $0x8b0] ss:$24 sps:$4 sm:$0xff]  }
 0x175   :  { %3512 = vmatprep.subr.bf16.mxu1 %v7803_v0  ;;  %v7830_v28 = vld [vmem:[%s9797_s2 + $0x2b0] ss:$24 sps:$4 sm:$0xff]   ;;  %v5964_v0 = vld [vmem:[%s9795_s1 + $0x8e4] ss:$24 sps:$4 sm:$0xff]  }
 0x176   :  { %10054 = vst [vmem:[#allocation33_spill] sm:$0xff] %v7830_v28 }
 0x177   :  { %2541 = vmatpush1.bf16.msra.mxu0 %v5950_v33  ;;  %v7839_v33 = vld [vmem:[%s9797_s2 + $0x2e4] ss:$24 sps:$4 sm:$0xff]  }
 0x178   :  { %3513 = vmatpush1.bf16.msra.mxu1 %v7812_v52  ;;  %2542 = vmatprep.subr.bf16.mxu0 %v5958_v8  ;;  %10055 = vst [vmem:[#allocation34_spill] sm:$0xff] %v7839_v33  ;;  %v5962_v52 = vld [vmem:[%s9795_s1 + $0x8e0] ss:$24 sps:$4 sm:$0xff]  }
 0x179   :  { %3514 = vmatprep.subr.bf16.mxu1 %v7821_v58  ;;  %v7848_v8 = vld [vmem:[%s9797_s2 + $0x2e0] ss:$24 sps:$4 sm:$0xff]   ;;  %v7928_v58 = vld [vmem:[%s9797_s2 + $0x90] ss:$24 sps:$4 sm:$0xff]  }
 0x17a   :  { %10056 = vst [vmem:[#allocation35_spill] sm:$0xff] %v7848_v8  ;;  %10063 = vst [vmem:[#allocation42_spill] sm:$0xff] %v7928_v58 }
 0x17b   :  { %2543 = vmatpush1.bf16.msra.mxu0 %v5956_v14  ;;  %v7855_v14 = vld [vmem:[%s9797_s2 + $0x4] ss:$24 sps:$4 sm:$0xff]  }
 0x17c   :  { %3515 = vmatpush1.bf16.msra.mxu1 %v7830_v28  ;;  %2544 = vmatprep.subr.bf16.mxu0 %v5964_v0  ;;  %v6082_v28 = vld [vmem:[%s9796_s0 + $0x10] ss:$24 sps:$4 sm:$0xff]   ;;  %v6083_v0 = vld [vmem:[%s9796_s0 + $0x44] ss:$24 sps:$4 sm:$0xff]  }
 0x17d   :  { %3516 = vmatprep.subr.bf16.mxu1 %v7839_v33 }
 0x17f   :  { %2545 = vmatpush1.bf16.msra.mxu0 %v5962_v52  ;;  %v7869_v52 = vld [vmem:[%s9797_s2] ss:$24 sps:$4 sm:$0xff]  }
 0x180   :  { %3517 = vmatpush1.bf16.msra.mxu1 %v7848_v8  ;;  %3573 = vmatprep.subr.bf16.mxu0 %v7855_v14  ;;  %10057 = vst [vmem:[#allocation36_spill] sm:$0xff] %v7869_v52  ;;  %v7905_v8 = vld [vmem:[%s9797_s2 + $0x60] ss:$24 sps:$4 sm:$0xff]  }
 0x181   :  { %3614 = vmatprep.subr.bf16.mxu1 %v7229_v27  ;;  %v7876_v27 = vld [vmem:[%s9797_s2 + $0x34] ss:$24 sps:$4 sm:$0xff]   ;;  %10061 = vst [vmem:[#allocation40_spill] sm:$0xff] %v7905_v8 }
 0x182   :  { %2547 = vmatmul.mubr.bf16.vlgmr.msra.gmra.mrb[16].mxu0 %v6082_v28  ;;  %10058 = vst [vmem:[#allocation37_spill] sm:$0xff] %v7876_v27  ;;  %v7883_v28 = vld [vmem:[%s9797_s2 + $0x30] ss:$24 sps:$4 sm:$0xff]  }
 0x183   :  { %3519 = vmatmul.mubr.bf16.vlgmr.msra.gmra.mrb[24].mxu1 %v10029_v20  ;;  %2556 = vmatprep.mubr.bf16.mxu0 %v6083_v0  ;;  %v340_v20 = vlaneseq  ;;  %10059 = vst [vmem:[#allocation38_spill] sm:$0xff] %v7883_v28 }
 0x184   :  { %3574 = vmatpush1.bf16.msra.mxu0 %v7869_v52  ;;  %3615 = vmatpush1.bf16.msra.mxu1 %v7237_v29  ;;  %v7890_v29 = vld [vmem:[%s9797_s2 + $0x64] ss:$24 sps:$4 sm:$0xff]  }
 0x185   :  { %3575 = vmatprep.subr.bf16.mxu0 %v7876_v27  ;;  %3616 = vmatprep.subr.bf16.mxu1 %v7247_v31  ;;  %10060 = vst [vmem:[#allocation39_spill] sm:$0xff] %v7890_v29  ;;  %v6088_v31 = vld [vmem:[%s9796_s0 + $0x40] ss:$24 sps:$4 sm:$0xff]   ;;  %v7897_v0 = vshrl.u32 %v340_v20, 7 }
 0x187   :  { %v9844_v20 = vsub.s32 0, %v7897_v0  ;;  %v354_v33 = vsub.s32 3, %v7897_v0 }
 0x188   :  { %3576 = vmatpush1.bf16.msra.mxu0 %v7883_v28  ;;  %3617 = vmatpush1.bf16.msra.mxu1 %v7259_v34  ;;  %v6089_v34 = vld [vmem:[%s9796_s0 + $0x74] ss:$24 sps:$4 sm:$0xff]  }
 0x189   :  { %3577 = vmatprep.subr.bf16.mxu0 %v7890_v29  ;;  %3618 = vmatprep.subr.bf16.mxu1 %v7269_v36  ;;  %v7912_v36 = vld [vmem:[%s9797_s2 + $0x94] ss:$24 sps:$4 sm:$0xff]  }
 0x18a   :  { %2557 = vmatmul.mubr.bf16.gmra.mrb[20].mxu0 %v6088_v31  ;;  %10062 = vst [vmem:[#allocation41_spill] sm:$0xff] %v7912_v36  ;;  %v350_v31 = vsub.s32 2, %v7897_v0 }
 0x18b   :  { %2566 = vmatprep.mubr.bf16.mxu0 %v6089_v34  ;;  %v7921_v34 = vld [vmem:[%s9798_s3] sm:$0x3f] }
 0x18c   :  { %3578 = vmatpush1.bf16.msra.mxu0 %v7905_v8  ;;  %3619 = vmatpush1.bf16.msra.mxu1 %v7281_v39  ;;  %v6094_v39 = vld [vmem:[%s9796_s0 + $0x70] ss:$24 sps:$4 sm:$0xff]   ;;  %v7945_v40 = vrot.slane %v7921_v34, %v9844_v20 }
 0x18d   :  { %3579 = vmatprep.subr.bf16.mxu0 %v7912_v36  ;;  %3620 = vmatprep.subr.bf16.mxu1 %v7291_v41  ;;  %v7935_v41 = vld [vmem:[%s9797_s2 + $0xc4] ss:$24 sps:$4 sm:$0xff]  }
 0x18e   :  { %10064 = vst [vmem:[#allocation43_spill] sm:$0xff] %v7935_v41 }
 0x190   :  { %3580 = vmatpush1.bf16.msra.mxu0 %v7928_v58  ;;  %3621 = vmatpush1.bf16.msra.mxu1 %v7299_v45  ;;  %v7948_v45 = vrot.slane %v7921_v34, %v350_v31  ;;  %v10065_v58 = vsub.s32 1, %v7897_v0 }
 0x191   :  { %3581 = vmatprep.subr.bf16.mxu0 %v7935_v41  ;;  %3622 = vmatprep.subr.bf16.mxu1 %v7312_v50  ;;  %v7956_v50 = vrot.slane %v7921_v34, %v354_v33 }
 0x192   :  { %2567 = vmatmul.mubr.bf16.gmra.mrb[24].mxu0 %v6094_v39  ;;  %v7953_v36 = vrot.slane %v7921_v34, %v10065_v58  ;;  %v7962_v39 = vld [vmem:[%s9797_s2 + $0xc0] ss:$24 sps:$4 sm:$0xff]  }
 0x193   :  { %2576 = vmatprep.mubr.bf16.mxu0 %v7022_v44  ;;  %10066 = vst [vmem:[#allocation44_spill] sm:$0xff] %v7962_v39 }
 0x194   :  { %3582 = vmatpush1.bf16.msra.mxu0 %v7962_v39  ;;  %3623 = vmatpush1.bf16.msra.mxu1 %v7324_v56 }
 0x195   :  { %3583 = vmatprep.subr.bf16.mxu0 %v7017_v43  ;;  %v2110_v31 = vpop.f32.mrb[0].mxu0  ;;  %3624 = vmatprep.subr.bf16.mxu1 %v7333_v60  ;;  %v7975_v43 = vld [vmem:[%s9797_s2 + $0xf0] ss:$24 sps:$4 sm:$0xff]  }
 0x196   :  { %v2329_v20 = vpop.f32.mrb[0].mxu1  ;;  %v5211_v58 = vadd.f32 %v2110_v31, %v7945_v40  ;;  %v2112_v44 = vpop.f32.mrb[1].mxu0 }
 0x197   :  { %v5227_v33 = vadd.f32 %v2329_v20, %v7948_v45  ;;  %v2331_v41 = vpop.f32.mrb[1].mxu1  ;;  %v5212_v8 = vadd.f32 %v2112_v44, %v7953_v36  ;;  %v2114_v28 = vpop.f32.mrb[2].mxu0 }
 0x198   :  { %v5228_v29 = vadd.f32 %v2331_v41, %v7956_v50  ;;  %v2333_v39 = vpop.f32.mrb[2].mxu1  ;;  %3584 = vmatpush1.bf16.msra.mxu0 %v7975_v43  ;;  %v5213_v56 = vadd.f32 %v2114_v28, %v7945_v40  ;;  %v2116_v20 = vpop.f32.mrb[3].mxu0  ;;  %3625 = vmatpush1.bf16.msra.mxu1 %v7345_v2 }
 0x199   :  { %v5229_v60 = vadd.f32 %v2333_v39, %v7948_v45  ;;  %v2335_v31 = vpop.f32.mrb[3].mxu1  ;;  %3585 = vmatprep.subr.bf16.mxu0 %v7037_v48  ;;  %v7982_v41 = vpack.c.bf16 %v5212_v8, %v5211_v58  ;;  %v5214_v27 = vadd.f32 %v2116_v20, %v7953_v36  ;;  %3626 = vmatprep.subr.bf16.mxu1 %v7354_v6 }
 0x19a   :  { %v7984_v44 = vpack.c.bf16 %v5228_v29, %v5227_v33  ;;  %v5230_v52 = vadd.f32 %v2335_v31, %v7956_v50  ;;  %2577 = vmatmul.mubr.bf16.gmra.mrb[28].mxu0 %v7044_v49 }
 0x19b   :  { %v7990_v28 = vpack.c.bf16 %v5214_v27, %v5213_v56 }
 0x19c   :  { %v7992_v39 = vpack.c.bf16 %v5230_v52, %v5229_v60  ;;  %3586 = vmatpush1.bf16.msra.mxu0 %v7052_v51  ;;  %3627 = vmatpush1.bf16.msra.mxu1 %v7366_v12 }
 0x19d   :  { %3587 = vmatprep.subr.bf16.mxu0 %v7061_v53  ;;  %v2120_v48 = vpop.f32.mrb[4].mxu0  ;;  %3628 = vmatprep.subr.bf16.mxu1 %v7375_v16 }
 0x19e   :  { %v2339_v2 = vpop.f32.mrb[4].mxu1  ;;  %v5215_v8 = vadd.f32 %v2120_v48, %v7945_v40  ;;  %v2122_v29 = vpop.f32.mrb[5].mxu0 }
 0x19f   :  { %v5231_v6 = vadd.f32 %v2339_v2, %v7948_v45  ;;  %v2341_v49 = vpop.f32.mrb[5].mxu1  ;;  %v5216_v27 = vadd.f32 %v2122_v29, %v7953_v36  ;;  %v2124_v58 = vpop.f32.mrb[6].mxu0 }
 0x1a0   :  { %v5232_v52 = vadd.f32 %v2341_v49, %v7956_v50  ;;  %v2343_v51 = vpop.f32.mrb[6].mxu1  ;;  %3588 = vmatpush1.bf16.msra.mxu0 %v7071_v55  ;;  %v5217_v53 = vadd.f32 %v2124_v58, %v7945_v40  ;;  %v2126_v33 = vpop.f32.mrb[7].mxu0  ;;  %3629 = vmatpush1.bf16.msra.mxu1 %v7387_v22 }
 0x1a1   :  { %v5233_v12 = vadd.f32 %v2343_v51, %v7948_v45  ;;  %v2345_v16 = vpop.f32.mrb[7].mxu1  ;;  %3589 = vmatprep.subr.bf16.mxu0 %v7081_v57  ;;  %v8007_v56 = vpack.c.bf16 %v5216_v27, %v5215_v8  ;;  %v5218_v20 = vadd.f32 %v2126_v33, %v7953_v36  ;;  %3630 = vmatprep.subr.bf16.mxu1 %v7396_v26 }
 0x1a2   :  { %v8009_v60 = vpack.c.bf16 %v5232_v52, %v5231_v6  ;;  %v5234_v31 = vadd.f32 %v2345_v16, %v7956_v50 }
 0x1a3   :  { %10067 = vst [vmem:[#allocation45_spill] sm:$0xff] %v8007_v56  ;;  %v8014_v55 = vpack.c.bf16 %v5218_v20, %v5217_v53  ;;  %v8441_v56 = vld [vmem:[%s9797_s2 + $0x1ec] ss:$24 sps:$4 sm:$0xff]  }
 0x1a4   :  { %10068 = vst [vmem:[#allocation46_spill] sm:$0xff] %v8009_v60  ;;  %v8016_v48 = vpack.c.bf16 %v5234_v31, %v5233_v12  ;;  %3590 = vmatpush1.bf16.msra.mxu0 %v7093_v61  ;;  %3631 = vmatpush1.bf16.msra.mxu1 %v7408_v32  ;;  %v8435_v60 = vld [vmem:[%s9797_s2 + $0x1b8] ss:$24 sps:$4 sm:$0xff]  }
 0x1a5   :  { %10069 = vst [vmem:[#allocation47_spill] sm:$0xff] %v8014_v55  ;;  %3591 = vmatprep.subr.bf16.mxu0 %v7103_v63  ;;  %v2130_v57 = vpop.f32.mrb[8].mxu0  ;;  %3632 = vmatprep.subr.bf16.mxu1 %v7417_v35  ;;  %v8423_v55 = vld [vmem:[%s9797_s2 + $0x188] ss:$24 sps:$4 sm:$0xff]  }
 0x1a6   :  { %10070 = vst [vmem:[#allocation48_spill] sm:$0xff] %v8016_v48  ;;  %v2349_v22 = vpop.f32.mrb[8].mxu1  ;;  %v5219_v2 = vadd.f32 %v2130_v57, %v7945_v40  ;;  %v2132_v6 = vpop.f32.mrb[9].mxu0  ;;  %v8417_v48 = vld [vmem:[%s9797_s2 + $0x18c] ss:$24 sps:$4 sm:$0xff]  }
 0x1a7   :  { %v5235_v8 = vadd.f32 %v2349_v22, %v7948_v45  ;;  %v2351_v26 = vpop.f32.mrb[9].mxu1  ;;  %v5220_v29 = vadd.f32 %v2132_v6, %v7953_v36  ;;  %v2134_v27 = vpop.f32.mrb[10].mxu0 }
 0x1a8   :  { %v5236_v49 = vadd.f32 %v2351_v26, %v7956_v50  ;;  %v2353_v61 = vpop.f32.mrb[10].mxu1  ;;  %3592 = vmatpush1.bf16.msra.mxu0 %v7111_v1  ;;  %v5221_v63 = vadd.f32 %v2134_v27, %v7945_v40  ;;  %v2136_v52 = vpop.f32.mrb[11].mxu0  ;;  %3633 = vmatpush1.bf16.msra.mxu1 %v7426_v38  ;;  %v2803_v27 = vld [vmem:[%s9799_s4] sm:$0x3] }
 0x1a9   :  { %v5237_v32 = vadd.f32 %v2353_v61, %v7948_v45  ;;  %v2355_v35 = vpop.f32.mrb[11].mxu1  ;;  %3593 = vmatprep.subr.bf16.mxu0 %v7121_v3  ;;  %v8031_v58 = vpack.c.bf16 %v5220_v29, %v5219_v2  ;;  %v5222_v53 = vadd.f32 %v2136_v52, %v7953_v36  ;;  %3634 = vmatprep.subr.bf16.mxu1 %v7435_v42  ;;  %v362_v61 = vsub.s32 5, %v7897_v0 }
 0x1aa   :  { %v8033_v51 = vpack.c.bf16 %v5236_v49, %v5235_v8  ;;  %v5238_v12 = vadd.f32 %v2355_v35, %v7956_v50  ;;  %v10080_v52 = vsub.s32 0, %v7897_v0 }
 0x1ab   :  { %10071 = vst [vmem:[#allocation49_spill] sm:$0xff] %v8031_v58  ;;  %v8038_v1 = vpack.c.bf16 %v5222_v53, %v5221_v63  ;;  %v8405_v58 = vld [vmem:[%s9797_s2 + $0x15c] ss:$24 sps:$4 sm:$0xff]  }
 0x1ac   :  { %10072 = vst [vmem:[#allocation50_spill] sm:$0xff] %v8033_v51  ;;  %v8040_v33 = vpack.c.bf16 %v5238_v12, %v5237_v32  ;;  %3594 = vmatpush1.bf16.msra.mxu0 %v7129_v5  ;;  %3635 = vmatpush1.bf16.msra.mxu1 %v7444_v47  ;;  %v8096_v35 = vrot.slane %v2803_v27, %v10080_v52  ;;  %v8399_v51 = vld [vmem:[%s9797_s2 + $0x128] ss:$24 sps:$4 sm:$0xff]  }
 0x1ad   :  { %10073 = vst [vmem:[#allocation51_spill] sm:$0xff] %v8038_v1  ;;  %3595 = vmatprep.subr.bf16.mxu0 %v7139_v7  ;;  %v2140_v3 = vpop.f32.mrb[12].mxu0  ;;  %3636 = vmatprep.subr.bf16.mxu1 %v7453_v54  ;;  %v8099_v12 = vrot.slane %v7921_v34, %v362_v61  ;;  %v8387_v1 = vld [vmem:[%s9797_s2 + $0xf8] ss:$24 sps:$4 sm:$0xff]  }
 0x1ae   :  { %10074 = vst [vmem:[#allocation52_spill] sm:$0xff] %v8040_v33  ;;  %v2359_v38 = vpop.f32.mrb[12].mxu1  ;;  %v5223_v16 = vadd.f32 %v2140_v3, %v7945_v40  ;;  %v2142_v31 = vpop.f32.mrb[13].mxu0  ;;  %v10081_v3 = vsub.s32 1, %v7897_v0  ;;  %v8381_v33 = vld [vmem:[%s9797_s2 + $0xfc] ss:$24 sps:$4 sm:$0xff]  }
 0x1af   :  { %v5239_v20 = vadd.f32 %v2359_v38, %v7948_v45  ;;  %v2361_v42 = vpop.f32.mrb[13].mxu1  ;;  %v5224_v57 = vadd.f32 %v2142_v31, %v7953_v36  ;;  %v2144_v2 = vpop.f32.mrb[14].mxu0 }
 0x1b0   :  { %v5240_v22 = vadd.f32 %v2361_v42, %v7956_v50  ;;  %v2363_v5 = vpop.f32.mrb[14].mxu1  ;;  %3596 = vmatpush1.bf16.msra.mxu0 %v7147_v9  ;;  %v5225_v7 = vadd.f32 %v2144_v2, %v7945_v40  ;;  %v2146_v8 = vpop.f32.mrb[15].mxu0  ;;  %3637 = vmatpush1.bf16.msra.mxu1 %v7462_v62  ;;  %v8103_v38 = vrot.slane %v2803_v27, %v10081_v3 }
 0x1b1   :  { %v5241_v47 = vadd.f32 %v2363_v5, %v7948_v45  ;;  %v2365_v54 = vpop.f32.mrb[15].mxu1  ;;  %3597 = vmatprep.subr.bf16.mxu0 %v7157_v11  ;;  %v8055_v6 = vpack.c.bf16 %v5224_v57, %v5223_v16  ;;  %v5226_v29 = vadd.f32 %v2146_v8, %v7953_v36  ;;  %3638 = vmatprep.subr.bf16.mxu1 %v7471_v4  ;;  %v10079_v11 = vld [vmem:[#allocation4_spill] sm:$0xff] }
 0x1b2   :  { %v8057_v26 = vpack.c.bf16 %v5240_v22, %v5239_v20  ;;  %v5242_v49 = vadd.f32 %v2365_v54, %v7956_v50  ;;  %v358_v50 = vsub.s32 4, %v7897_v0 }
 0x1b3   :  { %10075 = vst [vmem:[#allocation53_spill] sm:$0xff] %v8055_v6  ;;  %v8062_v9 = vpack.c.bf16 %v5226_v29, %v5225_v7  ;;  %v8369_v6 = vld [vmem:[%s9797_s2 + $0xcc] ss:$24 sps:$4 sm:$0xff]  }
 0x1b4   :  { %10076 = vst [vmem:[#allocation54_spill] sm:$0xff] %v8057_v26  ;;  %v8064_v40 = vpack.c.bf16 %v5242_v49, %v5241_v47  ;;  %3598 = vmatpush1.bf16.msra.mxu0 %v7165_v13  ;;  %3639 = vmatpush1.bf16.msra.mxu1 %v7480_v10  ;;  %v2820_v13 = vunpack.c.l.bf16 %v7982_v41  ;;  %v2822_v10 = vunpack.c.l.bf16 %v7984_v44  ;;  %v8092_v32 = vrot.slane %v7921_v34, %v358_v50  ;;  %v8363_v26 = vld [vmem:[%s9797_s2 + $0x98] ss:$24 sps:$4 sm:$0xff]  }
 0x1b5   :  { %10077 = vst [vmem:[#allocation55_spill] sm:$0xff] %v8062_v9  ;;  %3599 = vmatprep.subr.bf16.mxu0 %v7175_v15  ;;  %3640 = vmatprep.subr.bf16.mxu1 %v7489_v18  ;;  %v8351_v9 = vld [vmem:[%s9797_s2 + $0x68] ss:$24 sps:$4 sm:$0xff]  }
 0x1b6   :  { %10078 = vst [vmem:[#allocation56_spill] sm:$0xff] %v8064_v40  ;;  %v8333_v40 = vld [vmem:[%s9797_s2 + $0x3c] ss:$24 sps:$4 sm:$0xff]  }
 0x1b8   :  { %3600 = vmatpush1.bf16.msra.mxu0 %v7183_v17  ;;  %3641 = vmatpush1.bf16.msra.mxu1 %v7498_v24  ;;  %v2821_v17 = vunpack.c.h.bf16 %v7982_v41 }
 0x1b9   :  { %3601 = vmatprep.subr.bf16.mxu0 %v7193_v19  ;;  %3642 = vmatprep.subr.bf16.mxu1 %v7507_v30 }
 0x1bc   :  { %3602 = vmatpush1.bf16.msra.mxu0 %v7201_v21  ;;  %3643 = vmatpush1.bf16.msra.mxu1 %v7516_v37 }
 0x1bd   :  { %3603 = vmatprep.subr.bf16.mxu0 %v7211_v23  ;;  %3644 = vmatprep.subr.bf16.mxu1 %v7525_v46 }
 0x1c0   :  { %3604 = vmatpush1.bf16.msra.mxu0 %v7219_v25  ;;  %3645 = vmatpush1.bf16.msra.mxu1 %v7534_v59  ;;  %v2823_v25 = vunpack.c.h.bf16 %v7984_v44 }
 0x1c1   :  { %3655 = vmatprep.subr.bf16.mxu0 %v10079_v11  ;;  %3742 = vmatprep.subr.bf16.mxu1 %v7855_v14 }
 0x1d6   :  { %v3438_v15 = vpop.f32.mrb[16].mxu1 }
 0x1d7   :  { %v3527_v19 = vadd.f32 %v3438_v15, %v2820_v13  ;;  %v3440_v21 = vpop.f32.mrb[17].mxu1 }
 0x1d8   :  { %v3528_v62 = vadd.f32 %v3440_v21, %v2821_v17  ;;  %v3442_v4 = vpop.f32.mrb[18].mxu1 }
 0x1d9   :  { %v3443_v23 = vpop.f32.mrb[19].mxu1  ;;  %v3531_v36 = vmul.f32 0.5, %v3527_v19 }
 0x1da   :  { %v3532_v45 = vmul.f32 0.5, %v3528_v62 }
 0x1db   :  { %5968 = vtanh.f32 %v3531_v36 }
 0x1dc   :  { %5970 = vtanh.f32 %v3532_v45 }
 0x1e5   :  { %v5969_v41 = vpop.eup %5968 }
 0x1e6   :  { %v5971_v63 = vpop.eup %5970  ;;  %v3539_v44 = vadd.f32 1.0, %v5969_v41 }
 0x1e7   :  { %v3540_v53 = vadd.f32 1.0, %v5971_v63 }
 0x1e8   :  { %v3543_v22 = vmul.f32 0.5, %v3539_v44 }
 0x1e9   :  { %v3544_v8 = vmul.f32 0.5, %v3540_v53 }
 0x216   :  { %v3479_v18 = vpop.f32.mrb[20].mxu1 }
 0x217   :  { %v3529_v24 = vadd.f32 %v3479_v18, %v2822_v10  ;;  %v3481_v30 = vpop.f32.mrb[21].mxu1 }
 0x218   :  { %v3530_v37 = vadd.f32 %v3481_v30, %v2823_v25  ;;  %v3483_v46 = vpop.f32.mrb[22].mxu1 }
 0x219   :  { %v3484_v59 = vpop.f32.mrb[23].mxu1  ;;  %v3533_v16 = vmul.f32 0.5, %v3529_v24 }
 0x21a   :  { %v3534_v42 = vmul.f32 0.5, %v3530_v37 }
 0x21b   :  { %5972 = vtanh.f32 %v3533_v16 }
 0x21c   :  { %5974 = vtanh.f32 %v3534_v42 }
 0x225   :  { %v5973_v41 = vpop.eup %5972 }
 0x226   :  { %v5975_v61 = vpop.eup %5974  ;;  %v3541_v44 = vadd.f32 1.0, %v5973_v41  ;;  %v10094_v41 = vld [vmem:[#allocation38_spill] sm:$0xff] }
 0x227   :  { %v3542_v3 = vadd.f32 1.0, %v5975_v61  ;;  %v10095_v61 = vld [vmem:[#allocation39_spill] sm:$0xff] }
 0x255   :  { %v2548_v20 = vpop.f32.mrb[16].mxu0 }
 0x256   :  { %v3520_v31 = vpop.f32.mrb[24].mxu1  ;;  %v5243_v57 = vadd.f32 %v2548_v20, %v8092_v32  ;;  %v2550_v5 = vpop.f32.mrb[17].mxu0 }
 0x257   :  { %v3547_v2 = vadd.f32 %v3520_v31, %v8096_v35  ;;  %v3522_v7 = vpop.f32.mrb[25].mxu1  ;;  %v5244_v47 = vadd.f32 %v2550_v5, %v8099_v12  ;;  %v2552_v54 = vpop.f32.mrb[18].mxu0 }
 0x258   :  { %v3548_v34 = vadd.f32 %v3522_v7, %v8103_v38  ;;  %v3524_v0 = vpop.f32.mrb[26].mxu1  ;;  %v5245_v49 = vadd.f32 %v2552_v54, %v8092_v32  ;;  %v2554_v13 = vpop.f32.mrb[19].mxu0  ;;  %v3545_v7 = vmul.f32 0.5, %v3541_v44  ;;  %v10097_v44 = vld [vmem:[#allocation10_spill] sm:$0xff] }
 0x259   :  { %v3549_v29 = vmul.f32 %v3547_v2, %v3543_v22  ;;  %v3525_v15 = vpop.f32.mrb[27].mxu1  ;;  %v5189_v17 = vpack.c.bf16 %v5244_v47, %v5243_v57  ;;  %v5246_v21 = vadd.f32 %v2554_v13, %v8099_v12 }
 0x25a   :  { %v3550_v19 = vmul.f32 %v3548_v34, %v3544_v8  ;;  %v3546_v8 = vmul.f32 0.5, %v3542_v3  ;;  %v10100_v3 = vld [vmem:[#allocation11_spill] sm:$0xff] }
 0x25b   :  { %v2824_v62 = vunpack.c.l.bf16 %v5189_v17  ;;  %v2825_v4 = vunpack.c.h.bf16 %v5189_v17  ;;  %v8111_v23 = vpack.c.bf16 %v5246_v21, %v5245_v49 }
 0x25d   :  { %v3551_v10 = vadd.f32 %v3549_v29, %v2824_v62  ;;  %v3552_v18 = vadd.f32 %v3550_v19, %v2825_v4  ;;  %v2558_v25 = vpop.f32.mrb[20].mxu0 }
 0x25e   :  { %v5247_v24 = vadd.f32 %v2558_v25, %v8092_v32  ;;  %v2560_v30 = vpop.f32.mrb[21].mxu0 }
 0x25f   :  { %5976 = vtanh.f32 %v3551_v10  ;;  %v5248_v37 = vadd.f32 %v2560_v30, %v8099_v12  ;;  %v2562_v46 = vpop.f32.mrb[22].mxu0 }
 0x260   :  { %5978 = vtanh.f32 %v3552_v18  ;;  %v5249_v59 = vadd.f32 %v2562_v46, %v8092_v32  ;;  %v2564_v36 = vpop.f32.mrb[23].mxu0  ;;  %v10089_v46 = vld [vmem:[#allocation6_spill] sm:$0xff] }
 0x261   :  { %v8116_v45 = vpack.c.bf16 %v5248_v37, %v5247_v24  ;;  %v5250_v50 = vadd.f32 %v2564_v36, %v8099_v12  ;;  %v10091_v36 = vld [vmem:[#allocation37_spill] sm:$0xff] }
 0x263   :  { %10082 = vst [vmem:[#allocation4_spill] sm:$0xff] %v8116_v45  ;;  %v8119_v27 = vpack.c.bf16 %v5250_v50, %v5249_v59  ;;  %v10090_v59 = vld [vmem:[#allocation36_spill] sm:$0xff]  ;;  %v8429_v45 = vld [vmem:[%s9797_s2 + $0x1bc] ss:$24 sps:$4 sm:$0xff]  }
 0x264   :  { %v10093_v50 = vld [vmem:[#allocation8_spill] sm:$0xff] }
 0x265   :  { %10083 = vst [vmem:[#allocation57_spill] sm:$0xff] %v8119_v27  ;;  %v2568_v63 = vpop.f32.mrb[24].mxu0  ;;  %v8411_v27 = vld [vmem:[%s9797_s2 + $0x158] ss:$24 sps:$4 sm:$0xff]  }
 0x266   :  { %v5251_v52 = vadd.f32 %v2568_v63, %v8092_v32  ;;  %v2570_v53 = vpop.f32.mrb[25].mxu0  ;;  %v10096_v63 = vld [vmem:[#allocation9_spill] sm:$0xff] }
 0x267   :  { %v5252_v16 = vadd.f32 %v2570_v53, %v8099_v12  ;;  %v2572_v20 = vpop.f32.mrb[26].mxu0  ;;  %v10099_v53 = vld [vmem:[#allocation41_spill] sm:$0xff] }
 0x268   :  { %v5253_v31 = vadd.f32 %v2572_v20, %v8092_v32  ;;  %v2574_v42 = vpop.f32.mrb[27].mxu0  ;;  %v10102_v20 = vld [vmem:[#allocation42_spill] sm:$0xff] }
 0x269   :  { %v5977_v57 = vpop.eup %5976  ;;  %v8124_v22 = vpack.c.bf16 %v5252_v16, %v5251_v52  ;;  %v5254_v2 = vadd.f32 %v2574_v42, %v8099_v12  ;;  %v10098_v52 = vld [vmem:[#allocation40_spill] sm:$0xff]  ;;  %v10104_v42 = vld [vmem:[#allocation13_spill] sm:$0xff] }
 0x26a   :  { %v5979_v5 = vpop.eup %5978  ;;  %v3555_v47 = vsub.f32 0.0, %v5977_v57  ;;  %v10101_v16 = vld [vmem:[#allocation12_spill] sm:$0xff] }
 0x26b   :  { %10084 = vst [vmem:[#allocation58_spill] sm:$0xff] %v8124_v22  ;;  %v8127_v34 = vpack.c.bf16 %v5254_v2, %v5253_v31  ;;  %v3556_v54 = vsub.f32 0.0, %v5979_v5  ;;  %v10103_v31 = vld [vmem:[#allocation43_spill] sm:$0xff]  ;;  %v10106_v2 = vld [vmem:[#allocation44_spill] sm:$0xff] }
 0x26c   :  { %v3557_v0 = vmul.f32 %v3555_v47, %v3545_v7  ;;  %v10107_v7 = vld [vmem:[#allocation15_spill] sm:$0xff]  ;;  %v10108_v47 = vld [vmem:[#allocation16_spill] sm:$0xff]  ;;  %10143 = vst [vmem:[#allocation43_spill] sm:$0xff] %v8333_v40  ;;  %10146 = vst [vmem:[#allocation44_spill] sm:$0xff] %v8351_v9 }
 0x26d   :  { %10085 = vst [vmem:[#allocation59_spill] sm:$0xff] %v8127_v34  ;;  %v2578_v29 = vpop.f32.mrb[28].mxu0  ;;  %v3558_v49 = vmul.f32 %v3556_v54, %v3546_v8  ;;  %v8180_v8 = vld [vmem:[%s9797_s2 + $0x124] ss:$24 sps:$4 sm:$0xff]   ;;  %v10109_v54 = vld [vmem:[#allocation17_spill] sm:$0xff]  ;;  %10148 = vst [vmem:[#allocation16_spill] sm:$0xff] %v8363_v26 }
 0x26e   :  { %v5255_v13 = vadd.f32 %v2578_v29, %v8092_v32  ;;  %v2580_v15 = vpop.f32.mrb[29].mxu0  ;;  %v8130_v17 = vadd.f32 %v5977_v57, %v3557_v0  ;;  %v10105_v57 = vld [vmem:[#allocation14_spill] sm:$0xff]  ;;  %v8188_v29 = vld [vmem:[%s9797_s2 + $0x120] ss:$24 sps:$4 sm:$0xff]   ;;  %10149 = vst [vmem:[#allocation17_spill] sm:$0xff] %v8369_v6 }
 0x26f   :  { %v5256_v19 = vadd.f32 %v2580_v15, %v8099_v12  ;;  %v2582_v21 = vpop.f32.mrb[30].mxu0  ;;  %v8133_v62 = vadd.f32 %v5979_v5, %v3558_v49  ;;  %v8171_v5 = vld [vmem:[%s9797_s2 + $0xf4] ss:$24 sps:$4 sm:$0xff]   ;;  %v10112_v15 = vld [vmem:[#allocation20_spill] sm:$0xff] }
 0x270   :  { %v5257_v4 = vadd.f32 %v2582_v21, %v8092_v32  ;;  %v2584_v10 = vpop.f32.mrb[31].mxu0  ;;  %v8138_v18 = vpack.c.bf16 %v8130_v17, %v8130_v17  ;;  %v10088_v32 = vld [vmem:[#allocation5_spill] sm:$0xff]  ;;  %v10110_v0 = vld [vmem:[#allocation18_spill] sm:$0xff]  ;;  %v8208_v21 = vld [vmem:[%s9797_s2 + $0x184] ss:$24 sps:$4 sm:$0xff]   ;;  %10152 = vst [vmem:[#allocation20_spill] sm:$0xff] %v8387_v1 }
 0x271   :  { %v8140_v25 = vpack.c.bf16 %v5256_v19, %v5255_v13  ;;  %v5258_v24 = vadd.f32 %v2584_v10, %v8099_v12  ;;  %v3572_v30 = vpack.c.bf16 %v8133_v62, %v8133_v62  ;;  %v10092_v12 = vld [vmem:[#allocation7_spill] sm:$0xff]  ;;  %v8194_v49 = vld [vmem:[%s9797_s2 + $0x154] ss:$24 sps:$4 sm:$0xff]   ;;  %v8202_v19 = vld [vmem:[%s9797_s2 + $0x150] ss:$24 sps:$4 sm:$0xff]  }
 0x272   :  { %v10111_v13 = vld [vmem:[#allocation19_spill] sm:$0xff]  ;;  %v10114_v10 = vld [vmem:[#allocation22_spill] sm:$0xff]  ;;  %v8375_v34 = vld [vmem:[%s9797_s2 + $0xc8] ss:$24 sps:$4 sm:$0xff]  }
 0x273   :  { %10086 = vst [vmem:[#allocation60_spill] sm:$0xff] %v8140_v25  ;;  %v8145_v37 = vpack.c.bf16 %v5258_v24, %v5257_v4  ;;  %3605 = vmatprep.mubr.bf16.mxu0 %v3572_v30  ;;  %3646 = vmatprep.mubr.bf16.mxu1 %v3572_v30  ;;  %v10113_v4 = vld [vmem:[#allocation21_spill] sm:$0xff]  ;;  %v8216_v24 = vld [vmem:[%s9797_s2 + $0x180] ss:$24 sps:$4 sm:$0xff]   ;;  %v8357_v25 = vld [vmem:[%s9797_s2 + $0x9c] ss:$24 sps:$4 sm:$0xff]  }
 0x274   :  { %3606 = vmatmul.mubr.bf16.vlgmr.msra.gmra.mrb[32].mxu0 %v8138_v18  ;;  %3647 = vmatmul.mubr.bf16.vlgmr.msra.gmra.mrb[28].mxu1 %v8138_v18  ;;  %10147 = vst [vmem:[#allocation15_spill] sm:$0xff] %v8357_v25  ;;  %10150 = vst [vmem:[#allocation18_spill] sm:$0xff] %v8375_v34  ;;  %v8393_v22 = vld [vmem:[%s9797_s2 + $0x12c] ss:$24 sps:$4 sm:$0xff]  }
 0x275   :  { %10087 = vst [vmem:[#allocation61_spill] sm:$0xff] %v8145_v37  ;;  %3656 = vmatpush1.bf16.msra.mxu0 %v10088_v32  ;;  %3687 = vmatprep.mubr.bf16.mxu0 %v3572_v30  ;;  %v8222_v30 = vld [vmem:[%s9797_s2 + $0x1b4] ss:$24 sps:$4 sm:$0xff]   ;;  %v10115_v32 = vld [vmem:[#allocation23_spill] sm:$0xff]  ;;  %v8327_v37 = vld [vmem:[%s9797_s2 + $0x8] ss:$24 sps:$4 sm:$0xff]  }
 0x276   :  { %3657 = vmatprep.subr.bf16.mxu0 %v10089_v46  ;;  %3743 = vmatpush1.bf16.msra.mxu1 %v10090_v59  ;;  %v10116_v46 = vld [vmem:[#allocation24_spill] sm:$0xff]  ;;  %10142 = vst [vmem:[#allocation42_spill] sm:$0xff] %v8327_v37  ;;  %10151 = vst [vmem:[#allocation19_spill] sm:$0xff] %v8381_v33 }
 0x277   :  { %3744 = vmatprep.subr.bf16.mxu1 %v10091_v36  ;;  %10153 = vst [vmem:[#allocation21_spill] sm:$0xff] %v8393_v22  ;;  %10154 = vst [vmem:[#allocation22_spill] sm:$0xff] %v8399_v51 }
 0x278   :  { %10155 = vst [vmem:[#allocation23_spill] sm:$0xff] %v8405_v58  ;;  %10156 = vst [vmem:[#allocation24_spill] sm:$0xff] %v8411_v27 }
 0x279   :  { %3658 = vmatpush1.bf16.msra.mxu0 %v10092_v12  ;;  %v8230_v12 = vld [vmem:[%s9797_s2 + $0x1b0] ss:$24 sps:$4 sm:$0xff]  }
 0x27a   :  { %3659 = vmatprep.subr.bf16.mxu0 %v10093_v50  ;;  %3745 = vmatpush1.bf16.msra.mxu1 %v10094_v41  ;;  %10117 = vst [vmem:[#allocation5_spill] sm:$0xff] %v8230_v12  ;;  %v8236_v50 = vld [vmem:[%s9797_s2 + $0x1e4] ss:$24 sps:$4 sm:$0xff]  }
 0x27b   :  { %3746 = vmatprep.subr.bf16.mxu1 %v10095_v61  ;;  %10118 = vst [vmem:[#allocation6_spill] sm:$0xff] %v8236_v50 }
 0x27d   :  { %3660 = vmatpush1.bf16.msra.mxu0 %v10096_v63  ;;  %v10119_v63 = vld [vmem:[#allocation25_spill] sm:$0xff] }
 0x27e   :  { %3661 = vmatprep.subr.bf16.mxu0 %v10097_v44  ;;  %3747 = vmatpush1.bf16.msra.mxu1 %v10098_v52  ;;  %v10120_v44 = vld [vmem:[#allocation26_spill] sm:$0xff]  ;;  %10157 = vst [vmem:[#allocation25_spill] sm:$0xff] %v8417_v48 }
 0x27f   :  { %3748 = vmatprep.subr.bf16.mxu1 %v10099_v53  ;;  %10158 = vst [vmem:[#allocation26_spill] sm:$0xff] %v8423_v55 }
 0x281   :  { %3662 = vmatpush1.bf16.msra.mxu0 %v10100_v3  ;;  %v8244_v3 = vld [vmem:[%s9797_s2 + $0x1e0] ss:$24 sps:$4 sm:$0xff]  }
 0x282   :  { %3663 = vmatprep.subr.bf16.mxu0 %v10101_v16  ;;  %3749 = vmatpush1.bf16.msra.mxu1 %v10102_v20  ;;  %10121 = vst [vmem:[#allocation36_spill] sm:$0xff] %v8244_v3  ;;  %v8250_v16 = vld [vmem:[%s9797_s2 + $0x214] ss:$24 sps:$4 sm:$0xff]  }
 0x283   :  { %3750 = vmatprep.subr.bf16.mxu1 %v10103_v31  ;;  %10122 = vst [vmem:[#allocation37_spill] sm:$0xff] %v8250_v16 }
 0x285   :  { %3664 = vmatpush1.bf16.msra.mxu0 %v10104_v42  ;;  %v10123_v42 = vld [vmem:[#allocation27_spill] sm:$0xff] }
 0x286   :  { %3665 = vmatprep.subr.bf16.mxu0 %v10105_v57  ;;  %3751 = vmatpush1.bf16.msra.mxu1 %v10106_v2  ;;  %v10124_v57 = vld [vmem:[#allocation28_spill] sm:$0xff]  ;;  %10159 = vst [vmem:[#allocation27_spill] sm:$0xff] %v8429_v45 }
 0x287   :  { %3752 = vmatprep.subr.bf16.mxu1 %v8171_v5  ;;  %10160 = vst [vmem:[#allocation28_spill] sm:$0xff] %v8435_v60 }
 0x289   :  { %3666 = vmatpush1.bf16.msra.mxu0 %v10107_v7  ;;  %v8258_v7 = vld [vmem:[%s9797_s2 + $0x210] ss:$24 sps:$4 sm:$0xff]  }
 0x28a   :  { %3667 = vmatprep.subr.bf16.mxu0 %v10108_v47  ;;  %3753 = vmatpush1.bf16.msra.mxu1 %v7975_v43  ;;  %10125 = vst [vmem:[#allocation7_spill] sm:$0xff] %v8258_v7  ;;  %v8264_v47 = vld [vmem:[%s9797_s2 + $0x244] ss:$24 sps:$4 sm:$0xff]  }
 0x28b   :  { %3754 = vmatprep.subr.bf16.mxu1 %v8180_v8  ;;  %10126 = vst [vmem:[#allocation8_spill] sm:$0xff] %v8264_v47 }
 0x28d   :  { %3668 = vmatpush1.bf16.msra.mxu0 %v10109_v54  ;;  %v10127_v54 = vld [vmem:[#allocation29_spill] sm:$0xff] }
 0x28e   :  { %3669 = vmatprep.subr.bf16.mxu0 %v10110_v0  ;;  %3755 = vmatpush1.bf16.msra.mxu1 %v8188_v29  ;;  %v10128_v0 = vld [vmem:[#allocation30_spill] sm:$0xff]  ;;  %10161 = vst [vmem:[#allocation29_spill] sm:$0xff] %v8441_v56 }
 0x28f   :  { %3756 = vmatprep.subr.bf16.mxu1 %v8194_v49 }
 0x291   :  { %3670 = vmatpush1.bf16.msra.mxu0 %v10111_v13  ;;  %v8272_v13 = vld [vmem:[%s9797_s2 + $0x240] ss:$24 sps:$4 sm:$0xff]  }
 0x292   :  { %3671 = vmatprep.subr.bf16.mxu0 %v10112_v15  ;;  %3757 = vmatpush1.bf16.msra.mxu1 %v8202_v19  ;;  %10129 = vst [vmem:[#allocation38_spill] sm:$0xff] %v8272_v13  ;;  %v8278_v15 = vld [vmem:[%s9797_s2 + $0x274] ss:$24 sps:$4 sm:$0xff]  }
 0x293   :  { %3758 = vmatprep.subr.bf16.mxu1 %v8208_v21  ;;  %10130 = vst [vmem:[#allocation39_spill] sm:$0xff] %v8278_v15 }
 0x295   :  { %3672 = vmatpush1.bf16.msra.mxu0 %v10113_v4  ;;  %v10131_v4 = vld [vmem:[#allocation31_spill] sm:$0xff] }
 0x296   :  { %3673 = vmatprep.subr.bf16.mxu0 %v10114_v10  ;;  %3759 = vmatpush1.bf16.msra.mxu1 %v8216_v24  ;;  %v10132_v10 = vld [vmem:[#allocation32_spill] sm:$0xff] }
 0x297   :  { %3760 = vmatprep.subr.bf16.mxu1 %v8222_v30 }
 0x299   :  { %3674 = vmatpush1.bf16.msra.mxu0 %v10115_v32  ;;  %v8286_v32 = vld [vmem:[%s9797_s2 + $0x270] ss:$24 sps:$4 sm:$0xff]  }
 0x29a   :  { %3675 = vmatprep.subr.bf16.mxu0 %v10116_v46  ;;  %3761 = vmatpush1.bf16.msra.mxu1 %v8230_v12  ;;  %10133 = vst [vmem:[#allocation9_spill] sm:$0xff] %v8286_v32  ;;  %v8292_v46 = vld [vmem:[%s9797_s2 + $0x2a4] ss:$24 sps:$4 sm:$0xff]  }
 0x29b   :  { %3762 = vmatprep.subr.bf16.mxu1 %v8236_v50  ;;  %10134 = vst [vmem:[#allocation10_spill] sm:$0xff] %v8292_v46 }
 0x29d   :  { %3676 = vmatpush1.bf16.msra.mxu0 %v10119_v63  ;;  %v10135_v63 = vld [vmem:[#allocation33_spill] sm:$0xff] }
 0x29e   :  { %3677 = vmatprep.subr.bf16.mxu0 %v10120_v44  ;;  %3763 = vmatpush1.bf16.msra.mxu1 %v8244_v3  ;;  %v10136_v44 = vld [vmem:[#allocation34_spill] sm:$0xff] }
 0x29f   :  { %3764 = vmatprep.subr.bf16.mxu1 %v8250_v16 }
 0x2a1   :  { %3678 = vmatpush1.bf16.msra.mxu0 %v10123_v42  ;;  %v8300_v42 = vld [vmem:[%s9797_s2 + $0x2a0] ss:$24 sps:$4 sm:$0xff]  }
 0x2a2   :  { %3679 = vmatprep.subr.bf16.mxu0 %v10124_v57  ;;  %3765 = vmatpush1.bf16.msra.mxu1 %v8258_v7  ;;  %10137 = vst [vmem:[#allocation40_spill] sm:$0xff] %v8300_v42  ;;  %v8306_v57 = vld [vmem:[%s9797_s2 + $0x2d4] ss:$24 sps:$4 sm:$0xff]  }
 0x2a3   :  { %3766 = vmatprep.subr.bf16.mxu1 %v8264_v47  ;;  %10138 = vst [vmem:[#allocation41_spill] sm:$0xff] %v8306_v57 }
 0x2a5   :  { %3680 = vmatpush1.bf16.msra.mxu0 %v10127_v54  ;;  %v10139_v54 = vld [vmem:[#allocation35_spill] sm:$0xff] }
 0x2a6   :  { %3681 = vmatprep.subr.bf16.mxu0 %v10128_v0  ;;  %3767 = vmatpush1.bf16.msra.mxu1 %v8272_v13  ;;  %v8313_v0 = vld [vmem:[%s9797_s2 + $0xc] ss:$24 sps:$4 sm:$0xff]  }
 0x2a7   :  { %3768 = vmatprep.subr.bf16.mxu1 %v8278_v15  ;;  %10140 = vst [vmem:[#allocation11_spill] sm:$0xff] %v8313_v0 }
 0x2a9   :  { %3682 = vmatpush1.bf16.msra.mxu0 %v10131_v4  ;;  %v8319_v4 = vld [vmem:[%s9797_s2 + $0x2d0] ss:$24 sps:$4 sm:$0xff]  }
 0x2aa   :  { %3683 = vmatprep.subr.bf16.mxu0 %v10132_v10  ;;  %3769 = vmatpush1.bf16.msra.mxu1 %v8286_v32  ;;  %10141 = vst [vmem:[#allocation12_spill] sm:$0xff] %v8319_v4 }
 0x2ab   :  { %3770 = vmatprep.subr.bf16.mxu1 %v8292_v46 }
 0x2ad   :  { %3684 = vmatpush1.bf16.msra.mxu0 %v10135_v63 }
 0x2ae   :  { %3685 = vmatprep.subr.bf16.mxu0 %v10136_v44  ;;  %3771 = vmatpush1.bf16.msra.mxu1 %v8300_v42 }
 0x2af   :  { %3772 = vmatprep.subr.bf16.mxu1 %v8306_v57 }
 0x2b1   :  { %3686 = vmatpush1.bf16.msra.mxu0 %v10139_v54 }
 0x2b2   :  { %3783 = vmatprep.subr.bf16.mxu0 %v8313_v0  ;;  %3773 = vmatpush1.bf16.msra.mxu1 %v8319_v4 }
 0x2b3   :  { %3824 = vmatprep.subr.bf16.mxu1 %v10079_v11  ;;  %v8339_v11 = vld [vmem:[%s9797_s2 + $0x38] ss:$24 sps:$4 sm:$0xff]  }
 0x2b4   :  { %3688 = vmatmul.mubr.bf16.vlgmr.msra.gmra.mrb[36].mxu0 %v8138_v18  ;;  %10144 = vst [vmem:[#allocation13_spill] sm:$0xff] %v8339_v11  ;;  %v8345_v18 = vld [vmem:[%s9797_s2 + $0x6c] ss:$24 sps:$4 sm:$0xff]  }
 0x2b5   :  { %3784 = vmatpush1.bf16.msra.mxu0 %v8327_v37  ;;  %10145 = vst [vmem:[#allocation14_spill] sm:$0xff] %v8345_v18 }
 0x2b6   :  { %3785 = vmatprep.subr.bf16.mxu0 %v8333_v40 }
 0x2b9   :  { %3786 = vmatpush1.bf16.msra.mxu0 %v8339_v11 }
 0x2ba   :  { %3787 = vmatprep.subr.bf16.mxu0 %v8345_v18 }
 0x2bd   :  { %3788 = vmatpush1.bf16.msra.mxu0 %v8351_v9 }
 0x2be   :  { %3789 = vmatprep.subr.bf16.mxu0 %v8357_v25 }
 0x2c1   :  { %3790 = vmatpush1.bf16.msra.mxu0 %v8363_v26 }
 0x2c2   :  { %3791 = vmatprep.subr.bf16.mxu0 %v8369_v6 }
 0x2c5   :  { %3792 = vmatpush1.bf16.msra.mxu0 %v8375_v34 }
 0x2c6   :  { %3793 = vmatprep.subr.bf16.mxu0 %v8381_v33 }
 0x2c9   :  { %3794 = vmatpush1.bf16.msra.mxu0 %v8387_v1 }
 0x2ca   :  { %3795 = vmatprep.subr.bf16.mxu0 %v8393_v22 }
 0x2cd   :  { %3796 = vmatpush1.bf16.msra.mxu0 %v8399_v51  ;;  %v3568_v51 = vunpack.c.h.bf16 %v7992_v39 }
 0x2ce   :  { %3797 = vmatprep.subr.bf16.mxu0 %v8405_v58  ;;  %v3566_v58 = vunpack.c.h.bf16 %v7990_v28 }
 0x2d1   :  { %3798 = vmatpush1.bf16.msra.mxu0 %v8411_v27 }
 0x2d2   :  { %3799 = vmatprep.subr.bf16.mxu0 %v8417_v48 }
 0x2d5   :  { %3800 = vmatpush1.bf16.msra.mxu0 %v8423_v55  ;;  %v8447_v55 = vld [vmem:[%s9797_s2 + $0x1e8] ss:$24 sps:$4 sm:$0xff]  }
 0x2d6   :  { %3801 = vmatprep.subr.bf16.mxu0 %v8429_v45  ;;  %10162 = vst [vmem:[#allocation30_spill] sm:$0xff] %v8447_v55  ;;  %v8453_v45 = vld [vmem:[%s9797_s2 + $0x21c] ss:$24 sps:$4 sm:$0xff]  }
 0x2d7   :  { %10163 = vst [vmem:[#allocation31_spill] sm:$0xff] %v8453_v45 }
 0x2d9   :  { %3802 = vmatpush1.bf16.msra.mxu0 %v8435_v60  ;;  %v8459_v60 = vld [vmem:[%s9797_s2 + $0x218] ss:$24 sps:$4 sm:$0xff]  }
 0x2da   :  { %3803 = vmatprep.subr.bf16.mxu0 %v8441_v56  ;;  %10164 = vst [vmem:[#allocation32_spill] sm:$0xff] %v8459_v60  ;;  %v8465_v56 = vld [vmem:[%s9797_s2 + $0x24c] ss:$24 sps:$4 sm:$0xff]  }
 0x2db   :  { %10165 = vst [vmem:[#allocation33_spill] sm:$0xff] %v8465_v56 }
 0x2dd   :  { %3804 = vmatpush1.bf16.msra.mxu0 %v8447_v55  ;;  %v8471_v55 = vld [vmem:[%s9797_s2 + $0x248] ss:$24 sps:$4 sm:$0xff]  }
 0x2de   :  { %3805 = vmatprep.subr.bf16.mxu0 %v8453_v45  ;;  %10166 = vst [vmem:[#allocation34_spill] sm:$0xff] %v8471_v55  ;;  %v8477_v45 = vld [vmem:[%s9797_s2 + $0x27c] ss:$24 sps:$4 sm:$0xff]  }
 0x2df   :  { %10167 = vst [vmem:[#allocation35_spill] sm:$0xff] %v8477_v45 }
 0x2e1   :  { %3806 = vmatpush1.bf16.msra.mxu0 %v8459_v60  ;;  %v8483_v60 = vld [vmem:[%s9797_s2 + $0x278] ss:$24 sps:$4 sm:$0xff]  }
 0x2e2   :  { %3807 = vmatprep.subr.bf16.mxu0 %v8465_v56  ;;  %10168 = vst [vmem:[#allocation62_spill] sm:$0xff] %v8483_v60  ;;  %v8489_v56 = vld [vmem:[%s9797_s2 + $0x2ac] ss:$24 sps:$4 sm:$0xff]  }
 0x2e3   :  { %10169 = vst [vmem:[#allocation63_spill] sm:$0xff] %v8489_v56 }
 0x2e5   :  { %3808 = vmatpush1.bf16.msra.mxu0 %v8471_v55  ;;  %v8495_v55 = vld [vmem:[%s9797_s2 + $0x2a8] ss:$24 sps:$4 sm:$0xff]  }
 0x2e6   :  { %3809 = vmatprep.subr.bf16.mxu0 %v8477_v45  ;;  %10170 = vst [vmem:[#allocation64_spill] sm:$0xff] %v8495_v55  ;;  %v8501_v45 = vld [vmem:[%s9797_s2 + $0x2dc] ss:$24 sps:$4 sm:$0xff]  }
 0x2e7   :  { %10171 = vst [vmem:[#allocation65_spill] sm:$0xff] %v8501_v45 }
 0x2e9   :  { %3810 = vmatpush1.bf16.msra.mxu0 %v8483_v60  ;;  %v8507_v60 = vld [vmem:[%s9797_s2 + $0x2d8] ss:$24 sps:$4 sm:$0xff]  }
 0x2ea   :  { %3811 = vmatprep.subr.bf16.mxu0 %v8489_v56  ;;  %10172 = vst [vmem:[#allocation66_spill] sm:$0xff] %v8507_v60  ;;  %v3565_v56 = vunpack.c.l.bf16 %v7990_v28 }
 0x2ed   :  { %3812 = vmatpush1.bf16.msra.mxu0 %v8495_v55  ;;  %v3567_v55 = vunpack.c.l.bf16 %v7992_v39 }
 0x2ee   :  { %3813 = vmatprep.subr.bf16.mxu0 %v8501_v45 }
 0x2f1   :  { %3814 = vmatpush1.bf16.msra.mxu0 %v8507_v60 }
 0x2f2   :  { %3911 = vmatprep.subr.bf16.mxu0 %v7855_v14 }
 0x347   :  { %v3607_v48 = vpop.f32.mrb[32].mxu0  ;;  %v3648_v27 = vpop.f32.mrb[28].mxu1 }
 0x348   :  { %v3696_v45 = vadd.f32 %v3607_v48, %v3565_v56  ;;  %v3698_v22 = vadd.f32 %v3648_v27, %v3567_v55  ;;  %v3609_v1 = vpop.f32.mrb[33].mxu0  ;;  %v3650_v33 = vpop.f32.mrb[29].mxu1 }
 0x349   :  { %v3697_v34 = vadd.f32 %v3609_v1, %v3566_v58  ;;  %v3699_v6 = vadd.f32 %v3650_v33, %v3568_v51  ;;  %v3611_v26 = vpop.f32.mrb[34].mxu0  ;;  %v3652_v60 = vpop.f32.mrb[30].mxu1  ;;  %v3569_v33 = vunpack.c.l.bf16 %v8111_v23 }
 0x34a   :  { %v3612_v25 = vpop.f32.mrb[35].mxu0  ;;  %v3653_v14 = vpop.f32.mrb[31].mxu1  ;;  %v3700_v9 = vmul.f32 0.5, %v3696_v45  ;;  %v3702_v28 = vmul.f32 0.5, %v3698_v22  ;;  %v3570_v45 = vunpack.c.h.bf16 %v8111_v23 }
 0x34b   :  { %v3701_v18 = vmul.f32 0.5, %v3697_v34  ;;  %v3703_v39 = vmul.f32 0.5, %v3699_v6 }
 0x34c   :  { %5980 = vtanh.f32 %v3700_v9 }
 0x34d   :  { %5982 = vtanh.f32 %v3701_v18 }
 0x34e   :  { %5984 = vtanh.f32 %v3702_v28 }
 0x34f   :  { %5986 = vtanh.f32 %v3703_v39 }
 0x356   :  { %v5981_v11 = vpop.eup %5980 }
 0x357   :  { %v5983_v40 = vpop.eup %5982  ;;  %v3708_v37 = vadd.f32 1.0, %v5981_v11 }
 0x358   :  { %v3709_v4 = vadd.f32 1.0, %v5983_v40  ;;  %v5985_v22 = vpop.eup %5984 }
 0x359   :  { %v3712_v55 = vmul.f32 0.5, %v3708_v37  ;;  %v5987_v34 = vpop.eup %5986  ;;  %v3710_v25 = vadd.f32 1.0, %v5985_v22  ;;  %v8682_v22 = vld [vmem:[%s9797_s2 + $0x224] ss:$24 sps:$4 sm:$0xff]  }
 0x35a   :  { %v3713_v60 = vmul.f32 0.5, %v3709_v4  ;;  %v3711_v37 = vadd.f32 1.0, %v5987_v34  ;;  %10176 = vst [vmem:[#allocation70_spill] sm:$0xff] %v8682_v22  ;;  %v8690_v34 = vld [vmem:[%s9797_s2 + $0x220] ss:$24 sps:$4 sm:$0xff]  }
 0x35b   :  { %v3714_v18 = vmul.f32 0.5, %v3710_v25  ;;  %10177 = vst [vmem:[#allocation71_spill] sm:$0xff] %v8690_v34  ;;  %v8696_v25 = vld [vmem:[%s9797_s2 + $0x254] ss:$24 sps:$4 sm:$0xff]  }
 0x35c   :  { %v3715_v28 = vmul.f32 0.5, %v3711_v37  ;;  %10178 = vst [vmem:[#allocation72_spill] sm:$0xff] %v8696_v25  ;;  %v8704_v37 = vld [vmem:[%s9797_s2 + $0x250] ss:$24 sps:$4 sm:$0xff]  }
 0x35d   :  { %10179 = vst [vmem:[#allocation73_spill] sm:$0xff] %v8704_v37 }
 0x387   :  { %v3689_v56 = vpop.f32.mrb[36].mxu0 }
 0x388   :  { %v3716_v48 = vadd.f32 %v3689_v56, %v8096_v35  ;;  %v3691_v58 = vpop.f32.mrb[37].mxu0 }
 0x389   :  { %v3717_v51 = vadd.f32 %v3691_v58, %v8103_v38  ;;  %v3693_v1 = vpop.f32.mrb[38].mxu0 }
 0x38a   :  { %v3718_v26 = vmul.f32 %v3716_v48, %v3712_v55  ;;  %v3694_v9 = vpop.f32.mrb[39].mxu0  ;;  %v8556_v1 = vld [vmem:[%s9797_s2 + $0x74] ss:$24 sps:$4 sm:$0xff]  }
 0x38b   :  { %v3719_v27 = vmul.f32 %v3717_v51, %v3713_v60  ;;  %v8550_v51 = vld [vmem:[%s9797_s2 + $0x40] ss:$24 sps:$4 sm:$0xff]   ;;  %v8648_v9 = vld [vmem:[%s9797_s2 + $0x190] ss:$24 sps:$4 sm:$0xff]  }
 0x38c   :  { %v3720_v40 = vadd.f32 %v3718_v26, %v3569_v33  ;;  %v8626_v33 = vld [vmem:[%s9797_s2 + $0x164] ss:$24 sps:$4 sm:$0xff]   ;;  %v8640_v26 = vld [vmem:[%s9797_s2 + $0x194] ss:$24 sps:$4 sm:$0xff]  }
 0x38d   :  { %v3721_v6 = vadd.f32 %v3719_v27, %v3570_v45  ;;  %v8654_v45 = vld [vmem:[%s9797_s2 + $0x1c4] ss:$24 sps:$4 sm:$0xff]   ;;  %v8662_v27 = vld [vmem:[%s9797_s2 + $0x1c0] ss:$24 sps:$4 sm:$0xff]  }
 0x38e   :  { %5988 = vtanh.f32 %v3720_v40  ;;  %10173 = vst [vmem:[#allocation67_spill] sm:$0xff] %v8662_v27  ;;  %v8668_v40 = vld [vmem:[%s9797_s2 + $0x1f4] ss:$24 sps:$4 sm:$0xff]  }
 0x38f   :  { %5990 = vtanh.f32 %v3721_v6  ;;  %10174 = vst [vmem:[#allocation68_spill] sm:$0xff] %v8668_v40  ;;  %v8676_v6 = vld [vmem:[%s9797_s2 + $0x1f0] ss:$24 sps:$4 sm:$0xff]  }
 0x390   :  { %10175 = vst [vmem:[#allocation69_spill] sm:$0xff] %v8676_v6 }
 0x398   :  { %v5989_v11 = vpop.eup %5988 }
 0x399   :  { %v5991_v4 = vpop.eup %5990  ;;  %v3724_v14 = vsub.f32 %v8130_v17, %v5989_v11  ;;  %v8536_v17 = vld [vmem:[%s9797_s2 + $0x10] ss:$24 sps:$4 sm:$0xff]  }
 0x39a   :  { %v3725_v39 = vsub.f32 %v8133_v62, %v5991_v4  ;;  %v8542_v62 = vld [vmem:[%s9797_s2 + $0x44] ss:$24 sps:$4 sm:$0xff]  }
 0x39b   :  { %v3726_v56 = vmul.f32 %v3724_v14, %v3714_v18  ;;  %v10182_v18 = vld [vmem:[#allocation12_spill] sm:$0xff]  ;;  %v10186_v14 = vld [vmem:[#allocation13_spill] sm:$0xff] }
 0x39c   :  { %v3727_v55 = vmul.f32 %v3725_v39, %v3715_v28  ;;  %v10188_v28 = vld [vmem:[#allocation44_spill] sm:$0xff]  ;;  %v10189_v39 = vld [vmem:[#allocation15_spill] sm:$0xff] }
 0x39d   :  { %v8521_v23 = vadd.f32 %v5989_v11, %v3726_v56  ;;  %v8710_v11 = vld [vmem:[%s9797_s2 + $0x284] ss:$24 sps:$4 sm:$0xff]  }
 0x39e   :  { %v8523_v48 = vadd.f32 %v5991_v4, %v3727_v55  ;;  %10180 = vst [vmem:[#allocation74_spill] sm:$0xff] %v8710_v11  ;;  %v8718_v4 = vld [vmem:[%s9797_s2 + $0x280] ss:$24 sps:$4 sm:$0xff]   ;;  %v10191_v55 = vld [vmem:[#allocation17_spill] sm:$0xff] }
 0x39f   :  { %v8529_v60 = vpack.c.bf16 %v8521_v23, %v8521_v23  ;;  %10181 = vst [vmem:[#allocation75_spill] sm:$0xff] %v8718_v4  ;;  %v10190_v56 = vld [vmem:[#allocation16_spill] sm:$0xff] }
 0x3a0   :  { %v3741_v58 = vpack.c.bf16 %v8523_v48, %v8523_v48 }
 0x3a2   :  { %3774 = vmatprep.mubr.bf16.mxu1 %v3741_v58  ;;  %3815 = vmatprep.mubr.bf16.mxu0 %v3741_v58 }
 0x3a3   :  { %3775 = vmatmul.mubr.bf16.vlgmr.msra.gmra.mrb[32].mxu1 %v8529_v60  ;;  %3816 = vmatmul.mubr.bf16.vlgmr.msra.gmra.mrb[40].mxu0 %v8529_v60 }
 0x3a4   :  { %3825 = vmatpush1.bf16.msra.mxu1 %v8536_v17  ;;  %3856 = vmatprep.mubr.bf16.mxu1 %v3741_v58  ;;  %v10192_v58 = vld [vmem:[#allocation18_spill] sm:$0xff] }
 0x3a5   :  { %3826 = vmatprep.subr.bf16.mxu1 %v8542_v62  ;;  %3912 = vmatpush1.bf16.msra.mxu0 %v10090_v59  ;;  %v8564_v59 = vld [vmem:[%s9797_s2 + $0x70] ss:$24 sps:$4 sm:$0xff]  }
 0x3a6   :  { %3913 = vmatprep.subr.bf16.mxu0 %v10091_v36  ;;  %v8570_v36 = vld [vmem:[%s9797_s2 + $0xa4] ss:$24 sps:$4 sm:$0xff]  }
 0x3a8   :  { %3827 = vmatpush1.bf16.msra.mxu1 %v8550_v51 }
 0x3a9   :  { %3828 = vmatprep.subr.bf16.mxu1 %v8556_v1  ;;  %3914 = vmatpush1.bf16.msra.mxu0 %v10094_v41  ;;  %v8578_v41 = vld [vmem:[%s9797_s2 + $0xa0] ss:$24 sps:$4 sm:$0xff]  }
 0x3aa   :  { %3915 = vmatprep.subr.bf16.mxu0 %v10095_v61  ;;  %v8584_v61 = vld [vmem:[%s9797_s2 + $0xd4] ss:$24 sps:$4 sm:$0xff]  }
 0x3ac   :  { %3829 = vmatpush1.bf16.msra.mxu1 %v8564_v59 }
 0x3ad   :  { %3830 = vmatprep.subr.bf16.mxu1 %v8570_v36  ;;  %3916 = vmatpush1.bf16.msra.mxu0 %v10098_v52  ;;  %v8592_v52 = vld [vmem:[%s9797_s2 + $0xd0] ss:$24 sps:$4 sm:$0xff]  }
 0x3ae   :  { %3917 = vmatprep.subr.bf16.mxu0 %v10099_v53  ;;  %v8598_v53 = vld [vmem:[%s9797_s2 + $0x104] ss:$24 sps:$4 sm:$0xff]  }
 0x3b0   :  { %3831 = vmatpush1.bf16.msra.mxu1 %v8578_v41 }
 0x3b1   :  { %3832 = vmatprep.subr.bf16.mxu1 %v8584_v61  ;;  %3918 = vmatpush1.bf16.msra.mxu0 %v10102_v20  ;;  %v8606_v20 = vld [vmem:[%s9797_s2 + $0x100] ss:$24 sps:$4 sm:$0xff]  }
 0x3b2   :  { %3919 = vmatprep.subr.bf16.mxu0 %v10103_v31  ;;  %v8612_v31 = vld [vmem:[%s9797_s2 + $0x134] ss:$24 sps:$4 sm:$0xff]  }
 0x3b4   :  { %3833 = vmatpush1.bf16.msra.mxu1 %v8592_v52 }
 0x3b5   :  { %3834 = vmatprep.subr.bf16.mxu1 %v8598_v53  ;;  %3920 = vmatpush1.bf16.msra.mxu0 %v10106_v2  ;;  %v8620_v2 = vld [vmem:[%s9797_s2 + $0x130] ss:$24 sps:$4 sm:$0xff]  }
 0x3b6   :  { %3921 = vmatprep.subr.bf16.mxu0 %v8171_v5 }
 0x3b8   :  { %3835 = vmatpush1.bf16.msra.mxu1 %v8606_v20 }
 0x3b9   :  { %3836 = vmatprep.subr.bf16.mxu1 %v8612_v31  ;;  %3922 = vmatpush1.bf16.msra.mxu0 %v7975_v43  ;;  %v8634_v43 = vld [vmem:[%s9797_s2 + $0x160] ss:$24 sps:$4 sm:$0xff]  }
 0x3ba   :  { %3923 = vmatprep.subr.bf16.mxu0 %v8180_v8 }
 0x3bc   :  { %3837 = vmatpush1.bf16.msra.mxu1 %v8620_v2 }
 0x3bd   :  { %3838 = vmatprep.subr.bf16.mxu1 %v8626_v33  ;;  %3924 = vmatpush1.bf16.msra.mxu0 %v8188_v29 }
 0x3be   :  { %3925 = vmatprep.subr.bf16.mxu0 %v8194_v49 }
 0x3c0   :  { %3839 = vmatpush1.bf16.msra.mxu1 %v8634_v43 }
 0x3c1   :  { %3840 = vmatprep.subr.bf16.mxu1 %v8640_v26  ;;  %3926 = vmatpush1.bf16.msra.mxu0 %v8202_v19 }
 0x3c2   :  { %3927 = vmatprep.subr.bf16.mxu0 %v8208_v21 }
 0x3c4   :  { %3841 = vmatpush1.bf16.msra.mxu1 %v8648_v9 }
 0x3c5   :  { %3842 = vmatprep.subr.bf16.mxu1 %v8654_v45  ;;  %3928 = vmatpush1.bf16.msra.mxu0 %v8216_v24 }
 0x3c6   :  { %3929 = vmatprep.subr.bf16.mxu0 %v8222_v30 }
 0x3c8   :  { %3843 = vmatpush1.bf16.msra.mxu1 %v8662_v27 }
 0x3c9   :  { %3844 = vmatprep.subr.bf16.mxu1 %v8668_v40  ;;  %3930 = vmatpush1.bf16.msra.mxu0 %v8230_v12 }
 0x3ca   :  { %3931 = vmatprep.subr.bf16.mxu0 %v8236_v50 }
 0x3cc   :  { %3845 = vmatpush1.bf16.msra.mxu1 %v8676_v6 }
 0x3cd   :  { %3846 = vmatprep.subr.bf16.mxu1 %v8682_v22  ;;  %3932 = vmatpush1.bf16.msra.mxu0 %v8244_v3 }
 0x3ce   :  { %3933 = vmatprep.subr.bf16.mxu0 %v8250_v16 }
 0x3d0   :  { %3847 = vmatpush1.bf16.msra.mxu1 %v8690_v34 }
 0x3d1   :  { %3848 = vmatprep.subr.bf16.mxu1 %v8696_v25  ;;  %3934 = vmatpush1.bf16.msra.mxu0 %v8258_v7 }
 0x3d2   :  { %3935 = vmatprep.subr.bf16.mxu0 %v8264_v47 }
 0x3d4   :  { %3849 = vmatpush1.bf16.msra.mxu1 %v8704_v37 }
 0x3d5   :  { %3850 = vmatprep.subr.bf16.mxu1 %v8710_v11  ;;  %3936 = vmatpush1.bf16.msra.mxu0 %v8272_v13 }
 0x3d6   :  { %3937 = vmatprep.subr.bf16.mxu0 %v8278_v15 }
 0x3d8   :  { %3851 = vmatpush1.bf16.msra.mxu1 %v8718_v4 }
 0x3d9   :  { %3852 = vmatprep.subr.bf16.mxu1 %v10132_v10  ;;  %3938 = vmatpush1.bf16.msra.mxu0 %v8286_v32  ;;  %v8734_v10 = vld [vmem:[%s9797_s2 + $0x14] ss:$24 sps:$4 sm:$0xff]  }
 0x3da   :  { %3939 = vmatprep.subr.bf16.mxu0 %v8292_v46  ;;  %10183 = vst [vmem:[#allocation76_spill] sm:$0xff] %v8734_v10 }
 0x3dc   :  { %3853 = vmatpush1.bf16.msra.mxu1 %v10135_v63  ;;  %v10184_v63 = vld [vmem:[#allocation42_spill] sm:$0xff] }
 0x3dd   :  { %3854 = vmatprep.subr.bf16.mxu1 %v10136_v44  ;;  %3940 = vmatpush1.bf16.msra.mxu0 %v8300_v42  ;;  %v10185_v44 = vld [vmem:[#allocation43_spill] sm:$0xff] }
 0x3de   :  { %3941 = vmatprep.subr.bf16.mxu0 %v8306_v57 }
 0x3e0   :  { %3855 = vmatpush1.bf16.msra.mxu1 %v10139_v54  ;;  %v10187_v54 = vld [vmem:[#allocation14_spill] sm:$0xff] }
 0x3e1   :  { %3952 = vmatprep.subr.bf16.mxu1 %v8313_v0  ;;  %3942 = vmatpush1.bf16.msra.mxu0 %v10182_v18 }
 0x3e2   :  { %3993 = vmatprep.subr.bf16.mxu0 %v8734_v10  ;;  %v10193_v10 = vld [vmem:[#allocation19_spill] sm:$0xff] }
 0x3e3   :  { %3857 = vmatmul.mubr.bf16.vlgmr.msra.gmra.mrb[36].mxu1 %v8529_v60  ;;  %v10194_v60 = vld [vmem:[#allocation20_spill] sm:$0xff] }
 0x3e4   :  { %3953 = vmatpush1.bf16.msra.mxu1 %v10184_v63  ;;  %v10195_v63 = vld [vmem:[#allocation21_spill] sm:$0xff] }
 0x3e5   :  { %3954 = vmatprep.subr.bf16.mxu1 %v10185_v44  ;;  %v10196_v44 = vld [vmem:[#allocation22_spill] sm:$0xff] }
 0x3e8   :  { %3955 = vmatpush1.bf16.msra.mxu1 %v10186_v14  ;;  %v10197_v14 = vld [vmem:[#allocation23_spill] sm:$0xff] }
 0x3e9   :  { %3956 = vmatprep.subr.bf16.mxu1 %v10187_v54  ;;  %v10198_v54 = vld [vmem:[#allocation24_spill] sm:$0xff] }
 0x3ec   :  { %3957 = vmatpush1.bf16.msra.mxu1 %v10188_v28  ;;  %v10199_v28 = vld [vmem:[#allocation25_spill] sm:$0xff] }
 0x3ed   :  { %3958 = vmatprep.subr.bf16.mxu1 %v10189_v39  ;;  %v10200_v39 = vld [vmem:[#allocation26_spill] sm:$0xff] }
 0x3f0   :  { %3959 = vmatpush1.bf16.msra.mxu1 %v10190_v56  ;;  %v10201_v56 = vld [vmem:[#allocation27_spill] sm:$0xff] }
 0x3f1   :  { %3960 = vmatprep.subr.bf16.mxu1 %v10191_v55  ;;  %v10202_v55 = vld [vmem:[#allocation28_spill] sm:$0xff] }
 0x3f4   :  { %3961 = vmatpush1.bf16.msra.mxu1 %v10192_v58  ;;  %v10203_v58 = vld [vmem:[#allocation29_spill] sm:$0xff] }
 0x3f5   :  { %3962 = vmatprep.subr.bf16.mxu1 %v10193_v10  ;;  %v10204_v10 = vld [vmem:[#allocation30_spill] sm:$0xff] }
 0x3f8   :  { %3963 = vmatpush1.bf16.msra.mxu1 %v10194_v60  ;;  %v10205_v60 = vld [vmem:[#allocation31_spill] sm:$0xff] }
 0x3f9   :  { %3964 = vmatprep.subr.bf16.mxu1 %v10195_v63  ;;  %v10206_v63 = vld [vmem:[#allocation32_spill] sm:$0xff] }
 0x3fc   :  { %3965 = vmatpush1.bf16.msra.mxu1 %v10196_v44  ;;  %v10207_v44 = vld [vmem:[#allocation33_spill] sm:$0xff] }
 0x3fd   :  { %3966 = vmatprep.subr.bf16.mxu1 %v10197_v14  ;;  %v10208_v14 = vld [vmem:[#allocation34_spill] sm:$0xff] }
 0x400   :  { %3967 = vmatpush1.bf16.msra.mxu1 %v10198_v54  ;;  %v10209_v54 = vld [vmem:[#allocation35_spill] sm:$0xff] }
 0x401   :  { %3968 = vmatprep.subr.bf16.mxu1 %v10199_v28  ;;  %v10210_v28 = vld [vmem:[#allocation62_spill] sm:$0xff] }
 0x404   :  { %3969 = vmatpush1.bf16.msra.mxu1 %v10200_v39  ;;  %v10211_v39 = vld [vmem:[#allocation63_spill] sm:$0xff] }
 0x405   :  { %3970 = vmatprep.subr.bf16.mxu1 %v10201_v56  ;;  %v10212_v56 = vld [vmem:[#allocation64_spill] sm:$0xff] }
 0x408   :  { %3971 = vmatpush1.bf16.msra.mxu1 %v10202_v55  ;;  %v10213_v55 = vld [vmem:[#allocation65_spill] sm:$0xff] }
 0x409   :  { %3972 = vmatprep.subr.bf16.mxu1 %v10203_v58  ;;  %v10214_v58 = vld [vmem:[#allocation66_spill] sm:$0xff] }
 0x40c   :  { %3973 = vmatpush1.bf16.msra.mxu1 %v10204_v10 }
 0x40d   :  { %3974 = vmatprep.subr.bf16.mxu1 %v10205_v60 }
 0x410   :  { %3975 = vmatpush1.bf16.msra.mxu1 %v10206_v63  ;;  %v8772_v63 = vld [vmem:[%s9797_s2 + $0x4] ss:$24 sps:$4 sm:$0xff]  }
 0x411   :  { %3976 = vmatprep.subr.bf16.mxu1 %v10207_v44  ;;  %10215 = vst [vmem:[#allocation77_spill] sm:$0xff] %v8772_v63 }
 0x414   :  { %3977 = vmatpush1.bf16.msra.mxu1 %v10208_v14  ;;  %v10216_v14 = vld [vmem:[#allocation45_spill] sm:$0xff] }
 0x415   :  { %3978 = vmatprep.subr.bf16.mxu1 %v10209_v54  ;;  %v3734_v44 = vunpack.c.l.bf16 %v10216_v14  ;;  %v10217_v54 = vld [vmem:[#allocation46_spill] sm:$0xff] }
 0x416   :  { %v3736_v60 = vunpack.c.l.bf16 %v10217_v54 }
 0x418   :  { %3979 = vmatpush1.bf16.msra.mxu1 %v10210_v28 }
 0x419   :  { %3980 = vmatprep.subr.bf16.mxu1 %v10211_v39  ;;  %v3735_v39 = vunpack.c.h.bf16 %v10216_v14 }
 0x41c   :  { %3981 = vmatpush1.bf16.msra.mxu1 %v10212_v56  ;;  %v3737_v56 = vunpack.c.h.bf16 %v10217_v54 }
 0x41d   :  { %3982 = vmatprep.subr.bf16.mxu1 %v10213_v55 }
 0x420   :  { %3983 = vmatpush1.bf16.msra.mxu1 %v10214_v58 }
 0x421   :  { %4080 = vmatprep.subr.bf16.mxu1 %v8772_v63 }
 0x476   :  { %v3776_v28 = vpop.f32.mrb[32].mxu1  ;;  %v3817_v10 = vpop.f32.mrb[40].mxu0 }
 0x477   :  { %v3865_v55 = vadd.f32 %v3776_v28, %v3734_v44  ;;  %v3867_v18 = vadd.f32 %v3817_v10, %v3736_v60  ;;  %v3778_v58 = vpop.f32.mrb[33].mxu1  ;;  %v3819_v0 = vpop.f32.mrb[41].mxu0 }
 0x478   :  { %v3866_v57 = vadd.f32 %v3778_v58, %v3735_v39  ;;  %v3868_v42 = vadd.f32 %v3819_v0, %v3737_v56  ;;  %v3780_v46 = vpop.f32.mrb[34].mxu1  ;;  %v3821_v32 = vpop.f32.mrb[42].mxu0 }
 0x479   :  { %v3781_v4 = vpop.f32.mrb[35].mxu1  ;;  %v3822_v63 = vpop.f32.mrb[43].mxu0  ;;  %v3869_v15 = vmul.f32 0.5, %v3865_v55  ;;  %v3871_v14 = vmul.f32 0.5, %v3867_v18 }
 0x47a   :  { %v3870_v13 = vmul.f32 0.5, %v3866_v57  ;;  %v3872_v54 = vmul.f32 0.5, %v3868_v42  ;;  %v10218_v57 = vld [vmem:[#allocation4_spill] sm:$0xff] }
 0x47b   :  { %5992 = vtanh.f32 %v3869_v15  ;;  %v3738_v15 = vunpack.c.l.bf16 %v10218_v57 }
 0x47c   :  { %5994 = vtanh.f32 %v3870_v13 }
 0x47d   :  { %5996 = vtanh.f32 %v3871_v14 }
 0x47e   :  { %5998 = vtanh.f32 %v3872_v54 }
 0x485   :  { %v5993_v11 = vpop.eup %5992 }
 0x486   :  { %v5995_v37 = vpop.eup %5994  ;;  %v3877_v47 = vadd.f32 1.0, %v5993_v11  ;;  %v3739_v11 = vunpack.c.h.bf16 %v10218_v57  ;;  %v8816_v57 = vld [vmem:[%s9797_s2 + $0x30] ss:$24 sps:$4 sm:$0xff]  }
 0x487   :  { %v3878_v7 = vadd.f32 1.0, %v5995_v37 }
 0x488   :  { %v3881_v10 = vmul.f32 0.5, %v3877_v47  ;;  %v5997_v47 = vpop.eup %5996 }
 0x489   :  { %v3882_v32 = vmul.f32 0.5, %v3878_v7  ;;  %v5999_v39 = vpop.eup %5998  ;;  %v3879_v56 = vadd.f32 1.0, %v5997_v47  ;;  %v10219_v47 = vld [vmem:[#allocation7_spill] sm:$0xff] }
 0x48a   :  { %v3880_v55 = vadd.f32 1.0, %v5999_v39  ;;  %v10220_v39 = vld [vmem:[#allocation8_spill] sm:$0xff] }
 0x48b   :  { %v3883_v60 = vmul.f32 0.5, %v3879_v56  ;;  %v10221_v56 = vld [vmem:[#allocation73_spill] sm:$0xff] }
 0x48c   :  { %v3884_v54 = vmul.f32 0.5, %v3880_v55  ;;  %v10222_v55 = vld [vmem:[#allocation74_spill] sm:$0xff] }
 0x4b6   :  { %v3858_v44 = vpop.f32.mrb[36].mxu1 }
 0x4b7   :  { %v3885_v28 = vadd.f32 %v3858_v44, %v8096_v35  ;;  %v3860_v0 = vpop.f32.mrb[37].mxu1 }
 0x4b8   :  { %v3886_v46 = vadd.f32 %v3860_v0, %v8103_v38  ;;  %v3862_v4 = vpop.f32.mrb[38].mxu1 }
 0x4b9   :  { %v3887_v13 = vmul.f32 %v3885_v28, %v3881_v10  ;;  %v3863_v63 = vpop.f32.mrb[39].mxu1 }
 0x4ba   :  { %v3888_v18 = vmul.f32 %v3886_v46, %v3882_v32  ;;  %v8836_v63 = vld [vmem:[%s9797_s2 + $0x94] ss:$24 sps:$4 sm:$0xff]  }
 0x4bb   :  { %v3889_v37 = vadd.f32 %v3887_v13, %v3738_v15  ;;  %v8822_v15 = vld [vmem:[%s9797_s2 + $0x64] ss:$24 sps:$4 sm:$0xff]   ;;  %v8830_v13 = vld [vmem:[%s9797_s2 + $0x60] ss:$24 sps:$4 sm:$0xff]  }
 0x4bc   :  { %v3890_v42 = vadd.f32 %v3888_v18, %v3739_v11  ;;  %v8844_v11 = vld [vmem:[%s9797_s2 + $0x90] ss:$24 sps:$4 sm:$0xff]   ;;  %v8850_v18 = vld [vmem:[%s9797_s2 + $0xc4] ss:$24 sps:$4 sm:$0xff]  }
 0x4bd   :  { %6000 = vtanh.f32 %v3889_v37  ;;  %v8858_v37 = vld [vmem:[%s9797_s2 + $0xc0] ss:$24 sps:$4 sm:$0xff]  }
 0x4be   :  { %6002 = vtanh.f32 %v3890_v42  ;;  %v8867_v42 = vld [vmem:[%s9797_s2 + $0xf0] ss:$24 sps:$4 sm:$0xff]  }
 0x4c7   :  { %v6001_v58 = vpop.eup %6000 }
 0x4c8   :  { %v6003_v7 = vpop.eup %6002  ;;  %v3893_v14 = vsub.f32 %v8521_v23, %v6001_v58  ;;  %v8802_v23 = vld [vmem:[%s9797_s2] ss:$24 sps:$4 sm:$0xff]  }
 0x4c9   :  { %v3894_v44 = vsub.f32 %v8523_v48, %v6003_v7  ;;  %v8808_v48 = vld [vmem:[%s9797_s2 + $0x34] ss:$24 sps:$4 sm:$0xff]  }
 0x4ca   :  { %v3895_v10 = vmul.f32 %v3893_v14, %v3883_v60  ;;  %v10225_v60 = vld [vmem:[#allocation75_spill] sm:$0xff]  ;;  %v8903_v14 = vld [vmem:[%s9797_s2 + $0x2b4] ss:$24 sps:$4 sm:$0xff]  }
 0x4cb   :  { %v3896_v28 = vmul.f32 %v3894_v44, %v3884_v54  ;;  %10226 = vst [vmem:[#allocation45_spill] sm:$0xff] %v8903_v14  ;;  %v10227_v54 = vld [vmem:[#allocation9_spill] sm:$0xff]  ;;  %v10228_v44 = vld [vmem:[#allocation10_spill] sm:$0xff] }
 0x4cc   :  { %v8785_v0 = vadd.f32 %v6001_v58, %v3895_v10  ;;  %v10223_v58 = vld [vmem:[#allocation38_spill] sm:$0xff] }
 0x4cd   :  { %v8787_v32 = vadd.f32 %v6003_v7, %v3896_v28  ;;  %v10224_v7 = vld [vmem:[#allocation39_spill] sm:$0xff]  ;;  %v8911_v10 = vld [vmem:[%s9797_s2 + $0x2b0] ss:$24 sps:$4 sm:$0xff]  }
 0x4ce   :  { %v8793_v4 = vpack.c.bf16 %v8785_v0, %v8785_v0  ;;  %10229 = vst [vmem:[#allocation46_spill] sm:$0xff] %v8911_v10  ;;  %v8917_v28 = vld [vmem:[%s9797_s2 + $0x2e4] ss:$24 sps:$4 sm:$0xff]  }
 0x4cf   :  { %v3910_v46 = vpack.c.bf16 %v8787_v32, %v8787_v32  ;;  %10230 = vst [vmem:[#allocation4_spill] sm:$0xff] %v8917_v28 }
 0x4d1   :  { %3943 = vmatprep.mubr.bf16.mxu0 %v3910_v46  ;;  %3984 = vmatprep.mubr.bf16.mxu1 %v3910_v46 }
 0x4d2   :  { %3944 = vmatmul.mubr.bf16.vlgmr.msra.gmra.mrb[44].mxu0 %v8793_v4  ;;  %3985 = vmatmul.mubr.bf16.vlgmr.msra.gmra.mrb[40].mxu1 %v8793_v4 }
 0x4d3   :  { %3994 = vmatpush1.bf16.msra.mxu0 %v8536_v17  ;;  %4025 = vmatprep.mubr.bf16.mxu0 %v3910_v46  ;;  %v10231_v46 = vld [vmem:[#allocation40_spill] sm:$0xff] }
 0x4d4   :  { %3995 = vmatprep.subr.bf16.mxu0 %v8542_v62  ;;  %4081 = vmatpush1.bf16.msra.mxu1 %v8802_v23 }
 0x4d5   :  { %4082 = vmatprep.subr.bf16.mxu1 %v8808_v48 }
 0x4d7   :  { %3996 = vmatpush1.bf16.msra.mxu0 %v8550_v51 }
 0x4d8   :  { %3997 = vmatprep.subr.bf16.mxu0 %v8556_v1  ;;  %4083 = vmatpush1.bf16.msra.mxu1 %v8816_v57 }
 0x4d9   :  { %4084 = vmatprep.subr.bf16.mxu1 %v8822_v15 }
 0x4db   :  { %3998 = vmatpush1.bf16.msra.mxu0 %v8564_v59 }
 0x4dc   :  { %3999 = vmatprep.subr.bf16.mxu0 %v8570_v36  ;;  %4085 = vmatpush1.bf16.msra.mxu1 %v8830_v13 }
 0x4dd   :  { %4086 = vmatprep.subr.bf16.mxu1 %v8836_v63 }
 0x4df   :  { %4000 = vmatpush1.bf16.msra.mxu0 %v8578_v41 }
 0x4e0   :  { %4001 = vmatprep.subr.bf16.mxu0 %v8584_v61  ;;  %4087 = vmatpush1.bf16.msra.mxu1 %v8844_v11 }
 0x4e1   :  { %4088 = vmatprep.subr.bf16.mxu1 %v8850_v18 }
 0x4e3   :  { %4002 = vmatpush1.bf16.msra.mxu0 %v8592_v52 }
 0x4e4   :  { %4003 = vmatprep.subr.bf16.mxu0 %v8598_v53  ;;  %4089 = vmatpush1.bf16.msra.mxu1 %v8858_v37 }
 0x4e5   :  { %4090 = vmatprep.subr.bf16.mxu1 %v8171_v5 }
 0x4e7   :  { %4004 = vmatpush1.bf16.msra.mxu0 %v8606_v20 }
 0x4e8   :  { %4005 = vmatprep.subr.bf16.mxu0 %v8612_v31  ;;  %4091 = vmatpush1.bf16.msra.mxu1 %v8867_v42 }
 0x4e9   :  { %4092 = vmatprep.subr.bf16.mxu1 %v8180_v8 }
 0x4eb   :  { %4006 = vmatpush1.bf16.msra.mxu0 %v8620_v2 }
 0x4ec   :  { %4007 = vmatprep.subr.bf16.mxu0 %v8626_v33  ;;  %4093 = vmatpush1.bf16.msra.mxu1 %v8188_v29 }
 0x4ed   :  { %4094 = vmatprep.subr.bf16.mxu1 %v8194_v49 }
 0x4ef   :  { %4008 = vmatpush1.bf16.msra.mxu0 %v8634_v43 }
 0x4f0   :  { %4009 = vmatprep.subr.bf16.mxu0 %v8640_v26  ;;  %4095 = vmatpush1.bf16.msra.mxu1 %v8202_v19 }
 0x4f1   :  { %4096 = vmatprep.subr.bf16.mxu1 %v8208_v21 }
 0x4f3   :  { %4010 = vmatpush1.bf16.msra.mxu0 %v8648_v9 }
 0x4f4   :  { %4011 = vmatprep.subr.bf16.mxu0 %v8654_v45  ;;  %4097 = vmatpush1.bf16.msra.mxu1 %v8216_v24 }
 0x4f5   :  { %4098 = vmatprep.subr.bf16.mxu1 %v8222_v30 }
 0x4f7   :  { %4012 = vmatpush1.bf16.msra.mxu0 %v8662_v27 }
 0x4f8   :  { %4013 = vmatprep.subr.bf16.mxu0 %v8668_v40  ;;  %4099 = vmatpush1.bf16.msra.mxu1 %v8230_v12 }
 0x4f9   :  { %4100 = vmatprep.subr.bf16.mxu1 %v8236_v50 }
 0x4fb   :  { %4014 = vmatpush1.bf16.msra.mxu0 %v8676_v6 }
 0x4fc   :  { %4015 = vmatprep.subr.bf16.mxu0 %v8682_v22  ;;  %4101 = vmatpush1.bf16.msra.mxu1 %v8244_v3 }
 0x4fd   :  { %4102 = vmatprep.subr.bf16.mxu1 %v8250_v16 }
 0x4ff   :  { %4016 = vmatpush1.bf16.msra.mxu0 %v8690_v34 }
 0x500   :  { %4017 = vmatprep.subr.bf16.mxu0 %v8696_v25  ;;  %4103 = vmatpush1.bf16.msra.mxu1 %v10219_v47 }
 0x501   :  { %4104 = vmatprep.subr.bf16.mxu1 %v10220_v39 }
 0x503   :  { %4018 = vmatpush1.bf16.msra.mxu0 %v10221_v56  ;;  %v10270_v56 = vld [vmem:[#allocation48_spill] sm:$0xff] }
 0x504   :  { %4019 = vmatprep.subr.bf16.mxu0 %v10222_v55  ;;  %4105 = vmatpush1.bf16.msra.mxu1 %v10223_v58  ;;  %v10241_v58 = vld [vmem:[#allocation44_spill] sm:$0xff]  ;;  %v10242_v55 = vld [vmem:[#allocation15_spill] sm:$0xff] }
 0x505   :  { %4106 = vmatprep.subr.bf16.mxu1 %v10224_v7  ;;  %v10240_v7 = vld [vmem:[#allocation14_spill] sm:$0xff] }
 0x507   :  { %4020 = vmatpush1.bf16.msra.mxu0 %v10225_v60  ;;  %v10236_v60 = vld [vmem:[#allocation76_spill] sm:$0xff] }
 0x508   :  { %4021 = vmatprep.subr.bf16.mxu0 %v8903_v14  ;;  %4107 = vmatpush1.bf16.msra.mxu1 %v10227_v54  ;;  %v10232_v14 = vld [vmem:[#allocation41_spill] sm:$0xff]  ;;  %v10234_v54 = vld [vmem:[#allocation11_spill] sm:$0xff] }
 0x509   :  { %4108 = vmatprep.subr.bf16.mxu1 %v10228_v44  ;;  %v8925_v44 = vld [vmem:[%s9797_s2 + $0x2e0] ss:$24 sps:$4 sm:$0xff]  }
 0x50a   :  { %10233 = vst [vmem:[#allocation78_spill] sm:$0xff] %v8925_v44 }
 0x50b   :  { %4022 = vmatpush1.bf16.msra.mxu0 %v8911_v10  ;;  %v10235_v10 = vld [vmem:[#allocation12_spill] sm:$0xff] }
 0x50c   :  { %4023 = vmatprep.subr.bf16.mxu0 %v8917_v28  ;;  %4109 = vmatpush1.bf16.msra.mxu1 %v10231_v46  ;;  %v10237_v28 = vld [vmem:[#allocation42_spill] sm:$0xff]  ;;  %v10238_v46 = vld [vmem:[#allocation43_spill] sm:$0xff] }
 0x50d   :  { %4110 = vmatprep.subr.bf16.mxu1 %v10232_v14  ;;  %v10239_v14 = vld [vmem:[#allocation13_spill] sm:$0xff] }
 0x50f   :  { %4024 = vmatpush1.bf16.msra.mxu0 %v8925_v44  ;;  %v10243_v44 = vld [vmem:[#allocation16_spill] sm:$0xff] }
 0x510   :  { %4121 = vmatprep.subr.bf16.mxu0 %v10234_v54  ;;  %4111 = vmatpush1.bf16.msra.mxu1 %v10235_v10  ;;  %v10244_v54 = vld [vmem:[#allocation17_spill] sm:$0xff]  ;;  %v10245_v10 = vld [vmem:[#allocation18_spill] sm:$0xff] }
 0x511   :  { %4162 = vmatprep.subr.bf16.mxu1 %v10236_v60  ;;  %v10246_v60 = vld [vmem:[#allocation19_spill] sm:$0xff] }
 0x512   :  { %4026 = vmatmul.mubr.bf16.vlgmr.msra.gmra.mrb[48].mxu0 %v8793_v4  ;;  %v10247_v4 = vld [vmem:[#allocation20_spill] sm:$0xff] }
 0x513   :  { %4122 = vmatpush1.bf16.msra.mxu0 %v10237_v28  ;;  %v10248_v28 = vld [vmem:[#allocation21_spill] sm:$0xff] }
 0x514   :  { %4123 = vmatprep.subr.bf16.mxu0 %v10238_v46  ;;  %v10249_v46 = vld [vmem:[#allocation22_spill] sm:$0xff] }
 0x517   :  { %4124 = vmatpush1.bf16.msra.mxu0 %v10239_v14  ;;  %v10250_v14 = vld [vmem:[#allocation23_spill] sm:$0xff] }
 0x518   :  { %4125 = vmatprep.subr.bf16.mxu0 %v10240_v7  ;;  %v10251_v7 = vld [vmem:[#allocation24_spill] sm:$0xff] }
 0x51b   :  { %4126 = vmatpush1.bf16.msra.mxu0 %v10241_v58  ;;  %v10252_v58 = vld [vmem:[#allocation25_spill] sm:$0xff] }
 0x51c   :  { %4127 = vmatprep.subr.bf16.mxu0 %v10242_v55  ;;  %v10253_v55 = vld [vmem:[#allocation26_spill] sm:$0xff] }
 0x51f   :  { %4128 = vmatpush1.bf16.msra.mxu0 %v10243_v44  ;;  %v10254_v44 = vld [vmem:[#allocation27_spill] sm:$0xff] }
 0x520   :  { %4129 = vmatprep.subr.bf16.mxu0 %v10244_v54  ;;  %v10255_v54 = vld [vmem:[#allocation28_spill] sm:$0xff] }
 0x523   :  { %4130 = vmatpush1.bf16.msra.mxu0 %v10245_v10  ;;  %v10256_v10 = vld [vmem:[#allocation29_spill] sm:$0xff] }
 0x524   :  { %4131 = vmatprep.subr.bf16.mxu0 %v10246_v60  ;;  %v10257_v60 = vld [vmem:[#allocation30_spill] sm:$0xff] }
 0x527   :  { %4132 = vmatpush1.bf16.msra.mxu0 %v10247_v4  ;;  %v10258_v4 = vld [vmem:[#allocation31_spill] sm:$0xff] }
 0x528   :  { %4133 = vmatprep.subr.bf16.mxu0 %v10248_v28  ;;  %v10259_v28 = vld [vmem:[#allocation32_spill] sm:$0xff] }
 0x52b   :  { %4134 = vmatpush1.bf16.msra.mxu0 %v10249_v46  ;;  %v10260_v46 = vld [vmem:[#allocation33_spill] sm:$0xff] }
 0x52c   :  { %4135 = vmatprep.subr.bf16.mxu0 %v10250_v14  ;;  %v10261_v14 = vld [vmem:[#allocation34_spill] sm:$0xff] }
 0x52f   :  { %4136 = vmatpush1.bf16.msra.mxu0 %v10251_v7  ;;  %v10262_v7 = vld [vmem:[#allocation35_spill] sm:$0xff] }
 0x530   :  { %4137 = vmatprep.subr.bf16.mxu0 %v10252_v58  ;;  %v10263_v58 = vld [vmem:[#allocation62_spill] sm:$0xff] }
 0x533   :  { %4138 = vmatpush1.bf16.msra.mxu0 %v10253_v55  ;;  %v10264_v55 = vld [vmem:[#allocation63_spill] sm:$0xff] }
 0x534   :  { %4139 = vmatprep.subr.bf16.mxu0 %v10254_v44  ;;  %v10265_v44 = vld [vmem:[#allocation64_spill] sm:$0xff] }
 0x537   :  { %4140 = vmatpush1.bf16.msra.mxu0 %v10255_v54  ;;  %v10266_v54 = vld [vmem:[#allocation65_spill] sm:$0xff] }
 0x538   :  { %4141 = vmatprep.subr.bf16.mxu0 %v10256_v10  ;;  %v10267_v10 = vld [vmem:[#allocation66_spill] sm:$0xff] }
 0x53b   :  { %4142 = vmatpush1.bf16.msra.mxu0 %v10257_v60  ;;  %v10268_v60 = vld [vmem:[#allocation77_spill] sm:$0xff] }
 0x53c   :  { %4143 = vmatprep.subr.bf16.mxu0 %v10258_v4  ;;  %v10269_v4 = vld [vmem:[#allocation47_spill] sm:$0xff] }
 0x53f   :  { %4144 = vmatpush1.bf16.msra.mxu0 %v10259_v28  ;;  %v3903_v28 = vunpack.c.l.bf16 %v10269_v4 }
 0x540   :  { %4145 = vmatprep.subr.bf16.mxu0 %v10260_v46  ;;  %v3905_v46 = vunpack.c.l.bf16 %v10270_v56 }
 0x543   :  { %4146 = vmatpush1.bf16.msra.mxu0 %v10261_v14 }
 0x544   :  { %4147 = vmatprep.subr.bf16.mxu0 %v10262_v7  ;;  %v3904_v7 = vunpack.c.h.bf16 %v10269_v4 }
 0x547   :  { %4148 = vmatpush1.bf16.msra.mxu0 %v10263_v58  ;;  %v3906_v58 = vunpack.c.h.bf16 %v10270_v56 }
 0x548   :  { %4149 = vmatprep.subr.bf16.mxu0 %v10264_v55 }
 0x54b   :  { %4150 = vmatpush1.bf16.msra.mxu0 %v10265_v44 }
 0x54c   :  { %4151 = vmatprep.subr.bf16.mxu0 %v10266_v54 }
 0x54f   :  { %4152 = vmatpush1.bf16.msra.mxu0 %v10267_v10 }
 0x550   :  { %4249 = vmatprep.subr.bf16.mxu0 %v10268_v60 }
 0x5a5   :  { %v3945_v39 = vpop.f32.mrb[44].mxu0  ;;  %v3986_v14 = vpop.f32.mrb[40].mxu1 }
 0x5a6   :  { %v4034_v47 = vadd.f32 %v3945_v39, %v3903_v28  ;;  %v4036_v55 = vadd.f32 %v3986_v14, %v3905_v46  ;;  %v3947_v25 = vpop.f32.mrb[45].mxu0  ;;  %v3988_v44 = vpop.f32.mrb[41].mxu1 }
 0x5a7   :  { %v4035_v34 = vadd.f32 %v3947_v25, %v3904_v7  ;;  %v4037_v54 = vadd.f32 %v3988_v44, %v3906_v58  ;;  %v3949_v16 = vpop.f32.mrb[46].mxu0  ;;  %v3990_v10 = vpop.f32.mrb[42].mxu1 }
 0x5a8   :  { %v3950_v3 = vpop.f32.mrb[47].mxu0  ;;  %v3991_v60 = vpop.f32.mrb[43].mxu1  ;;  %v4038_v22 = vmul.f32 0.5, %v4034_v47  ;;  %v4040_v4 = vmul.f32 0.5, %v4036_v55 }
 0x5a9   :  { %v4039_v6 = vmul.f32 0.5, %v4035_v34  ;;  %v4041_v56 = vmul.f32 0.5, %v4037_v54  ;;  %v10271_v34 = vld [vmem:[#allocation57_spill] sm:$0xff] }
 0x5aa   :  { %6004 = vtanh.f32 %v4038_v22  ;;  %v3907_v22 = vunpack.c.l.bf16 %v10271_v34 }
 0x5ab   :  { %6006 = vtanh.f32 %v4039_v6 }
 0x5ac   :  { %6008 = vtanh.f32 %v4040_v4 }
 0x5ad   :  { %6010 = vtanh.f32 %v4041_v56 }
 0x5b4   :  { %v6005_v50 = vpop.eup %6004 }
 0x5b5   :  { %v6007_v12 = vpop.eup %6006  ;;  %v4046_v40 = vadd.f32 1.0, %v6005_v50  ;;  %v3908_v50 = vunpack.c.h.bf16 %v10271_v34  ;;  %v10280_v34 = vld [vmem:[#allocation71_spill] sm:$0xff] }
 0x5b6   :  { %v4047_v27 = vadd.f32 1.0, %v6007_v12 }
 0x5b7   :  { %v4050_v14 = vmul.f32 0.5, %v4046_v40  ;;  %v6009_v40 = vpop.eup %6008 }
 0x5b8   :  { %v4051_v16 = vmul.f32 0.5, %v4047_v27  ;;  %v6011_v54 = vpop.eup %6010  ;;  %v4048_v44 = vadd.f32 1.0, %v6009_v40  ;;  %v10290_v40 = vld [vmem:[#allocation9_spill] sm:$0xff] }
 0x5b9   :  { %v4049_v10 = vadd.f32 1.0, %v6011_v54  ;;  %v10291_v54 = vld [vmem:[#allocation10_spill] sm:$0xff] }
 0x5ba   :  { %v4052_v46 = vmul.f32 0.5, %v4048_v44  ;;  %v10292_v44 = vld [vmem:[#allocation46_spill] sm:$0xff] }
 0x5bb   :  { %v4053_v56 = vmul.f32 0.5, %v4049_v10  ;;  %v10293_v10 = vld [vmem:[#allocation4_spill] sm:$0xff] }
 0x5e5   :  { %v4027_v39 = vpop.f32.mrb[48].mxu0 }
 0x5e6   :  { %v4054_v25 = vadd.f32 %v4027_v39, %v8096_v35  ;;  %v4029_v58 = vpop.f32.mrb[49].mxu0 }
 0x5e7   :  { %v4055_v3 = vadd.f32 %v4029_v58, %v8103_v38  ;;  %v4031_v47 = vpop.f32.mrb[50].mxu0 }
 0x5e8   :  { %v4056_v6 = vmul.f32 %v4054_v25, %v4050_v14  ;;  %v4032_v7 = vpop.f32.mrb[51].mxu0 }
 0x5e9   :  { %v4057_v55 = vmul.f32 %v4055_v3, %v4051_v16  ;;  %v10285_v7 = vld [vmem:[#allocation74_spill] sm:$0xff] }
 0x5ea   :  { %v4058_v12 = vadd.f32 %v4056_v6, %v3907_v22  ;;  %v10283_v22 = vld [vmem:[#allocation8_spill] sm:$0xff]  ;;  %v10284_v6 = vld [vmem:[#allocation73_spill] sm:$0xff] }
 0x5eb   :  { %v4059_v60 = vadd.f32 %v4057_v55, %v3908_v50  ;;  %v10286_v50 = vld [vmem:[#allocation38_spill] sm:$0xff]  ;;  %v10287_v55 = vld [vmem:[#allocation39_spill] sm:$0xff] }
 0x5ec   :  { %6012 = vtanh.f32 %v4058_v12  ;;  %v10288_v12 = vld [vmem:[#allocation75_spill] sm:$0xff] }
 0x5ed   :  { %6014 = vtanh.f32 %v4059_v60  ;;  %v10289_v60 = vld [vmem:[#allocation45_spill] sm:$0xff] }
 0x5f6   :  { %v6013_v28 = vpop.eup %6012 }
 0x5f7   :  { %v6015_v27 = vpop.eup %6014  ;;  %v4062_v4 = vsub.f32 %v8785_v0, %v6013_v28  ;;  %v10276_v0 = vld [vmem:[#allocation69_spill] sm:$0xff] }
 0x5f8   :  { %v4063_v39 = vsub.f32 %v8787_v32, %v6015_v27  ;;  %v10279_v32 = vld [vmem:[#allocation37_spill] sm:$0xff] }
 0x5f9   :  { %v4064_v14 = vmul.f32 %v4062_v4, %v4052_v46  ;;  %v10296_v46 = vld [vmem:[#allocation78_spill] sm:$0xff]  ;;  %v10297_v4 = vld [vmem:[#allocation11_spill] sm:$0xff] }
 0x5fa   :  { %v4065_v25 = vmul.f32 %v4063_v39, %v4053_v56  ;;  %v10298_v56 = vld [vmem:[#allocation12_spill] sm:$0xff] }
 0x5fb   :  { %v8974_v58 = vadd.f32 %v6013_v28, %v4064_v14  ;;  %v10294_v28 = vld [vmem:[#allocation40_spill] sm:$0xff]  ;;  %v10300_v14 = vld [vmem:[#allocation42_spill] sm:$0xff] }
 0x5fc   :  { %v8976_v16 = vadd.f32 %v6015_v27, %v4065_v25  ;;  %v10295_v27 = vld [vmem:[#allocation41_spill] sm:$0xff]  ;;  %v10299_v39 = vld [vmem:[#allocation76_spill] sm:$0xff]  ;;  %v10301_v25 = vld [vmem:[#allocation43_spill] sm:$0xff] }
 0x5fd   :  { %v8982_v47 = vpack.c.bf16 %v8974_v58, %v8974_v58 }
 0x5fe   :  { %v4079_v3 = vpack.c.bf16 %v8976_v16, %v8976_v16 }
 0x600   :  { %4112 = vmatprep.mubr.bf16.mxu1 %v4079_v3  ;;  %4153 = vmatprep.mubr.bf16.mxu0 %v4079_v3 }
 0x601   :  { %4113 = vmatmul.mubr.bf16.vlgmr.msra.gmra.mrb[44].mxu1 %v8982_v47  ;;  %4154 = vmatmul.mubr.bf16.vlgmr.msra.gmra.mrb[52].mxu0 %v8982_v47 }
 0x602   :  { %4163 = vmatpush1.bf16.msra.mxu1 %v8536_v17  ;;  %4194 = vmatprep.mubr.bf16.mxu1 %v4079_v3  ;;  %v10302_v3 = vld [vmem:[#allocation13_spill] sm:$0xff] }
 0x603   :  { %4164 = vmatprep.subr.bf16.mxu1 %v8542_v62  ;;  %4250 = vmatpush1.bf16.msra.mxu0 %v8802_v23 }
 0x604   :  { %4251 = vmatprep.subr.bf16.mxu0 %v8808_v48 }
 0x606   :  { %4165 = vmatpush1.bf16.msra.mxu1 %v8550_v51 }
 0x607   :  { %4166 = vmatprep.subr.bf16.mxu1 %v8556_v1  ;;  %4252 = vmatpush1.bf16.msra.mxu0 %v8816_v57 }
 0x608   :  { %4253 = vmatprep.subr.bf16.mxu0 %v8822_v15 }
 0x60a   :  { %4167 = vmatpush1.bf16.msra.mxu1 %v8564_v59 }
 0x60b   :  { %4168 = vmatprep.subr.bf16.mxu1 %v8570_v36  ;;  %4254 = vmatpush1.bf16.msra.mxu0 %v8830_v13 }
 0x60c   :  { %4255 = vmatprep.subr.bf16.mxu0 %v8836_v63 }
 0x60e   :  { %4169 = vmatpush1.bf16.msra.mxu1 %v8578_v41 }
 0x60f   :  { %4170 = vmatprep.subr.bf16.mxu1 %v8584_v61  ;;  %4256 = vmatpush1.bf16.msra.mxu0 %v8844_v11 }
 0x610   :  { %4257 = vmatprep.subr.bf16.mxu0 %v8850_v18 }
 0x612   :  { %4171 = vmatpush1.bf16.msra.mxu1 %v8592_v52 }
 0x613   :  { %4172 = vmatprep.subr.bf16.mxu1 %v8598_v53  ;;  %4258 = vmatpush1.bf16.msra.mxu0 %v8858_v37 }
 0x614   :  { %4259 = vmatprep.subr.bf16.mxu0 %v8171_v5  ;;  %v10272_v5 = vld [vmem:[#allocation67_spill] sm:$0xff] }
 0x616   :  { %4173 = vmatpush1.bf16.msra.mxu1 %v8606_v20 }
 0x617   :  { %4174 = vmatprep.subr.bf16.mxu1 %v8612_v31  ;;  %4260 = vmatpush1.bf16.msra.mxu0 %v8867_v42 }
 0x618   :  { %4261 = vmatprep.subr.bf16.mxu0 %v8180_v8  ;;  %v10273_v8 = vld [vmem:[#allocation68_spill] sm:$0xff] }
 0x61a   :  { %4175 = vmatpush1.bf16.msra.mxu1 %v8620_v2 }
 0x61b   :  { %4176 = vmatprep.subr.bf16.mxu1 %v8626_v33  ;;  %4262 = vmatpush1.bf16.msra.mxu0 %v8188_v29  ;;  %v10274_v29 = vld [vmem:[#allocation5_spill] sm:$0xff] }
 0x61c   :  { %4263 = vmatprep.subr.bf16.mxu0 %v8194_v49  ;;  %v10275_v49 = vld [vmem:[#allocation6_spill] sm:$0xff] }
 0x61e   :  { %4177 = vmatpush1.bf16.msra.mxu1 %v8634_v43 }
 0x61f   :  { %4178 = vmatprep.subr.bf16.mxu1 %v8640_v26  ;;  %4264 = vmatpush1.bf16.msra.mxu0 %v8202_v19  ;;  %v10277_v19 = vld [vmem:[#allocation70_spill] sm:$0xff] }
 0x620   :  { %4265 = vmatprep.subr.bf16.mxu0 %v8208_v21  ;;  %v10278_v21 = vld [vmem:[#allocation36_spill] sm:$0xff] }
 0x622   :  { %4179 = vmatpush1.bf16.msra.mxu1 %v8648_v9 }
 0x623   :  { %4180 = vmatprep.subr.bf16.mxu1 %v8654_v45  ;;  %4266 = vmatpush1.bf16.msra.mxu0 %v8216_v24  ;;  %v10281_v24 = vld [vmem:[#allocation72_spill] sm:$0xff] }
 0x624   :  { %4267 = vmatprep.subr.bf16.mxu0 %v8222_v30  ;;  %v10282_v30 = vld [vmem:[#allocation7_spill] sm:$0xff] }
 0x626   :  { %4181 = vmatpush1.bf16.msra.mxu1 %v10272_v5 }
 0x627   :  { %4182 = vmatprep.subr.bf16.mxu1 %v10273_v8  ;;  %4268 = vmatpush1.bf16.msra.mxu0 %v10274_v29  ;;  %v10303_v29 = vld [vmem:[#allocation14_spill] sm:$0xff] }
 0x628   :  { %4269 = vmatprep.subr.bf16.mxu0 %v10275_v49  ;;  %v10304_v49 = vld [vmem:[#allocation44_spill] sm:$0xff] }
 0x62a   :  { %4183 = vmatpush1.bf16.msra.mxu1 %v10276_v0 }
 0x62b   :  { %4184 = vmatprep.subr.bf16.mxu1 %v10277_v19  ;;  %4270 = vmatpush1.bf16.msra.mxu0 %v10278_v21  ;;  %v10305_v21 = vld [vmem:[#allocation15_spill] sm:$0xff] }
 0x62c   :  { %4271 = vmatprep.subr.bf16.mxu0 %v10279_v32  ;;  %v10306_v32 = vld [vmem:[#allocation16_spill] sm:$0xff] }
 0x62e   :  { %4185 = vmatpush1.bf16.msra.mxu1 %v10280_v34 }
 0x62f   :  { %4186 = vmatprep.subr.bf16.mxu1 %v10281_v24  ;;  %4272 = vmatpush1.bf16.msra.mxu0 %v10282_v30  ;;  %v10307_v30 = vld [vmem:[#allocation17_spill] sm:$0xff] }
 0x630   :  { %4273 = vmatprep.subr.bf16.mxu0 %v10283_v22  ;;  %v10308_v22 = vld [vmem:[#allocation18_spill] sm:$0xff] }
 0x632   :  { %4187 = vmatpush1.bf16.msra.mxu1 %v10284_v6 }
 0x633   :  { %4188 = vmatprep.subr.bf16.mxu1 %v10285_v7  ;;  %4274 = vmatpush1.bf16.msra.mxu0 %v10286_v50  ;;  %v10309_v50 = vld [vmem:[#allocation19_spill] sm:$0xff] }
 0x634   :  { %4275 = vmatprep.subr.bf16.mxu0 %v10287_v55  ;;  %v10311_v55 = vld [vmem:[#allocation21_spill] sm:$0xff] }
 0x636   :  { %4189 = vmatpush1.bf16.msra.mxu1 %v10288_v12 }
 0x637   :  { %4190 = vmatprep.subr.bf16.mxu1 %v10289_v60  ;;  %4276 = vmatpush1.bf16.msra.mxu0 %v10290_v40  ;;  %v10312_v40 = vld [vmem:[#allocation22_spill] sm:$0xff] }
 0x638   :  { %4277 = vmatprep.subr.bf16.mxu0 %v10291_v54  ;;  %v10313_v54 = vld [vmem:[#allocation23_spill] sm:$0xff] }
 0x63a   :  { %4191 = vmatpush1.bf16.msra.mxu1 %v10292_v44 }
 0x63b   :  { %4192 = vmatprep.subr.bf16.mxu1 %v10293_v10  ;;  %4278 = vmatpush1.bf16.msra.mxu0 %v10294_v28  ;;  %v10314_v28 = vld [vmem:[#allocation24_spill] sm:$0xff] }
 0x63c   :  { %4279 = vmatprep.subr.bf16.mxu0 %v10295_v27  ;;  %v10315_v27 = vld [vmem:[#allocation25_spill] sm:$0xff] }
 0x63e   :  { %4193 = vmatpush1.bf16.msra.mxu1 %v10296_v46 }
 0x63f   :  { %4290 = vmatprep.subr.bf16.mxu1 %v10297_v4  ;;  %4280 = vmatpush1.bf16.msra.mxu0 %v10298_v56  ;;  %v10316_v4 = vld [vmem:[#allocation26_spill] sm:$0xff]  ;;  %v10317_v56 = vld [vmem:[#allocation27_spill] sm:$0xff] }
 0x640   :  { %4331 = vmatprep.subr.bf16.mxu0 %v10299_v39 }
 0x641   :  { %4195 = vmatmul.mubr.bf16.vlgmr.msra.gmra.mrb[48].mxu1 %v8982_v47  ;;  %v10310_v47 = vld [vmem:[#allocation20_spill] sm:$0xff] }
 0x642   :  { %4291 = vmatpush1.bf16.msra.mxu1 %v10300_v14  ;;  %v10318_v14 = vld [vmem:[#allocation28_spill] sm:$0xff] }
 0x643   :  { %4292 = vmatprep.subr.bf16.mxu1 %v10301_v25  ;;  %v10319_v25 = vld [vmem:[#allocation29_spill] sm:$0xff] }
 0x646   :  { %4293 = vmatpush1.bf16.msra.mxu1 %v10302_v3  ;;  %v10320_v3 = vld [vmem:[#allocation30_spill] sm:$0xff] }
 0x647   :  { %4294 = vmatprep.subr.bf16.mxu1 %v10303_v29  ;;  %v10321_v29 = vld [vmem:[#allocation31_spill] sm:$0xff] }
 0x64a   :  { %4295 = vmatpush1.bf16.msra.mxu1 %v10304_v49  ;;  %v10322_v49 = vld [vmem:[#allocation32_spill] sm:$0xff] }
 0x64b   :  { %4296 = vmatprep.subr.bf16.mxu1 %v10305_v21  ;;  %v10323_v21 = vld [vmem:[#allocation33_spill] sm:$0xff] }
 0x64e   :  { %4297 = vmatpush1.bf16.msra.mxu1 %v10306_v32  ;;  %v10324_v32 = vld [vmem:[#allocation34_spill] sm:$0xff] }
 0x64f   :  { %4298 = vmatprep.subr.bf16.mxu1 %v10307_v30  ;;  %v10325_v30 = vld [vmem:[#allocation35_spill] sm:$0xff] }
 0x652   :  { %4299 = vmatpush1.bf16.msra.mxu1 %v10308_v22  ;;  %v10326_v22 = vld [vmem:[#allocation62_spill] sm:$0xff] }
 0x653   :  { %4300 = vmatprep.subr.bf16.mxu1 %v10309_v50  ;;  %v10327_v50 = vld [vmem:[#allocation63_spill] sm:$0xff] }
 0x656   :  { %4301 = vmatpush1.bf16.msra.mxu1 %v10310_v47  ;;  %v10328_v47 = vld [vmem:[#allocation64_spill] sm:$0xff] }
 0x657   :  { %4302 = vmatprep.subr.bf16.mxu1 %v10311_v55  ;;  %v10329_v55 = vld [vmem:[#allocation65_spill] sm:$0xff] }
 0x65a   :  { %4303 = vmatpush1.bf16.msra.mxu1 %v10312_v40  ;;  %v10330_v40 = vld [vmem:[#allocation66_spill] sm:$0xff] }
 0x65b   :  { %4304 = vmatprep.subr.bf16.mxu1 %v10313_v54  ;;  %v10331_v54 = vld [vmem:[#allocation77_spill] sm:$0xff] }
 0x65e   :  { %4305 = vmatpush1.bf16.msra.mxu1 %v10314_v28  ;;  %v10332_v28 = vld [vmem:[#allocation49_spill] sm:$0xff] }
 0x65f   :  { %4306 = vmatprep.subr.bf16.mxu1 %v10315_v27  ;;  %v4072_v27 = vunpack.c.l.bf16 %v10332_v28 }
 0x662   :  { %4307 = vmatpush1.bf16.msra.mxu1 %v10316_v4  ;;  %v10333_v4 = vld [vmem:[#allocation50_spill] sm:$0xff] }
 0x663   :  { %4308 = vmatprep.subr.bf16.mxu1 %v10317_v56  ;;  %v4074_v56 = vunpack.c.l.bf16 %v10333_v4 }
 0x666   :  { %4309 = vmatpush1.bf16.msra.mxu1 %v10318_v14 }
 0x667   :  { %4310 = vmatprep.subr.bf16.mxu1 %v10319_v25 }
 0x66a   :  { %4311 = vmatpush1.bf16.msra.mxu1 %v10320_v3  ;;  %v4073_v3 = vunpack.c.h.bf16 %v10332_v28 }
 0x66b   :  { %4312 = vmatprep.subr.bf16.mxu1 %v10321_v29  ;;  %v4075_v29 = vunpack.c.h.bf16 %v10333_v4 }
 0x66e   :  { %4313 = vmatpush1.bf16.msra.mxu1 %v10322_v49 }
 0x66f   :  { %4314 = vmatprep.subr.bf16.mxu1 %v10323_v21 }
 0x672   :  { %4315 = vmatpush1.bf16.msra.mxu1 %v10324_v32 }
 0x673   :  { %4316 = vmatprep.subr.bf16.mxu1 %v10325_v30 }
 0x676   :  { %4317 = vmatpush1.bf16.msra.mxu1 %v10326_v22 }
 0x677   :  { %4318 = vmatprep.subr.bf16.mxu1 %v10327_v50 }
 0x67a   :  { %4319 = vmatpush1.bf16.msra.mxu1 %v10328_v47 }
 0x67b   :  { %4320 = vmatprep.subr.bf16.mxu1 %v10329_v55 }
 0x67e   :  { %4321 = vmatpush1.bf16.msra.mxu1 %v10330_v40 }
 0x67f   :  { %4418 = vmatprep.subr.bf16.mxu1 %v10331_v54 }
 0x6d4   :  { %v4114_v14 = vpop.f32.mrb[44].mxu1  ;;  %v4155_v25 = vpop.f32.mrb[52].mxu0 }
 0x6d5   :  { %v4203_v49 = vadd.f32 %v4114_v14, %v4072_v27  ;;  %v4205_v21 = vadd.f32 %v4155_v25, %v4074_v56  ;;  %v4116_v32 = vpop.f32.mrb[45].mxu1  ;;  %v4157_v30 = vpop.f32.mrb[53].mxu0 }
 0x6d6   :  { %v4204_v22 = vadd.f32 %v4116_v32, %v4073_v3  ;;  %v4206_v50 = vadd.f32 %v4157_v30, %v4075_v29  ;;  %v4118_v47 = vpop.f32.mrb[46].mxu1  ;;  %v4159_v55 = vpop.f32.mrb[54].mxu0 }
 0x6d7   :  { %v4119_v40 = vpop.f32.mrb[47].mxu1  ;;  %v4160_v54 = vpop.f32.mrb[55].mxu0  ;;  %v4207_v39 = vmul.f32 0.5, %v4203_v49  ;;  %v4209_v28 = vmul.f32 0.5, %v4205_v21  ;;  %v10334_v49 = vld [vmem:[#allocation58_spill] sm:$0xff] }
 0x6d8   :  { %v4208_v46 = vmul.f32 0.5, %v4204_v22  ;;  %v4210_v4 = vmul.f32 0.5, %v4206_v50 }
 0x6d9   :  { %6016 = vtanh.f32 %v4207_v39  ;;  %v4076_v39 = vunpack.c.l.bf16 %v10334_v49 }
 0x6da   :  { %6018 = vtanh.f32 %v4208_v46 }
 0x6db   :  { %6020 = vtanh.f32 %v4209_v28 }
 0x6dc   :  { %6022 = vtanh.f32 %v4210_v4 }
 0x6e3   :  { %v6017_v10 = vpop.eup %6016 }
 0x6e4   :  { %v6019_v44 = vpop.eup %6018  ;;  %v4215_v60 = vadd.f32 1.0, %v6017_v10  ;;  %v4077_v10 = vunpack.c.h.bf16 %v10334_v49  ;;  %v9283_v49 = vld [vmem:[%s9797_s2 + $0x8] ss:$24 sps:$4 sm:$0xff]  }
 0x6e5   :  { %v4216_v12 = vadd.f32 1.0, %v6019_v44  ;;  %10341 = vst [vmem:[#allocation47_spill] sm:$0xff] %v9283_v49 }
 0x6e6   :  { %v4219_v56 = vmul.f32 0.5, %v4215_v60  ;;  %v6021_v60 = vpop.eup %6020 }
 0x6e7   :  { %v4220_v3 = vmul.f32 0.5, %v4216_v12  ;;  %v6023_v22 = vpop.eup %6022  ;;  %v4217_v50 = vadd.f32 1.0, %v6021_v60  ;;  %v9331_v60 = vld [vmem:[%s9797_s2 + $0xc8] ss:$24 sps:$4 sm:$0xff]  }
 0x6e8   :  { %v4218_v47 = vadd.f32 1.0, %v6023_v22  ;;  %10349 = vst [vmem:[#allocation70_spill] sm:$0xff] %v9331_v60  ;;  %v9337_v22 = vld [vmem:[%s9797_s2 + $0xfc] ss:$24 sps:$4 sm:$0xff]  }
 0x6e9   :  { %v4221_v40 = vmul.f32 0.5, %v4217_v50  ;;  %10350 = vst [vmem:[#allocation36_spill] sm:$0xff] %v9337_v22  ;;  %v9343_v50 = vld [vmem:[%s9797_s2 + $0xf8] ss:$24 sps:$4 sm:$0xff]  }
 0x6ea   :  { %v4222_v4 = vmul.f32 0.5, %v4218_v47  ;;  %10351 = vst [vmem:[#allocation37_spill] sm:$0xff] %v9343_v50  ;;  %v9349_v47 = vld [vmem:[%s9797_s2 + $0x12c] ss:$24 sps:$4 sm:$0xff]  }
 0x6eb   :  { %10352 = vst [vmem:[#allocation71_spill] sm:$0xff] %v9349_v47 }
 0x714   :  { %v4196_v27 = vpop.f32.mrb[48].mxu1 }
 0x715   :  { %v4223_v14 = vadd.f32 %v4196_v27, %v8096_v35  ;;  %v4198_v25 = vpop.f32.mrb[49].mxu1 }
 0x716   :  { %v4224_v54 = vadd.f32 %v4198_v25, %v8103_v38  ;;  %v4200_v29 = vpop.f32.mrb[50].mxu1 }
 0x717   :  { %v4225_v46 = vmul.f32 %v4223_v14, %v4219_v56  ;;  %v4201_v32 = vpop.f32.mrb[51].mxu1 }
 0x718   :  { %v4226_v21 = vmul.f32 %v4224_v54, %v4220_v3  ;;  %v9301_v32 = vld [vmem:[%s9797_s2 + $0x6c] ss:$24 sps:$4 sm:$0xff]  }
 0x719   :  { %v4227_v44 = vadd.f32 %v4225_v46, %v4076_v39  ;;  %v9289_v39 = vld [vmem:[%s9797_s2 + $0x3c] ss:$24 sps:$4 sm:$0xff]   ;;  %v9295_v46 = vld [vmem:[%s9797_s2 + $0x38] ss:$24 sps:$4 sm:$0xff]   ;;  %10344 = vst [vmem:[#allocation67_spill] sm:$0xff] %v9301_v32 }
 0x71a   :  { %v4228_v30 = vadd.f32 %v4226_v21, %v4077_v10  ;;  %10342 = vst [vmem:[#allocation48_spill] sm:$0xff] %v9289_v39  ;;  %10343 = vst [vmem:[#allocation57_spill] sm:$0xff] %v9295_v46  ;;  %v9307_v10 = vld [vmem:[%s9797_s2 + $0x68] ss:$24 sps:$4 sm:$0xff]   ;;  %v9313_v21 = vld [vmem:[%s9797_s2 + $0x9c] ss:$24 sps:$4 sm:$0xff]  }
 0x71b   :  { %6024 = vtanh.f32 %v4227_v44  ;;  %10345 = vst [vmem:[#allocation68_spill] sm:$0xff] %v9307_v10  ;;  %10346 = vst [vmem:[#allocation5_spill] sm:$0xff] %v9313_v21  ;;  %v9319_v44 = vld [vmem:[%s9797_s2 + $0x98] ss:$24 sps:$4 sm:$0xff]  }
 0x71c   :  { %6026 = vtanh.f32 %v4228_v30  ;;  %10347 = vst [vmem:[#allocation6_spill] sm:$0xff] %v9319_v44  ;;  %v9325_v30 = vld [vmem:[%s9797_s2 + $0xcc] ss:$24 sps:$4 sm:$0xff]  }
 0x71d   :  { %10348 = vst [vmem:[#allocation69_spill] sm:$0xff] %v9325_v30 }
 0x725   :  { %v6025_v55 = vpop.eup %6024 }
 0x726   :  { %v6027_v12 = vpop.eup %6026  ;;  %v4231_v28 = vsub.f32 %v8974_v58, %v6025_v55  ;;  %v9242_v58 = vld [vmem:[%s9797_s2 + $0x270] ss:$24 sps:$4 sm:$0xff]  }
 0x727   :  { %v4232_v27 = vsub.f32 %v8976_v16, %v6027_v12  ;;  %v9248_v16 = vld [vmem:[%s9797_s2 + $0x2a4] ss:$24 sps:$4 sm:$0xff]  }
 0x728   :  { %v4233_v56 = vmul.f32 %v4231_v28, %v4221_v40  ;;  %v9367_v40 = vld [vmem:[%s9797_s2 + $0x158] ss:$24 sps:$4 sm:$0xff]   ;;  %v9373_v28 = vld [vmem:[%s9797_s2 + $0x18c] ss:$24 sps:$4 sm:$0xff]  }
 0x729   :  { %v4234_v14 = vmul.f32 %v4232_v27, %v4222_v4  ;;  %10355 = vst [vmem:[#allocation8_spill] sm:$0xff] %v9367_v40  ;;  %10356 = vst [vmem:[#allocation73_spill] sm:$0xff] %v9373_v28  ;;  %v9379_v4 = vld [vmem:[%s9797_s2 + $0x188] ss:$24 sps:$4 sm:$0xff]   ;;  %v9385_v27 = vld [vmem:[%s9797_s2 + $0x1bc] ss:$24 sps:$4 sm:$0xff]  }
 0x72a   :  { %v9093_v25 = vadd.f32 %v6025_v55, %v4233_v56  ;;  %v9355_v55 = vld [vmem:[%s9797_s2 + $0x128] ss:$24 sps:$4 sm:$0xff]   ;;  %10357 = vst [vmem:[#allocation74_spill] sm:$0xff] %v9379_v4  ;;  %10358 = vst [vmem:[#allocation38_spill] sm:$0xff] %v9385_v27  ;;  %v9391_v56 = vld [vmem:[%s9797_s2 + $0x1b8] ss:$24 sps:$4 sm:$0xff]  }
 0x72b   :  { %v9095_v3 = vadd.f32 %v6027_v12, %v4234_v14  ;;  %10353 = vst [vmem:[#allocation72_spill] sm:$0xff] %v9355_v55  ;;  %v9361_v12 = vld [vmem:[%s9797_s2 + $0x15c] ss:$24 sps:$4 sm:$0xff]   ;;  %10359 = vst [vmem:[#allocation39_spill] sm:$0xff] %v9391_v56  ;;  %v9397_v14 = vld [vmem:[%s9797_s2 + $0x1ec] ss:$24 sps:$4 sm:$0xff]  }
 0x72c   :  { %v9101_v29 = vpack.c.bf16 %v9093_v25, %v9093_v25  ;;  %10354 = vst [vmem:[#allocation7_spill] sm:$0xff] %v9361_v12  ;;  %10360 = vst [vmem:[#allocation9_spill] sm:$0xff] %v9397_v14 }
 0x72d   :  { %v4248_v54 = vpack.c.bf16 %v9095_v3, %v9095_v3 }
 0x72f   :  { %4281 = vmatprep.mubr.bf16.mxu0 %v4248_v54  ;;  %4322 = vmatprep.mubr.bf16.mxu1 %v4248_v54 }
 0x730   :  { %4282 = vmatmul.mubr.bf16.vlgmr.msra.gmra.mrb[56].mxu0 %v9101_v29  ;;  %4323 = vmatmul.mubr.bf16.vlgmr.msra.gmra.mrb[52].mxu1 %v9101_v29 }
 0x731   :  { %4332 = vmatpush1.bf16.msra.mxu0 %v8536_v17  ;;  %4363 = vmatprep.mubr.bf16.mxu0 %v4248_v54  ;;  %v9127_v17 = vld [vmem:[%s9797_s2 + $0xf4] ss:$24 sps:$4 sm:$0xff]   ;;  %v9403_v54 = vld [vmem:[%s9797_s2 + $0x1e8] ss:$24 sps:$4 sm:$0xff]  }
 0x732   :  { %4333 = vmatprep.subr.bf16.mxu0 %v8542_v62  ;;  %4419 = vmatpush1.bf16.msra.mxu1 %v8802_v23  ;;  %v9136_v62 = vld [vmem:[%s9797_s2 + $0x124] ss:$24 sps:$4 sm:$0xff]   ;;  %10361 = vst [vmem:[#allocation10_spill] sm:$0xff] %v9403_v54 }
 0x733   :  { %4420 = vmatprep.subr.bf16.mxu1 %v8808_v48 }
 0x735   :  { %4334 = vmatpush1.bf16.msra.mxu0 %v8550_v51  ;;  %v9144_v51 = vld [vmem:[%s9797_s2 + $0x120] ss:$24 sps:$4 sm:$0xff]  }
 0x736   :  { %4335 = vmatprep.subr.bf16.mxu0 %v8556_v1  ;;  %4421 = vmatpush1.bf16.msra.mxu1 %v8816_v57  ;;  %v9150_v1 = vld [vmem:[%s9797_s2 + $0x154] ss:$24 sps:$4 sm:$0xff]  }
 0x737   :  { %4422 = vmatprep.subr.bf16.mxu1 %v8822_v15 }
 0x739   :  { %4336 = vmatpush1.bf16.msra.mxu0 %v8564_v59  ;;  %v9158_v59 = vld [vmem:[%s9797_s2 + $0x150] ss:$24 sps:$4 sm:$0xff]  }
 0x73a   :  { %4337 = vmatprep.subr.bf16.mxu0 %v8570_v36  ;;  %4423 = vmatpush1.bf16.msra.mxu1 %v8830_v13  ;;  %v9164_v36 = vld [vmem:[%s9797_s2 + $0x184] ss:$24 sps:$4 sm:$0xff]  }
 0x73b   :  { %4424 = vmatprep.subr.bf16.mxu1 %v8836_v63 }
 0x73d   :  { %4338 = vmatpush1.bf16.msra.mxu0 %v8578_v41  ;;  %v9172_v41 = vld [vmem:[%s9797_s2 + $0x180] ss:$24 sps:$4 sm:$0xff]  }
 0x73e   :  { %4339 = vmatprep.subr.bf16.mxu0 %v8584_v61  ;;  %4425 = vmatpush1.bf16.msra.mxu1 %v8844_v11  ;;  %v9178_v61 = vld [vmem:[%s9797_s2 + $0x1b4] ss:$24 sps:$4 sm:$0xff]  }
 0x73f   :  { %4426 = vmatprep.subr.bf16.mxu1 %v8850_v18 }
 0x741   :  { %4340 = vmatpush1.bf16.msra.mxu0 %v8592_v52  ;;  %v9186_v52 = vld [vmem:[%s9797_s2 + $0x1b0] ss:$24 sps:$4 sm:$0xff]  }
 0x742   :  { %4341 = vmatprep.subr.bf16.mxu0 %v8598_v53  ;;  %4427 = vmatpush1.bf16.msra.mxu1 %v8858_v37  ;;  %v9192_v53 = vld [vmem:[%s9797_s2 + $0x1e4] ss:$24 sps:$4 sm:$0xff]  }
 0x743   :  { %4428 = vmatprep.subr.bf16.mxu1 %v9127_v17 }
 0x745   :  { %4342 = vmatpush1.bf16.msra.mxu0 %v8606_v20  ;;  %v9200_v20 = vld [vmem:[%s9797_s2 + $0x1e0] ss:$24 sps:$4 sm:$0xff]  }
 0x746   :  { %4343 = vmatprep.subr.bf16.mxu0 %v8612_v31  ;;  %4429 = vmatpush1.bf16.msra.mxu1 %v8867_v42  ;;  %v9206_v31 = vld [vmem:[%s9797_s2 + $0x214] ss:$24 sps:$4 sm:$0xff]  }
 0x747   :  { %4430 = vmatprep.subr.bf16.mxu1 %v9136_v62 }
 0x749   :  { %4344 = vmatpush1.bf16.msra.mxu0 %v8620_v2  ;;  %v9214_v2 = vld [vmem:[%s9797_s2 + $0x210] ss:$24 sps:$4 sm:$0xff]  }
 0x74a   :  { %4345 = vmatprep.subr.bf16.mxu0 %v8626_v33  ;;  %4431 = vmatpush1.bf16.msra.mxu1 %v9144_v51  ;;  %v9220_v33 = vld [vmem:[%s9797_s2 + $0x244] ss:$24 sps:$4 sm:$0xff]  }
 0x74b   :  { %4432 = vmatprep.subr.bf16.mxu1 %v9150_v1 }
 0x74d   :  { %4346 = vmatpush1.bf16.msra.mxu0 %v8634_v43  ;;  %v9228_v43 = vld [vmem:[%s9797_s2 + $0x240] ss:$24 sps:$4 sm:$0xff]  }
 0x74e   :  { %4347 = vmatprep.subr.bf16.mxu0 %v8640_v26  ;;  %4433 = vmatpush1.bf16.msra.mxu1 %v9158_v59  ;;  %v9234_v26 = vld [vmem:[%s9797_s2 + $0x274] ss:$24 sps:$4 sm:$0xff]  }
 0x74f   :  { %4434 = vmatprep.subr.bf16.mxu1 %v9164_v36 }
 0x751   :  { %4348 = vmatpush1.bf16.msra.mxu0 %v8648_v9  ;;  %v10335_v9 = vld [vmem:[#allocation75_spill] sm:$0xff] }
 0x752   :  { %4349 = vmatprep.subr.bf16.mxu0 %v8654_v45  ;;  %4435 = vmatpush1.bf16.msra.mxu1 %v9172_v41  ;;  %v10336_v45 = vld [vmem:[#allocation45_spill] sm:$0xff] }
 0x753   :  { %4436 = vmatprep.subr.bf16.mxu1 %v9178_v61 }
 0x755   :  { %4350 = vmatpush1.bf16.msra.mxu0 %v10272_v5  ;;  %v10337_v5 = vld [vmem:[#allocation46_spill] sm:$0xff] }
 0x756   :  { %4351 = vmatprep.subr.bf16.mxu0 %v10273_v8  ;;  %4437 = vmatpush1.bf16.msra.mxu1 %v9186_v52  ;;  %v10338_v8 = vld [vmem:[#allocation4_spill] sm:$0xff] }
 0x757   :  { %4438 = vmatprep.subr.bf16.mxu1 %v9192_v53 }
 0x759   :  { %4352 = vmatpush1.bf16.msra.mxu0 %v10276_v0  ;;  %v9256_v0 = vld [vmem:[%s9797_s2 + $0x2a0] ss:$24 sps:$4 sm:$0xff]  }
 0x75a   :  { %4353 = vmatprep.subr.bf16.mxu0 %v10277_v19  ;;  %4439 = vmatpush1.bf16.msra.mxu1 %v9200_v20  ;;  %v9262_v19 = vld [vmem:[%s9797_s2 + $0x2d4] ss:$24 sps:$4 sm:$0xff]  }
 0x75b   :  { %4440 = vmatprep.subr.bf16.mxu1 %v9206_v31 }
 0x75d   :  { %4354 = vmatpush1.bf16.msra.mxu0 %v10280_v34  ;;  %v10339_v34 = vld [vmem:[#allocation78_spill] sm:$0xff] }
 0x75e   :  { %4355 = vmatprep.subr.bf16.mxu0 %v10281_v24  ;;  %4441 = vmatpush1.bf16.msra.mxu1 %v9214_v2  ;;  %v9269_v24 = vld [vmem:[%s9797_s2 + $0xc] ss:$24 sps:$4 sm:$0xff]  }
 0x75f   :  { %4442 = vmatprep.subr.bf16.mxu1 %v9220_v33 }
 0x761   :  { %4356 = vmatpush1.bf16.msra.mxu0 %v10284_v6  ;;  %v9275_v6 = vld [vmem:[%s9797_s2 + $0x2d0] ss:$24 sps:$4 sm:$0xff]  }
 0x762   :  { %4357 = vmatprep.subr.bf16.mxu0 %v10285_v7  ;;  %4443 = vmatpush1.bf16.msra.mxu1 %v9228_v43  ;;  %v10340_v7 = vld [vmem:[#allocation76_spill] sm:$0xff] }
 0x763   :  { %4444 = vmatprep.subr.bf16.mxu1 %v9234_v26 }
 0x765   :  { %4358 = vmatpush1.bf16.msra.mxu0 %v10335_v9  ;;  %v9415_v9 = vld [vmem:[%s9797_s2 + $0x218] ss:$24 sps:$4 sm:$0xff]  }
 0x766   :  { %4359 = vmatprep.subr.bf16.mxu0 %v10336_v45  ;;  %4445 = vmatpush1.bf16.msra.mxu1 %v9242_v58  ;;  %10363 = vst [vmem:[#allocation41_spill] sm:$0xff] %v9415_v9 }
 0x767   :  { %4446 = vmatprep.subr.bf16.mxu1 %v9248_v16 }
 0x769   :  { %4360 = vmatpush1.bf16.msra.mxu0 %v10337_v5 }
 0x76a   :  { %4361 = vmatprep.subr.bf16.mxu0 %v10338_v8  ;;  %4447 = vmatpush1.bf16.msra.mxu1 %v9256_v0 }
 0x76b   :  { %4448 = vmatprep.subr.bf16.mxu1 %v9262_v19 }
 0x76d   :  { %4362 = vmatpush1.bf16.msra.mxu0 %v10339_v34 }
 0x76e   :  { %4459 = vmatprep.subr.bf16.mxu0 %v9269_v24  ;;  %4449 = vmatpush1.bf16.msra.mxu1 %v9275_v6 }
 0x76f   :  { %4500 = vmatprep.subr.bf16.mxu1 %v10340_v7  ;;  %v9421_v7 = vld [vmem:[%s9797_s2 + $0x24c] ss:$24 sps:$4 sm:$0xff]  }
 0x770   :  { %4364 = vmatmul.mubr.bf16.vlgmr.msra.gmra.mrb[60].mxu0 %v9101_v29  ;;  %v9409_v29 = vld [vmem:[%s9797_s2 + $0x21c] ss:$24 sps:$4 sm:$0xff]   ;;  %10364 = vst [vmem:[#allocation11_spill] sm:$0xff] %v9421_v7 }
 0x771   :  { %4460 = vmatpush1.bf16.msra.mxu0 %v9283_v49  ;;  %10362 = vst [vmem:[#allocation40_spill] sm:$0xff] %v9409_v29 }
 0x772   :  { %4461 = vmatprep.subr.bf16.mxu0 %v9289_v39 }
 0x775   :  { %4462 = vmatpush1.bf16.msra.mxu0 %v9295_v46 }
 0x776   :  { %4463 = vmatprep.subr.bf16.mxu0 %v9301_v32 }
 0x779   :  { %4464 = vmatpush1.bf16.msra.mxu0 %v9307_v10 }
 0x77a   :  { %4465 = vmatprep.subr.bf16.mxu0 %v9313_v21 }
 0x77d   :  { %4466 = vmatpush1.bf16.msra.mxu0 %v9319_v44 }
 0x77e   :  { %4467 = vmatprep.subr.bf16.mxu0 %v9325_v30 }
 0x781   :  { %4468 = vmatpush1.bf16.msra.mxu0 %v9331_v60 }
 0x782   :  { %4469 = vmatprep.subr.bf16.mxu0 %v9337_v22 }
 0x785   :  { %4470 = vmatpush1.bf16.msra.mxu0 %v9343_v50 }
 0x786   :  { %4471 = vmatprep.subr.bf16.mxu0 %v9349_v47 }
 0x789   :  { %4472 = vmatpush1.bf16.msra.mxu0 %v9355_v55 }
 0x78a   :  { %4473 = vmatprep.subr.bf16.mxu0 %v9361_v12 }
 0x78d   :  { %4474 = vmatpush1.bf16.msra.mxu0 %v9367_v40 }
 0x78e   :  { %4475 = vmatprep.subr.bf16.mxu0 %v9373_v28 }
 0x791   :  { %4476 = vmatpush1.bf16.msra.mxu0 %v9379_v4 }
 0x792   :  { %4477 = vmatprep.subr.bf16.mxu0 %v9385_v27  ;;  %v10374_v27 = vld [vmem:[#allocation52_spill] sm:$0xff] }
 0x793   :  { %v4244_v12 = vunpack.c.h.bf16 %v10374_v27 }
 0x795   :  { %4478 = vmatpush1.bf16.msra.mxu0 %v9391_v56 }
 0x796   :  { %4479 = vmatprep.subr.bf16.mxu0 %v9397_v14  ;;  %v10373_v14 = vld [vmem:[#allocation51_spill] sm:$0xff] }
 0x797   :  { %v4241_v56 = vunpack.c.l.bf16 %v10373_v14  ;;  %v4242_v40 = vunpack.c.h.bf16 %v10373_v14 }
 0x799   :  { %4480 = vmatpush1.bf16.msra.mxu0 %v9403_v54  ;;  %v9427_v54 = vld [vmem:[%s9797_s2 + $0x248] ss:$24 sps:$4 sm:$0xff]  }
 0x79a   :  { %4481 = vmatprep.subr.bf16.mxu0 %v9409_v29  ;;  %10365 = vst [vmem:[#allocation12_spill] sm:$0xff] %v9427_v54  ;;  %v9433_v29 = vld [vmem:[%s9797_s2 + $0x27c] ss:$24 sps:$4 sm:$0xff]  }
 0x79b   :  { %10366 = vst [vmem:[#allocation42_spill] sm:$0xff] %v9433_v29 }
 0x79d   :  { %4482 = vmatpush1.bf16.msra.mxu0 %v9415_v9  ;;  %v9439_v9 = vld [vmem:[%s9797_s2 + $0x278] ss:$24 sps:$4 sm:$0xff]  }
 0x79e   :  { %4483 = vmatprep.subr.bf16.mxu0 %v9421_v7  ;;  %10367 = vst [vmem:[#allocation43_spill] sm:$0xff] %v9439_v9  ;;  %v9445_v7 = vld [vmem:[%s9797_s2 + $0x2ac] ss:$24 sps:$4 sm:$0xff]  }
 0x79f   :  { %10368 = vst [vmem:[#allocation13_spill] sm:$0xff] %v9445_v7 }
 0x7a1   :  { %4484 = vmatpush1.bf16.msra.mxu0 %v9427_v54  ;;  %v9451_v54 = vld [vmem:[%s9797_s2 + $0x2a8] ss:$24 sps:$4 sm:$0xff]  }
 0x7a2   :  { %4485 = vmatprep.subr.bf16.mxu0 %v9433_v29  ;;  %10369 = vst [vmem:[#allocation14_spill] sm:$0xff] %v9451_v54  ;;  %v9457_v29 = vld [vmem:[%s9797_s2 + $0x2dc] ss:$24 sps:$4 sm:$0xff]  }
 0x7a3   :  { %10370 = vst [vmem:[#allocation44_spill] sm:$0xff] %v9457_v29 }
 0x7a5   :  { %4486 = vmatpush1.bf16.msra.mxu0 %v9439_v9  ;;  %v9463_v9 = vld [vmem:[%s9797_s2 + $0x2d8] ss:$24 sps:$4 sm:$0xff]  }
 0x7a6   :  { %4487 = vmatprep.subr.bf16.mxu0 %v9445_v7  ;;  %10371 = vst [vmem:[#allocation15_spill] sm:$0xff] %v9463_v9  ;;  %v10372_v7 = vld [vmem:[#allocation77_spill] sm:$0xff] }
 0x7a9   :  { %4488 = vmatpush1.bf16.msra.mxu0 %v9451_v54  ;;  %v4243_v54 = vunpack.c.l.bf16 %v10374_v27 }
 0x7aa   :  { %4489 = vmatprep.subr.bf16.mxu0 %v9457_v29 }
 0x7ad   :  { %4490 = vmatpush1.bf16.msra.mxu0 %v9463_v9 }
 0x7ae   :  { %4587 = vmatprep.subr.bf16.mxu0 %v10372_v7 }
 0x803   :  { %v4283_v4 = vpop.f32.mrb[56].mxu0  ;;  %v4324_v28 = vpop.f32.mrb[52].mxu1 }
 0x804   :  { %v4372_v29 = vadd.f32 %v4283_v4, %v4241_v56  ;;  %v4374_v55 = vadd.f32 %v4324_v28, %v4243_v54  ;;  %v4285_v47 = vpop.f32.mrb[57].mxu0  ;;  %v4326_v50 = vpop.f32.mrb[53].mxu1 }
 0x805   :  { %v4373_v22 = vadd.f32 %v4285_v47, %v4242_v40  ;;  %v4375_v60 = vadd.f32 %v4326_v50, %v4244_v12  ;;  %v4287_v30 = vpop.f32.mrb[58].mxu0  ;;  %v4328_v9 = vpop.f32.mrb[54].mxu1 }
 0x806   :  { %v4288_v44 = vpop.f32.mrb[59].mxu0  ;;  %v4329_v7 = vpop.f32.mrb[55].mxu1  ;;  %v4376_v21 = vmul.f32 0.5, %v4372_v29  ;;  %v4378_v14 = vmul.f32 0.5, %v4374_v55 }
 0x807   :  { %v4377_v10 = vmul.f32 0.5, %v4373_v22  ;;  %v4379_v27 = vmul.f32 0.5, %v4375_v60  ;;  %v10375_v22 = vld [vmem:[#allocation59_spill] sm:$0xff] }
 0x808   :  { %6028 = vtanh.f32 %v4376_v21  ;;  %v4245_v21 = vunpack.c.l.bf16 %v10375_v22 }
 0x809   :  { %6030 = vtanh.f32 %v4377_v10 }
 0x80a   :  { %6032 = vtanh.f32 %v4378_v14 }
 0x80b   :  { %6034 = vtanh.f32 %v4379_v27 }
 0x812   :  { %v6029_v32 = vpop.eup %6028 }
 0x813   :  { %v6031_v46 = vpop.eup %6030  ;;  %v4384_v39 = vadd.f32 1.0, %v6029_v32  ;;  %v4246_v32 = vunpack.c.h.bf16 %v10375_v22  ;;  %v9506_v22 = vld [vmem:[%s9797_s2 + $0x40] ss:$24 sps:$4 sm:$0xff]  }
 0x814   :  { %v4385_v49 = vadd.f32 1.0, %v6031_v46 }
 0x815   :  { %v4388_v28 = vmul.f32 0.5, %v4384_v39  ;;  %v6033_v39 = vpop.eup %6032 }
 0x816   :  { %v4389_v30 = vmul.f32 0.5, %v4385_v49  ;;  %v6035_v56 = vpop.eup %6034  ;;  %v4386_v54 = vadd.f32 1.0, %v6033_v39  ;;  %v10394_v39 = vld [vmem:[#allocation39_spill] sm:$0xff] }
 0x817   :  { %v4387_v29 = vadd.f32 1.0, %v6035_v56  ;;  %v10395_v56 = vld [vmem:[#allocation9_spill] sm:$0xff] }
 0x818   :  { %v4390_v7 = vmul.f32 0.5, %v4386_v54  ;;  %v10396_v54 = vld [vmem:[#allocation10_spill] sm:$0xff] }
 0x819   :  { %v4391_v27 = vmul.f32 0.5, %v4387_v29  ;;  %v10397_v29 = vld [vmem:[#allocation40_spill] sm:$0xff] }
 0x843   :  { %v4365_v4 = vpop.f32.mrb[60].mxu0 }
 0x844   :  { %v4392_v47 = vadd.f32 %v4365_v4, %v8096_v35  ;;  %v4367_v50 = vpop.f32.mrb[61].mxu0 }
 0x845   :  { %v4393_v44 = vadd.f32 %v4367_v50, %v8103_v38  ;;  %v4369_v12 = vpop.f32.mrb[62].mxu0 }
 0x846   :  { %v4394_v10 = vmul.f32 %v4392_v47, %v4388_v28  ;;  %v4370_v40 = vpop.f32.mrb[63].mxu0 }
 0x847   :  { %v4395_v55 = vmul.f32 %v4393_v44, %v4389_v30  ;;  %v10389_v40 = vld [vmem:[#allocation7_spill] sm:$0xff] }
 0x848   :  { %v4396_v46 = vadd.f32 %v4394_v10, %v4245_v21  ;;  %v9512_v21 = vld [vmem:[%s9797_s2 + $0x74] ss:$24 sps:$4 sm:$0xff]   ;;  %v10388_v10 = vld [vmem:[#allocation72_spill] sm:$0xff] }
 0x849   :  { %v4397_v60 = vadd.f32 %v4395_v55, %v4246_v32  ;;  %v10390_v32 = vld [vmem:[#allocation8_spill] sm:$0xff]  ;;  %v10391_v55 = vld [vmem:[#allocation73_spill] sm:$0xff] }
 0x84a   :  { %6036 = vtanh.f32 %v4396_v46  ;;  %v10392_v46 = vld [vmem:[#allocation74_spill] sm:$0xff] }
 0x84b   :  { %6038 = vtanh.f32 %v4397_v60  ;;  %v10393_v60 = vld [vmem:[#allocation38_spill] sm:$0xff] }
 0x854   :  { %v6037_v9 = vpop.eup %6036 }
 0x855   :  { %v6039_v49 = vpop.eup %6038  ;;  %v4400_v14 = vsub.f32 %v9093_v25, %v6037_v9  ;;  %v9492_v25 = vld [vmem:[%s9797_s2 + $0x10] ss:$24 sps:$4 sm:$0xff]  }
 0x856   :  { %v4401_v4 = vsub.f32 %v9095_v3, %v6039_v49  ;;  %v9498_v3 = vld [vmem:[%s9797_s2 + $0x44] ss:$24 sps:$4 sm:$0xff]  }
 0x857   :  { %v4402_v28 = vmul.f32 %v4400_v14, %v4390_v7  ;;  %v10400_v7 = vld [vmem:[#allocation12_spill] sm:$0xff]  ;;  %v10401_v14 = vld [vmem:[#allocation42_spill] sm:$0xff] }
 0x858   :  { %v4403_v47 = vmul.f32 %v4401_v4, %v4391_v27  ;;  %v10402_v27 = vld [vmem:[#allocation43_spill] sm:$0xff]  ;;  %v10403_v4 = vld [vmem:[#allocation13_spill] sm:$0xff] }
 0x859   :  { %v9477_v50 = vadd.f32 %v6037_v9, %v4402_v28  ;;  %v10398_v9 = vld [vmem:[#allocation41_spill] sm:$0xff]  ;;  %v10404_v28 = vld [vmem:[#allocation14_spill] sm:$0xff] }
 0x85a   :  { %v9479_v30 = vadd.f32 %v6039_v49, %v4403_v47  ;;  %v10399_v49 = vld [vmem:[#allocation11_spill] sm:$0xff]  ;;  %v10405_v47 = vld [vmem:[#allocation44_spill] sm:$0xff] }
 0x85b   :  { %v9485_v12 = vpack.c.bf16 %v9477_v50, %v9477_v50 }
 0x85c   :  { %v4417_v44 = vpack.c.bf16 %v9479_v30, %v9479_v30 }
 0x85e   :  { %4450 = vmatprep.mubr.bf16.mxu1 %v4417_v44  ;;  %4491 = vmatprep.mubr.bf16.mxu0 %v4417_v44 }
 0x85f   :  { %4451 = vmatmul.mubr.bf16.vlgmr.msra.gmra.mrb[56].mxu1 %v9485_v12  ;;  %4492 = vmatmul.mubr.bf16.vlgmr.msra.gmra.mrb[64].mxu0 %v9485_v12 }
 0x860   :  { %4501 = vmatpush1.bf16.msra.mxu1 %v9492_v25  ;;  %4532 = vmatprep.mubr.bf16.mxu1 %v4417_v44  ;;  %v10406_v44 = vld [vmem:[#allocation15_spill] sm:$0xff] }
 0x861   :  { %4502 = vmatprep.subr.bf16.mxu1 %v9498_v3  ;;  %4588 = vmatpush1.bf16.msra.mxu0 %v8802_v23  ;;  %v9520_v23 = vld [vmem:[%s9797_s2 + $0x70] ss:$24 sps:$4 sm:$0xff]  }
 0x862   :  { %4589 = vmatprep.subr.bf16.mxu0 %v8808_v48  ;;  %v9526_v48 = vld [vmem:[%s9797_s2 + $0xa4] ss:$24 sps:$4 sm:$0xff]  }
 0x864   :  { %4503 = vmatpush1.bf16.msra.mxu1 %v9506_v22 }
 0x865   :  { %4504 = vmatprep.subr.bf16.mxu1 %v9512_v21  ;;  %4590 = vmatpush1.bf16.msra.mxu0 %v8816_v57  ;;  %v9534_v57 = vld [vmem:[%s9797_s2 + $0xa0] ss:$24 sps:$4 sm:$0xff]  }
 0x866   :  { %4591 = vmatprep.subr.bf16.mxu0 %v8822_v15  ;;  %v9540_v15 = vld [vmem:[%s9797_s2 + $0xd4] ss:$24 sps:$4 sm:$0xff]  }
 0x868   :  { %4505 = vmatpush1.bf16.msra.mxu1 %v9520_v23 }
 0x869   :  { %4506 = vmatprep.subr.bf16.mxu1 %v9526_v48  ;;  %4592 = vmatpush1.bf16.msra.mxu0 %v8830_v13  ;;  %v9548_v13 = vld [vmem:[%s9797_s2 + $0xd0] ss:$24 sps:$4 sm:$0xff]  }
 0x86a   :  { %4593 = vmatprep.subr.bf16.mxu0 %v8836_v63  ;;  %v9554_v63 = vld [vmem:[%s9797_s2 + $0x104] ss:$24 sps:$4 sm:$0xff]  }
 0x86c   :  { %4507 = vmatpush1.bf16.msra.mxu1 %v9534_v57 }
 0x86d   :  { %4508 = vmatprep.subr.bf16.mxu1 %v9540_v15  ;;  %4594 = vmatpush1.bf16.msra.mxu0 %v8844_v11  ;;  %v9562_v11 = vld [vmem:[%s9797_s2 + $0x100] ss:$24 sps:$4 sm:$0xff]  }
 0x86e   :  { %4595 = vmatprep.subr.bf16.mxu0 %v8850_v18  ;;  %v9568_v18 = vld [vmem:[%s9797_s2 + $0x134] ss:$24 sps:$4 sm:$0xff]  }
 0x870   :  { %4509 = vmatpush1.bf16.msra.mxu1 %v9548_v13 }
 0x871   :  { %4510 = vmatprep.subr.bf16.mxu1 %v9554_v63  ;;  %4596 = vmatpush1.bf16.msra.mxu0 %v8858_v37  ;;  %v9576_v37 = vld [vmem:[%s9797_s2 + $0x130] ss:$24 sps:$4 sm:$0xff]  }
 0x872   :  { %4597 = vmatprep.subr.bf16.mxu0 %v9127_v17  ;;  %v9582_v17 = vld [vmem:[%s9797_s2 + $0x164] ss:$24 sps:$4 sm:$0xff]  }
 0x874   :  { %4511 = vmatpush1.bf16.msra.mxu1 %v9562_v11 }
 0x875   :  { %4512 = vmatprep.subr.bf16.mxu1 %v9568_v18  ;;  %4598 = vmatpush1.bf16.msra.mxu0 %v8867_v42  ;;  %v9590_v42 = vld [vmem:[%s9797_s2 + $0x160] ss:$24 sps:$4 sm:$0xff]  }
 0x876   :  { %4599 = vmatprep.subr.bf16.mxu0 %v9136_v62  ;;  %v9596_v62 = vld [vmem:[%s9797_s2 + $0x194] ss:$24 sps:$4 sm:$0xff]  }
 0x878   :  { %4513 = vmatpush1.bf16.msra.mxu1 %v9576_v37 }
 0x879   :  { %4514 = vmatprep.subr.bf16.mxu1 %v9582_v17  ;;  %4600 = vmatpush1.bf16.msra.mxu0 %v9144_v51  ;;  %v9604_v51 = vld [vmem:[%s9797_s2 + $0x190] ss:$24 sps:$4 sm:$0xff]  }
 0x87a   :  { %4601 = vmatprep.subr.bf16.mxu0 %v9150_v1  ;;  %v9610_v1 = vld [vmem:[%s9797_s2 + $0x1c4] ss:$24 sps:$4 sm:$0xff]  }
 0x87c   :  { %4515 = vmatpush1.bf16.msra.mxu1 %v9590_v42 }
 0x87d   :  { %4516 = vmatprep.subr.bf16.mxu1 %v9596_v62  ;;  %4602 = vmatpush1.bf16.msra.mxu0 %v9158_v59  ;;  %v9618_v59 = vld [vmem:[%s9797_s2 + $0x1c0] ss:$24 sps:$4 sm:$0xff]  }
 0x87e   :  { %4603 = vmatprep.subr.bf16.mxu0 %v9164_v36  ;;  %v9624_v36 = vld [vmem:[%s9797_s2 + $0x1f4] ss:$24 sps:$4 sm:$0xff]  }
 0x880   :  { %4517 = vmatpush1.bf16.msra.mxu1 %v9604_v51 }
 0x881   :  { %4518 = vmatprep.subr.bf16.mxu1 %v9610_v1  ;;  %4604 = vmatpush1.bf16.msra.mxu0 %v9172_v41  ;;  %v9632_v41 = vld [vmem:[%s9797_s2 + $0x1f0] ss:$24 sps:$4 sm:$0xff]  }
 0x882   :  { %4605 = vmatprep.subr.bf16.mxu0 %v9178_v61  ;;  %v9638_v61 = vld [vmem:[%s9797_s2 + $0x224] ss:$24 sps:$4 sm:$0xff]  }
 0x884   :  { %4519 = vmatpush1.bf16.msra.mxu1 %v9618_v59 }
 0x885   :  { %4520 = vmatprep.subr.bf16.mxu1 %v9624_v36  ;;  %4606 = vmatpush1.bf16.msra.mxu0 %v9186_v52  ;;  %v9646_v52 = vld [vmem:[%s9797_s2 + $0x220] ss:$24 sps:$4 sm:$0xff]  }
 0x886   :  { %4607 = vmatprep.subr.bf16.mxu0 %v9192_v53  ;;  %v9652_v53 = vld [vmem:[%s9797_s2 + $0x254] ss:$24 sps:$4 sm:$0xff]  }
 0x888   :  { %4521 = vmatpush1.bf16.msra.mxu1 %v9632_v41 }
 0x889   :  { %4522 = vmatprep.subr.bf16.mxu1 %v9638_v61  ;;  %4608 = vmatpush1.bf16.msra.mxu0 %v9200_v20  ;;  %v9660_v20 = vld [vmem:[%s9797_s2 + $0x250] ss:$24 sps:$4 sm:$0xff]  }
 0x88a   :  { %4609 = vmatprep.subr.bf16.mxu0 %v9206_v31  ;;  %v9666_v31 = vld [vmem:[%s9797_s2 + $0x284] ss:$24 sps:$4 sm:$0xff]  }
 0x88c   :  { %4523 = vmatpush1.bf16.msra.mxu1 %v9646_v52 }
 0x88d   :  { %4524 = vmatprep.subr.bf16.mxu1 %v9652_v53  ;;  %4610 = vmatpush1.bf16.msra.mxu0 %v9214_v2  ;;  %v9674_v2 = vld [vmem:[%s9797_s2 + $0x280] ss:$24 sps:$4 sm:$0xff]  }
 0x88e   :  { %4611 = vmatprep.subr.bf16.mxu0 %v9220_v33  ;;  %v6273_v33 = vld [vmem:[%s9797_s2 + $0x14] ss:$24 sps:$4 sm:$0xff]  }
 0x890   :  { %4525 = vmatpush1.bf16.msra.mxu1 %v9660_v20 }
 0x891   :  { %4526 = vmatprep.subr.bf16.mxu1 %v9666_v31  ;;  %4612 = vmatpush1.bf16.msra.mxu0 %v9228_v43  ;;  %v10376_v43 = vld [vmem:[#allocation47_spill] sm:$0xff] }
 0x892   :  { %4613 = vmatprep.subr.bf16.mxu0 %v9234_v26  ;;  %v10377_v26 = vld [vmem:[#allocation48_spill] sm:$0xff] }
 0x894   :  { %4527 = vmatpush1.bf16.msra.mxu1 %v9674_v2 }
 0x895   :  { %4528 = vmatprep.subr.bf16.mxu1 %v10336_v45  ;;  %4614 = vmatpush1.bf16.msra.mxu0 %v9242_v58  ;;  %v10378_v45 = vld [vmem:[#allocation57_spill] sm:$0xff]  ;;  %v10379_v58 = vld [vmem:[#allocation67_spill] sm:$0xff] }
 0x896   :  { %4615 = vmatprep.subr.bf16.mxu0 %v9248_v16  ;;  %v10380_v16 = vld [vmem:[#allocation68_spill] sm:$0xff] }
 0x898   :  { %4529 = vmatpush1.bf16.msra.mxu1 %v10337_v5  ;;  %v10381_v5 = vld [vmem:[#allocation5_spill] sm:$0xff] }
 0x899   :  { %4530 = vmatprep.subr.bf16.mxu1 %v10338_v8  ;;  %4616 = vmatpush1.bf16.msra.mxu0 %v9256_v0  ;;  %v10382_v8 = vld [vmem:[#allocation6_spill] sm:$0xff]  ;;  %v10383_v0 = vld [vmem:[#allocation69_spill] sm:$0xff] }
 0x89a   :  { %4617 = vmatprep.subr.bf16.mxu0 %v9262_v19  ;;  %v10384_v19 = vld [vmem:[#allocation70_spill] sm:$0xff] }
 0x89c   :  { %4531 = vmatpush1.bf16.msra.mxu1 %v10339_v34  ;;  %v10385_v34 = vld [vmem:[#allocation36_spill] sm:$0xff] }
 0x89d   :  { %4628 = vmatprep.subr.bf16.mxu1 %v9269_v24  ;;  %4618 = vmatpush1.bf16.msra.mxu0 %v9275_v6  ;;  %v10386_v24 = vld [vmem:[#allocation37_spill] sm:$0xff]  ;;  %v10387_v6 = vld [vmem:[#allocation71_spill] sm:$0xff] }
 0x89e   :  { %4669 = vmatprep.subr.bf16.mxu0 %v6273_v33 }
 0x89f   :  { %4533 = vmatmul.mubr.bf16.vlgmr.msra.gmra.mrb[60].mxu1 %v9485_v12  ;;  %v10407_v12 = vld [vmem:[#allocation53_spill] sm:$0xff] }
 0x8a0   :  { %4629 = vmatpush1.bf16.msra.mxu1 %v10376_v43  ;;  %v4410_v33 = vunpack.c.l.bf16 %v10407_v12  ;;  %v10408_v43 = vld [vmem:[#allocation54_spill] sm:$0xff] }
 0x8a1   :  { %4630 = vmatprep.subr.bf16.mxu1 %v10377_v26  ;;  %v4412_v26 = vunpack.c.l.bf16 %v10408_v43 }
 0x8a4   :  { %4631 = vmatpush1.bf16.msra.mxu1 %v10378_v45 }
 0x8a5   :  { %4632 = vmatprep.subr.bf16.mxu1 %v10379_v58 }
 0x8a8   :  { %4633 = vmatpush1.bf16.msra.mxu1 %v10380_v16  ;;  %v4411_v16 = vunpack.c.h.bf16 %v10407_v12  ;;  %v10409_v12 = vld [vmem:[#allocation60_spill] sm:$0xff] }
 0x8a9   :  { %4634 = vmatprep.subr.bf16.mxu1 %v10381_v5  ;;  %v4413_v5 = vunpack.c.h.bf16 %v10408_v43 }
 0x8ac   :  { %4635 = vmatpush1.bf16.msra.mxu1 %v10382_v8 }
 0x8ad   :  { %4636 = vmatprep.subr.bf16.mxu1 %v10383_v0 }
 0x8b0   :  { %4637 = vmatpush1.bf16.msra.mxu1 %v10384_v19 }
 0x8b1   :  { %4638 = vmatprep.subr.bf16.mxu1 %v10385_v34 }
 0x8b4   :  { %4639 = vmatpush1.bf16.msra.mxu1 %v10386_v24 }
 0x8b5   :  { %4640 = vmatprep.subr.bf16.mxu1 %v10387_v6 }
 0x8b8   :  { %4641 = vmatpush1.bf16.msra.mxu1 %v10388_v10 }
 0x8b9   :  { %4642 = vmatprep.subr.bf16.mxu1 %v10389_v40 }
 0x8bc   :  { %4643 = vmatpush1.bf16.msra.mxu1 %v10390_v32 }
 0x8bd   :  { %4644 = vmatprep.subr.bf16.mxu1 %v10391_v55 }
 0x8c0   :  { %4645 = vmatpush1.bf16.msra.mxu1 %v10392_v46 }
 0x8c1   :  { %4646 = vmatprep.subr.bf16.mxu1 %v10393_v60 }
 0x8c4   :  { %4647 = vmatpush1.bf16.msra.mxu1 %v10394_v39 }
 0x8c5   :  { %4648 = vmatprep.subr.bf16.mxu1 %v10395_v56 }
 0x8c8   :  { %4649 = vmatpush1.bf16.msra.mxu1 %v10396_v54 }
 0x8c9   :  { %4650 = vmatprep.subr.bf16.mxu1 %v10397_v29 }
 0x8cc   :  { %4651 = vmatpush1.bf16.msra.mxu1 %v10398_v9 }
 0x8cd   :  { %4652 = vmatprep.subr.bf16.mxu1 %v10399_v49 }
 0x8d0   :  { %4653 = vmatpush1.bf16.msra.mxu1 %v10400_v7 }
 0x8d1   :  { %4654 = vmatprep.subr.bf16.mxu1 %v10401_v14 }
 0x8d4   :  { %4655 = vmatpush1.bf16.msra.mxu1 %v10402_v27 }
 0x8d5   :  { %4656 = vmatprep.subr.bf16.mxu1 %v10403_v4 }
 0x8d8   :  { %4657 = vmatpush1.bf16.msra.mxu1 %v10404_v28 }
 0x8d9   :  { %4658 = vmatprep.subr.bf16.mxu1 %v10405_v47 }
 0x8dc   :  { %4659 = vmatpush1.bf16.msra.mxu1 %v10406_v44 }
 0x932   :  { %v4452_v45 = vpop.f32.mrb[56].mxu1  ;;  %v4493_v58 = vpop.f32.mrb[64].mxu0 }
 0x933   :  { %v4541_v8 = vadd.f32 %v4452_v45, %v4410_v33  ;;  %v4543_v0 = vadd.f32 %v4493_v58, %v4412_v26  ;;  %v4454_v19 = vpop.f32.mrb[57].mxu1  ;;  %v4495_v34 = vpop.f32.mrb[65].mxu0  ;;  %v4414_v33 = vunpack.c.l.bf16 %v10409_v12  ;;  %v4415_v45 = vunpack.c.h.bf16 %v10409_v12 }
 0x934   :  { %v4542_v24 = vadd.f32 %v4454_v19, %v4411_v16  ;;  %v4544_v6 = vadd.f32 %v4495_v34, %v4413_v5  ;;  %v4456_v10 = vpop.f32.mrb[58].mxu1  ;;  %v4497_v40 = vpop.f32.mrb[66].mxu0 }
 0x935   :  { %v4457_v32 = vpop.f32.mrb[59].mxu1  ;;  %v4498_v55 = vpop.f32.mrb[67].mxu0  ;;  %v4545_v46 = vmul.f32 0.5, %v4541_v8  ;;  %v4547_v29 = vmul.f32 0.5, %v4543_v0 }
 0x936   :  { %v4546_v60 = vmul.f32 0.5, %v4542_v24  ;;  %v4548_v49 = vmul.f32 0.5, %v4544_v6 }
 0x937   :  { %6040 = vtanh.f32 %v4545_v46 }
 0x938   :  { %6042 = vtanh.f32 %v4546_v60 }
 0x939   :  { %6044 = vtanh.f32 %v4547_v29 }
 0x93a   :  { %6046 = vtanh.f32 %v4548_v49 }
 0x941   :  { %v6041_v39 = vpop.eup %6040 }
 0x942   :  { %v6043_v56 = vpop.eup %6042  ;;  %v4553_v54 = vadd.f32 1.0, %v6041_v39 }
 0x943   :  { %v4554_v9 = vadd.f32 1.0, %v6043_v56  ;;  %v6045_v8 = vpop.eup %6044 }
 0x944   :  { %v4557_v14 = vmul.f32 0.5, %v4553_v54  ;;  %v6047_v0 = vpop.eup %6046  ;;  %v4555_v19 = vadd.f32 1.0, %v6045_v8 }
 0x945   :  { %v4558_v28 = vmul.f32 0.5, %v4554_v9  ;;  %v4556_v34 = vadd.f32 1.0, %v6047_v0 }
 0x946   :  { %v4559_v10 = vmul.f32 0.5, %v4555_v19 }
 0x947   :  { %v4560_v32 = vmul.f32 0.5, %v4556_v34 }
 0x972   :  { %v4534_v7 = vpop.f32.mrb[60].mxu1 }
 0x973   :  { %v4561_v27 = vadd.f32 %v4534_v7, %v8096_v35  ;;  %v4536_v4 = vpop.f32.mrb[61].mxu1 }
 0x974   :  { %v4562_v47 = vadd.f32 %v4536_v4, %v8103_v38  ;;  %v4538_v44 = vpop.f32.mrb[62].mxu1 }
 0x975   :  { %v4563_v43 = vmul.f32 %v4561_v27, %v4557_v14  ;;  %v4539_v26 = vpop.f32.mrb[63].mxu1  ;;  %v10412_v44 = vld [vmem:[#allocation61_spill] sm:$0xff] }
 0x976   :  { %v4564_v58 = vmul.f32 %v4562_v47, %v4558_v28  ;;  %v4583_v12 = vunpack.c.l.bf16 %v10412_v44  ;;  %v4584_v26 = vunpack.c.h.bf16 %v10412_v44 }
 0x977   :  { %v4565_v16 = vadd.f32 %v4563_v43, %v4414_v33 }
 0x978   :  { %v4566_v5 = vadd.f32 %v4564_v58, %v4415_v45 }
 0x979   :  { %6048 = vtanh.f32 %v4565_v16 }
 0x97a   :  { %6050 = vtanh.f32 %v4566_v5 }
 0x983   :  { %v6049_v24 = vpop.eup %6048 }
 0x984   :  { %v6051_v6 = vpop.eup %6050  ;;  %v4569_v40 = vsub.f32 %v9477_v50, %v6049_v24  ;;  %v6274_v50 = vld [vmem:[%s9797_s2 + $0x2b4] ss:$24 sps:$4 sm:$0xff]  }
 0x985   :  { %v4570_v55 = vsub.f32 %v9479_v30, %v6051_v6  ;;  %v6275_v30 = vld [vmem:[%s9797_s2 + $0x2b0] ss:$24 sps:$4 sm:$0xff]  }
 0x986   :  { %v4571_v46 = vmul.f32 %v4569_v40, %v4559_v10 }
 0x987   :  { %v4572_v60 = vmul.f32 %v4570_v55, %v4560_v32 }
 0x988   :  { %v9732_v39 = vadd.f32 %v6049_v24, %v4571_v46 }
 0x989   :  { %v9734_v56 = vadd.f32 %v6051_v6, %v4572_v60 }
 0x98a   :  { %v4585_v29 = vpack.c.bf16 %v9732_v39, %v9732_v39 }
 0x98b   :  { %v4586_v54 = vpack.c.bf16 %v9734_v56, %v9734_v56 }
 0x98d   :  { %4619 = vmatprep.mubr.bf16.mxu0 %v4586_v54  ;;  %4660 = vmatprep.mubr.bf16.mxu1 %v4586_v54 }
 0x98e   :  { %4620 = vmatmul.mubr.bf16.vlgmr.msra.gmra.mrb[68].mxu0 %v4585_v29  ;;  %4661 = vmatmul.mubr.bf16.vlgmr.msra.gmra.mrb[64].mxu1 %v4585_v29 }
 0x98f   :  { %4670 = vmatpush1.bf16.msra.mxu0 %v9492_v25  ;;  %4701 = vmatprep.mubr.bf16.mxu0 %v4586_v54  ;;  %v6276_v25 = vld [vmem:[%s9797_s2 + $0x2e4] ss:$24 sps:$4 sm:$0xff]  }
 0x990   :  { %4671 = vmatprep.subr.bf16.mxu0 %v9498_v3  ;;  %v6277_v3 = vld [vmem:[%s9797_s2 + $0x2e0] ss:$24 sps:$4 sm:$0xff]  }
 0x993   :  { %4672 = vmatpush1.bf16.msra.mxu0 %v9506_v22  ;;  %v10410_v22 = vld [vmem:[#allocation55_spill] sm:$0xff] }
 0x994   :  { %4673 = vmatprep.subr.bf16.mxu0 %v9512_v21  ;;  %v4579_v21 = vunpack.c.l.bf16 %v10410_v22 }
 0x997   :  { %4674 = vmatpush1.bf16.msra.mxu0 %v9520_v23  ;;  %v10411_v23 = vld [vmem:[#allocation56_spill] sm:$0xff] }
 0x998   :  { %4675 = vmatprep.subr.bf16.mxu0 %v9526_v48  ;;  %v4581_v48 = vunpack.c.l.bf16 %v10411_v23 }
 0x99b   :  { %4676 = vmatpush1.bf16.msra.mxu0 %v9534_v57 }
 0x99c   :  { %4677 = vmatprep.subr.bf16.mxu0 %v9540_v15 }
 0x99f   :  { %4678 = vmatpush1.bf16.msra.mxu0 %v9548_v13  ;;  %v4580_v13 = vunpack.c.h.bf16 %v10410_v22 }
 0x9a0   :  { %4679 = vmatprep.subr.bf16.mxu0 %v9554_v63  ;;  %v4582_v63 = vunpack.c.h.bf16 %v10411_v23 }
 0x9a3   :  { %4680 = vmatpush1.bf16.msra.mxu0 %v9562_v11 }
 0x9a4   :  { %4681 = vmatprep.subr.bf16.mxu0 %v9568_v18 }
 0x9a7   :  { %4682 = vmatpush1.bf16.msra.mxu0 %v9576_v37 }
 0x9a8   :  { %4683 = vmatprep.subr.bf16.mxu0 %v9582_v17 }
 0x9ab   :  { %4684 = vmatpush1.bf16.msra.mxu0 %v9590_v42 }
 0x9ac   :  { %4685 = vmatprep.subr.bf16.mxu0 %v9596_v62 }
 0x9af   :  { %4686 = vmatpush1.bf16.msra.mxu0 %v9604_v51 }
 0x9b0   :  { %4687 = vmatprep.subr.bf16.mxu0 %v9610_v1 }
 0x9b3   :  { %4688 = vmatpush1.bf16.msra.mxu0 %v9618_v59 }
 0x9b4   :  { %4689 = vmatprep.subr.bf16.mxu0 %v9624_v36 }
 0x9b7   :  { %4690 = vmatpush1.bf16.msra.mxu0 %v9632_v41 }
 0x9b8   :  { %4691 = vmatprep.subr.bf16.mxu0 %v9638_v61 }
 0x9bb   :  { %4692 = vmatpush1.bf16.msra.mxu0 %v9646_v52 }
 0x9bc   :  { %4693 = vmatprep.subr.bf16.mxu0 %v9652_v53 }
 0x9bf   :  { %4694 = vmatpush1.bf16.msra.mxu0 %v9660_v20 }
 0x9c0   :  { %4695 = vmatprep.subr.bf16.mxu0 %v9666_v31 }
 0x9c3   :  { %4696 = vmatpush1.bf16.msra.mxu0 %v9674_v2 }
 0x9c4   :  { %4697 = vmatprep.subr.bf16.mxu0 %v6274_v50 }
 0x9c7   :  { %4698 = vmatpush1.bf16.msra.mxu0 %v6275_v30 }
 0x9c8   :  { %4699 = vmatprep.subr.bf16.mxu0 %v6276_v25 }
 0x9cb   :  { %4700 = vmatpush1.bf16.msra.mxu0 %v6277_v3 }
 0x9ce   :  { %4702 = vmatmul.mubr.bf16.vlgmr.msra.gmra.mrb[72].mxu0 %v4585_v29 }
 0xa61   :  { %v4621_v57 = vpop.f32.mrb[68].mxu0  ;;  %v4662_v15 = vpop.f32.mrb[64].mxu1 }
 0xa62   :  { %v4710_v11 = vadd.f32 %v4621_v57, %v4579_v21  ;;  %v4712_v18 = vadd.f32 %v4662_v15, %v4581_v48  ;;  %v4623_v37 = vpop.f32.mrb[69].mxu0  ;;  %v4664_v17 = vpop.f32.mrb[65].mxu1 }
 0xa63   :  { %v4711_v42 = vadd.f32 %v4623_v37, %v4580_v13  ;;  %v4713_v62 = vadd.f32 %v4664_v17, %v4582_v63  ;;  %v4625_v51 = vpop.f32.mrb[70].mxu0  ;;  %v4666_v1 = vpop.f32.mrb[66].mxu1 }
 0xa64   :  { %v4626_v59 = vpop.f32.mrb[71].mxu0  ;;  %v4667_v36 = vpop.f32.mrb[67].mxu1  ;;  %v4714_v41 = vmul.f32 0.5, %v4710_v11  ;;  %v4716_v31 = vmul.f32 0.5, %v4712_v18 }
 0xa65   :  { %v4715_v61 = vmul.f32 0.5, %v4711_v42  ;;  %v4717_v9 = vmul.f32 0.5, %v4713_v62 }
 0xa66   :  { %6052 = vtanh.f32 %v4714_v41 }
 0xa67   :  { %6054 = vtanh.f32 %v4715_v61 }
 0xa68   :  { %6056 = vtanh.f32 %v4716_v31 }
 0xa69   :  { %6058 = vtanh.f32 %v4717_v9 }
 0xa70   :  { %v6053_v52 = vpop.eup %6052 }
 0xa71   :  { %v6055_v53 = vpop.eup %6054  ;;  %v4722_v20 = vadd.f32 1.0, %v6053_v52 }
 0xa72   :  { %v4723_v2 = vadd.f32 1.0, %v6055_v53  ;;  %v6057_v5 = vpop.eup %6056 }
 0xa73   :  { %v4726_v7 = vmul.f32 0.5, %v4722_v20  ;;  %v6059_v8 = vpop.eup %6058 }
 0xa74   :  { %v4727_v4 = vmul.f32 0.5, %v4723_v2  ;;  %v4725_v0 = vadd.f32 1.0, %v6059_v8 }
 0xa76   :  { %v4729_v6 = vmul.f32 0.5, %v4725_v0 }
 0xaa1   :  { %v4703_v49 = vpop.f32.mrb[72].mxu0 }
 0xaa2   :  { %v4730_v14 = vadd.f32 %v4703_v49, %v8096_v35  ;;  %v4705_v27 = vpop.f32.mrb[73].mxu0  ;;  %v4724_v35 = vadd.f32 1.0, %v6057_v5 }
 0xaa3   :  { %v4731_v28 = vadd.f32 %v4705_v27, %v8103_v38  ;;  %v4707_v47 = vpop.f32.mrb[74].mxu0 }
 0xaa4   :  { %v4732_v33 = vmul.f32 %v4730_v14, %v4726_v7  ;;  %v4708_v43 = vpop.f32.mrb[75].mxu0  ;;  %v4728_v24 = vmul.f32 0.5, %v4724_v35 }
 0xaa5   :  { %v4733_v45 = vmul.f32 %v4731_v28, %v4727_v4 }
 0xaa6   :  { %v4734_v58 = vadd.f32 %v4732_v33, %v4583_v12 }
 0xaa7   :  { %v4735_v16 = vadd.f32 %v4733_v45, %v4584_v26 }
 0xaa8   :  { %6060 = vtanh.f32 %v4734_v58 }
 0xaa9   :  { %6062 = vtanh.f32 %v4735_v16 }
 0xab2   :  { %v6061_v19 = vpop.eup %6060 }
 0xab3   :  { %v6063_v34 = vpop.eup %6062  ;;  %v4738_v38 = vsub.f32 %v9732_v39, %v6061_v19 }
 0xab4   :  { %v4739_v10 = vsub.f32 %v9734_v56, %v6063_v34 }
 0xab5   :  { %v4740_v40 = vmul.f32 %v4738_v38, %v4728_v24 }
 0xab6   :  { %v4741_v32 = vmul.f32 %v4739_v10, %v4729_v6 }
 0xab7   :  { %v4742_v55 = vadd.f32 %v6061_v19, %v4740_v40 }
 0xab8   :  { %v4743_v46 = vadd.f32 %v6063_v34, %v4741_v32 }
 0xab9   :  { %4749 = vst [vmem:[%s9800_s5] sm:$0xff] %v4742_v55 }
 0xaba   :  { %4750 = vst [vmem:[%s9800_s5 + $0x8] sm:$0xff] %v4743_v46 }

// kernel: forward.1
= control target key start
LH: loop header
LB: loop body
LE: loop exit
PB: predicated region body
PF: predicated region fallthrough
CT: control target
= control target key end

     0   :  { %s9795_s1 = inlined_call_operand.vmem [shape: bf16[768,768], index: 1, kind: input, shape index: {}]   ;;  %s9796_s0 = inlined_call_operand.vmem [shape: bf16[8,8,768], index: 0, kind: input, shape index: {}]   ;;  %s9797_s2 = inlined_call_operand.vmem [shape: bf16[256,768], index: 2, kind: input, shape index: {}]   ;;  %s9798_s3 = inlined_call_operand.vmem [shape: f32[1,768], index: 3, kind: input, shape index: {}]   ;;  %s9799_s4 = inlined_call_operand.vmem [shape: f32[1,256], index: 4, kind: input, shape index: {}]   ;;  %s9800_s5 = inlined_call_operand.vmem [shape: f32[8,256], index: 5, kind: output, shape index: {}]  }
   0x1   :  { %v5356_v0 = vld [vmem:[%s9795_s1 + $0x4] ss:$24 sps:$4 sm:$0xff]   ;;  %v5360_v2 = vld [vmem:[%s9795_s1] ss:$24 sps:$4 sm:$0xff]   ;;  %v5362_v4 = vld [vmem:[%s9795_s1 + $0x34] ss:$24 sps:$4 sm:$0xff]  }
   0x2   :  { %v5358_v1 = vld [vmem:[%s9795_s1 + $0xc] ss:$24 sps:$4 sm:$0xff]   ;;  %1930 = vmatprep.subr.bf16.mxu0 %v5356_v0  ;;  %v5361_v3 = vld [vmem:[%s9795_s1 + $0x8] ss:$24 sps:$4 sm:$0xff]   ;;  %v5364_v5 = vld [vmem:[%s9795_s1 + $0x3c] ss:$24 sps:$4 sm:$0xff]  }
   0x3   :  { %2149 = vmatprep.subr.bf16.mxu1 %v5358_v1  ;;  %1931 = vmatpush1.bf16.msra.mxu0 %v5360_v2  ;;  %v5366_v6 = vld [vmem:[%s9795_s1 + $0x30] ss:$24 sps:$4 sm:$0xff]   ;;  %v5368_v8 = vld [vmem:[%s9795_s1 + $0x64] ss:$24 sps:$4 sm:$0xff]   ;;  %v5372_v10 = vld [vmem:[%s9795_s1 + $0x60] ss:$24 sps:$4 sm:$0xff]  }
   0x4   :  { %2150 = vmatpush1.bf16.msra.mxu1 %v5361_v3  ;;  %1932 = vmatprep.subr.bf16.mxu0 %v5362_v4  ;;  %v5367_v7 = vld [vmem:[%s9795_s1 + $0x38] ss:$24 sps:$4 sm:$0xff]   ;;  %v5370_v9 = vld [vmem:[%s9795_s1 + $0x6c] ss:$24 sps:$4 sm:$0xff]   ;;  %v5373_v11 = vld [vmem:[%s9795_s1 + $0x68] ss:$24 sps:$4 sm:$0xff]  }
   0x5   :  { %2151 = vmatprep.subr.bf16.mxu1 %v5364_v5  ;;  %v5374_v12 = vld [vmem:[%s9795_s1 + $0x94] ss:$24 sps:$4 sm:$0xff]   ;;  %v5378_v14 = vld [vmem:[%s9795_s1 + $0x90] ss:$24 sps:$4 sm:$0xff]   ;;  %v5380_v16 = vld [vmem:[%s9795_s1 + $0xc4] ss:$24 sps:$4 sm:$0xff]  }
   0x6   :  { %v5376_v13 = vld [vmem:[%s9795_s1 + $0x9c] ss:$24 sps:$4 sm:$0xff]   ;;  %v5379_v15 = vld [vmem:[%s9795_s1 + $0x98] ss:$24 sps:$4 sm:$0xff]   ;;  %v5382_v17 = vld [vmem:[%s9795_s1 + $0xcc] ss:$24 sps:$4 sm:$0xff]  }
   0x7   :  { %1933 = vmatpush1.bf16.msra.mxu0 %v5366_v6  ;;  %v5384_v18 = vld [vmem:[%s9795_s1 + $0xc0] ss:$24 sps:$4 sm:$0xff]   ;;  %v5386_v20 = vld [vmem:[%s9795_s1 + $0xf4] ss:$24 sps:$4 sm:$0xff]   ;;  %v5390_v22 = vld [vmem:[%s9795_s1 + $0xf0] ss:$24 sps:$4 sm:$0xff]  }
   0x8   :  { %2152 = vmatpush1.bf16.msra.mxu1 %v5367_v7  ;;  %1934 = vmatprep.subr.bf16.mxu0 %v5368_v8  ;;  %v5385_v19 = vld [vmem:[%s9795_s1 + $0xc8] ss:$24 sps:$4 sm:$0xff]   ;;  %v5388_v21 = vld [vmem:[%s9795_s1 + $0xfc] ss:$24 sps:$4 sm:$0xff]   ;;  %v5391_v23 = vld [vmem:[%s9795_s1 + $0xf8] ss:$24 sps:$4 sm:$0xff]  }
   0x9   :  { %2153 = vmatprep.subr.bf16.mxu1 %v5370_v9  ;;  %v5392_v24 = vld [vmem:[%s9795_s1 + $0x124] ss:$24 sps:$4 sm:$0xff]   ;;  %v5396_v26 = vld [vmem:[%s9795_s1 + $0x120] ss:$24 sps:$4 sm:$0xff]   ;;  %v5398_v28 = vld [vmem:[%s9795_s1 + $0x154] ss:$24 sps:$4 sm:$0xff]  }
   0xa   :  { %v5394_v25 = vld [vmem:[%s9795_s1 + $0x12c] ss:$24 sps:$4 sm:$0xff]   ;;  %v5397_v27 = vld [vmem:[%s9795_s1 + $0x128] ss:$24 sps:$4 sm:$0xff]   ;;  %v5400_v29 = vld [vmem:[%s9795_s1 + $0x15c] ss:$24 sps:$4 sm:$0xff]  }
   0xb   :  { %1935 = vmatpush1.bf16.msra.mxu0 %v5372_v10  ;;  %v5402_v30 = vld [vmem:[%s9795_s1 + $0x150] ss:$24 sps:$4 sm:$0xff]   ;;  %v5404_v32 = vld [vmem:[%s9795_s1 + $0x184] ss:$24 sps:$4 sm:$0xff]   ;;  %v5408_v34 = vld [vmem:[%s9795_s1 + $0x180] ss:$24 sps:$4 sm:$0xff]  }
   0xc   :  { %2154 = vmatpush1.bf16.msra.mxu1 %v5373_v11  ;;  %1936 = vmatprep.subr.bf16.mxu0 %v5374_v12  ;;  %v5403_v31 = vld [vmem:[%s9795_s1 + $0x158] ss:$24 sps:$4 sm:$0xff]   ;;  %v5406_v33 = vld [vmem:[%s9795_s1 + $0x18c] ss:$24 sps:$4 sm:$0xff]   ;;  %v5409_v35 = vld [vmem:[%s9795_s1 + $0x188] ss:$24 sps:$4 sm:$0xff]  }
   0xd   :  { %2155 = vmatprep.subr.bf16.mxu1 %v5376_v13  ;;  %v5410_v36 = vld [vmem:[%s9795_s1 + $0x1b4] ss:$24 sps:$4 sm:$0xff]   ;;  %v5414_v38 = vld [vmem:[%s9795_s1 + $0x1b0] ss:$24 sps:$4 sm:$0xff]   ;;  %v5416_v40 = vld [vmem:[%s9795_s1 + $0x1e4] ss:$24 sps:$4 sm:$0xff]  }
   0xe   :  { %v5412_v37 = vld [vmem:[%s9795_s1 + $0x1bc] ss:$24 sps:$4 sm:$0xff]   ;;  %v5415_v39 = vld [vmem:[%s9795_s1 + $0x1b8] ss:$24 sps:$4 sm:$0xff]   ;;  %v5418_v41 = vld [vmem:[%s9795_s1 + $0x1ec] ss:$24 sps:$4 sm:$0xff]  }
   0xf   :  { %1937 = vmatpush1.bf16.msra.mxu0 %v5378_v14  ;;  %v5420_v42 = vld [vmem:[%s9795_s1 + $0x1e0] ss:$24 sps:$4 sm:$0xff]   ;;  %v5422_v44 = vld [vmem:[%s9795_s1 + $0x214] ss:$24 sps:$4 sm:$0xff]   ;;  %v5426_v46 = vld [vmem:[%s9795_s1 + $0x210] ss:$24 sps:$4 sm:$0xff]  }
  0x10   :  { %2156 = vmatpush1.bf16.msra.mxu1 %v5379_v15  ;;  %1938 = vmatprep.subr.bf16.mxu0 %v5380_v16  ;;  %v5421_v43 = vld [vmem:[%s9795_s1 + $0x1e8] ss:$24 sps:$4 sm:$0xff]   ;;  %v5424_v45 = vld [vmem:[%s9795_s1 + $0x21c] ss:$24 sps:$4 sm:$0xff]   ;;  %v5427_v48 = vld [vmem:[%s9795_s1 + $0x218] ss:$24 sps:$4 sm:$0xff]  }
  0x11   :  { %2157 = vmatprep.subr.bf16.mxu1 %v5382_v17  ;;  %v5452_v47 = vld [vmem:[%s9796_s0 + $0x4] ss:$24 sps:$4 sm:$0xff]   ;;  %v5432_v51 = vld [vmem:[%s9795_s1 + $0x240] ss:$24 sps:$4 sm:$0xff]   ;;  %v5434_v53 = vld [vmem:[%s9795_s1 + $0x274] ss:$24 sps:$4 sm:$0xff]  }
  0x12   :  { %v5428_v49 = vld [vmem:[%s9795_s1 + $0x244] ss:$24 sps:$4 sm:$0xff]   ;;  %1962 = vmatprep.mubr.bf16.mxu0 %v5452_v47  ;;  %2181 = vmatprep.mubr.bf16.mxu1 %v5452_v47  ;;  %v5433_v52 = vld [vmem:[%s9795_s1 + $0x248] ss:$24 sps:$4 sm:$0xff]   ;;  %v5439_v56 = vld [vmem:[%s9795_s1 + $0x278] ss:$24 sps:$4 sm:$0xff]  }
  0x13   :  { %1939 = vmatpush1.bf16.msra.mxu0 %v5384_v18  ;;  %v5430_v50 = vld [vmem:[%s9795_s1 + $0x24c] ss:$24 sps:$4 sm:$0xff]   ;;  %v5436_v54 = vld [vmem:[%s9795_s1 + $0x27c] ss:$24 sps:$4 sm:$0xff]   ;;  %v5438_v55 = vld [vmem:[%s9795_s1 + $0x270] ss:$24 sps:$4 sm:$0xff]  }
  0x14   :  { %2158 = vmatpush1.bf16.msra.mxu1 %v5385_v19  ;;  %1940 = vmatprep.subr.bf16.mxu0 %v5386_v20  ;;  %v5440_v57 = vld [vmem:[%s9795_s1 + $0x2a4] ss:$24 sps:$4 sm:$0xff]   ;;  %v5444_v59 = vld [vmem:[%s9795_s1 + $0x2a0] ss:$24 sps:$4 sm:$0xff]   ;;  %v5446_v61 = vld [vmem:[%s9795_s1 + $0x2d4] ss:$24 sps:$4 sm:$0xff]  }
  0x15   :  { %2159 = vmatprep.subr.bf16.mxu1 %v5388_v21  ;;  %v5442_v58 = vld [vmem:[%s9795_s1 + $0x2ac] ss:$24 sps:$4 sm:$0xff]   ;;  %v5445_v60 = vld [vmem:[%s9795_s1 + $0x2a8] ss:$24 sps:$4 sm:$0xff]   ;;  %v5448_v62 = vld [vmem:[%s9795_s1 + $0x2dc] ss:$24 sps:$4 sm:$0xff]  }
  0x16   :  { %v5450_v63 = vld [vmem:[%s9795_s1 + $0x2d0] ss:$24 sps:$4 sm:$0xff]   ;;  %v5456_v1 = vld [vmem:[%s9795_s1 + $0x304] ss:$24 sps:$4 sm:$0xff]   ;;  %v5454_v3 = vld [vmem:[%s9795_s1 + $0x300] ss:$24 sps:$4 sm:$0xff]  }
  0x17   :  { %1941 = vmatpush1.bf16.msra.mxu0 %v5390_v22  ;;  %v5451_v0 = vld [vmem:[%s9795_s1 + $0x2d8] ss:$24 sps:$4 sm:$0xff]   ;;  %v5459_v2 = vld [vmem:[%s9795_s1 + $0x30c] ss:$24 sps:$4 sm:$0xff]   ;;  %v5457_v4 = vld [vmem:[%s9795_s1 + $0x308] ss:$24 sps:$4 sm:$0xff]  }
  0x18   :  { %2160 = vmatpush1.bf16.msra.mxu1 %v5391_v23  ;;  %1942 = vmatprep.subr.bf16.mxu0 %v5392_v24  ;;  %v5460_v5 = vld [vmem:[%s9796_s0] ss:$24 sps:$4 sm:$0xff]   ;;  %v5463_v6 = vld [vmem:[%s9795_s1 + $0x334] ss:$24 sps:$4 sm:$0xff]   ;;  %v5461_v8 = vld [vmem:[%s9795_s1 + $0x330] ss:$24 sps:$4 sm:$0xff]  }
  0x19   :  { %2161 = vmatprep.subr.bf16.mxu1 %v5394_v25  ;;  %v5466_v7 = vld [vmem:[%s9795_s1 + $0x33c] ss:$24 sps:$4 sm:$0xff]   ;;  %v5464_v9 = vld [vmem:[%s9795_s1 + $0x338] ss:$24 sps:$4 sm:$0xff]   ;;  %v5472_v11 = vld [vmem:[%s9795_s1 + $0x36c] ss:$24 sps:$4 sm:$0xff]  }
  0x1a   :  { %v5469_v10 = vld [vmem:[%s9795_s1 + $0x364] ss:$24 sps:$4 sm:$0xff]   ;;  %v5467_v12 = vld [vmem:[%s9795_s1 + $0x360] ss:$24 sps:$4 sm:$0xff]   ;;  %v5515_v13 = vld [vmem:[%s9796_s0 + $0x34] ss:$24 sps:$4 sm:$0xff]  }
  0x1b   :  { %1943 = vmatpush1.bf16.msra.mxu0 %v5396_v26  ;;  %v5470_v14 = vld [vmem:[%s9795_s1 + $0x368] ss:$24 sps:$4 sm:$0xff]   ;;  %v5475_v15 = vld [vmem:[%s9795_s1 + $0x394] ss:$24 sps:$4 sm:$0xff]   ;;  %v5476_v19 = vld [vmem:[%s9795_s1 + $0x398] ss:$24 sps:$4 sm:$0xff]  }
  0x1c   :  { %2162 = vmatpush1.bf16.msra.mxu1 %v5397_v27  ;;  %1944 = vmatprep.subr.bf16.mxu0 %v5398_v28  ;;  %v5478_v16 = vld [vmem:[%s9795_s1 + $0x39c] ss:$24 sps:$4 sm:$0xff]   ;;  %v5523_v17 = vld [vmem:[%s9796_s0 + $0x30] ss:$24 sps:$4 sm:$0xff]   ;;  %v5484_v21 = vld [vmem:[%s9795_s1 + $0x3cc] ss:$24 sps:$4 sm:$0xff]  }
  0x1d   :  { %2163 = vmatprep.subr.bf16.mxu1 %v5400_v29  ;;  %v5473_v18 = vld [vmem:[%s9795_s1 + $0x390] ss:$24 sps:$4 sm:$0xff]   ;;  %v5481_v20 = vld [vmem:[%s9795_s1 + $0x3c4] ss:$24 sps:$4 sm:$0xff]   ;;  %v5479_v23 = vld [vmem:[%s9795_s1 + $0x3c0] ss:$24 sps:$4 sm:$0xff]  }
  0x1e   :  { %v5530_v22 = vld [vmem:[%s9796_s0 + $0x64] ss:$24 sps:$4 sm:$0xff]   ;;  %v5482_v24 = vld [vmem:[%s9795_s1 + $0x3c8] ss:$24 sps:$4 sm:$0xff]   ;;  %v5487_v25 = vld [vmem:[%s9795_s1 + $0x3f4] ss:$24 sps:$4 sm:$0xff]  }
  0x1f   :  { %1945 = vmatpush1.bf16.msra.mxu0 %v5402_v30  ;;  %v5490_v26 = vld [vmem:[%s9795_s1 + $0x3fc] ss:$24 sps:$4 sm:$0xff]   ;;  %v5485_v27 = vld [vmem:[%s9795_s1 + $0x3f0] ss:$24 sps:$4 sm:$0xff]   ;;  %v5538_v28 = vld [vmem:[%s9796_s0 + $0x60] ss:$24 sps:$4 sm:$0xff]  }
  0x20   :  { %2164 = vmatpush1.bf16.msra.mxu1 %v5403_v31  ;;  %1946 = vmatprep.subr.bf16.mxu0 %v5404_v32  ;;  %v5488_v29 = vld [vmem:[%s9795_s1 + $0x3f8] ss:$24 sps:$4 sm:$0xff]   ;;  %v5493_v30 = vld [vmem:[%s9795_s1 + $0x424] ss:$24 sps:$4 sm:$0xff]   ;;  %v5545_v31 = vld [vmem:[%s9796_s0 + $0x94] ss:$24 sps:$4 sm:$0xff]  }
  0x21   :  { %2165 = vmatprep.subr.bf16.mxu1 %v5406_v33  ;;  %v5496_v32 = vld [vmem:[%s9795_s1 + $0x42c] ss:$24 sps:$4 sm:$0xff]   ;;  %v5491_v33 = vld [vmem:[%s9795_s1 + $0x420] ss:$24 sps:$4 sm:$0xff]   ;;  %v5509_v47 = vld [vmem:[%s9795_s1 + $0x4b0] ss:$24 sps:$4 sm:$0xff]  }
  0x23   :  { %1947 = vmatpush1.bf16.msra.mxu0 %v5408_v34  ;;  %v5494_v34 = vld [vmem:[%s9795_s1 + $0x428] ss:$24 sps:$4 sm:$0xff]  }
  0x24   :  { %2166 = vmatpush1.bf16.msra.mxu1 %v5409_v35  ;;  %1948 = vmatprep.subr.bf16.mxu0 %v5410_v36  ;;  %v5499_v35 = vld [vmem:[%s9795_s1 + $0x454] ss:$24 sps:$4 sm:$0xff]  }
  0x25   :  { %2167 = vmatprep.subr.bf16.mxu1 %v5412_v37  ;;  %v5502_v36 = vld [vmem:[%s9795_s1 + $0x45c] ss:$24 sps:$4 sm:$0xff]   ;;  %v5497_v37 = vld [vmem:[%s9795_s1 + $0x450] ss:$24 sps:$4 sm:$0xff]  }
  0x27   :  { %1949 = vmatpush1.bf16.msra.mxu0 %v5414_v38  ;;  %v5553_v38 = vld [vmem:[%s9796_s0 + $0x90] ss:$24 sps:$4 sm:$0xff]  }
  0x28   :  { %2168 = vmatpush1.bf16.msra.mxu1 %v5415_v39  ;;  %1950 = vmatprep.subr.bf16.mxu0 %v5416_v40  ;;  %v5500_v39 = vld [vmem:[%s9795_s1 + $0x458] ss:$24 sps:$4 sm:$0xff]   ;;  %v5562_v40 = vld [vmem:[%s9796_s0 + $0xc] ss:$24 sps:$4 sm:$0xff]  }
  0x29   :  { %2169 = vmatprep.subr.bf16.mxu1 %v5418_v41  ;;  %v5505_v41 = vld [vmem:[%s9795_s1 + $0x484] ss:$24 sps:$4 sm:$0xff]  }
  0x2b   :  { %1951 = vmatpush1.bf16.msra.mxu0 %v5420_v42  ;;  %v5508_v42 = vld [vmem:[%s9795_s1 + $0x48c] ss:$24 sps:$4 sm:$0xff]  }
  0x2c   :  { %2170 = vmatpush1.bf16.msra.mxu1 %v5421_v43  ;;  %1952 = vmatprep.subr.bf16.mxu0 %v5422_v44  ;;  %v5503_v43 = vld [vmem:[%s9795_s1 + $0x480] ss:$24 sps:$4 sm:$0xff]  }
  0x2d   :  { %2171 = vmatprep.subr.bf16.mxu1 %v5424_v45  ;;  %v5506_v44 = vld [vmem:[%s9795_s1 + $0x488] ss:$24 sps:$4 sm:$0xff]   ;;  %v5511_v45 = vld [vmem:[%s9795_s1 + $0x4b4] ss:$24 sps:$4 sm:$0xff]  }
  0x2f   :  { %1953 = vmatpush1.bf16.msra.mxu0 %v5426_v46  ;;  %v5514_v46 = vld [vmem:[%s9795_s1 + $0x4bc] ss:$24 sps:$4 sm:$0xff]  }
  0x30   :  { %2172 = vmatpush1.bf16.msra.mxu1 %v5427_v48  ;;  %1954 = vmatprep.subr.bf16.mxu0 %v5428_v49  ;;  %v5512_v48 = vld [vmem:[%s9795_s1 + $0x4b8] ss:$24 sps:$4 sm:$0xff]   ;;  %v5519_v49 = vld [vmem:[%s9795_s1 + $0x4e4] ss:$24 sps:$4 sm:$0xff]  }
  0x31   :  { %2173 = vmatprep.subr.bf16.mxu1 %v5430_v50  ;;  %v5522_v50 = vld [vmem:[%s9795_s1 + $0x4ec] ss:$24 sps:$4 sm:$0xff]  }
  0x33   :  { %1955 = vmatpush1.bf16.msra.mxu0 %v5432_v51  ;;  %v5517_v51 = vld [vmem:[%s9795_s1 + $0x4e0] ss:$24 sps:$4 sm:$0xff]  }
  0x34   :  { %2174 = vmatpush1.bf16.msra.mxu1 %v5433_v52  ;;  %1956 = vmatprep.subr.bf16.mxu0 %v5434_v53  ;;  %v5520_v52 = vld [vmem:[%s9795_s1 + $0x4e8] ss:$24 sps:$4 sm:$0xff]   ;;  %v5526_v53 = vld [vmem:[%s9795_s1 + $0x514] ss:$24 sps:$4 sm:$0xff]  }
  0x35   :  { %2175 = vmatprep.subr.bf16.mxu1 %v5436_v54  ;;  %v5529_v54 = vld [vmem:[%s9795_s1 + $0x51c] ss:$24 sps:$4 sm:$0xff]  }
  0x37   :  { %1957 = vmatpush1.bf16.msra.mxu0 %v5438_v55  ;;  %v5524_v55 = vld [vmem:[%s9795_s1 + $0x510] ss:$24 sps:$4 sm:$0xff]  }
  0x38   :  { %2176 = vmatpush1.bf16.msra.mxu1 %v5439_v56  ;;  %1958 = vmatprep.subr.bf16.mxu0 %v5440_v57  ;;  %v5527_v56 = vld [vmem:[%s9795_s1 + $0x518] ss:$24 sps:$4 sm:$0xff]   ;;  %v5534_v57 = vld [vmem:[%s9795_s1 + $0x544] ss:$24 sps:$4 sm:$0xff]  }
  0x39   :  { %2177 = vmatprep.subr.bf16.mxu1 %v5442_v58  ;;  %v5537_v58 = vld [vmem:[%s9795_s1 + $0x54c] ss:$24 sps:$4 sm:$0xff]  }
  0x3b   :  { %1959 = vmatpush1.bf16.msra.mxu0 %v5444_v59  ;;  %v5532_v59 = vld [vmem:[%s9795_s1 + $0x540] ss:$24 sps:$4 sm:$0xff]  }
  0x3c   :  { %2178 = vmatpush1.bf16.msra.mxu1 %v5445_v60  ;;  %1960 = vmatprep.subr.bf16.mxu0 %v5446_v61  ;;  %v5535_v60 = vld [vmem:[%s9795_s1 + $0x548] ss:$24 sps:$4 sm:$0xff]   ;;  %v5541_v61 = vld [vmem:[%s9795_s1 + $0x574] ss:$24 sps:$4 sm:$0xff]  }
  0x3d   :  { %2179 = vmatprep.subr.bf16.mxu1 %v5448_v62  ;;  %v5544_v62 = vld [vmem:[%s9795_s1 + $0x57c] ss:$24 sps:$4 sm:$0xff]  }
  0x3f   :  { %1961 = vmatpush1.bf16.msra.mxu0 %v5450_v63  ;;  %v5539_v63 = vld [vmem:[%s9795_s1 + $0x570] ss:$24 sps:$4 sm:$0xff]  }
  0x40   :  { %2180 = vmatpush1.bf16.msra.mxu1 %v5451_v0  ;;  %2003 = vmatprep.subr.bf16.mxu0 %v5456_v1  ;;  %v5542_v0 = vld [vmem:[%s9795_s1 + $0x578] ss:$24 sps:$4 sm:$0xff]   ;;  %v5549_v1 = vld [vmem:[%s9795_s1 + $0x5a4] ss:$24 sps:$4 sm:$0xff]  }
  0x41   :  { %2222 = vmatprep.subr.bf16.mxu1 %v5459_v2  ;;  %v5552_v2 = vld [vmem:[%s9795_s1 + $0x5ac] ss:$24 sps:$4 sm:$0xff]  }
  0x42   :  { %1963 = vmatmul.mubr.bf16.vlgmr.msra.gmra.mrb[0].mxu0 %v5460_v5 }
  0x43   :  { %2182 = vmatmul.mubr.bf16.vlgmr.msra.gmra.mrb[0].mxu1 %v5460_v5  ;;  %2004 = vmatpush1.bf16.msra.mxu0 %v5454_v3  ;;  %v5547_v3 = vld [vmem:[%s9795_s1 + $0x5a0] ss:$24 sps:$4 sm:$0xff]   ;;  %v5556_v5 = vld [vmem:[%s9795_s1 + $0x5d4] ss:$24 sps:$4 sm:$0xff]  }
  0x44   :  { %2223 = vmatpush1.bf16.msra.mxu1 %v5457_v4  ;;  %2005 = vmatprep.subr.bf16.mxu0 %v5463_v6  ;;  %v5550_v4 = vld [vmem:[%s9795_s1 + $0x5a8] ss:$24 sps:$4 sm:$0xff]   ;;  %v5559_v6 = vld [vmem:[%s9795_s1 + $0x5dc] ss:$24 sps:$4 sm:$0xff]  }
  0x45   :  { %2224 = vmatprep.subr.bf16.mxu1 %v5466_v7  ;;  %1972 = vmatprep.mubr.bf16.mxu0 %v5515_v13  ;;  %v5554_v7 = vld [vmem:[%s9795_s1 + $0x5d0] ss:$24 sps:$4 sm:$0xff]  }
  0x46   :  { %2191 = vmatprep.mubr.bf16.mxu1 %v5515_v13  ;;  %v5566_v13 = vld [vmem:[%s9795_s1 + $0x608] ss:$24 sps:$4 sm:$0xff]  }
  0x47   :  { %2006 = vmatpush1.bf16.msra.mxu0 %v5461_v8  ;;  %v5557_v8 = vld [vmem:[%s9795_s1 + $0x5d8] ss:$24 sps:$4 sm:$0xff]  }
  0x48   :  { %2225 = vmatpush1.bf16.msra.mxu1 %v5464_v9  ;;  %2007 = vmatprep.subr.bf16.mxu0 %v5469_v10  ;;  %v5565_v9 = vld [vmem:[%s9795_s1 + $0x604] ss:$24 sps:$4 sm:$0xff]  }
  0x49   :  { %2226 = vmatprep.subr.bf16.mxu1 %v5472_v11  ;;  %v5568_v10 = vld [vmem:[%s9795_s1 + $0x60c] ss:$24 sps:$4 sm:$0xff]   ;;  %v5560_v11 = vld [vmem:[%s9796_s0 + $0x8] ss:$24 sps:$4 sm:$0xff]  }
  0x4a   :  { %1973 = vmatmul.mubr.bf16.gmra.mrb[4].mxu0 %v5523_v17 }
  0x4b   :  { %2008 = vmatpush1.bf16.msra.mxu0 %v5467_v12  ;;  %2192 = vmatmul.mubr.bf16.gmra.mrb[4].mxu1 %v5523_v17  ;;  %v5563_v12 = vld [vmem:[%s9795_s1 + $0x600] ss:$24 sps:$4 sm:$0xff]   ;;  %v5569_v17 = vld [vmem:[%s9795_s1 + $0x630] ss:$24 sps:$4 sm:$0xff]  }
  0x4c   :  { %2227 = vmatpush1.bf16.msra.mxu1 %v5470_v14  ;;  %2009 = vmatprep.subr.bf16.mxu0 %v5475_v15  ;;  %v5571_v14 = vld [vmem:[%s9795_s1 + $0x634] ss:$24 sps:$4 sm:$0xff]  }
  0x4d   :  { %2228 = vmatprep.subr.bf16.mxu1 %v5478_v16  ;;  %1982 = vmatprep.mubr.bf16.mxu0 %v5530_v22  ;;  %v5574_v15 = vld [vmem:[%s9795_s1 + $0x63c] ss:$24 sps:$4 sm:$0xff]  }
  0x4e   :  { %2201 = vmatprep.mubr.bf16.mxu1 %v5530_v22  ;;  %v5623_v16 = vld [vmem:[%s9796_s0 + $0x3c] ss:$24 sps:$4 sm:$0xff]   ;;  %v5578_v22 = vld [vmem:[%s9795_s1 + $0x668] ss:$24 sps:$4 sm:$0xff]  }
  0x4f   :  { %2010 = vmatpush1.bf16.msra.mxu0 %v5473_v18  ;;  %v5572_v18 = vld [vmem:[%s9795_s1 + $0x638] ss:$24 sps:$4 sm:$0xff]  }
  0x50   :  { %2229 = vmatpush1.bf16.msra.mxu1 %v5476_v19  ;;  %2011 = vmatprep.subr.bf16.mxu0 %v5481_v20  ;;  %v5577_v19 = vld [vmem:[%s9795_s1 + $0x664] ss:$24 sps:$4 sm:$0xff]  }
  0x51   :  { %2230 = vmatprep.subr.bf16.mxu1 %v5484_v21  ;;  %v5580_v20 = vld [vmem:[%s9795_s1 + $0x66c] ss:$24 sps:$4 sm:$0xff]   ;;  %v5575_v21 = vld [vmem:[%s9795_s1 + $0x660] ss:$24 sps:$4 sm:$0xff]  }
  0x52   :  { %1983 = vmatmul.mubr.bf16.gmra.mrb[8].mxu0 %v5538_v28 }
  0x53   :  { %2012 = vmatpush1.bf16.msra.mxu0 %v5479_v23  ;;  %2202 = vmatmul.mubr.bf16.gmra.mrb[8].mxu1 %v5538_v28  ;;  %v5625_v23 = vld [vmem:[%s9796_s0 + $0x38] ss:$24 sps:$4 sm:$0xff]  }
  0x54   :  { %2231 = vmatpush1.bf16.msra.mxu1 %v5482_v24  ;;  %2013 = vmatprep.subr.bf16.mxu0 %v5487_v25  ;;  %v5583_v24 = vld [vmem:[%s9795_s1 + $0x694] ss:$24 sps:$4 sm:$0xff]   ;;  %v5584_v28 = vld [vmem:[%s9795_s1 + $0x698] ss:$24 sps:$4 sm:$0xff]  }
  0x55   :  { %2232 = vmatprep.subr.bf16.mxu1 %v5490_v26  ;;  %1992 = vmatprep.mubr.bf16.mxu0 %v5545_v31  ;;  %v5586_v25 = vld [vmem:[%s9795_s1 + $0x69c] ss:$24 sps:$4 sm:$0xff]   ;;  %v5638_v26 = vld [vmem:[%s9796_s0 + $0x6c] ss:$24 sps:$4 sm:$0xff]  }
  0x56   :  { %2211 = vmatprep.mubr.bf16.mxu1 %v5545_v31  ;;  %v5587_v31 = vld [vmem:[%s9795_s1 + $0x6c0] ss:$24 sps:$4 sm:$0xff]  }
  0x57   :  { %2014 = vmatpush1.bf16.msra.mxu0 %v5485_v27  ;;  %v5581_v27 = vld [vmem:[%s9795_s1 + $0x690] ss:$24 sps:$4 sm:$0xff]  }
  0x58   :  { %2233 = vmatpush1.bf16.msra.mxu1 %v5488_v29  ;;  %2015 = vmatprep.subr.bf16.mxu0 %v5493_v30  ;;  %v5589_v29 = vld [vmem:[%s9795_s1 + $0x6c4] ss:$24 sps:$4 sm:$0xff]  }
  0x59   :  { %2234 = vmatprep.subr.bf16.mxu1 %v5496_v32  ;;  %v5592_v30 = vld [vmem:[%s9795_s1 + $0x6cc] ss:$24 sps:$4 sm:$0xff]   ;;  %v5590_v32 = vld [vmem:[%s9795_s1 + $0x6c8] ss:$24 sps:$4 sm:$0xff]  }
  0x5a   :  { %1993 = vmatmul.mubr.bf16.gmra.mrb[12].mxu0 %v5553_v38 }
  0x5b   :  { %2016 = vmatpush1.bf16.msra.mxu0 %v5491_v33  ;;  %2212 = vmatmul.mubr.bf16.gmra.mrb[12].mxu1 %v5553_v38  ;;  %v5640_v33 = vld [vmem:[%s9796_s0 + $0x68] ss:$24 sps:$4 sm:$0xff]   ;;  %v5596_v38 = vld [vmem:[%s9795_s1 + $0x6f8] ss:$24 sps:$4 sm:$0xff]  }
  0x5c   :  { %2235 = vmatpush1.bf16.msra.mxu1 %v5494_v34  ;;  %2017 = vmatprep.subr.bf16.mxu0 %v5499_v35  ;;  %v5595_v34 = vld [vmem:[%s9795_s1 + $0x6f4] ss:$24 sps:$4 sm:$0xff]  }
  0x5d   :  { %2236 = vmatprep.subr.bf16.mxu1 %v5502_v36  ;;  %2035 = vmatprep.mubr.bf16.mxu0 %v5562_v40  ;;  %v5598_v35 = vld [vmem:[%s9795_s1 + $0x6fc] ss:$24 sps:$4 sm:$0xff]  }
  0x5e   :  { %2254 = vmatprep.mubr.bf16.mxu1 %v5562_v40  ;;  %v5653_v36 = vld [vmem:[%s9796_s0 + $0x9c] ss:$24 sps:$4 sm:$0xff]   ;;  %v5604_v40 = vld [vmem:[%s9795_s1 + $0x72c] ss:$24 sps:$4 sm:$0xff]  }
  0x5f   :  { %2018 = vmatpush1.bf16.msra.mxu0 %v5497_v37  ;;  %v5593_v37 = vld [vmem:[%s9795_s1 + $0x6f0] ss:$24 sps:$4 sm:$0xff]  }
  0x60   :  { %2237 = vmatpush1.bf16.msra.mxu1 %v5500_v39  ;;  %2019 = vmatprep.subr.bf16.mxu0 %v5505_v41  ;;  %v5601_v39 = vld [vmem:[%s9795_s1 + $0x724] ss:$24 sps:$4 sm:$0xff]   ;;  %v5599_v41 = vld [vmem:[%s9795_s1 + $0x720] ss:$24 sps:$4 sm:$0xff]  }
  0x61   :  { %2238 = vmatprep.subr.bf16.mxu1 %v5508_v42  ;;  %v5602_v42 = vld [vmem:[%s9795_s1 + $0x728] ss:$24 sps:$4 sm:$0xff]  }
  0x63   :  { %2020 = vmatpush1.bf16.msra.mxu0 %v5503_v43  ;;  %v5655_v43 = vld [vmem:[%s9796_s0 + $0x98] ss:$24 sps:$4 sm:$0xff]  }
  0x64   :  { %2239 = vmatpush1.bf16.msra.mxu1 %v5506_v44  ;;  %2021 = vmatprep.subr.bf16.mxu0 %v5511_v45  ;;  %v5607_v44 = vld [vmem:[%s9795_s1 + $0x754] ss:$24 sps:$4 sm:$0xff]  }
  0x65   :  { %2240 = vmatprep.subr.bf16.mxu1 %v5514_v46  ;;  %v5610_v45 = vld [vmem:[%s9795_s1 + $0x75c] ss:$24 sps:$4 sm:$0xff]  }
  0x66   :  { %v5670_v46 = vld [vmem:[%s9796_s0 + $0x14] ss:$24 sps:$4 sm:$0xff]  }
  0x67   :  { %2022 = vmatpush1.bf16.msra.mxu0 %v5509_v47  ;;  %v5605_v47 = vld [vmem:[%s9795_s1 + $0x750] ss:$24 sps:$4 sm:$0xff]  }
  0x68   :  { %2241 = vmatpush1.bf16.msra.mxu1 %v5512_v48  ;;  %2023 = vmatprep.subr.bf16.mxu0 %v5519_v49  ;;  %v5608_v48 = vld [vmem:[%s9795_s1 + $0x758] ss:$24 sps:$4 sm:$0xff]   ;;  %v5613_v49 = vld [vmem:[%s9795_s1 + $0x784] ss:$24 sps:$4 sm:$0xff]  }
  0x69   :  { %2242 = vmatprep.subr.bf16.mxu1 %v5522_v50  ;;  %v5616_v50 = vld [vmem:[%s9795_s1 + $0x78c] ss:$24 sps:$4 sm:$0xff]  }
  0x6b   :  { %2024 = vmatpush1.bf16.msra.mxu0 %v5517_v51  ;;  %v5611_v51 = vld [vmem:[%s9795_s1 + $0x780] ss:$24 sps:$4 sm:$0xff]  }
  0x6c   :  { %2243 = vmatpush1.bf16.msra.mxu1 %v5520_v52  ;;  %2025 = vmatprep.subr.bf16.mxu0 %v5526_v53  ;;  %v5614_v52 = vld [vmem:[%s9795_s1 + $0x788] ss:$24 sps:$4 sm:$0xff]   ;;  %v5619_v53 = vld [vmem:[%s9795_s1 + $0x7b4] ss:$24 sps:$4 sm:$0xff]  }
  0x6d   :  { %2244 = vmatprep.subr.bf16.mxu1 %v5529_v54  ;;  %v5622_v54 = vld [vmem:[%s9795_s1 + $0x7bc] ss:$24 sps:$4 sm:$0xff]  }
  0x6f   :  { %2026 = vmatpush1.bf16.msra.mxu0 %v5524_v55  ;;  %v5617_v55 = vld [vmem:[%s9795_s1 + $0x7b0] ss:$24 sps:$4 sm:$0xff]  }
  0x70   :  { %2245 = vmatpush1.bf16.msra.mxu1 %v5527_v56  ;;  %2027 = vmatprep.subr.bf16.mxu0 %v5534_v57  ;;  %v5620_v56 = vld [vmem:[%s9795_s1 + $0x7b8] ss:$24 sps:$4 sm:$0xff]   ;;  %v5628_v57 = vld [vmem:[%s9795_s1 + $0x7e4] ss:$24 sps:$4 sm:$0xff]  }
  0x71   :  { %2246 = vmatprep.subr.bf16.mxu1 %v5537_v58  ;;  %v5631_v58 = vld [vmem:[%s9795_s1 + $0x7ec] ss:$24 sps:$4 sm:$0xff]  }
  0x73   :  { %2028 = vmatpush1.bf16.msra.mxu0 %v5532_v59  ;;  %v5626_v59 = vld [vmem:[%s9795_s1 + $0x7e0] ss:$24 sps:$4 sm:$0xff]  }
  0x74   :  { %2247 = vmatpush1.bf16.msra.mxu1 %v5535_v60  ;;  %2029 = vmatprep.subr.bf16.mxu0 %v5541_v61  ;;  %v5629_v60 = vld [vmem:[%s9795_s1 + $0x7e8] ss:$24 sps:$4 sm:$0xff]   ;;  %v5634_v61 = vld [vmem:[%s9795_s1 + $0x814] ss:$24 sps:$4 sm:$0xff]  }
  0x75   :  { %2248 = vmatprep.subr.bf16.mxu1 %v5544_v62  ;;  %v5637_v62 = vld [vmem:[%s9795_s1 + $0x81c] ss:$24 sps:$4 sm:$0xff]  }
  0x77   :  { %2030 = vmatpush1.bf16.msra.mxu0 %v5539_v63  ;;  %v5632_v63 = vld [vmem:[%s9795_s1 + $0x810] ss:$24 sps:$4 sm:$0xff]  }
  0x78   :  { %2249 = vmatpush1.bf16.msra.mxu1 %v5542_v0  ;;  %2031 = vmatprep.subr.bf16.mxu0 %v5549_v1  ;;  %v5635_v0 = vld [vmem:[%s9795_s1 + $0x818] ss:$24 sps:$4 sm:$0xff]   ;;  %v5643_v1 = vld [vmem:[%s9795_s1 + $0x844] ss:$24 sps:$4 sm:$0xff]  }
  0x79   :  { %2250 = vmatprep.subr.bf16.mxu1 %v5552_v2  ;;  %v5646_v2 = vld [vmem:[%s9795_s1 + $0x84c] ss:$24 sps:$4 sm:$0xff]  }
  0x7b   :  { %2032 = vmatpush1.bf16.msra.mxu0 %v5547_v3  ;;  %v5641_v3 = vld [vmem:[%s9795_s1 + $0x840] ss:$24 sps:$4 sm:$0xff]  }
  0x7c   :  { %2251 = vmatpush1.bf16.msra.mxu1 %v5550_v4  ;;  %2033 = vmatprep.subr.bf16.mxu0 %v5556_v5  ;;  %v5644_v4 = vld [vmem:[%s9795_s1 + $0x848] ss:$24 sps:$4 sm:$0xff]   ;;  %v5649_v5 = vld [vmem:[%s9795_s1 + $0x874] ss:$24 sps:$4 sm:$0xff]  }
  0x7d   :  { %2252 = vmatprep.subr.bf16.mxu1 %v5559_v6  ;;  %v5652_v6 = vld [vmem:[%s9795_s1 + $0x87c] ss:$24 sps:$4 sm:$0xff]  }
  0x7f   :  { %2034 = vmatpush1.bf16.msra.mxu0 %v5554_v7  ;;  %v5647_v7 = vld [vmem:[%s9795_s1 + $0x870] ss:$24 sps:$4 sm:$0xff]  }
  0x80   :  { %2253 = vmatpush1.bf16.msra.mxu1 %v5557_v8  ;;  %2076 = vmatprep.subr.bf16.mxu0 %v5565_v9  ;;  %v5650_v8 = vld [vmem:[%s9795_s1 + $0x878] ss:$24 sps:$4 sm:$0xff]   ;;  %v5658_v9 = vld [vmem:[%s9795_s1 + $0x8a4] ss:$24 sps:$4 sm:$0xff]  }
  0x81   :  { %2295 = vmatprep.subr.bf16.mxu1 %v5568_v10  ;;  %v5661_v10 = vld [vmem:[%s9795_s1 + $0x8ac] ss:$24 sps:$4 sm:$0xff]  }
  0x82   :  { %2036 = vmatmul.mubr.bf16.vlgmr.msra.gmra.mrb[0].mxu0 %v5560_v11 }
  0x83   :  { %2255 = vmatmul.mubr.bf16.vlgmr.msra.gmra.mrb[0].mxu1 %v5560_v11  ;;  %2077 = vmatpush1.bf16.msra.mxu0 %v5563_v12  ;;  %v5656_v11 = vld [vmem:[%s9795_s1 + $0x8a0] ss:$24 sps:$4 sm:$0xff]  }
  0x84   :  { %2296 = vmatpush1.bf16.msra.mxu1 %v5566_v13  ;;  %2078 = vmatprep.subr.bf16.mxu0 %v5571_v14  ;;  %v5659_v12 = vld [vmem:[%s9795_s1 + $0x8a8] ss:$24 sps:$4 sm:$0xff]   ;;  %v5664_v13 = vld [vmem:[%s9795_s1 + $0x8d4] ss:$24 sps:$4 sm:$0xff]  }
  0x85   :  { %2297 = vmatprep.subr.bf16.mxu1 %v5574_v15  ;;  %2045 = vmatprep.mubr.bf16.mxu0 %v5623_v16  ;;  %v5667_v14 = vld [vmem:[%s9795_s1 + $0x8dc] ss:$24 sps:$4 sm:$0xff]   ;;  %v5662_v15 = vld [vmem:[%s9795_s1 + $0x8d0] ss:$24 sps:$4 sm:$0xff]  }
  0x86   :  { %2264 = vmatprep.mubr.bf16.mxu1 %v5623_v16  ;;  %v5665_v16 = vld [vmem:[%s9795_s1 + $0x8d8] ss:$24 sps:$4 sm:$0xff]  }
  0x87   :  { %2079 = vmatpush1.bf16.msra.mxu0 %v5569_v17  ;;  %v5673_v17 = vld [vmem:[%s9795_s1 + $0x14] ss:$24 sps:$4 sm:$0xff]  }
  0x88   :  { %2298 = vmatpush1.bf16.msra.mxu1 %v5572_v18  ;;  %2080 = vmatprep.subr.bf16.mxu0 %v5577_v19  ;;  %v5674_v18 = vld [vmem:[%s9797_s2 + $0x4] ss:$24 sps:$4 sm:$0xff]   ;;  %v5668_v19 = vld [vmem:[%s9796_s0 + $0x10] ss:$24 sps:$4 sm:$0xff]  }
  0x89   :  { %2299 = vmatprep.subr.bf16.mxu1 %v5580_v20  ;;  %v5671_v20 = vld [vmem:[%s9795_s1 + $0x10] ss:$24 sps:$4 sm:$0xff]  }
  0x8a   :  { %2046 = vmatmul.mubr.bf16.gmra.mrb[4].mxu0 %v5625_v23 }
  0x8b   :  { %2265 = vmatmul.mubr.bf16.gmra.mrb[4].mxu1 %v5625_v23  ;;  %2081 = vmatpush1.bf16.msra.mxu0 %v5575_v21  ;;  %v5676_v21 = vld [vmem:[%s9797_s2] ss:$24 sps:$4 sm:$0xff]   ;;  %v5680_v23 = vld [vmem:[%s9797_s2 + $0x34] ss:$24 sps:$4 sm:$0xff]  }
  0x8c   :  { %2300 = vmatpush1.bf16.msra.mxu1 %v5578_v22  ;;  %2082 = vmatprep.subr.bf16.mxu0 %v5583_v24  ;;  %v5679_v22 = vld [vmem:[%s9795_s1 + $0x44] ss:$24 sps:$4 sm:$0xff]  }
  0x8d   :  { %2301 = vmatprep.subr.bf16.mxu1 %v5586_v25  ;;  %2055 = vmatprep.mubr.bf16.mxu0 %v5638_v26  ;;  %v5683_v24 = vld [vmem:[%s9796_s0 + $0x44] ss:$24 sps:$4 sm:$0xff]   ;;  %v5677_v25 = vld [vmem:[%s9795_s1 + $0x40] ss:$24 sps:$4 sm:$0xff]  }
  0x8e   :  { %2274 = vmatprep.mubr.bf16.mxu1 %v5638_v26  ;;  %v5682_v26 = vld [vmem:[%s9797_s2 + $0x30] ss:$24 sps:$4 sm:$0xff]  }
  0x8f   :  { %2083 = vmatpush1.bf16.msra.mxu0 %v5581_v27  ;;  %v5688_v27 = vld [vmem:[%s9795_s1 + $0x74] ss:$24 sps:$4 sm:$0xff]  }
  0x90   :  { %2302 = vmatpush1.bf16.msra.mxu1 %v5584_v28  ;;  %2084 = vmatprep.subr.bf16.mxu0 %v5589_v29  ;;  %v5689_v28 = vld [vmem:[%s9797_s2 + $0x64] ss:$24 sps:$4 sm:$0xff]   ;;  %v5685_v29 = vld [vmem:[%s9796_s0 + $0x40] ss:$24 sps:$4 sm:$0xff]  }
  0x91   :  { %2303 = vmatprep.subr.bf16.mxu1 %v5592_v30  ;;  %v5686_v30 = vld [vmem:[%s9795_s1 + $0x70] ss:$24 sps:$4 sm:$0xff]  }
  0x92   :  { %2056 = vmatmul.mubr.bf16.gmra.mrb[8].mxu0 %v5640_v33 }
  0x93   :  { %2275 = vmatmul.mubr.bf16.gmra.mrb[8].mxu1 %v5640_v33  ;;  %2085 = vmatpush1.bf16.msra.mxu0 %v5587_v31  ;;  %v5691_v31 = vld [vmem:[%s9797_s2 + $0x60] ss:$24 sps:$4 sm:$0xff]   ;;  %v5695_v33 = vld [vmem:[%s9797_s2 + $0x94] ss:$24 sps:$4 sm:$0xff]  }
  0x94   :  { %2304 = vmatpush1.bf16.msra.mxu1 %v5590_v32  ;;  %2086 = vmatprep.subr.bf16.mxu0 %v5595_v34  ;;  %v5694_v32 = vld [vmem:[%s9795_s1 + $0xa4] ss:$24 sps:$4 sm:$0xff]   ;;  %v5698_v34 = vld [vmem:[%s9796_s0 + $0x74] ss:$24 sps:$4 sm:$0xff]  }
  0x95   :  { %2305 = vmatprep.subr.bf16.mxu1 %v5598_v35  ;;  %2065 = vmatprep.mubr.bf16.mxu0 %v5653_v36  ;;  %v5692_v35 = vld [vmem:[%s9795_s1 + $0xa0] ss:$24 sps:$4 sm:$0xff]  }
  0x96   :  { %2284 = vmatprep.mubr.bf16.mxu1 %v5653_v36  ;;  %v5697_v36 = vld [vmem:[%s9797_s2 + $0x90] ss:$24 sps:$4 sm:$0xff]  }
  0x97   :  { %2087 = vmatpush1.bf16.msra.mxu0 %v5593_v37  ;;  %v5703_v37 = vld [vmem:[%s9795_s1 + $0xd4] ss:$24 sps:$4 sm:$0xff]  }
  0x98   :  { %2306 = vmatpush1.bf16.msra.mxu1 %v5596_v38  ;;  %2088 = vmatprep.subr.bf16.mxu0 %v5601_v39  ;;  %v5704_v38 = vld [vmem:[%s9797_s2 + $0xc4] ss:$24 sps:$4 sm:$0xff]   ;;  %v5700_v39 = vld [vmem:[%s9796_s0 + $0x70] ss:$24 sps:$4 sm:$0xff]  }
  0x99   :  { %2307 = vmatprep.subr.bf16.mxu1 %v5604_v40  ;;  %v5701_v40 = vld [vmem:[%s9795_s1 + $0xd0] ss:$24 sps:$4 sm:$0xff]  }
  0x9a   :  { %2066 = vmatmul.mubr.bf16.gmra.mrb[12].mxu0 %v5655_v43 }
  0x9b   :  { %2285 = vmatmul.mubr.bf16.gmra.mrb[12].mxu1 %v5655_v43  ;;  %2089 = vmatpush1.bf16.msra.mxu0 %v5599_v41  ;;  %v5706_v41 = vld [vmem:[%s9797_s2 + $0xc0] ss:$24 sps:$4 sm:$0xff]   ;;  %v7017_v43 = vld [vmem:[%s9797_s2 + $0xf4] ss:$24 sps:$4 sm:$0xff]  }
  0x9c   :  { %2308 = vmatpush1.bf16.msra.mxu1 %v5602_v42  ;;  %2090 = vmatprep.subr.bf16.mxu0 %v5607_v44  ;;  %v5709_v42 = vld [vmem:[%s9795_s1 + $0x104] ss:$24 sps:$4 sm:$0xff]  }
  0x9d   :  { %2309 = vmatprep.subr.bf16.mxu1 %v5610_v45  ;;  %2108 = vmatprep.mubr.bf16.mxu0 %v5670_v46  ;;  %v7022_v44 = vld [vmem:[%s9796_s0 + $0xa4] ss:$24 sps:$4 sm:$0xff]   ;;  %v5707_v45 = vld [vmem:[%s9795_s1 + $0x100] ss:$24 sps:$4 sm:$0xff]  }
  0x9e   :  { %2327 = vmatprep.mubr.bf16.mxu1 %v5670_v46  ;;  %v5712_v46 = vld [vmem:[%s9797_s2 + $0xf0] ss:$24 sps:$4 sm:$0xff]  }
  0x9f   :  { %2091 = vmatpush1.bf16.msra.mxu0 %v5605_v47  ;;  %v5718_v47 = vld [vmem:[%s9795_s1 + $0x134] ss:$24 sps:$4 sm:$0xff]  }
  0xa0   :  { %2310 = vmatpush1.bf16.msra.mxu1 %v5608_v48  ;;  %2092 = vmatprep.subr.bf16.mxu0 %v5613_v49  ;;  %v7037_v48 = vld [vmem:[%s9797_s2 + $0x124] ss:$24 sps:$4 sm:$0xff]   ;;  %v7044_v49 = vld [vmem:[%s9796_s0 + $0xa0] ss:$24 sps:$4 sm:$0xff]  }
  0xa1   :  { %2311 = vmatprep.subr.bf16.mxu1 %v5616_v50  ;;  %v5716_v50 = vld [vmem:[%s9795_s1 + $0x130] ss:$24 sps:$4 sm:$0xff]  }
  0xa3   :  { %2093 = vmatpush1.bf16.msra.mxu0 %v5611_v51  ;;  %v7052_v51 = vld [vmem:[%s9797_s2 + $0x120] ss:$24 sps:$4 sm:$0xff]  }
  0xa4   :  { %2312 = vmatpush1.bf16.msra.mxu1 %v5614_v52  ;;  %2094 = vmatprep.subr.bf16.mxu0 %v5619_v53  ;;  %v5724_v52 = vld [vmem:[%s9795_s1 + $0x164] ss:$24 sps:$4 sm:$0xff]   ;;  %v7061_v53 = vld [vmem:[%s9797_s2 + $0x154] ss:$24 sps:$4 sm:$0xff]  }
  0xa5   :  { %2313 = vmatprep.subr.bf16.mxu1 %v5622_v54  ;;  %v5722_v54 = vld [vmem:[%s9795_s1 + $0x160] ss:$24 sps:$4 sm:$0xff]  }
  0xa7   :  { %2095 = vmatpush1.bf16.msra.mxu0 %v5617_v55  ;;  %v7071_v55 = vld [vmem:[%s9797_s2 + $0x150] ss:$24 sps:$4 sm:$0xff]  }
  0xa8   :  { %2314 = vmatpush1.bf16.msra.mxu1 %v5620_v56  ;;  %2096 = vmatprep.subr.bf16.mxu0 %v5628_v57  ;;  %v5730_v56 = vld [vmem:[%s9795_s1 + $0x194] ss:$24 sps:$4 sm:$0xff]   ;;  %v7081_v57 = vld [vmem:[%s9797_s2 + $0x184] ss:$24 sps:$4 sm:$0xff]  }
  0xa9   :  { %2315 = vmatprep.subr.bf16.mxu1 %v5631_v58  ;;  %v9801_v58 = vmov 0.0|0.0  }
  0xab   :  { %2097 = vmatpush1.bf16.msra.mxu0 %v5626_v59  ;;  %v6064_v59 = vld [vmem:[%s9796_s0 + $0x4] ss:$24 sps:$4 sm:$0xff]  }
  0xac   :  { %2316 = vmatpush1.bf16.msra.mxu1 %v5629_v60  ;;  %2098 = vmatprep.subr.bf16.mxu0 %v5634_v61  ;;  %v5728_v60 = vld [vmem:[%s9795_s1 + $0x190] ss:$24 sps:$4 sm:$0xff]   ;;  %v7093_v61 = vld [vmem:[%s9797_s2 + $0x180] ss:$24 sps:$4 sm:$0xff]  }
  0xad   :  { %2317 = vmatprep.subr.bf16.mxu1 %v5637_v62  ;;  %v5736_v62 = vld [vmem:[%s9795_s1 + $0x1c4] ss:$24 sps:$4 sm:$0xff]  }
  0xaf   :  { %2099 = vmatpush1.bf16.msra.mxu0 %v5632_v63  ;;  %v7103_v63 = vld [vmem:[%s9797_s2 + $0x1b4] ss:$24 sps:$4 sm:$0xff]  }
  0xb0   :  { %2318 = vmatpush1.bf16.msra.mxu1 %v5635_v0  ;;  %2100 = vmatprep.subr.bf16.mxu0 %v5643_v1  ;;  %v5734_v0 = vld [vmem:[%s9795_s1 + $0x1c0] ss:$24 sps:$4 sm:$0xff]   ;;  %v7111_v1 = vld [vmem:[%s9797_s2 + $0x1b0] ss:$24 sps:$4 sm:$0xff]  }
  0xb1   :  { %2319 = vmatprep.subr.bf16.mxu1 %v5646_v2  ;;  %v5742_v2 = vld [vmem:[%s9795_s1 + $0x1f4] ss:$24 sps:$4 sm:$0xff]  }
  0xb3   :  { %2101 = vmatpush1.bf16.msra.mxu0 %v5641_v3  ;;  %v7121_v3 = vld [vmem:[%s9797_s2 + $0x1e4] ss:$24 sps:$4 sm:$0xff]  }
  0xb4   :  { %2320 = vmatpush1.bf16.msra.mxu1 %v5644_v4  ;;  %2102 = vmatprep.subr.bf16.mxu0 %v5649_v5  ;;  %v5740_v4 = vld [vmem:[%s9795_s1 + $0x1f0] ss:$24 sps:$4 sm:$0xff]   ;;  %v7129_v5 = vld [vmem:[%s9797_s2 + $0x1e0] ss:$24 sps:$4 sm:$0xff]  }
  0xb5   :  { %2321 = vmatprep.subr.bf16.mxu1 %v5652_v6  ;;  %v5748_v6 = vld [vmem:[%s9795_s1 + $0x224] ss:$24 sps:$4 sm:$0xff]  }
  0xb7   :  { %2103 = vmatpush1.bf16.msra.mxu0 %v5647_v7  ;;  %v7139_v7 = vld [vmem:[%s9797_s2 + $0x214] ss:$24 sps:$4 sm:$0xff]  }
  0xb8   :  { %2322 = vmatpush1.bf16.msra.mxu1 %v5650_v8  ;;  %2104 = vmatprep.subr.bf16.mxu0 %v5658_v9  ;;  %v5746_v8 = vld [vmem:[%s9795_s1 + $0x220] ss:$24 sps:$4 sm:$0xff]   ;;  %v7147_v9 = vld [vmem:[%s9797_s2 + $0x210] ss:$24 sps:$4 sm:$0xff]  }
  0xb9   :  { %2323 = vmatprep.subr.bf16.mxu1 %v5661_v10  ;;  %v5754_v10 = vld [vmem:[%s9795_s1 + $0x254] ss:$24 sps:$4 sm:$0xff]  }
  0xbb   :  { %2105 = vmatpush1.bf16.msra.mxu0 %v5656_v11  ;;  %v7157_v11 = vld [vmem:[%s9797_s2 + $0x244] ss:$24 sps:$4 sm:$0xff]  }
  0xbc   :  { %2324 = vmatpush1.bf16.msra.mxu1 %v5659_v12  ;;  %2106 = vmatprep.subr.bf16.mxu0 %v5664_v13  ;;  %v5752_v12 = vld [vmem:[%s9795_s1 + $0x250] ss:$24 sps:$4 sm:$0xff]   ;;  %v7165_v13 = vld [vmem:[%s9797_s2 + $0x240] ss:$24 sps:$4 sm:$0xff]  }
  0xbd   :  { %2325 = vmatprep.subr.bf16.mxu1 %v5667_v14  ;;  %v5760_v14 = vld [vmem:[%s9795_s1 + $0x284] ss:$24 sps:$4 sm:$0xff]  }
  0xbf   :  { %2107 = vmatpush1.bf16.msra.mxu0 %v5662_v15  ;;  %v7175_v15 = vld [vmem:[%s9797_s2 + $0x274] ss:$24 sps:$4 sm:$0xff]  }
  0xc0   :  { %2326 = vmatpush1.bf16.msra.mxu1 %v5665_v16  ;;  %2368 = vmatprep.subr.bf16.mxu0 %v5673_v17  ;;  %v5758_v16 = vld [vmem:[%s9795_s1 + $0x280] ss:$24 sps:$4 sm:$0xff]   ;;  %v7183_v17 = vld [vmem:[%s9797_s2 + $0x270] ss:$24 sps:$4 sm:$0xff]  }
  0xc1   :  { %3404 = vmatprep.subr.bf16.mxu1 %v5674_v18  ;;  %v5766_v18 = vld [vmem:[%s9795_s1 + $0x2b4] ss:$24 sps:$4 sm:$0xff]  }
  0xc2   :  { %2109 = vmatmul.mubr.bf16.vlgmr.msra.gmra.mrb[0].mxu0 %v5668_v19 }
  0xc3   :  { %2328 = vmatmul.mubr.bf16.vlgmr.msra.gmra.mrb[0].mxu1 %v5668_v19  ;;  %2369 = vmatpush1.bf16.msra.mxu0 %v5671_v20  ;;  %v7193_v19 = vld [vmem:[%s9797_s2 + $0x2a4] ss:$24 sps:$4 sm:$0xff]   ;;  %v5764_v20 = vld [vmem:[%s9795_s1 + $0x2b0] ss:$24 sps:$4 sm:$0xff]  }
  0xc4   :  { %3405 = vmatpush1.bf16.msra.mxu1 %v5676_v21  ;;  %2370 = vmatprep.subr.bf16.mxu0 %v5679_v22  ;;  %v7201_v21 = vld [vmem:[%s9797_s2 + $0x2a0] ss:$24 sps:$4 sm:$0xff]   ;;  %v5772_v22 = vld [vmem:[%s9795_s1 + $0x2e4] ss:$24 sps:$4 sm:$0xff]  }
  0xc5   :  { %3406 = vmatprep.subr.bf16.mxu1 %v5680_v23  ;;  %2118 = vmatprep.mubr.bf16.mxu0 %v5683_v24  ;;  %v7211_v23 = vld [vmem:[%s9797_s2 + $0x2d4] ss:$24 sps:$4 sm:$0xff]  }
  0xc6   :  { %2337 = vmatprep.mubr.bf16.mxu1 %v5683_v24  ;;  %v5770_v24 = vld [vmem:[%s9795_s1 + $0x2e0] ss:$24 sps:$4 sm:$0xff]  }
  0xc7   :  { %2371 = vmatpush1.bf16.msra.mxu0 %v5677_v25  ;;  %v7219_v25 = vld [vmem:[%s9797_s2 + $0x2d0] ss:$24 sps:$4 sm:$0xff]  }
  0xc8   :  { %3407 = vmatpush1.bf16.msra.mxu1 %v5682_v26  ;;  %2372 = vmatprep.subr.bf16.mxu0 %v5688_v27  ;;  %v5778_v26 = vld [vmem:[%s9795_s1 + $0x314] ss:$24 sps:$4 sm:$0xff]  }
  0xc9   :  { %3408 = vmatprep.subr.bf16.mxu1 %v5689_v28  ;;  %v7229_v27 = vld [vmem:[%s9797_s2 + $0xc] ss:$24 sps:$4 sm:$0xff]   ;;  %v5776_v28 = vld [vmem:[%s9795_s1 + $0x310] ss:$24 sps:$4 sm:$0xff]  }
  0xca   :  { %2119 = vmatmul.mubr.bf16.gmra.mrb[4].mxu0 %v5685_v29 }
  0xcb   :  { %2338 = vmatmul.mubr.bf16.gmra.mrb[4].mxu1 %v5685_v29  ;;  %2373 = vmatpush1.bf16.msra.mxu0 %v5686_v30  ;;  %v7237_v29 = vld [vmem:[%s9797_s2 + $0x8] ss:$24 sps:$4 sm:$0xff]   ;;  %v5784_v30 = vld [vmem:[%s9795_s1 + $0x344] ss:$24 sps:$4 sm:$0xff]  }
  0xcc   :  { %3409 = vmatpush1.bf16.msra.mxu1 %v5691_v31  ;;  %2374 = vmatprep.subr.bf16.mxu0 %v5694_v32  ;;  %v7247_v31 = vld [vmem:[%s9797_s2 + $0x3c] ss:$24 sps:$4 sm:$0xff]   ;;  %v6065_v32 = vld [vmem:[%s9796_s0] ss:$24 sps:$4 sm:$0xff]  }
  0xcd   :  { %3410 = vmatprep.subr.bf16.mxu1 %v5695_v33  ;;  %2128 = vmatprep.mubr.bf16.mxu0 %v5698_v34  ;;  %v5782_v33 = vld [vmem:[%s9795_s1 + $0x340] ss:$24 sps:$4 sm:$0xff]  }
  0xce   :  { %2347 = vmatprep.mubr.bf16.mxu1 %v5698_v34  ;;  %v7259_v34 = vld [vmem:[%s9797_s2 + $0x38] ss:$24 sps:$4 sm:$0xff]  }
  0xcf   :  { %2375 = vmatpush1.bf16.msra.mxu0 %v5692_v35  ;;  %v5790_v35 = vld [vmem:[%s9795_s1 + $0x374] ss:$24 sps:$4 sm:$0xff]  }
  0xd0   :  { %3411 = vmatpush1.bf16.msra.mxu1 %v5697_v36  ;;  %2376 = vmatprep.subr.bf16.mxu0 %v5703_v37  ;;  %v7269_v36 = vld [vmem:[%s9797_s2 + $0x6c] ss:$24 sps:$4 sm:$0xff]  }
  0xd1   :  { %3412 = vmatprep.subr.bf16.mxu1 %v5704_v38  ;;  %v6066_v37 = vld [vmem:[%s9796_s0 + $0x34] ss:$24 sps:$4 sm:$0xff]   ;;  %v5788_v38 = vld [vmem:[%s9795_s1 + $0x370] ss:$24 sps:$4 sm:$0xff]  }
  0xd2   :  { %2129 = vmatmul.mubr.bf16.gmra.mrb[8].mxu0 %v5700_v39 }
  0xd3   :  { %2348 = vmatmul.mubr.bf16.gmra.mrb[8].mxu1 %v5700_v39  ;;  %2377 = vmatpush1.bf16.msra.mxu0 %v5701_v40  ;;  %v7281_v39 = vld [vmem:[%s9797_s2 + $0x68] ss:$24 sps:$4 sm:$0xff]   ;;  %v5796_v40 = vld [vmem:[%s9795_s1 + $0x3a4] ss:$24 sps:$4 sm:$0xff]  }
  0xd4   :  { %3413 = vmatpush1.bf16.msra.mxu1 %v5706_v41  ;;  %2378 = vmatprep.subr.bf16.mxu0 %v5709_v42  ;;  %v7291_v41 = vld [vmem:[%s9797_s2 + $0x9c] ss:$24 sps:$4 sm:$0xff]   ;;  %v5794_v42 = vld [vmem:[%s9795_s1 + $0x3a0] ss:$24 sps:$4 sm:$0xff]  }
  0xd5   :  { %3414 = vmatprep.subr.bf16.mxu1 %v7017_v43  ;;  %2138 = vmatprep.mubr.bf16.mxu0 %v7022_v44 }
  0xd6   :  { %2357 = vmatprep.mubr.bf16.mxu1 %v7022_v44 }
  0xd7   :  { %2379 = vmatpush1.bf16.msra.mxu0 %v5707_v45  ;;  %v7299_v45 = vld [vmem:[%s9797_s2 + $0x98] ss:$24 sps:$4 sm:$0xff]  }
  0xd8   :  { %3415 = vmatpush1.bf16.msra.mxu1 %v5712_v46  ;;  %2380 = vmatprep.subr.bf16.mxu0 %v5718_v47  ;;  %v6067_v46 = vld [vmem:[%s9796_s0 + $0x30] ss:$24 sps:$4 sm:$0xff]   ;;  %v5802_v47 = vld [vmem:[%s9795_s1 + $0x3d4] ss:$24 sps:$4 sm:$0xff]  }
  0xd9   :  { %3416 = vmatprep.subr.bf16.mxu1 %v7037_v48 }
  0xda   :  { %2139 = vmatmul.mubr.bf16.gmra.mrb[12].mxu0 %v7044_v49 }
  0xdb   :  { %2358 = vmatmul.mubr.bf16.gmra.mrb[12].mxu1 %v7044_v49  ;;  %2381 = vmatpush1.bf16.msra.mxu0 %v5716_v50  ;;  %v7312_v50 = vld [vmem:[%s9797_s2 + $0xcc] ss:$24 sps:$4 sm:$0xff]  }
  0xdc   :  { %3417 = vmatpush1.bf16.msra.mxu1 %v7052_v51  ;;  %2382 = vmatprep.subr.bf16.mxu0 %v5724_v52  ;;  %v6068_v52 = vld [vmem:[%s9796_s0 + $0x64] ss:$24 sps:$4 sm:$0xff]  }
  0xdd   :  { %3418 = vmatprep.subr.bf16.mxu1 %v7061_v53  ;;  %3436 = vmatprep.mubr.bf16.mxu1 %v9801_v58 }
  0xde   :  { %2400 = vmatprep.mubr.bf16.mxu0 %v6064_v59  ;;  %v5808_v59 = vld [vmem:[%s9795_s1 + $0x404] ss:$24 sps:$4 sm:$0xff]  }
  0xdf   :  { %2383 = vmatpush1.bf16.msra.mxu0 %v5722_v54  ;;  %v5800_v54 = vld [vmem:[%s9795_s1 + $0x3d0] ss:$24 sps:$4 sm:$0xff]  }
  0xe0   :  { %3419 = vmatpush1.bf16.msra.mxu1 %v7071_v55  ;;  %2384 = vmatprep.subr.bf16.mxu0 %v5730_v56  ;;  %v7324_v56 = vld [vmem:[%s9797_s2 + $0xc8] ss:$24 sps:$4 sm:$0xff]  }
  0xe1   :  { %3420 = vmatprep.subr.bf16.mxu1 %v7081_v57 }
  0xe3   :  { %2385 = vmatpush1.bf16.msra.mxu0 %v5728_v60  ;;  %v7333_v60 = vld [vmem:[%s9797_s2 + $0xfc] ss:$24 sps:$4 sm:$0xff]  }
  0xe4   :  { %3421 = vmatpush1.bf16.msra.mxu1 %v7093_v61  ;;  %2386 = vmatprep.subr.bf16.mxu0 %v5736_v62  ;;  %v6069_v62 = vld [vmem:[%s9796_s0 + $0x60] ss:$24 sps:$4 sm:$0xff]  }
  0xe5   :  { %3422 = vmatprep.subr.bf16.mxu1 %v7103_v63 }
  0xe7   :  { %2387 = vmatpush1.bf16.msra.mxu0 %v5734_v0  ;;  %v5806_v0 = vld [vmem:[%s9795_s1 + $0x400] ss:$24 sps:$4 sm:$0xff]  }
  0xe8   :  { %3423 = vmatpush1.bf16.msra.mxu1 %v7111_v1  ;;  %2388 = vmatprep.subr.bf16.mxu0 %v5742_v2  ;;  %v7345_v2 = vld [vmem:[%s9797_s2 + $0xf8] ss:$24 sps:$4 sm:$0xff]  }
  0xe9   :  { %3424 = vmatprep.subr.bf16.mxu1 %v7121_v3 }
  0xeb   :  { %2389 = vmatpush1.bf16.msra.mxu0 %v5740_v4  ;;  %v5814_v4 = vld [vmem:[%s9795_s1 + $0x434] ss:$24 sps:$4 sm:$0xff]  }
  0xec   :  { %3425 = vmatpush1.bf16.msra.mxu1 %v7129_v5  ;;  %2390 = vmatprep.subr.bf16.mxu0 %v5748_v6  ;;  %v7354_v6 = vld [vmem:[%s9797_s2 + $0x12c] ss:$24 sps:$4 sm:$0xff]  }
  0xed   :  { %3426 = vmatprep.subr.bf16.mxu1 %v7139_v7 }
  0xef   :  { %2391 = vmatpush1.bf16.msra.mxu0 %v5746_v8  ;;  %v6070_v8 = vld [vmem:[%s9796_s0 + $0x94] ss:$24 sps:$4 sm:$0xff]  }
  0xf0   :  { %3427 = vmatpush1.bf16.msra.mxu1 %v7147_v9  ;;  %2392 = vmatprep.subr.bf16.mxu0 %v5754_v10  ;;  %v5812_v10 = vld [vmem:[%s9795_s1 + $0x430] ss:$24 sps:$4 sm:$0xff]  }
  0xf1   :  { %3428 = vmatprep.subr.bf16.mxu1 %v7157_v11 }
  0xf3   :  { %2393 = vmatpush1.bf16.msra.mxu0 %v5752_v12  ;;  %v7366_v12 = vld [vmem:[%s9797_s2 + $0x128] ss:$24 sps:$4 sm:$0xff]  }
  0xf4   :  { %3429 = vmatpush1.bf16.msra.mxu1 %v7165_v13  ;;  %2394 = vmatprep.subr.bf16.mxu0 %v5760_v14  ;;  %v5820_v14 = vld [vmem:[%s9795_s1 + $0x464] ss:$24 sps:$4 sm:$0xff]  }
  0xf5   :  { %3430 = vmatprep.subr.bf16.mxu1 %v7175_v15 }
  0xf7   :  { %2395 = vmatpush1.bf16.msra.mxu0 %v5758_v16  ;;  %v7375_v16 = vld [vmem:[%s9797_s2 + $0x15c] ss:$24 sps:$4 sm:$0xff]  }
  0xf8   :  { %3431 = vmatpush1.bf16.msra.mxu1 %v7183_v17  ;;  %2396 = vmatprep.subr.bf16.mxu0 %v5766_v18  ;;  %v6071_v18 = vld [vmem:[%s9796_s0 + $0x90] ss:$24 sps:$4 sm:$0xff]  }
  0xf9   :  { %3432 = vmatprep.subr.bf16.mxu1 %v7193_v19 }
  0xfb   :  { %2397 = vmatpush1.bf16.msra.mxu0 %v5764_v20  ;;  %v5818_v20 = vld [vmem:[%s9795_s1 + $0x460] ss:$24 sps:$4 sm:$0xff]  }
  0xfc   :  { %3433 = vmatpush1.bf16.msra.mxu1 %v7201_v21  ;;  %2398 = vmatprep.subr.bf16.mxu0 %v5772_v22  ;;  %v7387_v22 = vld [vmem:[%s9797_s2 + $0x158] ss:$24 sps:$4 sm:$0xff]  }
  0xfd   :  { %3434 = vmatprep.subr.bf16.mxu1 %v7211_v23 }
  0xff   :  { %2399 = vmatpush1.bf16.msra.mxu0 %v5770_v24  ;;  %v5826_v24 = vld [vmem:[%s9795_s1 + $0x494] ss:$24 sps:$4 sm:$0xff]  }
 0x100   :  { %3435 = vmatpush1.bf16.msra.mxu1 %v7219_v25  ;;  %2441 = vmatprep.subr.bf16.mxu0 %v5778_v26  ;;  %v7396_v26 = vld [vmem:[%s9797_s2 + $0x18c] ss:$24 sps:$4 sm:$0xff]  }
 0x101   :  { %3445 = vmatprep.subr.bf16.mxu1 %v7229_v27 }
 0x102   :  { %2401 = vmatmul.mubr.bf16.vlgmr.msra.gmra.mrb[16].mxu0 %v6065_v32  ;;  %v7408_v32 = vld [vmem:[%s9797_s2 + $0x188] ss:$24 sps:$4 sm:$0xff]  }
 0x103   :  { %3437 = vmatmul.mubr.bf16.vlgmr.msra.gmra.mrb[16].mxu1 %v9801_v58  ;;  %2442 = vmatpush1.bf16.msra.mxu0 %v5776_v28  ;;  %v6072_v28 = vld [vmem:[%s9796_s0 + $0xc] ss:$24 sps:$4 sm:$0xff]  }
 0x104   :  { %3446 = vmatpush1.bf16.msra.mxu1 %v7237_v29  ;;  %2443 = vmatprep.subr.bf16.mxu0 %v5784_v30  ;;  %v5824_v30 = vld [vmem:[%s9795_s1 + $0x490] ss:$24 sps:$4 sm:$0xff]  }
 0x105   :  { %3447 = vmatprep.subr.bf16.mxu1 %v7247_v31  ;;  %2410 = vmatprep.mubr.bf16.mxu0 %v6066_v37  ;;  %v5830_v37 = vld [vmem:[%s9795_s1 + $0x4c0] ss:$24 sps:$4 sm:$0xff]  }
 0x106   :  { %3477 = vmatprep.mubr.bf16.mxu1 %v9801_v58 }
 0x107   :  { %2444 = vmatpush1.bf16.msra.mxu0 %v5782_v33  ;;  %v5832_v33 = vld [vmem:[%s9795_s1 + $0x4c4] ss:$24 sps:$4 sm:$0xff]  }
 0x108   :  { %3448 = vmatpush1.bf16.msra.mxu1 %v7259_v34  ;;  %2445 = vmatprep.subr.bf16.mxu0 %v5790_v35  ;;  %v7417_v35 = vld [vmem:[%s9797_s2 + $0x1bc] ss:$24 sps:$4 sm:$0xff]  }
 0x109   :  { %3449 = vmatprep.subr.bf16.mxu1 %v7269_v36 }
 0x10a   :  { %2411 = vmatmul.mubr.bf16.gmra.mrb[20].mxu0 %v6067_v46  ;;  %v5836_v46 = vld [vmem:[%s9795_s1 + $0x4f0] ss:$24 sps:$4 sm:$0xff]  }
 0x10b   :  { %2446 = vmatpush1.bf16.msra.mxu0 %v5788_v38  ;;  %2420 = vmatprep.mubr.bf16.mxu0 %v6068_v52  ;;  %v7426_v38 = vld [vmem:[%s9797_s2 + $0x1b8] ss:$24 sps:$4 sm:$0xff]   ;;  %v5844_v52 = vld [vmem:[%s9795_s1 + $0x524] ss:$24 sps:$4 sm:$0xff]  }
 0x10c   :  { %3450 = vmatpush1.bf16.msra.mxu1 %v7281_v39  ;;  %2447 = vmatprep.subr.bf16.mxu0 %v5796_v40  ;;  %v5838_v40 = vld [vmem:[%s9795_s1 + $0x4f4] ss:$24 sps:$4 sm:$0xff]  }
 0x10d   :  { %3451 = vmatprep.subr.bf16.mxu1 %v7291_v41 }
 0x10f   :  { %2448 = vmatpush1.bf16.msra.mxu0 %v5794_v42  ;;  %v7435_v42 = vld [vmem:[%s9797_s2 + $0x1ec] ss:$24 sps:$4 sm:$0xff]  }
 0x110   :  { %3452 = vmatpush1.bf16.msra.mxu1 %v7299_v45  ;;  %2449 = vmatprep.subr.bf16.mxu0 %v5802_v47  ;;  %v7444_v47 = vld [vmem:[%s9797_s2 + $0x1e8] ss:$24 sps:$4 sm:$0xff]  }
 0x111   :  { %3453 = vmatprep.subr.bf16.mxu1 %v7312_v50 }
 0x112   :  { %2421 = vmatmul.mubr.bf16.gmra.mrb[24].mxu0 %v6069_v62  ;;  %v7462_v62 = vld [vmem:[%s9797_s2 + $0x218] ss:$24 sps:$4 sm:$0xff]  }
 0x113   :  { %2450 = vmatpush1.bf16.msra.mxu0 %v5800_v54  ;;  %2430 = vmatprep.mubr.bf16.mxu0 %v6070_v8  ;;  %v7453_v54 = vld [vmem:[%s9797_s2 + $0x21c] ss:$24 sps:$4 sm:$0xff]   ;;  %v5848_v8 = vld [vmem:[%s9795_s1 + $0x550] ss:$24 sps:$4 sm:$0xff]  }
 0x114   :  { %3454 = vmatpush1.bf16.msra.mxu1 %v7324_v56  ;;  %2451 = vmatprep.subr.bf16.mxu0 %v5808_v59  ;;  %v5842_v59 = vld [vmem:[%s9795_s1 + $0x520] ss:$24 sps:$4 sm:$0xff]  }
 0x115   :  { %3455 = vmatprep.subr.bf16.mxu1 %v7333_v60 }
 0x117   :  { %2452 = vmatpush1.bf16.msra.mxu0 %v5806_v0  ;;  %v5850_v0 = vld [vmem:[%s9795_s1 + $0x554] ss:$24 sps:$4 sm:$0xff]  }
 0x118   :  { %3456 = vmatpush1.bf16.msra.mxu1 %v7345_v2  ;;  %2453 = vmatprep.subr.bf16.mxu0 %v5814_v4  ;;  %v7471_v4 = vld [vmem:[%s9797_s2 + $0x24c] ss:$24 sps:$4 sm:$0xff]  }
 0x119   :  { %3457 = vmatprep.subr.bf16.mxu1 %v7354_v6 }
 0x11a   :  { %2431 = vmatmul.mubr.bf16.gmra.mrb[28].mxu0 %v6071_v18  ;;  %v7489_v18 = vld [vmem:[%s9797_s2 + $0x27c] ss:$24 sps:$4 sm:$0xff]  }
 0x11b   :  { %2454 = vmatpush1.bf16.msra.mxu0 %v5812_v10  ;;  %2473 = vmatprep.mubr.bf16.mxu0 %v6072_v28  ;;  %v7480_v10 = vld [vmem:[%s9797_s2 + $0x248] ss:$24 sps:$4 sm:$0xff]   ;;  %v5862_v28 = vld [vmem:[%s9795_s1 + $0x5b4] ss:$24 sps:$4 sm:$0xff]  }
 0x11c   :  { %3458 = vmatpush1.bf16.msra.mxu1 %v7366_v12  ;;  %2455 = vmatprep.subr.bf16.mxu0 %v5820_v14  ;;  %v5856_v14 = vld [vmem:[%s9795_s1 + $0x584] ss:$24 sps:$4 sm:$0xff]  }
 0x11d   :  { %3459 = vmatprep.subr.bf16.mxu1 %v7375_v16 }
 0x11f   :  { %2456 = vmatpush1.bf16.msra.mxu0 %v5818_v20  ;;  %v5854_v20 = vld [vmem:[%s9795_s1 + $0x580] ss:$24 sps:$4 sm:$0xff]  }
 0x120   :  { %3460 = vmatpush1.bf16.msra.mxu1 %v7387_v22  ;;  %2457 = vmatprep.subr.bf16.mxu0 %v5826_v24  ;;  %v7498_v24 = vld [vmem:[%s9797_s2 + $0x278] ss:$24 sps:$4 sm:$0xff]  }
 0x121   :  { %3461 = vmatprep.subr.bf16.mxu1 %v7396_v26 }
 0x123   :  { %2458 = vmatpush1.bf16.msra.mxu0 %v5824_v30  ;;  %v7507_v30 = vld [vmem:[%s9797_s2 + $0x2ac] ss:$24 sps:$4 sm:$0xff]  }
 0x124   :  { %3462 = vmatpush1.bf16.msra.mxu1 %v7408_v32  ;;  %2459 = vmatprep.subr.bf16.mxu0 %v5832_v33  ;;  %v5860_v33 = vld [vmem:[%s9795_s1 + $0x5b0] ss:$24 sps:$4 sm:$0xff]  }
 0x125   :  { %3463 = vmatprep.subr.bf16.mxu1 %v7417_v35 }
 0x127   :  { %2460 = vmatpush1.bf16.msra.mxu0 %v5830_v37  ;;  %v7516_v37 = vld [vmem:[%s9797_s2 + $0x2a8] ss:$24 sps:$4 sm:$0xff]  }
 0x128   :  { %3464 = vmatpush1.bf16.msra.mxu1 %v7426_v38  ;;  %2461 = vmatprep.subr.bf16.mxu0 %v5838_v40  ;;  %v5868_v40 = vld [vmem:[%s9795_s1 + $0x5e4] ss:$24 sps:$4 sm:$0xff]  }
 0x129   :  { %3465 = vmatprep.subr.bf16.mxu1 %v7435_v42 }
 0x12b   :  { %2462 = vmatpush1.bf16.msra.mxu0 %v5836_v46  ;;  %v7525_v46 = vld [vmem:[%s9797_s2 + $0x2dc] ss:$24 sps:$4 sm:$0xff]  }
 0x12c   :  { %3466 = vmatpush1.bf16.msra.mxu1 %v7444_v47  ;;  %2463 = vmatprep.subr.bf16.mxu0 %v5844_v52  ;;  %v5866_v52 = vld [vmem:[%s9795_s1 + $0x5e0] ss:$24 sps:$4 sm:$0xff]  }
 0x12d   :  { %3467 = vmatprep.subr.bf16.mxu1 %v7453_v54 }
 0x12f   :  { %2464 = vmatpush1.bf16.msra.mxu0 %v5842_v59  ;;  %v7534_v59 = vld [vmem:[%s9797_s2 + $0x2d8] ss:$24 sps:$4 sm:$0xff]  }
 0x130   :  { %3468 = vmatpush1.bf16.msra.mxu1 %v7462_v62  ;;  %2465 = vmatprep.subr.bf16.mxu0 %v5850_v0  ;;  %v5874_v0 = vld [vmem:[%s9795_s1 + $0x614] ss:$24 sps:$4 sm:$0xff]  }
 0x131   :  { %3469 = vmatprep.subr.bf16.mxu1 %v7471_v4 }
 0x133   :  { %2466 = vmatpush1.bf16.msra.mxu0 %v5848_v8  ;;  %v7543_v8 = vld [vmem:[%s9797_s2 + $0x14] ss:$24 sps:$4 sm:$0xff]  }
 0x134   :  { %3470 = vmatpush1.bf16.msra.mxu1 %v7480_v10  ;;  %2467 = vmatprep.subr.bf16.mxu0 %v5856_v14  ;;  %10024 = vst [vmem:[#allocation4_spill] sm:$0xff] %v7543_v8  ;;  %v5872_v14 = vld [vmem:[%s9795_s1 + $0x610] ss:$24 sps:$4 sm:$0xff]  }
 0x135   :  { %3471 = vmatprep.subr.bf16.mxu1 %v7489_v18 }
 0x137   :  { %2468 = vmatpush1.bf16.msra.mxu0 %v5854_v20  ;;  %v7552_v20 = vld [vmem:[%s9797_s2 + $0x10] ss:$24 sps:$4 sm:$0xff]  }
 0x138   :  { %3472 = vmatpush1.bf16.msra.mxu1 %v7498_v24  ;;  %2469 = vmatprep.subr.bf16.mxu0 %v5862_v28  ;;  %10025 = vst [vmem:[#allocation5_spill] sm:$0xff] %v7552_v20  ;;  %v5880_v28 = vld [vmem:[%s9795_s1 + $0x644] ss:$24 sps:$4 sm:$0xff]  }
 0x139   :  { %3473 = vmatprep.subr.bf16.mxu1 %v7507_v30 }
 0x13b   :  { %2470 = vmatpush1.bf16.msra.mxu0 %v5860_v33  ;;  %v7561_v33 = vld [vmem:[%s9797_s2 + $0x44] ss:$24 sps:$4 sm:$0xff]  }
 0x13c   :  { %3474 = vmatpush1.bf16.msra.mxu1 %v7516_v37  ;;  %2471 = vmatprep.subr.bf16.mxu0 %v5868_v40  ;;  %10026 = vst [vmem:[#allocation6_spill] sm:$0xff] %v7561_v33  ;;  %v6073_v40 = vld [vmem:[%s9796_s0 + $0x8] ss:$24 sps:$4 sm:$0xff]  }
 0x13d   :  { %3475 = vmatprep.subr.bf16.mxu1 %v7525_v46 }
 0x13f   :  { %2472 = vmatpush1.bf16.msra.mxu0 %v5866_v52  ;;  %v5878_v52 = vld [vmem:[%s9795_s1 + $0x640] ss:$24 sps:$4 sm:$0xff]  }
 0x140   :  { %3476 = vmatpush1.bf16.msra.mxu1 %v7534_v59  ;;  %2514 = vmatprep.subr.bf16.mxu0 %v5874_v0  ;;  %v7574_v0 = vld [vmem:[%s9797_s2 + $0x40] ss:$24 sps:$4 sm:$0xff]  }
 0x141   :  { %3486 = vmatprep.subr.bf16.mxu1 %v7543_v8  ;;  %10027 = vst [vmem:[#allocation7_spill] sm:$0xff] %v7574_v0  ;;  %v5898_v8 = vld [vmem:[%s9795_s1 + $0x6d4] ss:$24 sps:$4 sm:$0xff]  }
 0x142   :  { %2474 = vmatmul.mubr.bf16.vlgmr.msra.gmra.mrb[16].mxu0 %v6073_v40  ;;  %v6074_v40 = vld [vmem:[%s9796_s0 + $0x3c] ss:$24 sps:$4 sm:$0xff]  }
 0x143   :  { %3478 = vmatmul.mubr.bf16.vlgmr.msra.gmra.mrb[20].mxu1 %v9801_v58  ;;  %2515 = vmatpush1.bf16.msra.mxu0 %v5872_v14  ;;  %v5886_v58 = vld [vmem:[%s9795_s1 + $0x674] ss:$24 sps:$4 sm:$0xff]  }
 0x144   :  { %3487 = vmatpush1.bf16.msra.mxu1 %v7552_v20  ;;  %2516 = vmatprep.subr.bf16.mxu0 %v5880_v28  ;;  %v7583_v14 = vld [vmem:[%s9797_s2 + $0x74] ss:$24 sps:$4 sm:$0xff]   ;;  %v10029_v20 = vmov 0.0|0.0   ;;  %v5884_v28 = vld [vmem:[%s9795_s1 + $0x670] ss:$24 sps:$4 sm:$0xff]  }
 0x145   :  { %3488 = vmatprep.subr.bf16.mxu1 %v7561_v33  ;;  %10028 = vst [vmem:[#allocation8_spill] sm:$0xff] %v7583_v14  ;;  %2483 = vmatprep.mubr.bf16.mxu0 %v6074_v40  ;;  %v7596_v33 = vld [vmem:[%s9797_s2 + $0x70] ss:$24 sps:$4 sm:$0xff]   ;;  %v5892_v40 = vld [vmem:[%s9795_s1 + $0x6a4] ss:$24 sps:$4 sm:$0xff]  }
 0x146   :  { %3518 = vmatprep.mubr.bf16.mxu1 %v10029_v20  ;;  %10030 = vst [vmem:[#allocation9_spill] sm:$0xff] %v7596_v33 }
 0x147   :  { %2517 = vmatpush1.bf16.msra.mxu0 %v5878_v52  ;;  %v7605_v52 = vld [vmem:[%s9797_s2 + $0xa4] ss:$24 sps:$4 sm:$0xff]  }
 0x148   :  { %3489 = vmatpush1.bf16.msra.mxu1 %v7574_v0  ;;  %2518 = vmatprep.subr.bf16.mxu0 %v5886_v58  ;;  %10031 = vst [vmem:[#allocation10_spill] sm:$0xff] %v7605_v52  ;;  %v6075_v0 = vld [vmem:[%s9796_s0 + $0x38] ss:$24 sps:$4 sm:$0xff]  }
 0x149   :  { %3490 = vmatprep.subr.bf16.mxu1 %v7583_v14  ;;  %v5890_v58 = vld [vmem:[%s9795_s1 + $0x6a0] ss:$24 sps:$4 sm:$0xff]  }
 0x14a   :  { %2484 = vmatmul.mubr.bf16.gmra.mrb[20].mxu0 %v6075_v0  ;;  %v7617_v14 = vld [vmem:[%s9797_s2 + $0xa0] ss:$24 sps:$4 sm:$0xff]   ;;  %v7626_v0 = vld [vmem:[%s9797_s2 + $0xd4] ss:$24 sps:$4 sm:$0xff]  }
 0x14b   :  { %2519 = vmatpush1.bf16.msra.mxu0 %v5884_v28  ;;  %10032 = vst [vmem:[#allocation11_spill] sm:$0xff] %v7617_v14  ;;  %10033 = vst [vmem:[#allocation12_spill] sm:$0xff] %v7626_v0  ;;  %v6076_v28 = vld [vmem:[%s9796_s0 + $0x6c] ss:$24 sps:$4 sm:$0xff]  }
 0x14c   :  { %3491 = vmatpush1.bf16.msra.mxu1 %v7596_v33  ;;  %2520 = vmatprep.subr.bf16.mxu0 %v5892_v40  ;;  %v5896_v40 = vld [vmem:[%s9795_s1 + $0x6d0] ss:$24 sps:$4 sm:$0xff]   ;;  %v5904_v33 = vld [vmem:[%s9795_s1 + $0x704] ss:$24 sps:$4 sm:$0xff]  }
 0x14d   :  { %3492 = vmatprep.subr.bf16.mxu1 %v7605_v52  ;;  %2493 = vmatprep.mubr.bf16.mxu0 %v6076_v28  ;;  %v7638_v52 = vld [vmem:[%s9797_s2 + $0xd0] ss:$24 sps:$4 sm:$0xff]  }
 0x14e   :  { %10034 = vst [vmem:[#allocation13_spill] sm:$0xff] %v7638_v52  ;;  %v6077_v28 = vld [vmem:[%s9796_s0 + $0x68] ss:$24 sps:$4 sm:$0xff]  }
 0x14f   :  { %2521 = vmatpush1.bf16.msra.mxu0 %v5890_v58  ;;  %v7647_v58 = vld [vmem:[%s9797_s2 + $0x104] ss:$24 sps:$4 sm:$0xff]  }
 0x150   :  { %3493 = vmatpush1.bf16.msra.mxu1 %v7617_v14  ;;  %2522 = vmatprep.subr.bf16.mxu0 %v5898_v8  ;;  %10035 = vst [vmem:[#allocation14_spill] sm:$0xff] %v7647_v58  ;;  %v5902_v8 = vld [vmem:[%s9795_s1 + $0x700] ss:$24 sps:$4 sm:$0xff]   ;;  %v5910_v14 = vld [vmem:[%s9795_s1 + $0x734] ss:$24 sps:$4 sm:$0xff]  }
 0x151   :  { %3494 = vmatprep.subr.bf16.mxu1 %v7626_v0  ;;  %v7659_v0 = vld [vmem:[%s9797_s2 + $0x100] ss:$24 sps:$4 sm:$0xff]  }
 0x152   :  { %2494 = vmatmul.mubr.bf16.gmra.mrb[24].mxu0 %v6077_v28  ;;  %10036 = vst [vmem:[#allocation15_spill] sm:$0xff] %v7659_v0  ;;  %v6078_v28 = vld [vmem:[%s9796_s0 + $0x9c] ss:$24 sps:$4 sm:$0xff]  }
 0x153   :  { %2523 = vmatpush1.bf16.msra.mxu0 %v5896_v40  ;;  %v7668_v40 = vld [vmem:[%s9797_s2 + $0x134] ss:$24 sps:$4 sm:$0xff]   ;;  %2503 = vmatprep.mubr.bf16.mxu0 %v6078_v28  ;;  %v6079_v28 = vld [vmem:[%s9796_s0 + $0x98] ss:$24 sps:$4 sm:$0xff]  }
 0x154   :  { %3495 = vmatpush1.bf16.msra.mxu1 %v7638_v52  ;;  %2524 = vmatprep.subr.bf16.mxu0 %v5904_v33  ;;  %10037 = vst [vmem:[#allocation16_spill] sm:$0xff] %v7668_v40  ;;  %v5908_v33 = vld [vmem:[%s9795_s1 + $0x730] ss:$24 sps:$4 sm:$0xff]   ;;  %v5916_v52 = vld [vmem:[%s9795_s1 + $0x764] ss:$24 sps:$4 sm:$0xff]  }
 0x155   :  { %3496 = vmatprep.subr.bf16.mxu1 %v7647_v58  ;;  %v7680_v58 = vld [vmem:[%s9797_s2 + $0x130] ss:$24 sps:$4 sm:$0xff]  }
 0x156   :  { %10038 = vst [vmem:[#allocation17_spill] sm:$0xff] %v7680_v58 }
 0x157   :  { %2525 = vmatpush1.bf16.msra.mxu0 %v5902_v8  ;;  %v7689_v8 = vld [vmem:[%s9797_s2 + $0x164] ss:$24 sps:$4 sm:$0xff]  }
 0x158   :  { %3497 = vmatpush1.bf16.msra.mxu1 %v7659_v0  ;;  %2526 = vmatprep.subr.bf16.mxu0 %v5910_v14  ;;  %10039 = vst [vmem:[#allocation18_spill] sm:$0xff] %v7689_v8  ;;  %v5914_v14 = vld [vmem:[%s9795_s1 + $0x760] ss:$24 sps:$4 sm:$0xff]   ;;  %v5922_v0 = vld [vmem:[%s9795_s1 + $0x794] ss:$24 sps:$4 sm:$0xff]  }
 0x159   :  { %3498 = vmatprep.subr.bf16.mxu1 %v7668_v40  ;;  %v7701_v40 = vld [vmem:[%s9797_s2 + $0x160] ss:$24 sps:$4 sm:$0xff]  }
 0x15a   :  { %2504 = vmatmul.mubr.bf16.gmra.mrb[28].mxu0 %v6079_v28  ;;  %10040 = vst [vmem:[#allocation19_spill] sm:$0xff] %v7701_v40  ;;  %v6080_v28 = vld [vmem:[%s9796_s0 + $0x14] ss:$24 sps:$4 sm:$0xff]  }
 0x15b   :  { %2527 = vmatpush1.bf16.msra.mxu0 %v5908_v33  ;;  %v7710_v33 = vld [vmem:[%s9797_s2 + $0x194] ss:$24 sps:$4 sm:$0xff]   ;;  %2546 = vmatprep.mubr.bf16.mxu0 %v6080_v28  ;;  %v5926_v28 = vld [vmem:[%s9795_s1 + $0x7c0] ss:$24 sps:$4 sm:$0xff]  }
 0x15c   :  { %3499 = vmatpush1.bf16.msra.mxu1 %v7680_v58  ;;  %2528 = vmatprep.subr.bf16.mxu0 %v5916_v52  ;;  %10041 = vst [vmem:[#allocation20_spill] sm:$0xff] %v7710_v33  ;;  %v5920_v52 = vld [vmem:[%s9795_s1 + $0x790] ss:$24 sps:$4 sm:$0xff]   ;;  %v5928_v58 = vld [vmem:[%s9795_s1 + $0x7c4] ss:$24 sps:$4 sm:$0xff]  }
 0x15d   :  { %3500 = vmatprep.subr.bf16.mxu1 %v7689_v8  ;;  %v7722_v8 = vld [vmem:[%s9797_s2 + $0x190] ss:$24 sps:$4 sm:$0xff]  }
 0x15e   :  { %10042 = vst [vmem:[#allocation21_spill] sm:$0xff] %v7722_v8 }
 0x15f   :  { %2529 = vmatpush1.bf16.msra.mxu0 %v5914_v14  ;;  %v7731_v14 = vld [vmem:[%s9797_s2 + $0x1c4] ss:$24 sps:$4 sm:$0xff]  }
 0x160   :  { %3501 = vmatpush1.bf16.msra.mxu1 %v7701_v40  ;;  %2530 = vmatprep.subr.bf16.mxu0 %v5922_v0  ;;  %10043 = vst [vmem:[#allocation22_spill] sm:$0xff] %v7731_v14  ;;  %v7740_v0 = vld [vmem:[%s9797_s2 + $0x1c0] ss:$24 sps:$4 sm:$0xff]  }
 0x161   :  { %3502 = vmatprep.subr.bf16.mxu1 %v7710_v33  ;;  %10044 = vst [vmem:[#allocation23_spill] sm:$0xff] %v7740_v0  ;;  %v5934_v33 = vld [vmem:[%s9795_s1 + $0x7f4] ss:$24 sps:$4 sm:$0xff]  }
 0x163   :  { %2531 = vmatpush1.bf16.msra.mxu0 %v5920_v52  ;;  %v7749_v52 = vld [vmem:[%s9797_s2 + $0x1f4] ss:$24 sps:$4 sm:$0xff]  }
 0x164   :  { %3503 = vmatpush1.bf16.msra.mxu1 %v7722_v8  ;;  %2532 = vmatprep.subr.bf16.mxu0 %v5928_v58  ;;  %10045 = vst [vmem:[#allocation24_spill] sm:$0xff] %v7749_v52  ;;  %v5932_v8 = vld [vmem:[%s9795_s1 + $0x7f0] ss:$24 sps:$4 sm:$0xff]  }
 0x165   :  { %3504 = vmatprep.subr.bf16.mxu1 %v7731_v14  ;;  %v7758_v58 = vld [vmem:[%s9797_s2 + $0x1f0] ss:$24 sps:$4 sm:$0xff]   ;;  %v5940_v14 = vld [vmem:[%s9795_s1 + $0x824] ss:$24 sps:$4 sm:$0xff]  }
 0x166   :  { %10046 = vst [vmem:[#allocation25_spill] sm:$0xff] %v7758_v58 }
 0x167   :  { %2533 = vmatpush1.bf16.msra.mxu0 %v5926_v28  ;;  %v7767_v28 = vld [vmem:[%s9797_s2 + $0x224] ss:$24 sps:$4 sm:$0xff]  }
 0x168   :  { %3505 = vmatpush1.bf16.msra.mxu1 %v7740_v0  ;;  %2534 = vmatprep.subr.bf16.mxu0 %v5934_v33  ;;  %10047 = vst [vmem:[#allocation26_spill] sm:$0xff] %v7767_v28  ;;  %v5938_v0 = vld [vmem:[%s9795_s1 + $0x820] ss:$24 sps:$4 sm:$0xff]  }
 0x169   :  { %3506 = vmatprep.subr.bf16.mxu1 %v7749_v52  ;;  %v7776_v33 = vld [vmem:[%s9797_s2 + $0x220] ss:$24 sps:$4 sm:$0xff]   ;;  %v5946_v52 = vld [vmem:[%s9795_s1 + $0x854] ss:$24 sps:$4 sm:$0xff]  }
 0x16a   :  { %10048 = vst [vmem:[#allocation27_spill] sm:$0xff] %v7776_v33 }
 0x16b   :  { %2535 = vmatpush1.bf16.msra.mxu0 %v5932_v8  ;;  %v7785_v8 = vld [vmem:[%s9797_s2 + $0x254] ss:$24 sps:$4 sm:$0xff]  }
 0x16c   :  { %3507 = vmatpush1.bf16.msra.mxu1 %v7758_v58  ;;  %2536 = vmatprep.subr.bf16.mxu0 %v5940_v14  ;;  %10049 = vst [vmem:[#allocation28_spill] sm:$0xff] %v7785_v8  ;;  %v5944_v58 = vld [vmem:[%s9795_s1 + $0x850] ss:$24 sps:$4 sm:$0xff]  }
 0x16d   :  { %3508 = vmatprep.subr.bf16.mxu1 %v7767_v28  ;;  %v7794_v14 = vld [vmem:[%s9797_s2 + $0x250] ss:$24 sps:$4 sm:$0xff]   ;;  %v5952_v28 = vld [vmem:[%s9795_s1 + $0x884] ss:$24 sps:$4 sm:$0xff]  }
 0x16e   :  { %10050 = vst [vmem:[#allocation29_spill] sm:$0xff] %v7794_v14 }
 0x16f   :  { %2537 = vmatpush1.bf16.msra.mxu0 %v5938_v0  ;;  %v7803_v0 = vld [vmem:[%s9797_s2 + $0x284] ss:$24 sps:$4 sm:$0xff]  }
 0x170   :  { %3509 = vmatpush1.bf16.msra.mxu1 %v7776_v33  ;;  %2538 = vmatprep.subr.bf16.mxu0 %v5946_v52  ;;  %10051 = vst [vmem:[#allocation30_spill] sm:$0xff] %v7803_v0  ;;  %v5950_v33 = vld [vmem:[%s9795_s1 + $0x880] ss:$24 sps:$4 sm:$0xff]  }
 0x171   :  { %3510 = vmatprep.subr.bf16.mxu1 %v7785_v8  ;;  %v7812_v52 = vld [vmem:[%s9797_s2 + $0x280] ss:$24 sps:$4 sm:$0xff]   ;;  %v5958_v8 = vld [vmem:[%s9795_s1 + $0x8b4] ss:$24 sps:$4 sm:$0xff]  }
 0x172   :  { %10052 = vst [vmem:[#allocation31_spill] sm:$0xff] %v7812_v52 }
 0x173   :  { %2539 = vmatpush1.bf16.msra.mxu0 %v5944_v58  ;;  %v7821_v58 = vld [vmem:[%s9797_s2 + $0x2b4] ss:$24 sps:$4 sm:$0xff]  }
 0x174   :  { %3511 = vmatpush1.bf16.msra.mxu1 %v7794_v14  ;;  %2540 = vmatprep.subr.bf16.mxu0 %v5952_v28  ;;  %10053 = vst [vmem:[#allocation32_spill] sm:$0xff] %v7821_v58  ;;  %v5956_v14 = vld [vmem:[%s9795_s1 + $0x8b0] ss:$24 sps:$4 sm:$0xff]  }
 0x175   :  { %3512 = vmatprep.subr.bf16.mxu1 %v7803_v0  ;;  %v7830_v28 = vld [vmem:[%s9797_s2 + $0x2b0] ss:$24 sps:$4 sm:$0xff]   ;;  %v5964_v0 = vld [vmem:[%s9795_s1 + $0x8e4] ss:$24 sps:$4 sm:$0xff]  }
 0x176   :  { %10054 = vst [vmem:[#allocation33_spill] sm:$0xff] %v7830_v28 }
 0x177   :  { %2541 = vmatpush1.bf16.msra.mxu0 %v5950_v33  ;;  %v7839_v33 = vld [vmem:[%s9797_s2 + $0x2e4] ss:$24 sps:$4 sm:$0xff]  }
 0x178   :  { %3513 = vmatpush1.bf16.msra.mxu1 %v7812_v52  ;;  %2542 = vmatprep.subr.bf16.mxu0 %v5958_v8  ;;  %10055 = vst [vmem:[#allocation34_spill] sm:$0xff] %v7839_v33  ;;  %v5962_v52 = vld [vmem:[%s9795_s1 + $0x8e0] ss:$24 sps:$4 sm:$0xff]  }
 0x179   :  { %3514 = vmatprep.subr.bf16.mxu1 %v7821_v58  ;;  %v7848_v8 = vld [vmem:[%s9797_s2 + $0x2e0] ss:$24 sps:$4 sm:$0xff]   ;;  %v7928_v58 = vld [vmem:[%s9797_s2 + $0x90] ss:$24 sps:$4 sm:$0xff]  }
 0x17a   :  { %10056 = vst [vmem:[#allocation35_spill] sm:$0xff] %v7848_v8  ;;  %10063 = vst [vmem:[#allocation42_spill] sm:$0xff] %v7928_v58 }
 0x17b   :  { %2543 = vmatpush1.bf16.msra.mxu0 %v5956_v14  ;;  %v7855_v14 = vld [vmem:[%s9797_s2 + $0x4] ss:$24 sps:$4 sm:$0xff]  }
 0x17c   :  { %3515 = vmatpush1.bf16.msra.mxu1 %v7830_v28  ;;  %2544 = vmatprep.subr.bf16.mxu0 %v5964_v0  ;;  %v6082_v28 = vld [vmem:[%s9796_s0 + $0x10] ss:$24 sps:$4 sm:$0xff]   ;;  %v6083_v0 = vld [vmem:[%s9796_s0 + $0x44] ss:$24 sps:$4 sm:$0xff]  }
 0x17d   :  { %3516 = vmatprep.subr.bf16.mxu1 %v7839_v33 }
 0x17f   :  { %2545 = vmatpush1.bf16.msra.mxu0 %v5962_v52  ;;  %v7869_v52 = vld [vmem:[%s9797_s2] ss:$24 sps:$4 sm:$0xff]  }
 0x180   :  { %3517 = vmatpush1.bf16.msra.mxu1 %v7848_v8  ;;  %3573 = vmatprep.subr.bf16.mxu0 %v7855_v14  ;;  %10057 = vst [vmem:[#allocation36_spill] sm:$0xff] %v7869_v52  ;;  %v7905_v8 = vld [vmem:[%s9797_s2 + $0x60] ss:$24 sps:$4 sm:$0xff]  }
 0x181   :  { %3614 = vmatprep.subr.bf16.mxu1 %v7229_v27  ;;  %v7876_v27 = vld [vmem:[%s9797_s2 + $0x34] ss:$24 sps:$4 sm:$0xff]   ;;  %10061 = vst [vmem:[#allocation40_spill] sm:$0xff] %v7905_v8 }
 0x182   :  { %2547 = vmatmul.mubr.bf16.vlgmr.msra.gmra.mrb[16].mxu0 %v6082_v28  ;;  %10058 = vst [vmem:[#allocation37_spill] sm:$0xff] %v7876_v27  ;;  %v7883_v28 = vld [vmem:[%s9797_s2 + $0x30] ss:$24 sps:$4 sm:$0xff]  }
 0x183   :  { %3519 = vmatmul.mubr.bf16.vlgmr.msra.gmra.mrb[24].mxu1 %v10029_v20  ;;  %2556 = vmatprep.mubr.bf16.mxu0 %v6083_v0  ;;  %v340_v20 = vlaneseq  ;;  %10059 = vst [vmem:[#allocation38_spill] sm:$0xff] %v7883_v28 }
 0x184   :  { %3574 = vmatpush1.bf16.msra.mxu0 %v7869_v52  ;;  %3615 = vmatpush1.bf16.msra.mxu1 %v7237_v29  ;;  %v7890_v29 = vld [vmem:[%s9797_s2 + $0x64] ss:$24 sps:$4 sm:$0xff]  }
 0x185   :  { %3575 = vmatprep.subr.bf16.mxu0 %v7876_v27  ;;  %3616 = vmatprep.subr.bf16.mxu1 %v7247_v31  ;;  %10060 = vst [vmem:[#allocation39_spill] sm:$0xff] %v7890_v29  ;;  %v6088_v31 = vld [vmem:[%s9796_s0 + $0x40] ss:$24 sps:$4 sm:$0xff]   ;;  %v7897_v0 = vshrl.u32 %v340_v20, 7 }
 0x187   :  { %v9844_v20 = vsub.s32 0, %v7897_v0  ;;  %v354_v33 = vsub.s32 3, %v7897_v0 }
 0x188   :  { %3576 = vmatpush1.bf16.msra.mxu0 %v7883_v28  ;;  %3617 = vmatpush1.bf16.msra.mxu1 %v7259_v34  ;;  %v6089_v34 = vld [vmem:[%s9796_s0 + $0x74] ss:$24 sps:$4 sm:$0xff]  }
 0x189   :  { %3577 = vmatprep.subr.bf16.mxu0 %v7890_v29  ;;  %3618 = vmatprep.subr.bf16.mxu1 %v7269_v36  ;;  %v7912_v36 = vld [vmem:[%s9797_s2 + $0x94] ss:$24 sps:$4 sm:$0xff]  }
 0x18a   :  { %2557 = vmatmul.mubr.bf16.gmra.mrb[20].mxu0 %v6088_v31  ;;  %10062 = vst [vmem:[#allocation41_spill] sm:$0xff] %v7912_v36  ;;  %v350_v31 = vsub.s32 2, %v7897_v0 }
 0x18b   :  { %2566 = vmatprep.mubr.bf16.mxu0 %v6089_v34  ;;  %v7921_v34 = vld [vmem:[%s9798_s3] sm:$0x3f] }
 0x18c   :  { %3578 = vmatpush1.bf16.msra.mxu0 %v7905_v8  ;;  %3619 = vmatpush1.bf16.msra.mxu1 %v7281_v39  ;;  %v6094_v39 = vld [vmem:[%s9796_s0 + $0x70] ss:$24 sps:$4 sm:$0xff]   ;;  %v7945_v40 = vrot.slane %v7921_v34, %v9844_v20 }
 0x18d   :  { %3579 = vmatprep.subr.bf16.mxu0 %v7912_v36  ;;  %3620 = vmatprep.subr.bf16.mxu1 %v7291_v41  ;;  %v7935_v41 = vld [vmem:[%s9797_s2 + $0xc4] ss:$24 sps:$4 sm:$0xff]  }
 0x18e   :  { %10064 = vst [vmem:[#allocation43_spill] sm:$0xff] %v7935_v41 }
 0x190   :  { %3580 = vmatpush1.bf16.msra.mxu0 %v7928_v58  ;;  %3621 = vmatpush1.bf16.msra.mxu1 %v7299_v45  ;;  %v7948_v45 = vrot.slane %v7921_v34, %v350_v31  ;;  %v10065_v58 = vsub.s32 1, %v7897_v0 }
 0x191   :  { %3581 = vmatprep.subr.bf16.mxu0 %v7935_v41  ;;  %3622 = vmatprep.subr.bf16.mxu1 %v7312_v50  ;;  %v7956_v50 = vrot.slane %v7921_v34, %v354_v33 }
 0x192   :  { %2567 = vmatmul.mubr.bf16.gmra.mrb[24].mxu0 %v6094_v39  ;;  %v7953_v36 = vrot.slane %v7921_v34, %v10065_v58  ;;  %v7962_v39 = vld [vmem:[%s9797_s2 + $0xc0] ss:$24 sps:$4 sm:$0xff]  }
 0x193   :  { %2576 = vmatprep.mubr.bf16.mxu0 %v7022_v44  ;;  %10066 = vst [vmem:[#allocation44_spill] sm:$0xff] %v7962_v39 }
 0x194   :  { %3582 = vmatpush1.bf16.msra.mxu0 %v7962_v39  ;;  %3623 = vmatpush1.bf16.msra.mxu1 %v7324_v56 }
 0x195   :  { %3583 = vmatprep.subr.bf16.mxu0 %v7017_v43  ;;  %v2110_v31 = vpop.f32.mrb[0].mxu0  ;;  %3624 = vmatprep.subr.bf16.mxu1 %v7333_v60  ;;  %v7975_v43 = vld [vmem:[%s9797_s2 + $0xf0] ss:$24 sps:$4 sm:$0xff]  }
 0x196   :  { %v2329_v20 = vpop.f32.mrb[0].mxu1  ;;  %v5211_v58 = vadd.f32 %v2110_v31, %v7945_v40  ;;  %v2112_v44 = vpop.f32.mrb[1].mxu0 }
 0x197   :  { %v5227_v33 = vadd.f32 %v2329_v20, %v7948_v45  ;;  %v2331_v41 = vpop.f32.mrb[1].mxu1  ;;  %v5212_v8 = vadd.f32 %v2112_v44, %v7953_v36  ;;  %v2114_v28 = vpop.f32.mrb[2].mxu0 }
 0x198   :  { %v5228_v29 = vadd.f32 %v2331_v41, %v7956_v50  ;;  %v2333_v39 = vpop.f32.mrb[2].mxu1  ;;  %3584 = vmatpush1.bf16.msra.mxu0 %v7975_v43  ;;  %v5213_v56 = vadd.f32 %v2114_v28, %v7945_v40  ;;  %v2116_v20 = vpop.f32.mrb[3].mxu0  ;;  %3625 = vmatpush1.bf16.msra.mxu1 %v7345_v2 }
 0x199   :  { %v5229_v60 = vadd.f32 %v2333_v39, %v7948_v45  ;;  %v2335_v31 = vpop.f32.mrb[3].mxu1  ;;  %3585 = vmatprep.subr.bf16.mxu0 %v7037_v48  ;;  %v7982_v41 = vpack.c.bf16 %v5212_v8, %v5211_v58  ;;  %v5214_v27 = vadd.f32 %v2116_v20, %v7953_v36  ;;  %3626 = vmatprep.subr.bf16.mxu1 %v7354_v6 }
 0x19a   :  { %v7984_v44 = vpack.c.bf16 %v5228_v29, %v5227_v33  ;;  %v5230_v52 = vadd.f32 %v2335_v31, %v7956_v50  ;;  %2577 = vmatmul.mubr.bf16.gmra.mrb[28].mxu0 %v7044_v49 }
 0x19b   :  { %v7990_v28 = vpack.c.bf16 %v5214_v27, %v5213_v56 }
 0x19c   :  { %v7992_v39 = vpack.c.bf16 %v5230_v52, %v5229_v60  ;;  %3586 = vmatpush1.bf16.msra.mxu0 %v7052_v51  ;;  %3627 = vmatpush1.bf16.msra.mxu1 %v7366_v12 }
 0x19d   :  { %3587 = vmatprep.subr.bf16.mxu0 %v7061_v53  ;;  %v2120_v48 = vpop.f32.mrb[4].mxu0  ;;  %3628 = vmatprep.subr.bf16.mxu1 %v7375_v16 }
 0x19e   :  { %v2339_v2 = vpop.f32.mrb[4].mxu1  ;;  %v5215_v8 = vadd.f32 %v2120_v48, %v7945_v40  ;;  %v2122_v29 = vpop.f32.mrb[5].mxu0 }
 0x19f   :  { %v5231_v6 = vadd.f32 %v2339_v2, %v7948_v45  ;;  %v2341_v49 = vpop.f32.mrb[5].mxu1  ;;  %v5216_v27 = vadd.f32 %v2122_v29, %v7953_v36  ;;  %v2124_v58 = vpop.f32.mrb[6].mxu0 }
 0x1a0   :  { %v5232_v52 = vadd.f32 %v2341_v49, %v7956_v50  ;;  %v2343_v51 = vpop.f32.mrb[6].mxu1  ;;  %3588 = vmatpush1.bf16.msra.mxu0 %v7071_v55  ;;  %v5217_v53 = vadd.f32 %v2124_v58, %v7945_v40  ;;  %v2126_v33 = vpop.f32.mrb[7].mxu0  ;;  %3629 = vmatpush1.bf16.msra.mxu1 %v7387_v22 }
 0x1a1   :  { %v5233_v12 = vadd.f32 %v2343_v51, %v7948_v45  ;;  %v2345_v16 = vpop.f32.mrb[7].mxu1  ;;  %3589 = vmatprep.subr.bf16.mxu0 %v7081_v57  ;;  %v8007_v56 = vpack.c.bf16 %v5216_v27, %v5215_v8  ;;  %v5218_v20 = vadd.f32 %v2126_v33, %v7953_v36  ;;  %3630 = vmatprep.subr.bf16.mxu1 %v7396_v26 }
 0x1a2   :  { %v8009_v60 = vpack.c.bf16 %v5232_v52, %v5231_v6  ;;  %v5234_v31 = vadd.f32 %v2345_v16, %v7956_v50 }
 0x1a3   :  { %10067 = vst [vmem:[#allocation45_spill] sm:$0xff] %v8007_v56  ;;  %v8014_v55 = vpack.c.bf16 %v5218_v20, %v5217_v53  ;;  %v8441_v56 = vld [vmem:[%s9797_s2 + $0x1ec] ss:$24 sps:$4 sm:$0xff]  }
 0x1a4   :  { %10068 = vst [vmem:[#allocation46_spill] sm:$0xff] %v8009_v60  ;;  %v8016_v48 = vpack.c.bf16 %v5234_v31, %v5233_v12  ;;  %3590 = vmatpush1.bf16.msra.mxu0 %v7093_v61  ;;  %3631 = vmatpush1.bf16.msra.mxu1 %v7408_v32  ;;  %v8435_v60 = vld [vmem:[%s9797_s2 + $0x1b8] ss:$24 sps:$4 sm:$0xff]  }
 0x1a5   :  { %10069 = vst [vmem:[#allocation47_spill] sm:$0xff] %v8014_v55  ;;  %3591 = vmatprep.subr.bf16.mxu0 %v7103_v63  ;;  %v2130_v57 = vpop.f32.mrb[8].mxu0  ;;  %3632 = vmatprep.subr.bf16.mxu1 %v7417_v35  ;;  %v8423_v55 = vld [vmem:[%s9797_s2 + $0x188] ss:$24 sps:$4 sm:$0xff]  }
 0x1a6   :  { %10070 = vst [vmem:[#allocation48_spill] sm:$0xff] %v8016_v48  ;;  %v2349_v22 = vpop.f32.mrb[8].mxu1  ;;  %v5219_v2 = vadd.f32 %v2130_v57, %v7945_v40  ;;  %v2132_v6 = vpop.f32.mrb[9].mxu0  ;;  %v8417_v48 = vld [vmem:[%s9797_s2 + $0x18c] ss:$24 sps:$4 sm:$0xff]  }
 0x1a7   :  { %v5235_v8 = vadd.f32 %v2349_v22, %v7948_v45  ;;  %v2351_v26 = vpop.f32.mrb[9].mxu1  ;;  %v5220_v29 = vadd.f32 %v2132_v6, %v7953_v36  ;;  %v2134_v27 = vpop.f32.mrb[10].mxu0 }
 0x1a8   :  { %v5236_v49 = vadd.f32 %v2351_v26, %v7956_v50  ;;  %v2353_v61 = vpop.f32.mrb[10].mxu1  ;;  %3592 = vmatpush1.bf16.msra.mxu0 %v7111_v1  ;;  %v5221_v63 = vadd.f32 %v2134_v27, %v7945_v40  ;;  %v2136_v52 = vpop.f32.mrb[11].mxu0  ;;  %3633 = vmatpush1.bf16.msra.mxu1 %v7426_v38  ;;  %v2803_v27 = vld [vmem:[%s9799_s4] sm:$0x3] }
 0x1a9   :  { %v5237_v32 = vadd.f32 %v2353_v61, %v7948_v45  ;;  %v2355_v35 = vpop.f32.mrb[11].mxu1  ;;  %3593 = vmatprep.subr.bf16.mxu0 %v7121_v3  ;;  %v8031_v58 = vpack.c.bf16 %v5220_v29, %v5219_v2  ;;  %v5222_v53 = vadd.f32 %v2136_v52, %v7953_v36  ;;  %3634 = vmatprep.subr.bf16.mxu1 %v7435_v42  ;;  %v362_v61 = vsub.s32 5, %v7897_v0 }
 0x1aa   :  { %v8033_v51 = vpack.c.bf16 %v5236_v49, %v5235_v8  ;;  %v5238_v12 = vadd.f32 %v2355_v35, %v7956_v50  ;;  %v10080_v52 = vsub.s32 0, %v7897_v0 }
 0x1ab   :  { %10071 = vst [vmem:[#allocation49_spill] sm:$0xff] %v8031_v58  ;;  %v8038_v1 = vpack.c.bf16 %v5222_v53, %v5221_v63  ;;  %v8405_v58 = vld [vmem:[%s9797_s2 + $0x15c] ss:$24 sps:$4 sm:$0xff]  }
 0x1ac   :  { %10072 = vst [vmem:[#allocation50_spill] sm:$0xff] %v8033_v51  ;;  %v8040_v33 = vpack.c.bf16 %v5238_v12, %v5237_v32  ;;  %3594 = vmatpush1.bf16.msra.mxu0 %v7129_v5  ;;  %3635 = vmatpush1.bf16.msra.mxu1 %v7444_v47  ;;  %v8096_v35 = vrot.slane %v2803_v27, %v10080_v52  ;;  %v8399_v51 = vld [vmem:[%s9797_s2 + $0x128] ss:$24 sps:$4 sm:$0xff]  }
 0x1ad   :  { %10073 = vst [vmem:[#allocation51_spill] sm:$0xff] %v8038_v1  ;;  %3595 = vmatprep.subr.bf16.mxu0 %v7139_v7  ;;  %v2140_v3 = vpop.f32.mrb[12].mxu0  ;;  %3636 = vmatprep.subr.bf16.mxu1 %v7453_v54  ;;  %v8099_v12 = vrot.slane %v7921_v34, %v362_v61  ;;  %v8387_v1 = vld [vmem:[%s9797_s2 + $0xf8] ss:$24 sps:$4 sm:$0xff]  }
 0x1ae   :  { %10074 = vst [vmem:[#allocation52_spill] sm:$0xff] %v8040_v33  ;;  %v2359_v38 = vpop.f32.mrb[12].mxu1  ;;  %v5223_v16 = vadd.f32 %v2140_v3, %v7945_v40  ;;  %v2142_v31 = vpop.f32.mrb[13].mxu0  ;;  %v10081_v3 = vsub.s32 1, %v7897_v0  ;;  %v8381_v33 = vld [vmem:[%s9797_s2 + $0xfc] ss:$24 sps:$4 sm:$0xff]  }
 0x1af   :  { %v5239_v20 = vadd.f32 %v2359_v38, %v7948_v45  ;;  %v2361_v42 = vpop.f32.mrb[13].mxu1  ;;  %v5224_v57 = vadd.f32 %v2142_v31, %v7953_v36  ;;  %v2144_v2 = vpop.f32.mrb[14].mxu0 }
 0x1b0   :  { %v5240_v22 = vadd.f32 %v2361_v42, %v7956_v50  ;;  %v2363_v5 = vpop.f32.mrb[14].mxu1  ;;  %3596 = vmatpush1.bf16.msra.mxu0 %v7147_v9  ;;  %v5225_v7 = vadd.f32 %v2144_v2, %v7945_v40  ;;  %v2146_v8 = vpop.f32.mrb[15].mxu0  ;;  %3637 = vmatpush1.bf16.msra.mxu1 %v7462_v62  ;;  %v8103_v38 = vrot.slane %v2803_v27, %v10081_v3 }
 0x1b1   :  { %v5241_v47 = vadd.f32 %v2363_v5, %v7948_v45  ;;  %v2365_v54 = vpop.f32.mrb[15].mxu1  ;;  %3597 = vmatprep.subr.bf16.mxu0 %v7157_v11  ;;  %v8055_v6 = vpack.c.bf16 %v5224_v57, %v5223_v16  ;;  %v5226_v29 = vadd.f32 %v2146_v8, %v7953_v36  ;;  %3638 = vmatprep.subr.bf16.mxu1 %v7471_v4  ;;  %v10079_v11 = vld [vmem:[#allocation4_spill] sm:$0xff] }
 0x1b2   :  { %v8057_v26 = vpack.c.bf16 %v5240_v22, %v5239_v20  ;;  %v5242_v49 = vadd.f32 %v2365_v54, %v7956_v50  ;;  %v358_v50 = vsub.s32 4, %v7897_v0 }
 0x1b3   :  { %10075 = vst [vmem:[#allocation53_spill] sm:$0xff] %v8055_v6  ;;  %v8062_v9 = vpack.c.bf16 %v5226_v29, %v5225_v7  ;;  %v8369_v6 = vld [vmem:[%s9797_s2 + $0xcc] ss:$24 sps:$4 sm:$0xff]  }
 0x1b4   :  { %10076 = vst [vmem:[#allocation54_spill] sm:$0xff] %v8057_v26  ;;  %v8064_v40 = vpack.c.bf16 %v5242_v49, %v5241_v47  ;;  %3598 = vmatpush1.bf16.msra.mxu0 %v7165_v13  ;;  %3639 = vmatpush1.bf16.msra.mxu1 %v7480_v10  ;;  %v2820_v13 = vunpack.c.l.bf16 %v7982_v41  ;;  %v2822_v10 = vunpack.c.l.bf16 %v7984_v44  ;;  %v8092_v32 = vrot.slane %v7921_v34, %v358_v50  ;;  %v8363_v26 = vld [vmem:[%s9797_s2 + $0x98] ss:$24 sps:$4 sm:$0xff]  }
 0x1b5   :  { %10077 = vst [vmem:[#allocation55_spill] sm:$0xff] %v8062_v9  ;;  %3599 = vmatprep.subr.bf16.mxu0 %v7175_v15  ;;  %3640 = vmatprep.subr.bf16.mxu1 %v7489_v18  ;;  %v8351_v9 = vld [vmem:[%s9797_s2 + $0x68] ss:$24 sps:$4 sm:$0xff]  }
 0x1b6   :  { %10078 = vst [vmem:[#allocation56_spill] sm:$0xff] %v8064_v40  ;;  %v8333_v40 = vld [vmem:[%s9797_s2 + $0x3c] ss:$24 sps:$4 sm:$0xff]  }
 0x1b8   :  { %3600 = vmatpush1.bf16.msra.mxu0 %v7183_v17  ;;  %3641 = vmatpush1.bf16.msra.mxu1 %v7498_v24  ;;  %v2821_v17 = vunpack.c.h.bf16 %v7982_v41 }
 0x1b9   :  { %3601 = vmatprep.subr.bf16.mxu0 %v7193_v19  ;;  %3642 = vmatprep.subr.bf16.mxu1 %v7507_v30 }
 0x1bc   :  { %3602 = vmatpush1.bf16.msra.mxu0 %v7201_v21  ;;  %3643 = vmatpush1.bf16.msra.mxu1 %v7516_v37 }
 0x1bd   :  { %3603 = vmatprep.subr.bf16.mxu0 %v7211_v23  ;;  %3644 = vmatprep.subr.bf16.mxu1 %v7525_v46 }
 0x1c0   :  { %3604 = vmatpush1.bf16.msra.mxu0 %v7219_v25  ;;  %3645 = vmatpush1.bf16.msra.mxu1 %v7534_v59  ;;  %v2823_v25 = vunpack.c.h.bf16 %v7984_v44 }
 0x1c1   :  { %3655 = vmatprep.subr.bf16.mxu0 %v10079_v11  ;;  %3742 = vmatprep.subr.bf16.mxu1 %v7855_v14 }
 0x1d6   :  { %v3438_v15 = vpop.f32.mrb[16].mxu1 }
 0x1d7   :  { %v3527_v19 = vadd.f32 %v3438_v15, %v2820_v13  ;;  %v3440_v21 = vpop.f32.mrb[17].mxu1 }
 0x1d8   :  { %v3528_v62 = vadd.f32 %v3440_v21, %v2821_v17  ;;  %v3442_v4 = vpop.f32.mrb[18].mxu1 }
 0x1d9   :  { %v3443_v23 = vpop.f32.mrb[19].mxu1  ;;  %v3531_v36 = vmul.f32 0.5, %v3527_v19 }
 0x1da   :  { %v3532_v45 = vmul.f32 0.5, %v3528_v62 }
 0x1db   :  { %5968 = vtanh.f32 %v3531_v36 }
 0x1dc   :  { %5970 = vtanh.f32 %v3532_v45 }
 0x1e5   :  { %v5969_v41 = vpop.eup %5968 }
 0x1e6   :  { %v5971_v63 = vpop.eup %5970  ;;  %v3539_v44 = vadd.f32 1.0, %v5969_v41 }
 0x1e7   :  { %v3540_v53 = vadd.f32 1.0, %v5971_v63 }
 0x1e8   :  { %v3543_v22 = vmul.f32 0.5, %v3539_v44 }
 0x1e9   :  { %v3544_v8 = vmul.f32 0.5, %v3540_v53 }
 0x216   :  { %v3479_v18 = vpop.f32.mrb[20].mxu1 }
 0x217   :  { %v3529_v24 = vadd.f32 %v3479_v18, %v2822_v10  ;;  %v3481_v30 = vpop.f32.mrb[21].mxu1 }
 0x218   :  { %v3530_v37 = vadd.f32 %v3481_v30, %v2823_v25  ;;  %v3483_v46 = vpop.f32.mrb[22].mxu1 }
 0x219   :  { %v3484_v59 = vpop.f32.mrb[23].mxu1  ;;  %v3533_v16 = vmul.f32 0.5, %v3529_v24 }
 0x21a   :  { %v3534_v42 = vmul.f32 0.5, %v3530_v37 }
 0x21b   :  { %5972 = vtanh.f32 %v3533_v16 }
 0x21c   :  { %5974 = vtanh.f32 %v3534_v42 }
 0x225   :  { %v5973_v41 = vpop.eup %5972 }
 0x226   :  { %v5975_v61 = vpop.eup %5974  ;;  %v3541_v44 = vadd.f32 1.0, %v5973_v41  ;;  %v10094_v41 = vld [vmem:[#allocation38_spill] sm:$0xff] }
 0x227   :  { %v3542_v3 = vadd.f32 1.0, %v5975_v61  ;;  %v10095_v61 = vld [vmem:[#allocation39_spill] sm:$0xff] }
 0x255   :  { %v2548_v20 = vpop.f32.mrb[16].mxu0 }
 0x256   :  { %v3520_v31 = vpop.f32.mrb[24].mxu1  ;;  %v5243_v57 = vadd.f32 %v2548_v20, %v8092_v32  ;;  %v2550_v5 = vpop.f32.mrb[17].mxu0 }
 0x257   :  { %v3547_v2 = vadd.f32 %v3520_v31, %v8096_v35  ;;  %v3522_v7 = vpop.f32.mrb[25].mxu1  ;;  %v5244_v47 = vadd.f32 %v2550_v5, %v8099_v12  ;;  %v2552_v54 = vpop.f32.mrb[18].mxu0 }
 0x258   :  { %v3548_v34 = vadd.f32 %v3522_v7, %v8103_v38  ;;  %v3524_v0 = vpop.f32.mrb[26].mxu1  ;;  %v5245_v49 = vadd.f32 %v2552_v54, %v8092_v32  ;;  %v2554_v13 = vpop.f32.mrb[19].mxu0  ;;  %v3545_v7 = vmul.f32 0.5, %v3541_v44  ;;  %v10097_v44 = vld [vmem:[#allocation10_spill] sm:$0xff] }
 0x259   :  { %v3549_v29 = vmul.f32 %v3547_v2, %v3543_v22  ;;  %v3525_v15 = vpop.f32.mrb[27].mxu1  ;;  %v5189_v17 = vpack.c.bf16 %v5244_v47, %v5243_v57  ;;  %v5246_v21 = vadd.f32 %v2554_v13, %v8099_v12 }
 0x25a   :  { %v3550_v19 = vmul.f32 %v3548_v34, %v3544_v8  ;;  %v3546_v8 = vmul.f32 0.5, %v3542_v3  ;;  %v10100_v3 = vld [vmem:[#allocation11_spill] sm:$0xff] }
 0x25b   :  { %v2824_v62 = vunpack.c.l.bf16 %v5189_v17  ;;  %v2825_v4 = vunpack.c.h.bf16 %v5189_v17  ;;  %v8111_v23 = vpack.c.bf16 %v5246_v21, %v5245_v49 }
 0x25d   :  { %v3551_v10 = vadd.f32 %v3549_v29, %v2824_v62  ;;  %v3552_v18 = vadd.f32 %v3550_v19, %v2825_v4  ;;  %v2558_v25 = vpop.f32.mrb[20].mxu0 }
 0x25e   :  { %v5247_v24 = vadd.f32 %v2558_v25, %v8092_v32  ;;  %v2560_v30 = vpop.f32.mrb[21].mxu0 }
 0x25f   :  { %5976 = vtanh.f32 %v3551_v10  ;;  %v5248_v37 = vadd.f32 %v2560_v30, %v8099_v12  ;;  %v2562_v46 = vpop.f32.mrb[22].mxu0 }
 0x260   :  { %5978 = vtanh.f32 %v3552_v18  ;;  %v5249_v59 = vadd.f32 %v2562_v46, %v8092_v32  ;;  %v2564_v36 = vpop.f32.mrb[23].mxu0  ;;  %v10089_v46 = vld [vmem:[#allocation6_spill] sm:$0xff] }
 0x261   :  { %v8116_v45 = vpack.c.bf16 %v5248_v37, %v5247_v24  ;;  %v5250_v50 = vadd.f32 %v2564_v36, %v8099_v12  ;;  %v10091_v36 = vld [vmem:[#allocation37_spill] sm:$0xff] }
 0x263   :  { %10082 = vst [vmem:[#allocation4_spill] sm:$0xff] %v8116_v45  ;;  %v8119_v27 = vpack.c.bf16 %v5250_v50, %v5249_v59  ;;  %v10090_v59 = vld [vmem:[#allocation36_spill] sm:$0xff]  ;;  %v8429_v45 = vld [vmem:[%s9797_s2 + $0x1bc] ss:$24 sps:$4 sm:$0xff]  }
 0x264   :  { %v10093_v50 = vld [vmem:[#allocation8_spill] sm:$0xff] }
 0x265   :  { %10083 = vst [vmem:[#allocation57_spill] sm:$0xff] %v8119_v27  ;;  %v2568_v63 = vpop.f32.mrb[24].mxu0  ;;  %v8411_v27 = vld [vmem:[%s9797_s2 + $0x158] ss:$24 sps:$4 sm:$0xff]  }
 0x266   :  { %v5251_v52 = vadd.f32 %v2568_v63, %v8092_v32  ;;  %v2570_v53 = vpop.f32.mrb[25].mxu0  ;;  %v10096_v63 = vld [vmem:[#allocation9_spill] sm:$0xff] }
 0x267   :  { %v5252_v16 = vadd.f32 %v2570_v53, %v8099_v12  ;;  %v2572_v20 = vpop.f32.mrb[26].mxu0  ;;  %v10099_v53 = vld [vmem:[#allocation41_spill] sm:$0xff] }
 0x268   :  { %v5253_v31 = vadd.f32 %v2572_v20, %v8092_v32  ;;  %v2574_v42 = vpop.f32.mrb[27].mxu0  ;;  %v10102_v20 = vld [vmem:[#allocation42_spill] sm:$0xff] }
 0x269   :  { %v5977_v57 = vpop.eup %5976  ;;  %v8124_v22 = vpack.c.bf16 %v5252_v16, %v5251_v52  ;;  %v5254_v2 = vadd.f32 %v2574_v42, %v8099_v12  ;;  %v10098_v52 = vld [vmem:[#allocation40_spill] sm:$0xff]  ;;  %v10104_v42 = vld [vmem:[#allocation13_spill] sm:$0xff] }
 0x26a   :  { %v5979_v5 = vpop.eup %5978  ;;  %v3555_v47 = vsub.f32 0.0, %v5977_v57  ;;  %v10101_v16 = vld [vmem:[#allocation12_spill] sm:$0xff] }
 0x26b   :  { %10084 = vst [vmem:[#allocation58_spill] sm:$0xff] %v8124_v22  ;;  %v8127_v34 = vpack.c.bf16 %v5254_v2, %v5253_v31  ;;  %v3556_v54 = vsub.f32 0.0, %v5979_v5  ;;  %v10103_v31 = vld [vmem:[#allocation43_spill] sm:$0xff]  ;;  %v10106_v2 = vld [vmem:[#allocation44_spill] sm:$0xff] }
 0x26c   :  { %v3557_v0 = vmul.f32 %v3555_v47, %v3545_v7  ;;  %v10107_v7 = vld [vmem:[#allocation15_spill] sm:$0xff]  ;;  %v10108_v47 = vld [vmem:[#allocation16_spill] sm:$0xff]  ;;  %10143 = vst [vmem:[#allocation43_spill] sm:$0xff] %v8333_v40  ;;  %10146 = vst [vmem:[#allocation44_spill] sm:$0xff] %v8351_v9 }
 0x26d   :  { %10085 = vst [vmem:[#allocation59_spill] sm:$0xff] %v8127_v34  ;;  %v2578_v29 = vpop.f32.mrb[28].mxu0  ;;  %v3558_v49 = vmul.f32 %v3556_v54, %v3546_v8  ;;  %v8180_v8 = vld [vmem:[%s9797_s2 + $0x124] ss:$24 sps:$4 sm:$0xff]   ;;  %v10109_v54 = vld [vmem:[#allocation17_spill] sm:$0xff]  ;;  %10148 = vst [vmem:[#allocation16_spill] sm:$0xff] %v8363_v26 }
 0x26e   :  { %v5255_v13 = vadd.f32 %v2578_v29, %v8092_v32  ;;  %v2580_v15 = vpop.f32.mrb[29].mxu0  ;;  %v8130_v17 = vadd.f32 %v5977_v57, %v3557_v0  ;;  %v10105_v57 = vld [vmem:[#allocation14_spill] sm:$0xff]  ;;  %v8188_v29 = vld [vmem:[%s9797_s2 + $0x120] ss:$24 sps:$4 sm:$0xff]   ;;  %10149 = vst [vmem:[#allocation17_spill] sm:$0xff] %v8369_v6 }
 0x26f   :  { %v5256_v19 = vadd.f32 %v2580_v15, %v8099_v12  ;;  %v2582_v21 = vpop.f32.mrb[30].mxu0  ;;  %v8133_v62 = vadd.f32 %v5979_v5, %v3558_v49  ;;  %v8171_v5 = vld [vmem:[%s9797_s2 + $0xf4] ss:$24 sps:$4 sm:$0xff]   ;;  %v10112_v15 = vld [vmem:[#allocation20_spill] sm:$0xff] }
 0x270   :  { %v5257_v4 = vadd.f32 %v2582_v21, %v8092_v32  ;;  %v2584_v10 = vpop.f32.mrb[31].mxu0  ;;  %v8138_v18 = vpack.c.bf16 %v8130_v17, %v8130_v17  ;;  %v10088_v32 = vld [vmem:[#allocation5_spill] sm:$0xff]  ;;  %v10110_v0 = vld [vmem:[#allocation18_spill] sm:$0xff]  ;;  %v8208_v21 = vld [vmem:[%s9797_s2 + $0x184] ss:$24 sps:$4 sm:$0xff]   ;;  %10152 = vst [vmem:[#allocation20_spill] sm:$0xff] %v8387_v1 }
 0x271   :  { %v8140_v25 = vpack.c.bf16 %v5256_v19, %v5255_v13  ;;  %v5258_v24 = vadd.f32 %v2584_v10, %v8099_v12  ;;  %v3572_v30 = vpack.c.bf16 %v8133_v62, %v8133_v62  ;;  %v10092_v12 = vld [vmem:[#allocation7_spill] sm:$0xff]  ;;  %v8194_v49 = vld [vmem:[%s9797_s2 + $0x154] ss:$24 sps:$4 sm:$0xff]   ;;  %v8202_v19 = vld [vmem:[%s9797_s2 + $0x150] ss:$24 sps:$4 sm:$0xff]  }
 0x272   :  { %v10111_v13 = vld [vmem:[#allocation19_spill] sm:$0xff]  ;;  %v10114_v10 = vld [vmem:[#allocation22_spill] sm:$0xff]  ;;  %v8375_v34 = vld [vmem:[%s9797_s2 + $0xc8] ss:$24 sps:$4 sm:$0xff]  }
 0x273   :  { %10086 = vst [vmem:[#allocation60_spill] sm:$0xff] %v8140_v25  ;;  %v8145_v37 = vpack.c.bf16 %v5258_v24, %v5257_v4  ;;  %3605 = vmatprep.mubr.bf16.mxu0 %v3572_v30  ;;  %3646 = vmatprep.mubr.bf16.mxu1 %v3572_v30  ;;  %v10113_v4 = vld [vmem:[#allocation21_spill] sm:$0xff]  ;;  %v8216_v24 = vld [vmem:[%s9797_s2 + $0x180] ss:$24 sps:$4 sm:$0xff]   ;;  %v8357_v25 = vld [vmem:[%s9797_s2 + $0x9c] ss:$24 sps:$4 sm:$0xff]  }
 0x274   :  { %3606 = vmatmul.mubr.bf16.vlgmr.msra.gmra.mrb[32].mxu0 %v8138_v18  ;;  %3647 = vmatmul.mubr.bf16.vlgmr.msra.gmra.mrb[28].mxu1 %v8138_v18  ;;  %10147 = vst [vmem:[#allocation15_spill] sm:$0xff] %v8357_v25  ;;  %10150 = vst [vmem:[#allocation18_spill] sm:$0xff] %v8375_v34  ;;  %v8393_v22 = vld [vmem:[%s9797_s2 + $0x12c] ss:$24 sps:$4 sm:$0xff]  }
 0x275   :  { %10087 = vst [vmem:[#allocation61_spill] sm:$0xff] %v8145_v37  ;;  %3656 = vmatpush1.bf16.msra.mxu0 %v10088_v32  ;;  %3687 = vmatprep.mubr.bf16.mxu0 %v3572_v30  ;;  %v8222_v30 = vld [vmem:[%s9797_s2 + $0x1b4] ss:$24 sps:$4 sm:$0xff]   ;;  %v10115_v32 = vld [vmem:[#allocation23_spill] sm:$0xff]  ;;  %v8327_v37 = vld [vmem:[%s9797_s2 + $0x8] ss:$24 sps:$4 sm:$0xff]  }
 0x276   :  { %3657 = vmatprep.subr.bf16.mxu0 %v10089_v46  ;;  %3743 = vmatpush1.bf16.msra.mxu1 %v10090_v59  ;;  %v10116_v46 = vld [vmem:[#allocation24_spill] sm:$0xff]  ;;  %10142 = vst [vmem:[#allocation42_spill] sm:$0xff] %v8327_v37  ;;  %10151 = vst [vmem:[#allocation19_spill] sm:$0xff] %v8381_v33 }
 0x277   :  { %3744 = vmatprep.subr.bf16.mxu1 %v10091_v36  ;;  %10153 = vst [vmem:[#allocation21_spill] sm:$0xff] %v8393_v22  ;;  %10154 = vst [vmem:[#allocation22_spill] sm:$0xff] %v8399_v51 }
 0x278   :  { %10155 = vst [vmem:[#allocation23_spill] sm:$0xff] %v8405_v58  ;;  %10156 = vst [vmem:[#allocation24_spill] sm:$0xff] %v8411_v27 }
 0x279   :  { %3658 = vmatpush1.bf16.msra.mxu0 %v10092_v12  ;;  %v8230_v12 = vld [vmem:[%s9797_s2 + $0x1b0] ss:$24 sps:$4 sm:$0xff]  }
 0x27a   :  { %3659 = vmatprep.subr.bf16.mxu0 %v10093_v50  ;;  %3745 = vmatpush1.bf16.msra.mxu1 %v10094_v41  ;;  %10117 = vst [vmem:[#allocation5_spill] sm:$0xff] %v8230_v12  ;;  %v8236_v50 = vld [vmem:[%s9797_s2 + $0x1e4] ss:$24 sps:$4 sm:$0xff]  }
 0x27b   :  { %3746 = vmatprep.subr.bf16.mxu1 %v10095_v61  ;;  %10118 = vst [vmem:[#allocation6_spill] sm:$0xff] %v8236_v50 }
 0x27d   :  { %3660 = vmatpush1.bf16.msra.mxu0 %v10096_v63  ;;  %v10119_v63 = vld [vmem:[#allocation25_spill] sm:$0xff] }
 0x27e   :  { %3661 = vmatprep.subr.bf16.mxu0 %v10097_v44  ;;  %3747 = vmatpush1.bf16.msra.mxu1 %v10098_v52  ;;  %v10120_v44 = vld [vmem:[#allocation26_spill] sm:$0xff]  ;;  %10157 = vst [vmem:[#allocation25_spill] sm:$0xff] %v8417_v48 }
 0x27f   :  { %3748 = vmatprep.subr.bf16.mxu1 %v10099_v53  ;;  %10158 = vst [vmem:[#allocation26_spill] sm:$0xff] %v8423_v55 }
 0x281   :  { %3662 = vmatpush1.bf16.msra.mxu0 %v10100_v3  ;;  %v8244_v3 = vld [vmem:[%s9797_s2 + $0x1e0] ss:$24 sps:$4 sm:$0xff]  }
 0x282   :  { %3663 = vmatprep.subr.bf16.mxu0 %v10101_v16  ;;  %3749 = vmatpush1.bf16.msra.mxu1 %v10102_v20  ;;  %10121 = vst [vmem:[#allocation36_spill] sm:$0xff] %v8244_v3  ;;  %v8250_v16 = vld [vmem:[%s9797_s2 + $0x214] ss:$24 sps:$4 sm:$0xff]  }
 0x283   :  { %3750 = vmatprep.subr.bf16.mxu1 %v10103_v31  ;;  %10122 = vst [vmem:[#allocation37_spill] sm:$0xff] %v8250_v16 }
 0x285   :  { %3664 = vmatpush1.bf16.msra.mxu0 %v10104_v42  ;;  %v10123_v42 = vld [vmem:[#allocation27_spill] sm:$0xff] }
 0x286   :  { %3665 = vmatprep.subr.bf16.mxu0 %v10105_v57  ;;  %3751 = vmatpush1.bf16.msra.mxu1 %v10106_v2  ;;  %v10124_v57 = vld [vmem:[#allocation28_spill] sm:$0xff]  ;;  %10159 = vst [vmem:[#allocation27_spill] sm:$0xff] %v8429_v45 }
 0x287   :  { %3752 = vmatprep.subr.bf16.mxu1 %v8171_v5  ;;  %10160 = vst [vmem:[#allocation28_spill] sm:$0xff] %v8435_v60 }
 0x289   :  { %3666 = vmatpush1.bf16.msra.mxu0 %v10107_v7  ;;  %v8258_v7 = vld [vmem:[%s9797_s2 + $0x210] ss:$24 sps:$4 sm:$0xff]  }
 0x28a   :  { %3667 = vmatprep.subr.bf16.mxu0 %v10108_v47  ;;  %3753 = vmatpush1.bf16.msra.mxu1 %v7975_v43  ;;  %10125 = vst [vmem:[#allocation7_spill] sm:$0xff] %v8258_v7  ;;  %v8264_v47 = vld [vmem:[%s9797_s2 + $0x244] ss:$24 sps:$4 sm:$0xff]  }
 0x28b   :  { %3754 = vmatprep.subr.bf16.mxu1 %v8180_v8  ;;  %10126 = vst [vmem:[#allocation8_spill] sm:$0xff] %v8264_v47 }
 0x28d   :  { %3668 = vmatpush1.bf16.msra.mxu0 %v10109_v54  ;;  %v10127_v54 = vld [vmem:[#allocation29_spill] sm:$0xff] }
 0x28e   :  { %3669 = vmatprep.subr.bf16.mxu0 %v10110_v0  ;;  %3755 = vmatpush1.bf16.msra.mxu1 %v8188_v29  ;;  %v10128_v0 = vld [vmem:[#allocation30_spill] sm:$0xff]  ;;  %10161 = vst [vmem:[#allocation29_spill] sm:$0xff] %v8441_v56 }
 0x28f   :  { %3756 = vmatprep.subr.bf16.mxu1 %v8194_v49 }
 0x291   :  { %3670 = vmatpush1.bf16.msra.mxu0 %v10111_v13  ;;  %v8272_v13 = vld [vmem:[%s9797_s2 + $0x240] ss:$24 sps:$4 sm:$0xff]  }
 0x292   :  { %3671 = vmatprep.subr.bf16.mxu0 %v10112_v15  ;;  %3757 = vmatpush1.bf16.msra.mxu1 %v8202_v19  ;;  %10129 = vst [vmem:[#allocation38_spill] sm:$0xff] %v8272_v13  ;;  %v8278_v15 = vld [vmem:[%s9797_s2 + $0x274] ss:$24 sps:$4 sm:$0xff]  }
 0x293   :  { %3758 = vmatprep.subr.bf16.mxu1 %v8208_v21  ;;  %10130 = vst [vmem:[#allocation39_spill] sm:$0xff] %v8278_v15 }
 0x295   :  { %3672 = vmatpush1.bf16.msra.mxu0 %v10113_v4  ;;  %v10131_v4 = vld [vmem:[#allocation31_spill] sm:$0xff] }
 0x296   :  { %3673 = vmatprep.subr.bf16.mxu0 %v10114_v10  ;;  %3759 = vmatpush1.bf16.msra.mxu1 %v8216_v24  ;;  %v10132_v10 = vld [vmem:[#allocation32_spill] sm:$0xff] }
 0x297   :  { %3760 = vmatprep.subr.bf16.mxu1 %v8222_v30 }
 0x299   :  { %3674 = vmatpush1.bf16.msra.mxu0 %v10115_v32  ;;  %v8286_v32 = vld [vmem:[%s9797_s2 + $0x270] ss:$24 sps:$4 sm:$0xff]  }
 0x29a   :  { %3675 = vmatprep.subr.bf16.mxu0 %v10116_v46  ;;  %3761 = vmatpush1.bf16.msra.mxu1 %v8230_v12  ;;  %10133 = vst [vmem:[#allocation9_spill] sm:$0xff] %v8286_v32  ;;  %v8292_v46 = vld [vmem:[%s9797_s2 + $0x2a4] ss:$24 sps:$4 sm:$0xff]  }
 0x29b   :  { %3762 = vmatprep.subr.bf16.mxu1 %v8236_v50  ;;  %10134 = vst [vmem:[#allocation10_spill] sm:$0xff] %v8292_v46 }
 0x29d   :  { %3676 = vmatpush1.bf16.msra.mxu0 %v10119_v63  ;;  %v10135_v63 = vld [vmem:[#allocation33_spill] sm:$0xff] }
 0x29e   :  { %3677 = vmatprep.subr.bf16.mxu0 %v10120_v44  ;;  %3763 = vmatpush1.bf16.msra.mxu1 %v8244_v3  ;;  %v10136_v44 = vld [vmem:[#allocation34_spill] sm:$0xff] }
 0x29f   :  { %3764 = vmatprep.subr.bf16.mxu1 %v8250_v16 }
 0x2a1   :  { %3678 = vmatpush1.bf16.msra.mxu0 %v10123_v42  ;;  %v8300_v42 = vld [vmem:[%s9797_s2 + $0x2a0] ss:$24 sps:$4 sm:$0xff]  }
 0x2a2   :  { %3679 = vmatprep.subr.bf16.mxu0 %v10124_v57  ;;  %3765 = vmatpush1.bf16.msra.mxu1 %v8258_v7  ;;  %10137 = vst [vmem:[#allocation40_spill] sm:$0xff] %v8300_v42  ;;  %v8306_v57 = vld [vmem:[%s9797_s2 + $0x2d4] ss:$24 sps:$4 sm:$0xff]  }
 0x2a3   :  { %3766 = vmatprep.subr.bf16.mxu1 %v8264_v47  ;;  %10138 = vst [vmem:[#allocation41_spill] sm:$0xff] %v8306_v57 }
 0x2a5   :  { %3680 = vmatpush1.bf16.msra.mxu0 %v10127_v54  ;;  %v10139_v54 = vld [vmem:[#allocation35_spill] sm:$0xff] }
 0x2a6   :  { %3681 = vmatprep.subr.bf16.mxu0 %v10128_v0  ;;  %3767 = vmatpush1.bf16.msra.mxu1 %v8272_v13  ;;  %v8313_v0 = vld [vmem:[%s9797_s2 + $0xc] ss:$24 sps:$4 sm:$0xff]  }
 0x2a7   :  { %3768 = vmatprep.subr.bf16.mxu1 %v8278_v15  ;;  %10140 = vst [vmem:[#allocation11_spill] sm:$0xff] %v8313_v0 }
 0x2a9   :  { %3682 = vmatpush1.bf16.msra.mxu0 %v10131_v4  ;;  %v8319_v4 = vld [vmem:[%s9797_s2 + $0x2d0] ss:$24 sps:$4 sm:$0xff]  }
 0x2aa   :  { %3683 = vmatprep.subr.bf16.mxu0 %v10132_v10  ;;  %3769 = vmatpush1.bf16.msra.mxu1 %v8286_v32  ;;  %10141 = vst [vmem:[#allocation12_spill] sm:$0xff] %v8319_v4 }
 0x2ab   :  { %3770 = vmatprep.subr.bf16.mxu1 %v8292_v46 }
 0x2ad   :  { %3684 = vmatpush1.bf16.msra.mxu0 %v10135_v63 }
 0x2ae   :  { %3685 = vmatprep.subr.bf16.mxu0 %v10136_v44  ;;  %3771 = vmatpush1.bf16.msra.mxu1 %v8300_v42 }
 0x2af   :  { %3772 = vmatprep.subr.bf16.mxu1 %v8306_v57 }
 0x2b1   :  { %3686 = vmatpush1.bf16.msra.mxu0 %v10139_v54 }
 0x2b2   :  { %3783 = vmatprep.subr.bf16.mxu0 %v8313_v0  ;;  %3773 = vmatpush1.bf16.msra.mxu1 %v8319_v4 }
 0x2b3   :  { %3824 = vmatprep.subr.bf16.mxu1 %v10079_v11  ;;  %v8339_v11 = vld [vmem:[%s9797_s2 + $0x38] ss:$24 sps:$4 sm:$0xff]  }
 0x2b4   :  { %3688 = vmatmul.mubr.bf16.vlgmr.msra.gmra.mrb[36].mxu0 %v8138_v18  ;;  %10144 = vst [vmem:[#allocation13_spill] sm:$0xff] %v8339_v11  ;;  %v8345_v18 = vld [vmem:[%s9797_s2 + $0x6c] ss:$24 sps:$4 sm:$0xff]  }
 0x2b5   :  { %3784 = vmatpush1.bf16.msra.mxu0 %v8327_v37  ;;  %10145 = vst [vmem:[#allocation14_spill] sm:$0xff] %v8345_v18 }
 0x2b6   :  { %3785 = vmatprep.subr.bf16.mxu0 %v8333_v40 }
 0x2b9   :  { %3786 = vmatpush1.bf16.msra.mxu0 %v8339_v11 }
 0x2ba   :  { %3787 = vmatprep.subr.bf16.mxu0 %v8345_v18 }
 0x2bd   :  { %3788 = vmatpush1.bf16.msra.mxu0 %v8351_v9 }
 0x2be   :  { %3789 = vmatprep.subr.bf16.mxu0 %v8357_v25 }
 0x2c1   :  { %3790 = vmatpush1.bf16.msra.mxu0 %v8363_v26 }
 0x2c2   :  { %3791 = vmatprep.subr.bf16.mxu0 %v8369_v6 }
 0x2c5   :  { %3792 = vmatpush1.bf16.msra.mxu0 %v8375_v34 }
 0x2c6   :  { %3793 = vmatprep.subr.bf16.mxu0 %v8381_v33 }
 0x2c9   :  { %3794 = vmatpush1.bf16.msra.mxu0 %v8387_v1 }
 0x2ca   :  { %3795 = vmatprep.subr.bf16.mxu0 %v8393_v22 }
 0x2cd   :  { %3796 = vmatpush1.bf16.msra.mxu0 %v8399_v51  ;;  %v3568_v51 = vunpack.c.h.bf16 %v7992_v39 }
 0x2ce   :  { %3797 = vmatprep.subr.bf16.mxu0 %v8405_v58  ;;  %v3566_v58 = vunpack.c.h.bf16 %v7990_v28 }
 0x2d1   :  { %3798 = vmatpush1.bf16.msra.mxu0 %v8411_v27 }
 0x2d2   :  { %3799 = vmatprep.subr.bf16.mxu0 %v8417_v48 }
 0x2d5   :  { %3800 = vmatpush1.bf16.msra.mxu0 %v8423_v55  ;;  %v8447_v55 = vld [vmem:[%s9797_s2 + $0x1e8] ss:$24 sps:$4 sm:$0xff]  }
 0x2d6   :  { %3801 = vmatprep.subr.bf16.mxu0 %v8429_v45  ;;  %10162 = vst [vmem:[#allocation30_spill] sm:$0xff] %v8447_v55  ;;  %v8453_v45 = vld [vmem:[%s9797_s2 + $0x21c] ss:$24 sps:$4 sm:$0xff]  }
 0x2d7   :  { %10163 = vst [vmem:[#allocation31_spill] sm:$0xff] %v8453_v45 }
 0x2d9   :  { %3802 = vmatpush1.bf16.msra.mxu0 %v8435_v60  ;;  %v8459_v60 = vld [vmem:[%s9797_s2 + $0x218] ss:$24 sps:$4 sm:$0xff]  }
 0x2da   :  { %3803 = vmatprep.subr.bf16.mxu0 %v8441_v56  ;;  %10164 = vst [vmem:[#allocation32_spill] sm:$0xff] %v8459_v60  ;;  %v8465_v56 = vld [vmem:[%s9797_s2 + $0x24c] ss:$24 sps:$4 sm:$0xff]  }
 0x2db   :  { %10165 = vst [vmem:[#allocation33_spill] sm:$0xff] %v8465_v56 }
 0x2dd   :  { %3804 = vmatpush1.bf16.msra.mxu0 %v8447_v55  ;;  %v8471_v55 = vld [vmem:[%s9797_s2 + $0x248] ss:$24 sps:$4 sm:$0xff]  }
 0x2de   :  { %3805 = vmatprep.subr.bf16.mxu0 %v8453_v45  ;;  %10166 = vst [vmem:[#allocation34_spill] sm:$0xff] %v8471_v55  ;;  %v8477_v45 = vld [vmem:[%s9797_s2 + $0x27c] ss:$24 sps:$4 sm:$0xff]  }
 0x2df   :  { %10167 = vst [vmem:[#allocation35_spill] sm:$0xff] %v8477_v45 }
 0x2e1   :  { %3806 = vmatpush1.bf16.msra.mxu0 %v8459_v60  ;;  %v8483_v60 = vld [vmem:[%s9797_s2 + $0x278] ss:$24 sps:$4 sm:$0xff]  }
 0x2e2   :  { %3807 = vmatprep.subr.bf16.mxu0 %v8465_v56  ;;  %10168 = vst [vmem:[#allocation62_spill] sm:$0xff] %v8483_v60  ;;  %v8489_v56 = vld [vmem:[%s9797_s2 + $0x2ac] ss:$24 sps:$4 sm:$0xff]  }
 0x2e3   :  { %10169 = vst [vmem:[#allocation63_spill] sm:$0xff] %v8489_v56 }
 0x2e5   :  { %3808 = vmatpush1.bf16.msra.mxu0 %v8471_v55  ;;  %v8495_v55 = vld [vmem:[%s9797_s2 + $0x2a8] ss:$24 sps:$4 sm:$0xff]  }
 0x2e6   :  { %3809 = vmatprep.subr.bf16.mxu0 %v8477_v45  ;;  %10170 = vst [vmem:[#allocation64_spill] sm:$0xff] %v8495_v55  ;;  %v8501_v45 = vld [vmem:[%s9797_s2 + $0x2dc] ss:$24 sps:$4 sm:$0xff]  }
 0x2e7   :  { %10171 = vst [vmem:[#allocation65_spill] sm:$0xff] %v8501_v45 }
 0x2e9   :  { %3810 = vmatpush1.bf16.msra.mxu0 %v8483_v60  ;;  %v8507_v60 = vld [vmem:[%s9797_s2 + $0x2d8] ss:$24 sps:$4 sm:$0xff]  }
 0x2ea   :  { %3811 = vmatprep.subr.bf16.mxu0 %v8489_v56  ;;  %10172 = vst [vmem:[#allocation66_spill] sm:$0xff] %v8507_v60  ;;  %v3565_v56 = vunpack.c.l.bf16 %v7990_v28 }
 0x2ed   :  { %3812 = vmatpush1.bf16.msra.mxu0 %v8495_v55  ;;  %v3567_v55 = vunpack.c.l.bf16 %v7992_v39 }
 0x2ee   :  { %3813 = vmatprep.subr.bf16.mxu0 %v8501_v45 }
 0x2f1   :  { %3814 = vmatpush1.bf16.msra.mxu0 %v8507_v60 }
 0x2f2   :  { %3911 = vmatprep.subr.bf16.mxu0 %v7855_v14 }
 0x347   :  { %v3607_v48 = vpop.f32.mrb[32].mxu0  ;;  %v3648_v27 = vpop.f32.mrb[28].mxu1 }
 0x348   :  { %v3696_v45 = vadd.f32 %v3607_v48, %v3565_v56  ;;  %v3698_v22 = vadd.f32 %v3648_v27, %v3567_v55  ;;  %v3609_v1 = vpop.f32.mrb[33].mxu0  ;;  %v3650_v33 = vpop.f32.mrb[29].mxu1 }
 0x349   :  { %v3697_v34 = vadd.f32 %v3609_v1, %v3566_v58  ;;  %v3699_v6 = vadd.f32 %v3650_v33, %v3568_v51  ;;  %v3611_v26 = vpop.f32.mrb[34].mxu0  ;;  %v3652_v60 = vpop.f32.mrb[30].mxu1  ;;  %v3569_v33 = vunpack.c.l.bf16 %v8111_v23 }
 0x34a   :  { %v3612_v25 = vpop.f32.mrb[35].mxu0  ;;  %v3653_v14 = vpop.f32.mrb[31].mxu1  ;;  %v3700_v9 = vmul.f32 0.5, %v3696_v45  ;;  %v3702_v28 = vmul.f32 0.5, %v3698_v22  ;;  %v3570_v45 = vunpack.c.h.bf16 %v8111_v23 }
 0x34b   :  { %v3701_v18 = vmul.f32 0.5, %v3697_v34  ;;  %v3703_v39 = vmul.f32 0.5, %v3699_v6 }
 0x34c   :  { %5980 = vtanh.f32 %v3700_v9 }
 0x34d   :  { %5982 = vtanh.f32 %v3701_v18 }
 0x34e   :  { %5984 = vtanh.f32 %v3702_v28 }
 0x34f   :  { %5986 = vtanh.f32 %v3703_v39 }
 0x356   :  { %v5981_v11 = vpop.eup %5980 }
 0x357   :  { %v5983_v40 = vpop.eup %5982  ;;  %v3708_v37 = vadd.f32 1.0, %v5981_v11 }
 0x358   :  { %v3709_v4 = vadd.f32 1.0, %v5983_v40  ;;  %v5985_v22 = vpop.eup %5984 }
 0x359   :  { %v3712_v55 = vmul.f32 0.5, %v3708_v37  ;;  %v5987_v34 = vpop.eup %5986  ;;  %v3710_v25 = vadd.f32 1.0, %v5985_v22  ;;  %v8682_v22 = vld [vmem:[%s9797_s2 + $0x224] ss:$24 sps:$4 sm:$0xff]  }
 0x35a   :  { %v3713_v60 = vmul.f32 0.5, %v3709_v4  ;;  %v3711_v37 = vadd.f32 1.0, %v5987_v34  ;;  %10176 = vst [vmem:[#allocation70_spill] sm:$0xff] %v8682_v22  ;;  %v8690_v34 = vld [vmem:[%s9797_s2 + $0x220] ss:$24 sps:$4 sm:$0xff]  }
 0x35b   :  { %v3714_v18 = vmul.f32 0.5, %v3710_v25  ;;  %10177 = vst [vmem:[#allocation71_spill] sm:$0xff] %v8690_v34  ;;  %v8696_v25 = vld [vmem:[%s9797_s2 + $0x254] ss:$24 sps:$4 sm:$0xff]  }
 0x35c   :  { %v3715_v28 = vmul.f32 0.5, %v3711_v37  ;;  %10178 = vst [vmem:[#allocation72_spill] sm:$0xff] %v8696_v25  ;;  %v8704_v37 = vld [vmem:[%s9797_s2 + $0x250] ss:$24 sps:$4 sm:$0xff]  }
 0x35d   :  { %10179 = vst [vmem:[#allocation73_spill] sm:$0xff] %v8704_v37 }
 0x387   :  { %v3689_v56 = vpop.f32.mrb[36].mxu0 }
 0x388   :  { %v3716_v48 = vadd.f32 %v3689_v56, %v8096_v35  ;;  %v3691_v58 = vpop.f32.mrb[37].mxu0 }
 0x389   :  { %v3717_v51 = vadd.f32 %v3691_v58, %v8103_v38  ;;  %v3693_v1 = vpop.f32.mrb[38].mxu0 }
 0x38a   :  { %v3718_v26 = vmul.f32 %v3716_v48, %v3712_v55  ;;  %v3694_v9 = vpop.f32.mrb[39].mxu0  ;;  %v8556_v1 = vld [vmem:[%s9797_s2 + $0x74] ss:$24 sps:$4 sm:$0xff]  }
 0x38b   :  { %v3719_v27 = vmul.f32 %v3717_v51, %v3713_v60  ;;  %v8550_v51 = vld [vmem:[%s9797_s2 + $0x40] ss:$24 sps:$4 sm:$0xff]   ;;  %v8648_v9 = vld [vmem:[%s9797_s2 + $0x190] ss:$24 sps:$4 sm:$0xff]  }
 0x38c   :  { %v3720_v40 = vadd.f32 %v3718_v26, %v3569_v33  ;;  %v8626_v33 = vld [vmem:[%s9797_s2 + $0x164] ss:$24 sps:$4 sm:$0xff]   ;;  %v8640_v26 = vld [vmem:[%s9797_s2 + $0x194] ss:$24 sps:$4 sm:$0xff]  }
 0x38d   :  { %v3721_v6 = vadd.f32 %v3719_v27, %v3570_v45  ;;  %v8654_v45 = vld [vmem:[%s9797_s2 + $0x1c4] ss:$24 sps:$4 sm:$0xff]   ;;  %v8662_v27 = vld [vmem:[%s9797_s2 + $0x1c0] ss:$24 sps:$4 sm:$0xff]  }
 0x38e   :  { %5988 = vtanh.f32 %v3720_v40  ;;  %10173 = vst [vmem:[#allocation67_spill] sm:$0xff] %v8662_v27  ;;  %v8668_v40 = vld [vmem:[%s9797_s2 + $0x1f4] ss:$24 sps:$4 sm:$0xff]  }
 0x38f   :  { %5990 = vtanh.f32 %v3721_v6  ;;  %10174 = vst [vmem:[#allocation68_spill] sm:$0xff] %v8668_v40  ;;  %v8676_v6 = vld [vmem:[%s9797_s2 + $0x1f0] ss:$24 sps:$4 sm:$0xff]  }
 0x390   :  { %10175 = vst [vmem:[#allocation69_spill] sm:$0xff] %v8676_v6 }
 0x398   :  { %v5989_v11 = vpop.eup %5988 }
 0x399   :  { %v5991_v4 = vpop.eup %5990  ;;  %v3724_v14 = vsub.f32 %v8130_v17, %v5989_v11  ;;  %v8536_v17 = vld [vmem:[%s9797_s2 + $0x10] ss:$24 sps:$4 sm:$0xff]  }
 0x39a   :  { %v3725_v39 = vsub.f32 %v8133_v62, %v5991_v4  ;;  %v8542_v62 = vld [vmem:[%s9797_s2 + $0x44] ss:$24 sps:$4 sm:$0xff]  }
 0x39b   :  { %v3726_v56 = vmul.f32 %v3724_v14, %v3714_v18  ;;  %v10182_v18 = vld [vmem:[#allocation12_spill] sm:$0xff]  ;;  %v10186_v14 = vld [vmem:[#allocation13_spill] sm:$0xff] }
 0x39c   :  { %v3727_v55 = vmul.f32 %v3725_v39, %v3715_v28  ;;  %v10188_v28 = vld [vmem:[#allocation44_spill] sm:$0xff]  ;;  %v10189_v39 = vld [vmem:[#allocation15_spill] sm:$0xff] }
 0x39d   :  { %v8521_v23 = vadd.f32 %v5989_v11, %v3726_v56  ;;  %v8710_v11 = vld [vmem:[%s9797_s2 + $0x284] ss:$24 sps:$4 sm:$0xff]  }
 0x39e   :  { %v8523_v48 = vadd.f32 %v5991_v4, %v3727_v55  ;;  %10180 = vst [vmem:[#allocation74_spill] sm:$0xff] %v8710_v11  ;;  %v8718_v4 = vld [vmem:[%s9797_s2 + $0x280] ss:$24 sps:$4 sm:$0xff]   ;;  %v10191_v55 = vld [vmem:[#allocation17_spill] sm:$0xff] }
 0x39f   :  { %v8529_v60 = vpack.c.bf16 %v8521_v23, %v8521_v23  ;;  %10181 = vst [vmem:[#allocation75_spill] sm:$0xff] %v8718_v4  ;;  %v10190_v56 = vld [vmem:[#allocation16_spill] sm:$0xff] }
 0x3a0   :  { %v3741_v58 = vpack.c.bf16 %v8523_v48, %v8523_v48 }
 0x3a2   :  { %3774 = vmatprep.mubr.bf16.mxu1 %v3741_v58  ;;  %3815 = vmatprep.mubr.bf16.mxu0 %v3741_v58 }
 0x3a3   :  { %3775 = vmatmul.mubr.bf16.vlgmr.msra.gmra.mrb[32].mxu1 %v8529_v60  ;;  %3816 = vmatmul.mubr.bf16.vlgmr.msra.gmra.mrb[40].mxu0 %v8529_v60 }
 0x3a4   :  { %3825 = vmatpush1.bf16.msra.mxu1 %v8536_v17  ;;  %3856 = vmatprep.mubr.bf16.mxu1 %v3741_v58  ;;  %v10192_v58 = vld [vmem:[#allocation18_spill] sm:$0xff] }
 0x3a5   :  { %3826 = vmatprep.subr.bf16.mxu1 %v8542_v62  ;;  %3912 = vmatpush1.bf16.msra.mxu0 %v10090_v59  ;;  %v8564_v59 = vld [vmem:[%s9797_s2 + $0x70] ss:$24 sps:$4 sm:$0xff]  }
 0x3a6   :  { %3913 = vmatprep.subr.bf16.mxu0 %v10091_v36  ;;  %v8570_v36 = vld [vmem:[%s9797_s2 + $0xa4] ss:$24 sps:$4 sm:$0xff]  }
 0x3a8   :  { %3827 = vmatpush1.bf16.msra.mxu1 %v8550_v51 }
 0x3a9   :  { %3828 = vmatprep.subr.bf16.mxu1 %v8556_v1  ;;  %3914 = vmatpush1.bf16.msra.mxu0 %v10094_v41  ;;  %v8578_v41 = vld [vmem:[%s9797_s2 + $0xa0] ss:$24 sps:$4 sm:$0xff]  }
 0x3aa   :  { %3915 = vmatprep.subr.bf16.mxu0 %v10095_v61  ;;  %v8584_v61 = vld [vmem:[%s9797_s2 + $0xd4] ss:$24 sps:$4 sm:$0xff]  }
 0x3ac   :  { %3829 = vmatpush1.bf16.msra.mxu1 %v8564_v59 }
 0x3ad   :  { %3830 = vmatprep.subr.bf16.mxu1 %v8570_v36  ;;  %3916 = vmatpush1.bf16.msra.mxu0 %v10098_v52  ;;  %v8592_v52 = vld [vmem:[%s9797_s2 + $0xd0] ss:$24 sps:$4 sm:$0xff]  }
 0x3ae   :  { %3917 = vmatprep.subr.bf16.mxu0 %v10099_v53  ;;  %v8598_v53 = vld [vmem:[%s9797_s2 + $0x104] ss:$24 sps:$4 sm:$0xff]  }
 0x3b0   :  { %3831 = vmatpush1.bf16.msra.mxu1 %v8578_v41 }
 0x3b1   :  { %3832 = vmatprep.subr.bf16.mxu1 %v8584_v61  ;;  %3918 = vmatpush1.bf16.msra.mxu0 %v10102_v20  ;;  %v8606_v20 = vld [vmem:[%s9797_s2 + $0x100] ss:$24 sps:$4 sm:$0xff]  }
 0x3b2   :  { %3919 = vmatprep.subr.bf16.mxu0 %v10103_v31  ;;  %v8612_v31 = vld [vmem:[%s9797_s2 + $0x134] ss:$24 sps:$4 sm:$0xff]  }
 0x3b4   :  { %3833 = vmatpush1.bf16.msra.mxu1 %v8592_v52 }
 0x3b5   :  { %3834 = vmatprep.subr.bf16.mxu1 %v8598_v53  ;;  %3920 = vmatpush1.bf16.msra.mxu0 %v10106_v2  ;;  %v8620_v2 = vld [vmem:[%s9797_s2 + $0x130] ss:$24 sps:$4 sm:$0xff]  }
 0x3b6   :  { %3921 = vmatprep.subr.bf16.mxu0 %v8171_v5 }
 0x3b8   :  { %3835 = vmatpush1.bf16.msra.mxu1 %v8606_v20 }
 0x3b9   :  { %3836 = vmatprep.subr.bf16.mxu1 %v8612_v31  ;;  %3922 = vmatpush1.bf16.msra.mxu0 %v7975_v43  ;;  %v8634_v43 = vld [vmem:[%s9797_s2 + $0x160] ss:$24 sps:$4 sm:$0xff]  }
 0x3ba   :  { %3923 = vmatprep.subr.bf16.mxu0 %v8180_v8 }
 0x3bc   :  { %3837 = vmatpush1.bf16.msra.mxu1 %v8620_v2 }
 0x3bd   :  { %3838 = vmatprep.subr.bf16.mxu1 %v8626_v33  ;;  %3924 = vmatpush1.bf16.msra.mxu0 %v8188_v29 }
 0x3be   :  { %3925 = vmatprep.subr.bf16.mxu0 %v8194_v49 }
 0x3c0   :  { %3839 = vmatpush1.bf16.msra.mxu1 %v8634_v43 }
 0x3c1   :  { %3840 = vmatprep.subr.bf16.mxu1 %v8640_v26  ;;  %3926 = vmatpush1.bf16.msra.mxu0 %v8202_v19 }
 0x3c2   :  { %3927 = vmatprep.subr.bf16.mxu0 %v8208_v21 }
 0x3c4   :  { %3841 = vmatpush1.bf16.msra.mxu1 %v8648_v9 }
 0x3c5   :  { %3842 = vmatprep.subr.bf16.mxu1 %v8654_v45  ;;  %3928 = vmatpush1.bf16.msra.mxu0 %v8216_v24 }
 0x3c6   :  { %3929 = vmatprep.subr.bf16.mxu0 %v8222_v30 }
 0x3c8   :  { %3843 = vmatpush1.bf16.msra.mxu1 %v8662_v27 }
 0x3c9   :  { %3844 = vmatprep.subr.bf16.mxu1 %v8668_v40  ;;  %3930 = vmatpush1.bf16.msra.mxu0 %v8230_v12 }
 0x3ca   :  { %3931 = vmatprep.subr.bf16.mxu0 %v8236_v50 }
 0x3cc   :  { %3845 = vmatpush1.bf16.msra.mxu1 %v8676_v6 }
 0x3cd   :  { %3846 = vmatprep.subr.bf16.mxu1 %v8682_v22  ;;  %3932 = vmatpush1.bf16.msra.mxu0 %v8244_v3 }
 0x3ce   :  { %3933 = vmatprep.subr.bf16.mxu0 %v8250_v16 }
 0x3d0   :  { %3847 = vmatpush1.bf16.msra.mxu1 %v8690_v34 }
 0x3d1   :  { %3848 = vmatprep.subr.bf16.mxu1 %v8696_v25  ;;  %3934 = vmatpush1.bf16.msra.mxu0 %v8258_v7 }
 0x3d2   :  { %3935 = vmatprep.subr.bf16.mxu0 %v8264_v47 }
 0x3d4   :  { %3849 = vmatpush1.bf16.msra.mxu1 %v8704_v37 }
 0x3d5   :  { %3850 = vmatprep.subr.bf16.mxu1 %v8710_v11  ;;  %3936 = vmatpush1.bf16.msra.mxu0 %v8272_v13 }
 0x3d6   :  { %3937 = vmatprep.subr.bf16.mxu0 %v8278_v15 }
 0x3d8   :  { %3851 = vmatpush1.bf16.msra.mxu1 %v8718_v4 }
 0x3d9   :  { %3852 = vmatprep.subr.bf16.mxu1 %v10132_v10  ;;  %3938 = vmatpush1.bf16.msra.mxu0 %v8286_v32  ;;  %v8734_v10 = vld [vmem:[%s9797_s2 + $0x14] ss:$24 sps:$4 sm:$0xff]  }
 0x3da   :  { %3939 = vmatprep.subr.bf16.mxu0 %v8292_v46  ;;  %10183 = vst [vmem:[#allocation76_spill] sm:$0xff] %v8734_v10 }
 0x3dc   :  { %3853 = vmatpush1.bf16.msra.mxu1 %v10135_v63  ;;  %v10184_v63 = vld [vmem:[#allocation42_spill] sm:$0xff] }
 0x3dd   :  { %3854 = vmatprep.subr.bf16.mxu1 %v10136_v44  ;;  %3940 = vmatpush1.bf16.msra.mxu0 %v8300_v42  ;;  %v10185_v44 = vld [vmem:[#allocation43_spill] sm:$0xff] }
 0x3de   :  { %3941 = vmatprep.subr.bf16.mxu0 %v8306_v57 }
 0x3e0   :  { %3855 = vmatpush1.bf16.msra.mxu1 %v10139_v54  ;;  %v10187_v54 = vld [vmem:[#allocation14_spill] sm:$0xff] }
 0x3e1   :  { %3952 = vmatprep.subr.bf16.mxu1 %v8313_v0  ;;  %3942 = vmatpush1.bf16.msra.mxu0 %v10182_v18 }
 0x3e2   :  { %3993 = vmatprep.subr.bf16.mxu0 %v8734_v10  ;;  %v10193_v10 = vld [vmem:[#allocation19_spill] sm:$0xff] }
 0x3e3   :  { %3857 = vmatmul.mubr.bf16.vlgmr.msra.gmra.mrb[36].mxu1 %v8529_v60  ;;  %v10194_v60 = vld [vmem:[#allocation20_spill] sm:$0xff] }
 0x3e4   :  { %3953 = vmatpush1.bf16.msra.mxu1 %v10184_v63  ;;  %v10195_v63 = vld [vmem:[#allocation21_spill] sm:$0xff] }
 0x3e5   :  { %3954 = vmatprep.subr.bf16.mxu1 %v10185_v44  ;;  %v10196_v44 = vld [vmem:[#allocation22_spill] sm:$0xff] }
 0x3e8   :  { %3955 = vmatpush1.bf16.msra.mxu1 %v10186_v14  ;;  %v10197_v14 = vld [vmem:[#allocation23_spill] sm:$0xff] }
 0x3e9   :  { %3956 = vmatprep.subr.bf16.mxu1 %v10187_v54  ;;  %v10198_v54 = vld [vmem:[#allocation24_spill] sm:$0xff] }
 0x3ec   :  { %3957 = vmatpush1.bf16.msra.mxu1 %v10188_v28  ;;  %v10199_v28 = vld [vmem:[#allocation25_spill] sm:$0xff] }
 0x3ed   :  { %3958 = vmatprep.subr.bf16.mxu1 %v10189_v39  ;;  %v10200_v39 = vld [vmem:[#allocation26_spill] sm:$0xff] }
 0x3f0   :  { %3959 = vmatpush1.bf16.msra.mxu1 %v10190_v56  ;;  %v10201_v56 = vld [vmem:[#allocation27_spill] sm:$0xff] }
 0x3f1   :  { %3960 = vmatprep.subr.bf16.mxu1 %v10191_v55  ;;  %v10202_v55 = vld [vmem:[#allocation28_spill] sm:$0xff] }
 0x3f4   :  { %3961 = vmatpush1.bf16.msra.mxu1 %v10192_v58  ;;  %v10203_v58 = vld [vmem:[#allocation29_spill] sm:$0xff] }
 0x3f5   :  { %3962 = vmatprep.subr.bf16.mxu1 %v10193_v10  ;;  %v10204_v10 = vld [vmem:[#allocation30_spill] sm:$0xff] }
 0x3f8   :  { %3963 = vmatpush1.bf16.msra.mxu1 %v10194_v60  ;;  %v10205_v60 = vld [vmem:[#allocation31_spill] sm:$0xff] }
 0x3f9   :  { %3964 = vmatprep.subr.bf16.mxu1 %v10195_v63  ;;  %v10206_v63 = vld [vmem:[#allocation32_spill] sm:$0xff] }
 0x3fc   :  { %3965 = vmatpush1.bf16.msra.mxu1 %v10196_v44  ;;  %v10207_v44 = vld [vmem:[#allocation33_spill] sm:$0xff] }
 0x3fd   :  { %3966 = vmatprep.subr.bf16.mxu1 %v10197_v14  ;;  %v10208_v14 = vld [vmem:[#allocation34_spill] sm:$0xff] }
 0x400   :  { %3967 = vmatpush1.bf16.msra.mxu1 %v10198_v54  ;;  %v10209_v54 = vld [vmem:[#allocation35_spill] sm:$0xff] }
 0x401   :  { %3968 = vmatprep.subr.bf16.mxu1 %v10199_v28  ;;  %v10210_v28 = vld [vmem:[#allocation62_spill] sm:$0xff] }
 0x404   :  { %3969 = vmatpush1.bf16.msra.mxu1 %v10200_v39  ;;  %v10211_v39 = vld [vmem:[#allocation63_spill] sm:$0xff] }
 0x405   :  { %3970 = vmatprep.subr.bf16.mxu1 %v10201_v56  ;;  %v10212_v56 = vld [vmem:[#allocation64_spill] sm:$0xff] }
 0x408   :  { %3971 = vmatpush1.bf16.msra.mxu1 %v10202_v55  ;;  %v10213_v55 = vld [vmem:[#allocation65_spill] sm:$0xff] }
 0x409   :  { %3972 = vmatprep.subr.bf16.mxu1 %v10203_v58  ;;  %v10214_v58 = vld [vmem:[#allocation66_spill] sm:$0xff] }
 0x40c   :  { %3973 = vmatpush1.bf16.msra.mxu1 %v10204_v10 }
 0x40d   :  { %3974 = vmatprep.subr.bf16.mxu1 %v10205_v60 }
 0x410   :  { %3975 = vmatpush1.bf16.msra.mxu1 %v10206_v63  ;;  %v8772_v63 = vld [vmem:[%s9797_s2 + $0x4] ss:$24 sps:$4 sm:$0xff]  }
 0x411   :  { %3976 = vmatprep.subr.bf16.mxu1 %v10207_v44  ;;  %10215 = vst [vmem:[#allocation77_spill] sm:$0xff] %v8772_v63 }
 0x414   :  { %3977 = vmatpush1.bf16.msra.mxu1 %v10208_v14  ;;  %v10216_v14 = vld [vmem:[#allocation45_spill] sm:$0xff] }
 0x415   :  { %3978 = vmatprep.subr.bf16.mxu1 %v10209_v54  ;;  %v3734_v44 = vunpack.c.l.bf16 %v10216_v14  ;;  %v10217_v54 = vld [vmem:[#allocation46_spill] sm:$0xff] }
 0x416   :  { %v3736_v60 = vunpack.c.l.bf16 %v10217_v54 }
 0x418   :  { %3979 = vmatpush1.bf16.msra.mxu1 %v10210_v28 }
 0x419   :  { %3980 = vmatprep.subr.bf16.mxu1 %v10211_v39  ;;  %v3735_v39 = vunpack.c.h.bf16 %v10216_v14 }
 0x41c   :  { %3981 = vmatpush1.bf16.msra.mxu1 %v10212_v56  ;;  %v3737_v56 = vunpack.c.h.bf16 %v10217_v54 }
 0x41d   :  { %3982 = vmatprep.subr.bf16.mxu1 %v10213_v55 }
 0x420   :  { %3983 = vmatpush1.bf16.msra.mxu1 %v10214_v58 }
 0x421   :  { %4080 = vmatprep.subr.bf16.mxu1 %v8772_v63 }
 0x476   :  { %v3776_v28 = vpop.f32.mrb[32].mxu1  ;;  %v3817_v10 = vpop.f32.mrb[40].mxu0 }
 0x477   :  { %v3865_v55 = vadd.f32 %v3776_v28, %v3734_v44  ;;  %v3867_v18 = vadd.f32 %v3817_v10, %v3736_v60  ;;  %v3778_v58 = vpop.f32.mrb[33].mxu1  ;;  %v3819_v0 = vpop.f32.mrb[41].mxu0 }
 0x478   :  { %v3866_v57 = vadd.f32 %v3778_v58, %v3735_v39  ;;  %v3868_v42 = vadd.f32 %v3819_v0, %v3737_v56  ;;  %v3780_v46 = vpop.f32.mrb[34].mxu1  ;;  %v3821_v32 = vpop.f32.mrb[42].mxu0 }
 0x479   :  { %v3781_v4 = vpop.f32.mrb[35].mxu1  ;;  %v3822_v63 = vpop.f32.mrb[43].mxu0  ;;  %v3869_v15 = vmul.f32 0.5, %v3865_v55  ;;  %v3871_v14 = vmul.f32 0.5, %v3867_v18 }
 0x47a   :  { %v3870_v13 = vmul.f32 0.5, %v3866_v57  ;;  %v3872_v54 = vmul.f32 0.5, %v3868_v42  ;;  %v10218_v57 = vld [vmem:[#allocation4_spill] sm:$0xff] }
 0x47b   :  { %5992 = vtanh.f32 %v3869_v15  ;;  %v3738_v15 = vunpack.c.l.bf16 %v10218_v57 }
 0x47c   :  { %5994 = vtanh.f32 %v3870_v13 }
 0x47d   :  { %5996 = vtanh.f32 %v3871_v14 }
 0x47e   :  { %5998 = vtanh.f32 %v3872_v54 }
 0x485   :  { %v5993_v11 = vpop.eup %5992 }
 0x486   :  { %v5995_v37 = vpop.eup %5994  ;;  %v3877_v47 = vadd.f32 1.0, %v5993_v11  ;;  %v3739_v11 = vunpack.c.h.bf16 %v10218_v57  ;;  %v8816_v57 = vld [vmem:[%s9797_s2 + $0x30] ss:$24 sps:$4 sm:$0xff]  }
 0x487   :  { %v3878_v7 = vadd.f32 1.0, %v5995_v37 }
 0x488   :  { %v3881_v10 = vmul.f32 0.5, %v3877_v47  ;;  %v5997_v47 = vpop.eup %5996 }
 0x489   :  { %v3882_v32 = vmul.f32 0.5, %v3878_v7  ;;  %v5999_v39 = vpop.eup %5998  ;;  %v3879_v56 = vadd.f32 1.0, %v5997_v47  ;;  %v10219_v47 = vld [vmem:[#allocation7_spill] sm:$0xff] }
 0x48a   :  { %v3880_v55 = vadd.f32 1.0, %v5999_v39  ;;  %v10220_v39 = vld [vmem:[#allocation8_spill] sm:$0xff] }
 0x48b   :  { %v3883_v60 = vmul.f32 0.5, %v3879_v56  ;;  %v10221_v56 = vld [vmem:[#allocation73_spill] sm:$0xff] }
 0x48c   :  { %v3884_v54 = vmul.f32 0.5, %v3880_v55  ;;  %v10222_v55 = vld [vmem:[#allocation74_spill] sm:$0xff] }
 0x4b6   :  { %v3858_v44 = vpop.f32.mrb[36].mxu1 }
 0x4b7   :  { %v3885_v28 = vadd.f32 %v3858_v44, %v8096_v35  ;;  %v3860_v0 = vpop.f32.mrb[37].mxu1 }
 0x4b8   :  { %v3886_v46 = vadd.f32 %v3860_v0, %v8103_v38  ;;  %v3862_v4 = vpop.f32.mrb[38].mxu1 }
 0x4b9   :  { %v3887_v13 = vmul.f32 %v3885_v28, %v3881_v10  ;;  %v3863_v63 = vpop.f32.mrb[39].mxu1 }
 0x4ba   :  { %v3888_v18 = vmul.f32 %v3886_v46, %v3882_v32  ;;  %v8836_v63 = vld [vmem:[%s9797_s2 + $0x94] ss:$24 sps:$4 sm:$0xff]  }
 0x4bb   :  { %v3889_v37 = vadd.f32 %v3887_v13, %v3738_v15  ;;  %v8822_v15 = vld [vmem:[%s9797_s2 + $0x64] ss:$24 sps:$4 sm:$0xff]   ;;  %v8830_v13 = vld [vmem:[%s9797_s2 + $0x60] ss:$24 sps:$4 sm:$0xff]  }
 0x4bc   :  { %v3890_v42 = vadd.f32 %v3888_v18, %v3739_v11  ;;  %v8844_v11 = vld [vmem:[%s9797_s2 + $0x90] ss:$24 sps:$4 sm:$0xff]   ;;  %v8850_v18 = vld [vmem:[%s9797_s2 + $0xc4] ss:$24 sps:$4 sm:$0xff]  }
 0x4bd   :  { %6000 = vtanh.f32 %v3889_v37  ;;  %v8858_v37 = vld [vmem:[%s9797_s2 + $0xc0] ss:$24 sps:$4 sm:$0xff]  }
 0x4be   :  { %6002 = vtanh.f32 %v3890_v42  ;;  %v8867_v42 = vld [vmem:[%s9797_s2 + $0xf0] ss:$24 sps:$4 sm:$0xff]  }
 0x4c7   :  { %v6001_v58 = vpop.eup %6000 }
 0x4c8   :  { %v6003_v7 = vpop.eup %6002  ;;  %v3893_v14 = vsub.f32 %v8521_v23, %v6001_v58  ;;  %v8802_v23 = vld [vmem:[%s9797_s2] ss:$24 sps:$4 sm:$0xff]  }
 0x4c9   :  { %v3894_v44 = vsub.f32 %v8523_v48, %v6003_v7  ;;  %v8808_v48 = vld [vmem:[%s9797_s2 + $0x34] ss:$24 sps:$4 sm:$0xff]  }
 0x4ca   :  { %v3895_v10 = vmul.f32 %v3893_v14, %v3883_v60  ;;  %v10225_v60 = vld [vmem:[#allocation75_spill] sm:$0xff]  ;;  %v8903_v14 = vld [vmem:[%s9797_s2 + $0x2b4] ss:$24 sps:$4 sm:$0xff]  }
 0x4cb   :  { %v3896_v28 = vmul.f32 %v3894_v44, %v3884_v54  ;;  %10226 = vst [vmem:[#allocation45_spill] sm:$0xff] %v8903_v14  ;;  %v10227_v54 = vld [vmem:[#allocation9_spill] sm:$0xff]  ;;  %v10228_v44 = vld [vmem:[#allocation10_spill] sm:$0xff] }
 0x4cc   :  { %v8785_v0 = vadd.f32 %v6001_v58, %v3895_v10  ;;  %v10223_v58 = vld [vmem:[#allocation38_spill] sm:$0xff] }
 0x4cd   :  { %v8787_v32 = vadd.f32 %v6003_v7, %v3896_v28  ;;  %v10224_v7 = vld [vmem:[#allocation39_spill] sm:$0xff]  ;;  %v8911_v10 = vld [vmem:[%s9797_s2 + $0x2b0] ss:$24 sps:$4 sm:$0xff]  }
 0x4ce   :  { %v8793_v4 = vpack.c.bf16 %v8785_v0, %v8785_v0  ;;  %10229 = vst [vmem:[#allocation46_spill] sm:$0xff] %v8911_v10  ;;  %v8917_v28 = vld [vmem:[%s9797_s2 + $0x2e4] ss:$24 sps:$4 sm:$0xff]  }
 0x4cf   :  { %v3910_v46 = vpack.c.bf16 %v8787_v32, %v8787_v32  ;;  %10230 = vst [vmem:[#allocation4_spill] sm:$0xff] %v8917_v28 }
 0x4d1   :  { %3943 = vmatprep.mubr.bf16.mxu0 %v3910_v46  ;;  %3984 = vmatprep.mubr.bf16.mxu1 %v3910_v46 }
 0x4d2   :  { %3944 = vmatmul.mubr.bf16.vlgmr.msra.gmra.mrb[44].mxu0 %v8793_v4  ;;  %3985 = vmatmul.mubr.bf16.vlgmr.msra.gmra.mrb[40].mxu1 %v8793_v4 }
 0x4d3   :  { %3994 = vmatpush1.bf16.msra.mxu0 %v8536_v17  ;;  %4025 = vmatprep.mubr.bf16.mxu0 %v3910_v46  ;;  %v10231_v46 = vld [vmem:[#allocation40_spill] sm:$0xff] }
 0x4d4   :  { %3995 = vmatprep.subr.bf16.mxu0 %v8542_v62  ;;  %4081 = vmatpush1.bf16.msra.mxu1 %v8802_v23 }
 0x4d5   :  { %4082 = vmatprep.subr.bf16.mxu1 %v8808_v48 }
 0x4d7   :  { %3996 = vmatpush1.bf16.msra.mxu0 %v8550_v51 }
 0x4d8   :  { %3997 = vmatprep.subr.bf16.mxu0 %v8556_v1  ;;  %4083 = vmatpush1.bf16.msra.mxu1 %v8816_v57 }
 0x4d9   :  { %4084 = vmatprep.subr.bf16.mxu1 %v8822_v15 }
 0x4db   :  { %3998 = vmatpush1.bf16.msra.mxu0 %v8564_v59 }
 0x4dc   :  { %3999 = vmatprep.subr.bf16.mxu0 %v8570_v36  ;;  %4085 = vmatpush1.bf16.msra.mxu1 %v8830_v13 }
 0x4dd   :  { %4086 = vmatprep.subr.bf16.mxu1 %v8836_v63 }
 0x4df   :  { %4000 = vmatpush1.bf16.msra.mxu0 %v8578_v41 }
 0x4e0   :  { %4001 = vmatprep.subr.bf16.mxu0 %v8584_v61  ;;  %4087 = vmatpush1.bf16.msra.mxu1 %v8844_v11 }
 0x4e1   :  { %4088 = vmatprep.subr.bf16.mxu1 %v8850_v18 }
 0x4e3   :  { %4002 = vmatpush1.bf16.msra.mxu0 %v8592_v52 }
 0x4e4   :  { %4003 = vmatprep.subr.bf16.mxu0 %v8598_v53  ;;  %4089 = vmatpush1.bf16.msra.mxu1 %v8858_v37 }
 0x4e5   :  { %4090 = vmatprep.subr.bf16.mxu1 %v8171_v5 }
 0x4e7   :  { %4004 = vmatpush1.bf16.msra.mxu0 %v8606_v20 }
 0x4e8   :  { %4005 = vmatprep.subr.bf16.mxu0 %v8612_v31  ;;  %4091 = vmatpush1.bf16.msra.mxu1 %v8867_v42 }
 0x4e9   :  { %4092 = vmatprep.subr.bf16.mxu1 %v8180_v8 }
 0x4eb   :  { %4006 = vmatpush1.bf16.msra.mxu0 %v8620_v2 }
 0x4ec   :  { %4007 = vmatprep.subr.bf16.mxu0 %v8626_v33  ;;  %4093 = vmatpush1.bf16.msra.mxu1 %v8188_v29 }
 0x4ed   :  { %4094 = vmatprep.subr.bf16.mxu1 %v8194_v49 }
 0x4ef   :  { %4008 = vmatpush1.bf16.msra.mxu0 %v8634_v43 }
 0x4f0   :  { %4009 = vmatprep.subr.bf16.mxu0 %v8640_v26  ;;  %4095 = vmatpush1.bf16.msra.mxu1 %v8202_v19 }
 0x4f1   :  { %4096 = vmatprep.subr.bf16.mxu1 %v8208_v21 }
 0x4f3   :  { %4010 = vmatpush1.bf16.msra.mxu0 %v8648_v9 }
 0x4f4   :  { %4011 = vmatprep.subr.bf16.mxu0 %v8654_v45  ;;  %4097 = vmatpush1.bf16.msra.mxu1 %v8216_v24 }
 0x4f5   :  { %4098 = vmatprep.subr.bf16.mxu1 %v8222_v30 }
 0x4f7   :  { %4012 = vmatpush1.bf16.msra.mxu0 %v8662_v27 }
 0x4f8   :  { %4013 = vmatprep.subr.bf16.mxu0 %v8668_v40  ;;  %4099 = vmatpush1.bf16.msra.mxu1 %v8230_v12 }
 0x4f9   :  { %4100 = vmatprep.subr.bf16.mxu1 %v8236_v50 }
 0x4fb   :  { %4014 = vmatpush1.bf16.msra.mxu0 %v8676_v6 }
 0x4fc   :  { %4015 = vmatprep.subr.bf16.mxu0 %v8682_v22  ;;  %4101 = vmatpush1.bf16.msra.mxu1 %v8244_v3 }
 0x4fd   :  { %4102 = vmatprep.subr.bf16.mxu1 %v8250_v16 }
 0x4ff   :  { %4016 = vmatpush1.bf16.msra.mxu0 %v8690_v34 }
 0x500   :  { %4017 = vmatprep.subr.bf16.mxu0 %v8696_v25  ;;  %4103 = vmatpush1.bf16.msra.mxu1 %v10219_v47 }
 0x501   :  { %4104 = vmatprep.subr.bf16.mxu1 %v10220_v39 }
 0x503   :  { %4018 = vmatpush1.bf16.msra.mxu0 %v10221_v56  ;;  %v10270_v56 = vld [vmem:[#allocation48_spill] sm:$0xff] }
 0x504   :  { %4019 = vmatprep.subr.bf16.mxu0 %v10222_v55  ;;  %4105 = vmatpush1.bf16.msra.mxu1 %v10223_v58  ;;  %v10241_v58 = vld [vmem:[#allocation44_spill] sm:$0xff]  ;;  %v10242_v55 = vld [vmem:[#allocation15_spill] sm:$0xff] }
 0x505   :  { %4106 = vmatprep.subr.bf16.mxu1 %v10224_v7  ;;  %v10240_v7 = vld [vmem:[#allocation14_spill] sm:$0xff] }
 0x507   :  { %4020 = vmatpush1.bf16.msra.mxu0 %v10225_v60  ;;  %v10236_v60 = vld [vmem:[#allocation76_spill] sm:$0xff] }
 0x508   :  { %4021 = vmatprep.subr.bf16.mxu0 %v8903_v14  ;;  %4107 = vmatpush1.bf16.msra.mxu1 %v10227_v54  ;;  %v10232_v14 = vld [vmem:[#allocation41_spill] sm:$0xff]  ;;  %v10234_v54 = vld [vmem:[#allocation11_spill] sm:$0xff] }
 0x509   :  { %4108 = vmatprep.subr.bf16.mxu1 %v10228_v44  ;;  %v8925_v44 = vld [vmem:[%s9797_s2 + $0x2e0] ss:$24 sps:$4 sm:$0xff]  }
 0x50a   :  { %10233 = vst [vmem:[#allocation78_spill] sm:$0xff] %v8925_v44 }
 0x50b   :  { %4022 = vmatpush1.bf16.msra.mxu0 %v8911_v10  ;;  %v10235_v10 = vld [vmem:[#allocation12_spill] sm:$0xff] }
 0x50c   :  { %4023 = vmatprep.subr.bf16.mxu0 %v8917_v28  ;;  %4109 = vmatpush1.bf16.msra.mxu1 %v10231_v46  ;;  %v10237_v28 = vld [vmem:[#allocation42_spill] sm:$0xff]  ;;  %v10238_v46 = vld [vmem:[#allocation43_spill] sm:$0xff] }
 0x50d   :  { %4110 = vmatprep.subr.bf16.mxu1 %v10232_v14  ;;  %v10239_v14 = vld [vmem:[#allocation13_spill] sm:$0xff] }
 0x50f   :  { %4024 = vmatpush1.bf16.msra.mxu0 %v8925_v44  ;;  %v10243_v44 = vld [vmem:[#allocation16_spill] sm:$0xff] }
 0x510   :  { %4121 = vmatprep.subr.bf16.mxu0 %v10234_v54  ;;  %4111 = vmatpush1.bf16.msra.mxu1 %v10235_v10  ;;  %v10244_v54 = vld [vmem:[#allocation17_spill] sm:$0xff]  ;;  %v10245_v10 = vld [vmem:[#allocation18_spill] sm:$0xff] }
 0x511   :  { %4162 = vmatprep.subr.bf16.mxu1 %v10236_v60  ;;  %v10246_v60 = vld [vmem:[#allocation19_spill] sm:$0xff] }
 0x512   :  { %4026 = vmatmul.mubr.bf16.vlgmr.msra.gmra.mrb[48].mxu0 %v8793_v4  ;;  %v10247_v4 = vld [vmem:[#allocation20_spill] sm:$0xff] }
 0x513   :  { %4122 = vmatpush1.bf16.msra.mxu0 %v10237_v28  ;;  %v10248_v28 = vld [vmem:[#allocation21_spill] sm:$0xff] }
 0x514   :  { %4123 = vmatprep.subr.bf16.mxu0 %v10238_v46  ;;  %v10249_v46 = vld [vmem:[#allocation22_spill] sm:$0xff] }
 0x517   :  { %4124 = vmatpush1.bf16.msra.mxu0 %v10239_v14  ;;  %v10250_v14 = vld [vmem:[#allocation23_spill] sm:$0xff] }
 0x518   :  { %4125 = vmatprep.subr.bf16.mxu0 %v10240_v7  ;;  %v10251_v7 = vld [vmem:[#allocation24_spill] sm:$0xff] }
 0x51b   :  { %4126 = vmatpush1.bf16.msra.mxu0 %v10241_v58  ;;  %v10252_v58 = vld [vmem:[#allocation25_spill] sm:$0xff] }
 0x51c   :  { %4127 = vmatprep.subr.bf16.mxu0 %v10242_v55  ;;  %v10253_v55 = vld [vmem:[#allocation26_spill] sm:$0xff] }
 0x51f   :  { %4128 = vmatpush1.bf16.msra.mxu0 %v10243_v44  ;;  %v10254_v44 = vld [vmem:[#allocation27_spill] sm:$0xff] }
 0x520   :  { %4129 = vmatprep.subr.bf16.mxu0 %v10244_v54  ;;  %v10255_v54 = vld [vmem:[#allocation28_spill] sm:$0xff] }
 0x523   :  { %4130 = vmatpush1.bf16.msra.mxu0 %v10245_v10  ;;  %v10256_v10 = vld [vmem:[#allocation29_spill] sm:$0xff] }
 0x524   :  { %4131 = vmatprep.subr.bf16.mxu0 %v10246_v60  ;;  %v10257_v60 = vld [vmem:[#allocation30_spill] sm:$0xff] }
 0x527   :  { %4132 = vmatpush1.bf16.msra.mxu0 %v10247_v4  ;;  %v10258_v4 = vld [vmem:[#allocation31_spill] sm:$0xff] }
 0x528   :  { %4133 = vmatprep.subr.bf16.mxu0 %v10248_v28  ;;  %v10259_v28 = vld [vmem:[#allocation32_spill] sm:$0xff] }
 0x52b   :  { %4134 = vmatpush1.bf16.msra.mxu0 %v10249_v46  ;;  %v10260_v46 = vld [vmem:[#allocation33_spill] sm:$0xff] }
 0x52c   :  { %4135 = vmatprep.subr.bf16.mxu0 %v10250_v14  ;;  %v10261_v14 = vld [vmem:[#allocation34_spill] sm:$0xff] }
 0x52f   :  { %4136 = vmatpush1.bf16.msra.mxu0 %v10251_v7  ;;  %v10262_v7 = vld [vmem:[#allocation35_spill] sm:$0xff] }
 0x530   :  { %4137 = vmatprep.subr.bf16.mxu0 %v10252_v58  ;;  %v10263_v58 = vld [vmem:[#allocation62_spill] sm:$0xff] }
 0x533   :  { %4138 = vmatpush1.bf16.msra.mxu0 %v10253_v55  ;;  %v10264_v55 = vld [vmem:[#allocation63_spill] sm:$0xff] }
 0x534   :  { %4139 = vmatprep.subr.bf16.mxu0 %v10254_v44  ;;  %v10265_v44 = vld [vmem:[#allocation64_spill] sm:$0xff] }
 0x537   :  { %4140 = vmatpush1.bf16.msra.mxu0 %v10255_v54  ;;  %v10266_v54 = vld [vmem:[#allocation65_spill] sm:$0xff] }
 0x538   :  { %4141 = vmatprep.subr.bf16.mxu0 %v10256_v10  ;;  %v10267_v10 = vld [vmem:[#allocation66_spill] sm:$0xff] }
 0x53b   :  { %4142 = vmatpush1.bf16.msra.mxu0 %v10257_v60  ;;  %v10268_v60 = vld [vmem:[#allocation77_spill] sm:$0xff] }
 0x53c   :  { %4143 = vmatprep.subr.bf16.mxu0 %v10258_v4  ;;  %v10269_v4 = vld [vmem:[#allocation47_spill] sm:$0xff] }
 0x53f   :  { %4144 = vmatpush1.bf16.msra.mxu0 %v10259_v28  ;;  %v3903_v28 = vunpack.c.l.bf16 %v10269_v4 }
 0x540   :  { %4145 = vmatprep.subr.bf16.mxu0 %v10260_v46  ;;  %v3905_v46 = vunpack.c.l.bf16 %v10270_v56 }
 0x543   :  { %4146 = vmatpush1.bf16.msra.mxu0 %v10261_v14 }
 0x544   :  { %4147 = vmatprep.subr.bf16.mxu0 %v10262_v7  ;;  %v3904_v7 = vunpack.c.h.bf16 %v10269_v4 }
 0x547   :  { %4148 = vmatpush1.bf16.msra.mxu0 %v10263_v58  ;;  %v3906_v58 = vunpack.c.h.bf16 %v10270_v56 }
 0x548   :  { %4149 = vmatprep.subr.bf16.mxu0 %v10264_v55 }
 0x54b   :  { %4150 = vmatpush1.bf16.msra.mxu0 %v10265_v44 }
 0x54c   :  { %4151 = vmatprep.subr.bf16.mxu0 %v10266_v54 }
 0x54f   :  { %4152 = vmatpush1.bf16.msra.mxu0 %v10267_v10 }
 0x550   :  { %4249 = vmatprep.subr.bf16.mxu0 %v10268_v60 }
 0x5a5   :  { %v3945_v39 = vpop.f32.mrb[44].mxu0  ;;  %v3986_v14 = vpop.f32.mrb[40].mxu1 }
 0x5a6   :  { %v4034_v47 = vadd.f32 %v3945_v39, %v3903_v28  ;;  %v4036_v55 = vadd.f32 %v3986_v14, %v3905_v46  ;;  %v3947_v25 = vpop.f32.mrb[45].mxu0  ;;  %v3988_v44 = vpop.f32.mrb[41].mxu1 }
 0x5a7   :  { %v4035_v34 = vadd.f32 %v3947_v25, %v3904_v7  ;;  %v4037_v54 = vadd.f32 %v3988_v44, %v3906_v58  ;;  %v3949_v16 = vpop.f32.mrb[46].mxu0  ;;  %v3990_v10 = vpop.f32.mrb[42].mxu1 }
 0x5a8   :  { %v3950_v3 = vpop.f32.mrb[47].mxu0  ;;  %v3991_v60 = vpop.f32.mrb[43].mxu1  ;;  %v4038_v22 = vmul.f32 0.5, %v4034_v47  ;;  %v4040_v4 = vmul.f32 0.5, %v4036_v55 }
 0x5a9   :  { %v4039_v6 = vmul.f32 0.5, %v4035_v34  ;;  %v4041_v56 = vmul.f32 0.5, %v4037_v54  ;;  %v10271_v34 = vld [vmem:[#allocation57_spill] sm:$0xff] }
 0x5aa   :  { %6004 = vtanh.f32 %v4038_v22  ;;  %v3907_v22 = vunpack.c.l.bf16 %v10271_v34 }
 0x5ab   :  { %6006 = vtanh.f32 %v4039_v6 }
 0x5ac   :  { %6008 = vtanh.f32 %v4040_v4 }
 0x5ad   :  { %6010 = vtanh.f32 %v4041_v56 }
 0x5b4   :  { %v6005_v50 = vpop.eup %6004 }
 0x5b5   :  { %v6007_v12 = vpop.eup %6006  ;;  %v4046_v40 = vadd.f32 1.0, %v6005_v50  ;;  %v3908_v50 = vunpack.c.h.bf16 %v10271_v34  ;;  %v10280_v34 = vld [vmem:[#allocation71_spill] sm:$0xff] }
 0x5b6   :  { %v4047_v27 = vadd.f32 1.0, %v6007_v12 }
 0x5b7   :  { %v4050_v14 = vmul.f32 0.5, %v4046_v40  ;;  %v6009_v40 = vpop.eup %6008 }
 0x5b8   :  { %v4051_v16 = vmul.f32 0.5, %v4047_v27  ;;  %v6011_v54 = vpop.eup %6010  ;;  %v4048_v44 = vadd.f32 1.0, %v6009_v40  ;;  %v10290_v40 = vld [vmem:[#allocation9_spill] sm:$0xff] }
 0x5b9   :  { %v4049_v10 = vadd.f32 1.0, %v6011_v54  ;;  %v10291_v54 = vld [vmem:[#allocation10_spill] sm:$0xff] }
 0x5ba   :  { %v4052_v46 = vmul.f32 0.5, %v4048_v44  ;;  %v10292_v44 = vld [vmem:[#allocation46_spill] sm:$0xff] }
 0x5bb   :  { %v4053_v56 = vmul.f32 0.5, %v4049_v10  ;;  %v10293_v10 = vld [vmem:[#allocation4_spill] sm:$0xff] }
 0x5e5   :  { %v4027_v39 = vpop.f32.mrb[48].mxu0 }
 0x5e6   :  { %v4054_v25 = vadd.f32 %v4027_v39, %v8096_v35  ;;  %v4029_v58 = vpop.f32.mrb[49].mxu0 }
 0x5e7   :  { %v4055_v3 = vadd.f32 %v4029_v58, %v8103_v38  ;;  %v4031_v47 = vpop.f32.mrb[50].mxu0 }
 0x5e8   :  { %v4056_v6 = vmul.f32 %v4054_v25, %v4050_v14  ;;  %v4032_v7 = vpop.f32.mrb[51].mxu0 }
 0x5e9   :  { %v4057_v55 = vmul.f32 %v4055_v3, %v4051_v16  ;;  %v10285_v7 = vld [vmem:[#allocation74_spill] sm:$0xff] }
 0x5ea   :  { %v4058_v12 = vadd.f32 %v4056_v6, %v3907_v22  ;;  %v10283_v22 = vld [vmem:[#allocation8_spill] sm:$0xff]  ;;  %v10284_v6 = vld [vmem:[#allocation73_spill] sm:$0xff] }
 0x5eb   :  { %v4059_v60 = vadd.f32 %v4057_v55, %v3908_v50  ;;  %v10286_v50 = vld [vmem:[#allocation38_spill] sm:$0xff]  ;;  %v10287_v55 = vld [vmem:[#allocation39_spill] sm:$0xff] }
 0x5ec   :  { %6012 = vtanh.f32 %v4058_v12  ;;  %v10288_v12 = vld [vmem:[#allocation75_spill] sm:$0xff] }
 0x5ed   :  { %6014 = vtanh.f32 %v4059_v60  ;;  %v10289_v60 = vld [vmem:[#allocation45_spill] sm:$0xff] }
 0x5f6   :  { %v6013_v28 = vpop.eup %6012 }
 0x5f7   :  { %v6015_v27 = vpop.eup %6014  ;;  %v4062_v4 = vsub.f32 %v8785_v0, %v6013_v28  ;;  %v10276_v0 = vld [vmem:[#allocation69_spill] sm:$0xff] }
 0x5f8   :  { %v4063_v39 = vsub.f32 %v8787_v32, %v6015_v27  ;;  %v10279_v32 = vld [vmem:[#allocation37_spill] sm:$0xff] }
 0x5f9   :  { %v4064_v14 = vmul.f32 %v4062_v4, %v4052_v46  ;;  %v10296_v46 = vld [vmem:[#allocation78_spill] sm:$0xff]  ;;  %v10297_v4 = vld [vmem:[#allocation11_spill] sm:$0xff] }
 0x5fa   :  { %v4065_v25 = vmul.f32 %v4063_v39, %v4053_v56  ;;  %v10298_v56 = vld [vmem:[#allocation12_spill] sm:$0xff] }
 0x5fb   :  { %v8974_v58 = vadd.f32 %v6013_v28, %v4064_v14  ;;  %v10294_v28 = vld [vmem:[#allocation40_spill] sm:$0xff]  ;;  %v10300_v14 = vld [vmem:[#allocation42_spill] sm:$0xff] }
 0x5fc   :  { %v8976_v16 = vadd.f32 %v6015_v27, %v4065_v25  ;;  %v10295_v27 = vld [vmem:[#allocation41_spill] sm:$0xff]  ;;  %v10299_v39 = vld [vmem:[#allocation76_spill] sm:$0xff]  ;;  %v10301_v25 = vld [vmem:[#allocation43_spill] sm:$0xff] }
 0x5fd   :  { %v8982_v47 = vpack.c.bf16 %v8974_v58, %v8974_v58 }
 0x5fe   :  { %v4079_v3 = vpack.c.bf16 %v8976_v16, %v8976_v16 }
 0x600   :  { %4112 = vmatprep.mubr.bf16.mxu1 %v4079_v3  ;;  %4153 = vmatprep.mubr.bf16.mxu0 %v4079_v3 }
 0x601   :  { %4113 = vmatmul.mubr.bf16.vlgmr.msra.gmra.mrb[44].mxu1 %v8982_v47  ;;  %4154 = vmatmul.mubr.bf16.vlgmr.msra.gmra.mrb[52].mxu0 %v8982_v47 }
 0x602   :  { %4163 = vmatpush1.bf16.msra.mxu1 %v8536_v17  ;;  %4194 = vmatprep.mubr.bf16.mxu1 %v4079_v3  ;;  %v10302_v3 = vld [vmem:[#allocation13_spill] sm:$0xff] }
 0x603   :  { %4164 = vmatprep.subr.bf16.mxu1 %v8542_v62  ;;  %4250 = vmatpush1.bf16.msra.mxu0 %v8802_v23 }
 0x604   :  { %4251 = vmatprep.subr.bf16.mxu0 %v8808_v48 }
 0x606   :  { %4165 = vmatpush1.bf16.msra.mxu1 %v8550_v51 }
 0x607   :  { %4166 = vmatprep.subr.bf16.mxu1 %v8556_v1  ;;  %4252 = vmatpush1.bf16.msra.mxu0 %v8816_v57 }
 0x608   :  { %4253 = vmatprep.subr.bf16.mxu0 %v8822_v15 }
 0x60a   :  { %4167 = vmatpush1.bf16.msra.mxu1 %v8564_v59 }
 0x60b   :  { %4168 = vmatprep.subr.bf16.mxu1 %v8570_v36  ;;  %4254 = vmatpush1.bf16.msra.mxu0 %v8830_v13 }
 0x60c   :  { %4255 = vmatprep.subr.bf16.mxu0 %v8836_v63 }
 0x60e   :  { %4169 = vmatpush1.bf16.msra.mxu1 %v8578_v41 }
 0x60f   :  { %4170 = vmatprep.subr.bf16.mxu1 %v8584_v61  ;;  %4256 = vmatpush1.bf16.msra.mxu0 %v8844_v11 }
 0x610   :  { %4257 = vmatprep.subr.bf16.mxu0 %v8850_v18 }
 0x612   :  { %4171 = vmatpush1.bf16.msra.mxu1 %v8592_v52 }
 0x613   :  { %4172 = vmatprep.subr.bf16.mxu1 %v8598_v53  ;;  %4258 = vmatpush1.bf16.msra.mxu0 %v8858_v37 }
 0x614   :  { %4259 = vmatprep.subr.bf16.mxu0 %v8171_v5  ;;  %v10272_v5 = vld [vmem:[#allocation67_spill] sm:$0xff] }
 0x616   :  { %4173 = vmatpush1.bf16.msra.mxu1 %v8606_v20 }
 0x617   :  { %4174 = vmatprep.subr.bf16.mxu1 %v8612_v31  ;;  %4260 = vmatpush1.bf16.msra.mxu0 %v8867_v42 }
 0x618   :  { %4261 = vmatprep.subr.bf16.mxu0 %v8180_v8  ;;  %v10273_v8 = vld [vmem:[#allocation68_spill] sm:$0xff] }
 0x61a   :  { %4175 = vmatpush1.bf16.msra.mxu1 %v8620_v2 }
 0x61b   :  { %4176 = vmatprep.subr.bf16.mxu1 %v8626_v33  ;;  %4262 = vmatpush1.bf16.msra.mxu0 %v8188_v29  ;;  %v10274_v29 = vld [vmem:[#allocation5_spill] sm:$0xff] }
 0x61c   :  { %4263 = vmatprep.subr.bf16.mxu0 %v8194_v49  ;;  %v10275_v49 = vld [vmem:[#allocation6_spill] sm:$0xff] }
 0x61e   :  { %4177 = vmatpush1.bf16.msra.mxu1 %v8634_v43 }
 0x61f   :  { %4178 = vmatprep.subr.bf16.mxu1 %v8640_v26  ;;  %4264 = vmatpush1.bf16.msra.mxu0 %v8202_v19  ;;  %v10277_v19 = vld [vmem:[#allocation70_spill] sm:$0xff] }
 0x620   :  { %4265 = vmatprep.subr.bf16.mxu0 %v8208_v21  ;;  %v10278_v21 = vld [vmem:[#allocation36_spill] sm:$0xff] }
 0x622   :  { %4179 = vmatpush1.bf16.msra.mxu1 %v8648_v9 }
 0x623   :  { %4180 = vmatprep.subr.bf16.mxu1 %v8654_v45  ;;  %4266 = vmatpush1.bf16.msra.mxu0 %v8216_v24  ;;  %v10281_v24 = vld [vmem:[#allocation72_spill] sm:$0xff] }
 0x624   :  { %4267 = vmatprep.subr.bf16.mxu0 %v8222_v30  ;;  %v10282_v30 = vld [vmem:[#allocation7_spill] sm:$0xff] }
 0x626   :  { %4181 = vmatpush1.bf16.msra.mxu1 %v10272_v5 }
 0x627   :  { %4182 = vmatprep.subr.bf16.mxu1 %v10273_v8  ;;  %4268 = vmatpush1.bf16.msra.mxu0 %v10274_v29  ;;  %v10303_v29 = vld [vmem:[#allocation14_spill] sm:$0xff] }
 0x628   :  { %4269 = vmatprep.subr.bf16.mxu0 %v10275_v49  ;;  %v10304_v49 = vld [vmem:[#allocation44_spill] sm:$0xff] }
 0x62a   :  { %4183 = vmatpush1.bf16.msra.mxu1 %v10276_v0 }
 0x62b   :  { %4184 = vmatprep.subr.bf16.mxu1 %v10277_v19  ;;  %4270 = vmatpush1.bf16.msra.mxu0 %v10278_v21  ;;  %v10305_v21 = vld [vmem:[#allocation15_spill] sm:$0xff] }
 0x62c   :  { %4271 = vmatprep.subr.bf16.mxu0 %v10279_v32  ;;  %v10306_v32 = vld [vmem:[#allocation16_spill] sm:$0xff] }
 0x62e   :  { %4185 = vmatpush1.bf16.msra.mxu1 %v10280_v34 }
 0x62f   :  { %4186 = vmatprep.subr.bf16.mxu1 %v10281_v24  ;;  %4272 = vmatpush1.bf16.msra.mxu0 %v10282_v30  ;;  %v10307_v30 = vld [vmem:[#allocation17_spill] sm:$0xff] }
 0x630   :  { %4273 = vmatprep.subr.bf16.mxu0 %v10283_v22  ;;  %v10308_v22 = vld [vmem:[#allocation18_spill] sm:$0xff] }
 0x632   :  { %4187 = vmatpush1.bf16.msra.mxu1 %v10284_v6 }
 0x633   :  { %4188 = vmatprep.subr.bf16.mxu1 %v10285_v7  ;;  %4274 = vmatpush1.bf16.msra.mxu0 %v10286_v50  ;;  %v10309_v50 = vld [vmem:[#allocation19_spill] sm:$0xff] }
 0x634   :  { %4275 = vmatprep.subr.bf16.mxu0 %v10287_v55  ;;  %v10311_v55 = vld [vmem:[#allocation21_spill] sm:$0xff] }
 0x636   :  { %4189 = vmatpush1.bf16.msra.mxu1 %v10288_v12 }
 0x637   :  { %4190 = vmatprep.subr.bf16.mxu1 %v10289_v60  ;;  %4276 = vmatpush1.bf16.msra.mxu0 %v10290_v40  ;;  %v10312_v40 = vld [vmem:[#allocation22_spill] sm:$0xff] }
 0x638   :  { %4277 = vmatprep.subr.bf16.mxu0 %v10291_v54  ;;  %v10313_v54 = vld [vmem:[#allocation23_spill] sm:$0xff] }
 0x63a   :  { %4191 = vmatpush1.bf16.msra.mxu1 %v10292_v44 }
 0x63b   :  { %4192 = vmatprep.subr.bf16.mxu1 %v10293_v10  ;;  %4278 = vmatpush1.bf16.msra.mxu0 %v10294_v28  ;;  %v10314_v28 = vld [vmem:[#allocation24_spill] sm:$0xff] }
 0x63c   :  { %4279 = vmatprep.subr.bf16.mxu0 %v10295_v27  ;;  %v10315_v27 = vld [vmem:[#allocation25_spill] sm:$0xff] }
 0x63e   :  { %4193 = vmatpush1.bf16.msra.mxu1 %v10296_v46 }
 0x63f   :  { %4290 = vmatprep.subr.bf16.mxu1 %v10297_v4  ;;  %4280 = vmatpush1.bf16.msra.mxu0 %v10298_v56  ;;  %v10316_v4 = vld [vmem:[#allocation26_spill] sm:$0xff]  ;;  %v10317_v56 = vld [vmem:[#allocation27_spill] sm:$0xff] }
 0x640   :  { %4331 = vmatprep.subr.bf16.mxu0 %v10299_v39 }
 0x641   :  { %4195 = vmatmul.mubr.bf16.vlgmr.msra.gmra.mrb[48].mxu1 %v8982_v47  ;;  %v10310_v47 = vld [vmem:[#allocation20_spill] sm:$0xff] }
 0x642   :  { %4291 = vmatpush1.bf16.msra.mxu1 %v10300_v14  ;;  %v10318_v14 = vld [vmem:[#allocation28_spill] sm:$0xff] }
 0x643   :  { %4292 = vmatprep.subr.bf16.mxu1 %v10301_v25  ;;  %v10319_v25 = vld [vmem:[#allocation29_spill] sm:$0xff] }
 0x646   :  { %4293 = vmatpush1.bf16.msra.mxu1 %v10302_v3  ;;  %v10320_v3 = vld [vmem:[#allocation30_spill] sm:$0xff] }
 0x647   :  { %4294 = vmatprep.subr.bf16.mxu1 %v10303_v29  ;;  %v10321_v29 = vld [vmem:[#allocation31_spill] sm:$0xff] }
 0x64a   :  { %4295 = vmatpush1.bf16.msra.mxu1 %v10304_v49  ;;  %v10322_v49 = vld [vmem:[#allocation32_spill] sm:$0xff] }
 0x64b   :  { %4296 = vmatprep.subr.bf16.mxu1 %v10305_v21  ;;  %v10323_v21 = vld [vmem:[#allocation33_spill] sm:$0xff] }
 0x64e   :  { %4297 = vmatpush1.bf16.msra.mxu1 %v10306_v32  ;;  %v10324_v32 = vld [vmem:[#allocation34_spill] sm:$0xff] }
 0x64f   :  { %4298 = vmatprep.subr.bf16.mxu1 %v10307_v30  ;;  %v10325_v30 = vld [vmem:[#allocation35_spill] sm:$0xff] }
 0x652   :  { %4299 = vmatpush1.bf16.msra.mxu1 %v10308_v22  ;;  %v10326_v22 = vld [vmem:[#allocation62_spill] sm:$0xff] }
 0x653   :  { %4300 = vmatprep.subr.bf16.mxu1 %v10309_v50  ;;  %v10327_v50 = vld [vmem:[#allocation63_spill] sm:$0xff] }
 0x656   :  { %4301 = vmatpush1.bf16.msra.mxu1 %v10310_v47  ;;  %v10328_v47 = vld [vmem:[#allocation64_spill] sm:$0xff] }
 0x657   :  { %4302 = vmatprep.subr.bf16.mxu1 %v10311_v55  ;;  %v10329_v55 = vld [vmem:[#allocation65_spill] sm:$0xff] }
 0x65a   :  { %4303 = vmatpush1.bf16.msra.mxu1 %v10312_v40  ;;  %v10330_v40 = vld [vmem:[#allocation66_spill] sm:$0xff] }
 0x65b   :  { %4304 = vmatprep.subr.bf16.mxu1 %v10313_v54  ;;  %v10331_v54 = vld [vmem:[#allocation77_spill] sm:$0xff] }
 0x65e   :  { %4305 = vmatpush1.bf16.msra.mxu1 %v10314_v28  ;;  %v10332_v28 = vld [vmem:[#allocation49_spill] sm:$0xff] }
 0x65f   :  { %4306 = vmatprep.subr.bf16.mxu1 %v10315_v27  ;;  %v4072_v27 = vunpack.c.l.bf16 %v10332_v28 }
 0x662   :  { %4307 = vmatpush1.bf16.msra.mxu1 %v10316_v4  ;;  %v10333_v4 = vld [vmem:[#allocation50_spill] sm:$0xff] }
 0x663   :  { %4308 = vmatprep.subr.bf16.mxu1 %v10317_v56  ;;  %v4074_v56 = vunpack.c.l.bf16 %v10333_v4 }
 0x666   :  { %4309 = vmatpush1.bf16.msra.mxu1 %v10318_v14 }
 0x667   :  { %4310 = vmatprep.subr.bf16.mxu1 %v10319_v25 }
 0x66a   :  { %4311 = vmatpush1.bf16.msra.mxu1 %v10320_v3  ;;  %v4073_v3 = vunpack.c.h.bf16 %v10332_v28 }
 0x66b   :  { %4312 = vmatprep.subr.bf16.mxu1 %v10321_v29  ;;  %v4075_v29 = vunpack.c.h.bf16 %v10333_v4 }
 0x66e   :  { %4313 = vmatpush1.bf16.msra.mxu1 %v10322_v49 }
 0x66f   :  { %4314 = vmatprep.subr.bf16.mxu1 %v10323_v21 }
 0x672   :  { %4315 = vmatpush1.bf16.msra.mxu1 %v10324_v32 }
 0x673   :  { %4316 = vmatprep.subr.bf16.mxu1 %v10325_v30 }
 0x676   :  { %4317 = vmatpush1.bf16.msra.mxu1 %v10326_v22 }
 0x677   :  { %4318 = vmatprep.subr.bf16.mxu1 %v10327_v50 }
 0x67a   :  { %4319 = vmatpush1.bf16.msra.mxu1 %v10328_v47 }
 0x67b   :  { %4320 = vmatprep.subr.bf16.mxu1 %v10329_v55 }
 0x67e   :  { %4321 = vmatpush1.bf16.msra.mxu1 %v10330_v40 }
 0x67f   :  { %4418 = vmatprep.subr.bf16.mxu1 %v10331_v54 }
 0x6d4   :  { %v4114_v14 = vpop.f32.mrb[44].mxu1  ;;  %v4155_v25 = vpop.f32.mrb[52].mxu0 }
 0x6d5   :  { %v4203_v49 = vadd.f32 %v4114_v14, %v4072_v27  ;;  %v4205_v21 = vadd.f32 %v4155_v25, %v4074_v56  ;;  %v4116_v32 = vpop.f32.mrb[45].mxu1  ;;  %v4157_v30 = vpop.f32.mrb[53].mxu0 }
 0x6d6   :  { %v4204_v22 = vadd.f32 %v4116_v32, %v4073_v3  ;;  %v4206_v50 = vadd.f32 %v4157_v30, %v4075_v29  ;;  %v4118_v47 = vpop.f32.mrb[46].mxu1  ;;  %v4159_v55 = vpop.f32.mrb[54].mxu0 }
 0x6d7   :  { %v4119_v40 = vpop.f32.mrb[47].mxu1  ;;  %v4160_v54 = vpop.f32.mrb[55].mxu0  ;;  %v4207_v39 = vmul.f32 0.5, %v4203_v49  ;;  %v4209_v28 = vmul.f32 0.5, %v4205_v21  ;;  %v10334_v49 = vld [vmem:[#allocation58_spill] sm:$0xff] }
 0x6d8   :  { %v4208_v46 = vmul.f32 0.5, %v4204_v22  ;;  %v4210_v4 = vmul.f32 0.5, %v4206_v50 }
 0x6d9   :  { %6016 = vtanh.f32 %v4207_v39  ;;  %v4076_v39 = vunpack.c.l.bf16 %v10334_v49 }
 0x6da   :  { %6018 = vtanh.f32 %v4208_v46 }
 0x6db   :  { %6020 = vtanh.f32 %v4209_v28 }
 0x6dc   :  { %6022 = vtanh.f32 %v4210_v4 }
 0x6e3   :  { %v6017_v10 = vpop.eup %6016 }
 0x6e4   :  { %v6019_v44 = vpop.eup %6018  ;;  %v4215_v60 = vadd.f32 1.0, %v6017_v10  ;;  %v4077_v10 = vunpack.c.h.bf16 %v10334_v49  ;;  %v9283_v49 = vld [vmem:[%s9797_s2 + $0x8] ss:$24 sps:$4 sm:$0xff]  }
 0x6e5   :  { %v4216_v12 = vadd.f32 1.0, %v6019_v44  ;;  %10341 = vst [vmem:[#allocation47_spill] sm:$0xff] %v9283_v49 }
 0x6e6   :  { %v4219_v56 = vmul.f32 0.5, %v4215_v60  ;;  %v6021_v60 = vpop.eup %6020 }
 0x6e7   :  { %v4220_v3 = vmul.f32 0.5, %v4216_v12  ;;  %v6023_v22 = vpop.eup %6022  ;;  %v4217_v50 = vadd.f32 1.0, %v6021_v60  ;;  %v9331_v60 = vld [vmem:[%s9797_s2 + $0xc8] ss:$24 sps:$4 sm:$0xff]  }
 0x6e8   :  { %v4218_v47 = vadd.f32 1.0, %v6023_v22  ;;  %10349 = vst [vmem:[#allocation70_spill] sm:$0xff] %v9331_v60  ;;  %v9337_v22 = vld [vmem:[%s9797_s2 + $0xfc] ss:$24 sps:$4 sm:$0xff]  }
 0x6e9   :  { %v4221_v40 = vmul.f32 0.5, %v4217_v50  ;;  %10350 = vst [vmem:[#allocation36_spill] sm:$0xff] %v9337_v22  ;;  %v9343_v50 = vld [vmem:[%s9797_s2 + $0xf8] ss:$24 sps:$4 sm:$0xff]  }
 0x6ea   :  { %v4222_v4 = vmul.f32 0.5, %v4218_v47  ;;  %10351 = vst [vmem:[#allocation37_spill] sm:$0xff] %v9343_v50  ;;  %v9349_v47 = vld [vmem:[%s9797_s2 + $0x12c] ss:$24 sps:$4 sm:$0xff]  }
 0x6eb   :  { %10352 = vst [vmem:[#allocation71_spill] sm:$0xff] %v9349_v47 }
 0x714   :  { %v4196_v27 = vpop.f32.mrb[48].mxu1 }
 0x715   :  { %v4223_v14 = vadd.f32 %v4196_v27, %v8096_v35  ;;  %v4198_v25 = vpop.f32.mrb[49].mxu1 }
 0x716   :  { %v4224_v54 = vadd.f32 %v4198_v25, %v8103_v38  ;;  %v4200_v29 = vpop.f32.mrb[50].mxu1 }
 0x717   :  { %v4225_v46 = vmul.f32 %v4223_v14, %v4219_v56  ;;  %v4201_v32 = vpop.f32.mrb[51].mxu1 }
 0x718   :  { %v4226_v21 = vmul.f32 %v4224_v54, %v4220_v3  ;;  %v9301_v32 = vld [vmem:[%s9797_s2 + $0x6c] ss:$24 sps:$4 sm:$0xff]  }
 0x719   :  { %v4227_v44 = vadd.f32 %v4225_v46, %v4076_v39  ;;  %v9289_v39 = vld [vmem:[%s9797_s2 + $0x3c] ss:$24 sps:$4 sm:$0xff]   ;;  %v9295_v46 = vld [vmem:[%s9797_s2 + $0x38] ss:$24 sps:$4 sm:$0xff]   ;;  %10344 = vst [vmem:[#allocation67_spill] sm:$0xff] %v9301_v32 }
 0x71a   :  { %v4228_v30 = vadd.f32 %v4226_v21, %v4077_v10  ;;  %10342 = vst [vmem:[#allocation48_spill] sm:$0xff] %v9289_v39  ;;  %10343 = vst [vmem:[#allocation57_spill] sm:$0xff] %v9295_v46  ;;  %v9307_v10 = vld [vmem:[%s9797_s2 + $0x68] ss:$24 sps:$4 sm:$0xff]   ;;  %v9313_v21 = vld [vmem:[%s9797_s2 + $0x9c] ss:$24 sps:$4 sm:$0xff]  }
 0x71b   :  { %6024 = vtanh.f32 %v4227_v44  ;;  %10345 = vst [vmem:[#allocation68_spill] sm:$0xff] %v9307_v10  ;;  %10346 = vst [vmem:[#allocation5_spill] sm:$0xff] %v9313_v21  ;;  %v9319_v44 = vld [vmem:[%s9797_s2 + $0x98] ss:$24 sps:$4 sm:$0xff]  }
 0x71c   :  { %6026 = vtanh.f32 %v4228_v30  ;;  %10347 = vst [vmem:[#allocation6_spill] sm:$0xff] %v9319_v44  ;;  %v9325_v30 = vld [vmem:[%s9797_s2 + $0xcc] ss:$24 sps:$4 sm:$0xff]  }
 0x71d   :  { %10348 = vst [vmem:[#allocation69_spill] sm:$0xff] %v9325_v30 }
 0x725   :  { %v6025_v55 = vpop.eup %6024 }
 0x726   :  { %v6027_v12 = vpop.eup %6026  ;;  %v4231_v28 = vsub.f32 %v8974_v58, %v6025_v55  ;;  %v9242_v58 = vld [vmem:[%s9797_s2 + $0x270] ss:$24 sps:$4 sm:$0xff]  }
 0x727   :  { %v4232_v27 = vsub.f32 %v8976_v16, %v6027_v12  ;;  %v9248_v16 = vld [vmem:[%s9797_s2 + $0x2a4] ss:$24 sps:$4 sm:$0xff]  }
 0x728   :  { %v4233_v56 = vmul.f32 %v4231_v28, %v4221_v40  ;;  %v9367_v40 = vld [vmem:[%s9797_s2 + $0x158] ss:$24 sps:$4 sm:$0xff]   ;;  %v9373_v28 = vld [vmem:[%s9797_s2 + $0x18c] ss:$24 sps:$4 sm:$0xff]  }
 0x729   :  { %v4234_v14 = vmul.f32 %v4232_v27, %v4222_v4  ;;  %10355 = vst [vmem:[#allocation8_spill] sm:$0xff] %v9367_v40  ;;  %10356 = vst [vmem:[#allocation73_spill] sm:$0xff] %v9373_v28  ;;  %v9379_v4 = vld [vmem:[%s9797_s2 + $0x188] ss:$24 sps:$4 sm:$0xff]   ;;  %v9385_v27 = vld [vmem:[%s9797_s2 + $0x1bc] ss:$24 sps:$4 sm:$0xff]  }
 0x72a   :  { %v9093_v25 = vadd.f32 %v6025_v55, %v4233_v56  ;;  %v9355_v55 = vld [vmem:[%s9797_s2 + $0x128] ss:$24 sps:$4 sm:$0xff]   ;;  %10357 = vst [vmem:[#allocation74_spill] sm:$0xff] %v9379_v4  ;;  %10358 = vst [vmem:[#allocation38_spill] sm:$0xff] %v9385_v27  ;;  %v9391_v56 = vld [vmem:[%s9797_s2 + $0x1b8] ss:$24 sps:$4 sm:$0xff]  }
 0x72b   :  { %v9095_v3 = vadd.f32 %v6027_v12, %v4234_v14  ;;  %10353 = vst [vmem:[#allocation72_spill] sm:$0xff] %v9355_v55  ;;  %v9361_v12 = vld [vmem:[%s9797_s2 + $0x15c] ss:$24 sps:$4 sm:$0xff]   ;;  %10359 = vst [vmem:[#allocation39_spill] sm:$0xff] %v9391_v56  ;;  %v9397_v14 = vld [vmem:[%s9797_s2 + $0x1ec] ss:$24 sps:$4 sm:$0xff]  }
 0x72c   :  { %v9101_v29 = vpack.c.bf16 %v9093_v25, %v9093_v25  ;;  %10354 = vst [vmem:[#allocation7_spill] sm:$0xff] %v9361_v12  ;;  %10360 = vst [vmem:[#allocation9_spill] sm:$0xff] %v9397_v14 }
 0x72d   :  { %v4248_v54 = vpack.c.bf16 %v9095_v3, %v9095_v3 }
 0x72f   :  { %4281 = vmatprep.mubr.bf16.mxu0 %v4248_v54  ;;  %4322 = vmatprep.mubr.bf16.mxu1 %v4248_v54 }
 0x730   :  { %4282 = vmatmul.mubr.bf16.vlgmr.msra.gmra.mrb[56].mxu0 %v9101_v29  ;;  %4323 = vmatmul.mubr.bf16.vlgmr.msra.gmra.mrb[52].mxu1 %v9101_v29 }
 0x731   :  { %4332 = vmatpush1.bf16.msra.mxu0 %v8536_v17  ;;  %4363 = vmatprep.mubr.bf16.mxu0 %v4248_v54  ;;  %v9127_v17 = vld [vmem:[%s9797_s2 + $0xf4] ss:$24 sps:$4 sm:$0xff]   ;;  %v9403_v54 = vld [vmem:[%s9797_s2 + $0x1e8] ss:$24 sps:$4 sm:$0xff]  }
 0x732   :  { %4333 = vmatprep.subr.bf16.mxu0 %v8542_v62  ;;  %4419 = vmatpush1.bf16.msra.mxu1 %v8802_v23  ;;  %v9136_v62 = vld [vmem:[%s9797_s2 + $0x124] ss:$24 sps:$4 sm:$0xff]   ;;  %10361 = vst [vmem:[#allocation10_spill] sm:$0xff] %v9403_v54 }
 0x733   :  { %4420 = vmatprep.subr.bf16.mxu1 %v8808_v48 }
 0x735   :  { %4334 = vmatpush1.bf16.msra.mxu0 %v8550_v51  ;;  %v9144_v51 = vld [vmem:[%s9797_s2 + $0x120] ss:$24 sps:$4 sm:$0xff]  }
 0x736   :  { %4335 = vmatprep.subr.bf16.mxu0 %v8556_v1  ;;  %4421 = vmatpush1.bf16.msra.mxu1 %v8816_v57  ;;  %v9150_v1 = vld [vmem:[%s9797_s2 + $0x154] ss:$24 sps:$4 sm:$0xff]  }
 0x737   :  { %4422 = vmatprep.subr.bf16.mxu1 %v8822_v15 }
 0x739   :  { %4336 = vmatpush1.bf16.msra.mxu0 %v8564_v59  ;;  %v9158_v59 = vld [vmem:[%s9797_s2 + $0x150] ss:$24 sps:$4 sm:$0xff]  }
 0x73a   :  { %4337 = vmatprep.subr.bf16.mxu0 %v8570_v36  ;;  %4423 = vmatpush1.bf16.msra.mxu1 %v8830_v13  ;;  %v9164_v36 = vld [vmem:[%s9797_s2 + $0x184] ss:$24 sps:$4 sm:$0xff]  }
 0x73b   :  { %4424 = vmatprep.subr.bf16.mxu1 %v8836_v63 }
 0x73d   :  { %4338 = vmatpush1.bf16.msra.mxu0 %v8578_v41  ;;  %v9172_v41 = vld [vmem:[%s9797_s2 + $0x180] ss:$24 sps:$4 sm:$0xff]  }
 0x73e   :  { %4339 = vmatprep.subr.bf16.mxu0 %v8584_v61  ;;  %4425 = vmatpush1.bf16.msra.mxu1 %v8844_v11  ;;  %v9178_v61 = vld [vmem:[%s9797_s2 + $0x1b4] ss:$24 sps:$4 sm:$0xff]  }
 0x73f   :  { %4426 = vmatprep.subr.bf16.mxu1 %v8850_v18 }
 0x741   :  { %4340 = vmatpush1.bf16.msra.mxu0 %v8592_v52  ;;  %v9186_v52 = vld [vmem:[%s9797_s2 + $0x1b0] ss:$24 sps:$4 sm:$0xff]  }
 0x742   :  { %4341 = vmatprep.subr.bf16.mxu0 %v8598_v53  ;;  %4427 = vmatpush1.bf16.msra.mxu1 %v8858_v37  ;;  %v9192_v53 = vld [vmem:[%s9797_s2 + $0x1e4] ss:$24 sps:$4 sm:$0xff]  }
 0x743   :  { %4428 = vmatprep.subr.bf16.mxu1 %v9127_v17 }
 0x745   :  { %4342 = vmatpush1.bf16.msra.mxu0 %v8606_v20  ;;  %v9200_v20 = vld [vmem:[%s9797_s2 + $0x1e0] ss:$24 sps:$4 sm:$0xff]  }
 0x746   :  { %4343 = vmatprep.subr.bf16.mxu0 %v8612_v31  ;;  %4429 = vmatpush1.bf16.msra.mxu1 %v8867_v42  ;;  %v9206_v31 = vld [vmem:[%s9797_s2 + $0x214] ss:$24 sps:$4 sm:$0xff]  }
 0x747   :  { %4430 = vmatprep.subr.bf16.mxu1 %v9136_v62 }
 0x749   :  { %4344 = vmatpush1.bf16.msra.mxu0 %v8620_v2  ;;  %v9214_v2 = vld [vmem:[%s9797_s2 + $0x210] ss:$24 sps:$4 sm:$0xff]  }
 0x74a   :  { %4345 = vmatprep.subr.bf16.mxu0 %v8626_v33  ;;  %4431 = vmatpush1.bf16.msra.mxu1 %v9144_v51  ;;  %v9220_v33 = vld [vmem:[%s9797_s2 + $0x244] ss:$24 sps:$4 sm:$0xff]  }
 0x74b   :  { %4432 = vmatprep.subr.bf16.mxu1 %v9150_v1 }
 0x74d   :  { %4346 = vmatpush1.bf16.msra.mxu0 %v8634_v43  ;;  %v9228_v43 = vld [vmem:[%s9797_s2 + $0x240] ss:$24 sps:$4 sm:$0xff]  }
 0x74e   :  { %4347 = vmatprep.subr.bf16.mxu0 %v8640_v26  ;;  %4433 = vmatpush1.bf16.msra.mxu1 %v9158_v59  ;;  %v9234_v26 = vld [vmem:[%s9797_s2 + $0x274] ss:$24 sps:$4 sm:$0xff]  }
 0x74f   :  { %4434 = vmatprep.subr.bf16.mxu1 %v9164_v36 }
 0x751   :  { %4348 = vmatpush1.bf16.msra.mxu0 %v8648_v9  ;;  %v10335_v9 = vld [vmem:[#allocation75_spill] sm:$0xff] }
 0x752   :  { %4349 = vmatprep.subr.bf16.mxu0 %v8654_v45  ;;  %4435 = vmatpush1.bf16.msra.mxu1 %v9172_v41  ;;  %v10336_v45 = vld [vmem:[#allocation45_spill] sm:$0xff] }
 0x753   :  { %4436 = vmatprep.subr.bf16.mxu1 %v9178_v61 }
 0x755   :  { %4350 = vmatpush1.bf16.msra.mxu0 %v10272_v5  ;;  %v10337_v5 = vld [vmem:[#allocation46_spill] sm:$0xff] }
 0x756   :  { %4351 = vmatprep.subr.bf16.mxu0 %v10273_v8  ;;  %4437 = vmatpush1.bf16.msra.mxu1 %v9186_v52  ;;  %v10338_v8 = vld [vmem:[#allocation4_spill] sm:$0xff] }
 0x757   :  { %4438 = vmatprep.subr.bf16.mxu1 %v9192_v53 }
 0x759   :  { %4352 = vmatpush1.bf16.msra.mxu0 %v10276_v0  ;;  %v9256_v0 = vld [vmem:[%s9797_s2 + $0x2a0] ss:$24 sps:$4 sm:$0xff]  }
 0x75a   :  { %4353 = vmatprep.subr.bf16.mxu0 %v10277_v19  ;;  %4439 = vmatpush1.bf16.msra.mxu1 %v9200_v20  ;;  %v9262_v19 = vld [vmem:[%s9797_s2 + $0x2d4] ss:$24 sps:$4 sm:$0xff]  }
 0x75b   :  { %4440 = vmatprep.subr.bf16.mxu1 %v9206_v31 }
 0x75d   :  { %4354 = vmatpush1.bf16.msra.mxu0 %v10280_v34  ;;  %v10339_v34 = vld [vmem:[#allocation78_spill] sm:$0xff] }
 0x75e   :  { %4355 = vmatprep.subr.bf16.mxu0 %v10281_v24  ;;  %4441 = vmatpush1.bf16.msra.mxu1 %v9214_v2  ;;  %v9269_v24 = vld [vmem:[%s9797_s2 + $0xc] ss:$24 sps:$4 sm:$0xff]  }
 0x75f   :  { %4442 = vmatprep.subr.bf16.mxu1 %v9220_v33 }
 0x761   :  { %4356 = vmatpush1.bf16.msra.mxu0 %v10284_v6  ;;  %v9275_v6 = vld [vmem:[%s9797_s2 + $0x2d0] ss:$24 sps:$4 sm:$0xff]  }
 0x762   :  { %4357 = vmatprep.subr.bf16.mxu0 %v10285_v7  ;;  %4443 = vmatpush1.bf16.msra.mxu1 %v9228_v43  ;;  %v10340_v7 = vld [vmem:[#allocation76_spill] sm:$0xff] }
 0x763   :  { %4444 = vmatprep.subr.bf16.mxu1 %v9234_v26 }
 0x765   :  { %4358 = vmatpush1.bf16.msra.mxu0 %v10335_v9  ;;  %v9415_v9 = vld [vmem:[%s9797_s2 + $0x218] ss:$24 sps:$4 sm:$0xff]  }
 0x766   :  { %4359 = vmatprep.subr.bf16.mxu0 %v10336_v45  ;;  %4445 = vmatpush1.bf16.msra.mxu1 %v9242_v58  ;;  %10363 = vst [vmem:[#allocation41_spill] sm:$0xff] %v9415_v9 }
 0x767   :  { %4446 = vmatprep.subr.bf16.mxu1 %v9248_v16 }
 0x769   :  { %4360 = vmatpush1.bf16.msra.mxu0 %v10337_v5 }
 0x76a   :  { %4361 = vmatprep.subr.bf16.mxu0 %v10338_v8  ;;  %4447 = vmatpush1.bf16.msra.mxu1 %v9256_v0 }
 0x76b   :  { %4448 = vmatprep.subr.bf16.mxu1 %v9262_v19 }
 0x76d   :  { %4362 = vmatpush1.bf16.msra.mxu0 %v10339_v34 }
 0x76e   :  { %4459 = vmatprep.subr.bf16.mxu0 %v9269_v24  ;;  %4449 = vmatpush1.bf16.msra.mxu1 %v9275_v6 }
 0x76f   :  { %4500 = vmatprep.subr.bf16.mxu1 %v10340_v7  ;;  %v9421_v7 = vld [vmem:[%s9797_s2 + $0x24c] ss:$24 sps:$4 sm:$0xff]  }
 0x770   :  { %4364 = vmatmul.mubr.bf16.vlgmr.msra.gmra.mrb[60].mxu0 %v9101_v29  ;;  %v9409_v29 = vld [vmem:[%s9797_s2 + $0x21c] ss:$24 sps:$4 sm:$0xff]   ;;  %10364 = vst [vmem:[#allocation11_spill] sm:$0xff] %v9421_v7 }
 0x771   :  { %4460 = vmatpush1.bf16.msra.mxu0 %v9283_v49  ;;  %10362 = vst [vmem:[#allocation40_spill] sm:$0xff] %v9409_v29 }
 0x772   :  { %4461 = vmatprep.subr.bf16.mxu0 %v9289_v39 }
 0x775   :  { %4462 = vmatpush1.bf16.msra.mxu0 %v9295_v46 }
 0x776   :  { %4463 = vmatprep.subr.bf16.mxu0 %v9301_v32 }
 0x779   :  { %4464 = vmatpush1.bf16.msra.mxu0 %v9307_v10 }
 0x77a   :  { %4465 = vmatprep.subr.bf16.mxu0 %v9313_v21 }
 0x77d   :  { %4466 = vmatpush1.bf16.msra.mxu0 %v9319_v44 }
 0x77e   :  { %4467 = vmatprep.subr.bf16.mxu0 %v9325_v30 }
 0x781   :  { %4468 = vmatpush1.bf16.msra.mxu0 %v9331_v60 }
 0x782   :  { %4469 = vmatprep.subr.bf16.mxu0 %v9337_v22 }
 0x785   :  { %4470 = vmatpush1.bf16.msra.mxu0 %v9343_v50 }
 0x786   :  { %4471 = vmatprep.subr.bf16.mxu0 %v9349_v47 }
 0x789   :  { %4472 = vmatpush1.bf16.msra.mxu0 %v9355_v55 }
 0x78a   :  { %4473 = vmatprep.subr.bf16.mxu0 %v9361_v12 }
 0x78d   :  { %4474 = vmatpush1.bf16.msra.mxu0 %v9367_v40 }
 0x78e   :  { %4475 = vmatprep.subr.bf16.mxu0 %v9373_v28 }
 0x791   :  { %4476 = vmatpush1.bf16.msra.mxu0 %v9379_v4 }
 0x792   :  { %4477 = vmatprep.subr.bf16.mxu0 %v9385_v27  ;;  %v10374_v27 = vld [vmem:[#allocation52_spill] sm:$0xff] }
 0x793   :  { %v4244_v12 = vunpack.c.h.bf16 %v10374_v27 }
 0x795   :  { %4478 = vmatpush1.bf16.msra.mxu0 %v9391_v56 }
 0x796   :  { %4479 = vmatprep.subr.bf16.mxu0 %v9397_v14  ;;  %v10373_v14 = vld [vmem:[#allocation51_spill] sm:$0xff] }
 0x797   :  { %v4241_v56 = vunpack.c.l.bf16 %v10373_v14  ;;  %v4242_v40 = vunpack.c.h.bf16 %v10373_v14 }
 0x799   :  { %4480 = vmatpush1.bf16.msra.mxu0 %v9403_v54  ;;  %v9427_v54 = vld [vmem:[%s9797_s2 + $0x248] ss:$24 sps:$4 sm:$0xff]  }
 0x79a   :  { %4481 = vmatprep.subr.bf16.mxu0 %v9409_v29  ;;  %10365 = vst [vmem:[#allocation12_spill] sm:$0xff] %v9427_v54  ;;  %v9433_v29 = vld [vmem:[%s9797_s2 + $0x27c] ss:$24 sps:$4 sm:$0xff]  }
 0x79b   :  { %10366 = vst [vmem:[#allocation42_spill] sm:$0xff] %v9433_v29 }
 0x79d   :  { %4482 = vmatpush1.bf16.msra.mxu0 %v9415_v9  ;;  %v9439_v9 = vld [vmem:[%s9797_s2 + $0x278] ss:$24 sps:$4 sm:$0xff]  }
 0x79e   :  { %4483 = vmatprep.subr.bf16.mxu0 %v9421_v7  ;;  %10367 = vst [vmem:[#allocation43_spill] sm:$0xff] %v9439_v9  ;;  %v9445_v7 = vld [vmem:[%s9797_s2 + $0x2ac] ss:$24 sps:$4 sm:$0xff]  }
 0x79f   :  { %10368 = vst [vmem:[#allocation13_spill] sm:$0xff] %v9445_v7 }
 0x7a1   :  { %4484 = vmatpush1.bf16.msra.mxu0 %v9427_v54  ;;  %v9451_v54 = vld [vmem:[%s9797_s2 + $0x2a8] ss:$24 sps:$4 sm:$0xff]  }
 0x7a2   :  { %4485 = vmatprep.subr.bf16.mxu0 %v9433_v29  ;;  %10369 = vst [vmem:[#allocation14_spill] sm:$0xff] %v9451_v54  ;;  %v9457_v29 = vld [vmem:[%s9797_s2 + $0x2dc] ss:$24 sps:$4 sm:$0xff]  }
 0x7a3   :  { %10370 = vst [vmem:[#allocation44_spill] sm:$0xff] %v9457_v29 }
 0x7a5   :  { %4486 = vmatpush1.bf16.msra.mxu0 %v9439_v9  ;;  %v9463_v9 = vld [vmem:[%s9797_s2 + $0x2d8] ss:$24 sps:$4 sm:$0xff]  }
 0x7a6   :  { %4487 = vmatprep.subr.bf16.mxu0 %v9445_v7  ;;  %10371 = vst [vmem:[#allocation15_spill] sm:$0xff] %v9463_v9  ;;  %v10372_v7 = vld [vmem:[#allocation77_spill] sm:$0xff] }
 0x7a9   :  { %4488 = vmatpush1.bf16.msra.mxu0 %v9451_v54  ;;  %v4243_v54 = vunpack.c.l.bf16 %v10374_v27 }
 0x7aa   :  { %4489 = vmatprep.subr.bf16.mxu0 %v9457_v29 }
 0x7ad   :  { %4490 = vmatpush1.bf16.msra.mxu0 %v9463_v9 }
 0x7ae   :  { %4587 = vmatprep.subr.bf16.mxu0 %v10372_v7 }
 0x803   :  { %v4283_v4 = vpop.f32.mrb[56].mxu0  ;;  %v4324_v28 = vpop.f32.mrb[52].mxu1 }
 0x804   :  { %v4372_v29 = vadd.f32 %v4283_v4, %v4241_v56  ;;  %v4374_v55 = vadd.f32 %v4324_v28, %v4243_v54  ;;  %v4285_v47 = vpop.f32.mrb[57].mxu0  ;;  %v4326_v50 = vpop.f32.mrb[53].mxu1 }
 0x805   :  { %v4373_v22 = vadd.f32 %v4285_v47, %v4242_v40  ;;  %v4375_v60 = vadd.f32 %v4326_v50, %v4244_v12  ;;  %v4287_v30 = vpop.f32.mrb[58].mxu0  ;;  %v4328_v9 = vpop.f32.mrb[54].mxu1 }
 0x806   :  { %v4288_v44 = vpop.f32.mrb[59].mxu0  ;;  %v4329_v7 = vpop.f32.mrb[55].mxu1  ;;  %v4376_v21 = vmul.f32 0.5, %v4372_v29  ;;  %v4378_v14 = vmul.f32 0.5, %v4374_v55 }
 0x807   :  { %v4377_v10 = vmul.f32 0.5, %v4373_v22  ;;  %v4379_v27 = vmul.f32 0.5, %v4375_v60  ;;  %v10375_v22 = vld [vmem:[#allocation59_spill] sm:$0xff] }
 0x808   :  { %6028 = vtanh.f32 %v4376_v21  ;;  %v4245_v21 = vunpack.c.l.bf16 %v10375_v22 }
 0x809   :  { %6030 = vtanh.f32 %v4377_v10 }
 0x80a   :  { %6032 = vtanh.f32 %v4378_v14 }
 0x80b   :  { %6034 = vtanh.f32 %v4379_v27 }
 0x812   :  { %v6029_v32 = vpop.eup %6028 }
 0x813   :  { %v6031_v46 = vpop.eup %6030  ;;  %v4384_v39 = vadd.f32 1.0, %v6029_v32  ;;  %v4246_v32 = vunpack.c.h.bf16 %v10375_v22  ;;  %v9506_v22 = vld [vmem:[%s9797_s2 + $0x40] ss:$24 sps:$4 sm:$0xff]  }
 0x814   :  { %v4385_v49 = vadd.f32 1.0, %v6031_v46 }
 0x815   :  { %v4388_v28 = vmul.f32 0.5, %v4384_v39  ;;  %v6033_v39 = vpop.eup %6032 }
 0x816   :  { %v4389_v30 = vmul.f32 0.5, %v4385_v49  ;;  %v6035_v56 = vpop.eup %6034  ;;  %v4386_v54 = vadd.f32 1.0, %v6033_v39  ;;  %v10394_v39 = vld [vmem:[#allocation39_spill] sm:$0xff] }
 0x817   :  { %v4387_v29 = vadd.f32 1.0, %v6035_v56  ;;  %v10395_v56 = vld [vmem:[#allocation9_spill] sm:$0xff] }
 0x818   :  { %v4390_v7 = vmul.f32 0.5, %v4386_v54  ;;  %v10396_v54 = vld [vmem:[#allocation10_spill] sm:$0xff] }
 0x819   :  { %v4391_v27 = vmul.f32 0.5, %v4387_v29  ;;  %v10397_v29 = vld [vmem:[#allocation40_spill] sm:$0xff] }
 0x843   :  { %v4365_v4 = vpop.f32.mrb[60].mxu0 }
 0x844   :  { %v4392_v47 = vadd.f32 %v4365_v4, %v8096_v35  ;;  %v4367_v50 = vpop.f32.mrb[61].mxu0 }
 0x845   :  { %v4393_v44 = vadd.f32 %v4367_v50, %v8103_v38  ;;  %v4369_v12 = vpop.f32.mrb[62].mxu0 }
 0x846   :  { %v4394_v10 = vmul.f32 %v4392_v47, %v4388_v28  ;;  %v4370_v40 = vpop.f32.mrb[63].mxu0 }
 0x847   :  { %v4395_v55 = vmul.f32 %v4393_v44, %v4389_v30  ;;  %v10389_v40 = vld [vmem:[#allocation7_spill] sm:$0xff] }
 0x848   :  { %v4396_v46 = vadd.f32 %v4394_v10, %v4245_v21  ;;  %v9512_v21 = vld [vmem:[%s9797_s2 + $0x74] ss:$24 sps:$4 sm:$0xff]   ;;  %v10388_v10 = vld [vmem:[#allocation72_spill] sm:$0xff] }
 0x849   :  { %v4397_v60 = vadd.f32 %v4395_v55, %v4246_v32  ;;  %v10390_v32 = vld [vmem:[#allocation8_spill] sm:$0xff]  ;;  %v10391_v55 = vld [vmem:[#allocation73_spill] sm:$0xff] }
 0x84a   :  { %6036 = vtanh.f32 %v4396_v46  ;;  %v10392_v46 = vld [vmem:[#allocation74_spill] sm:$0xff] }
 0x84b   :  { %6038 = vtanh.f32 %v4397_v60  ;;  %v10393_v60 = vld [vmem:[#allocation38_spill] sm:$0xff] }
 0x854   :  { %v6037_v9 = vpop.eup %6036 }
 0x855   :  { %v6039_v49 = vpop.eup %6038  ;;  %v4400_v14 = vsub.f32 %v9093_v25, %v6037_v9  ;;  %v9492_v25 = vld [vmem:[%s9797_s2 + $0x10] ss:$24 sps:$4 sm:$0xff]  }
 0x856   :  { %v4401_v4 = vsub.f32 %v9095_v3, %v6039_v49  ;;  %v9498_v3 = vld [vmem:[%s9797_s2 + $0x44] ss:$24 sps:$4 sm:$0xff]  }
 0x857   :  { %v4402_v28 = vmul.f32 %v4400_v14, %v4390_v7  ;;  %v10400_v7 = vld [vmem:[#allocation12_spill] sm:$0xff]  ;;  %v10401_v14 = vld [vmem:[#allocation42_spill] sm:$0xff] }
 0x858   :  { %v4403_v47 = vmul.f32 %v4401_v4, %v4391_v27  ;;  %v10402_v27 = vld [vmem:[#allocation43_spill] sm:$0xff]  ;;  %v10403_v4 = vld [vmem:[#allocation13_spill] sm:$0xff] }
 0x859   :  { %v9477_v50 = vadd.f32 %v6037_v9, %v4402_v28  ;;  %v10398_v9 = vld [vmem:[#allocation41_spill] sm:$0xff]  ;;  %v10404_v28 = vld [vmem:[#allocation14_spill] sm:$0xff] }
 0x85a   :  { %v9479_v30 = vadd.f32 %v6039_v49, %v4403_v47  ;;  %v10399_v49 = vld [vmem:[#allocation11_spill] sm:$0xff]  ;;  %v10405_v47 = vld [vmem:[#allocation44_spill] sm:$0xff] }
 0x85b   :  { %v9485_v12 = vpack.c.bf16 %v9477_v50, %v9477_v50 }
 0x85c   :  { %v4417_v44 = vpack.c.bf16 %v9479_v30, %v9479_v30 }
 0x85e   :  { %4450 = vmatprep.mubr.bf16.mxu1 %v4417_v44  ;;  %4491 = vmatprep.mubr.bf16.mxu0 %v4417_v44 }
 0x85f   :  { %4451 = vmatmul.mubr.bf16.vlgmr.msra.gmra.mrb[56].mxu1 %v9485_v12  ;;  %4492 = vmatmul.mubr.bf16.vlgmr.msra.gmra.mrb[64].mxu0 %v9485_v12 }
 0x860   :  { %4501 = vmatpush1.bf16.msra.mxu1 %v9492_v25  ;;  %4532 = vmatprep.mubr.bf16.mxu1 %v4417_v44  ;;  %v10406_v44 = vld [vmem:[#allocation15_spill] sm:$0xff] }
 0x861   :  { %4502 = vmatprep.subr.bf16.mxu1 %v9498_v3  ;;  %4588 = vmatpush1.bf16.msra.mxu0 %v8802_v23  ;;  %v9520_v23 = vld [vmem:[%s9797_s2 + $0x70] ss:$24 sps:$4 sm:$0xff]  }
 0x862   :  { %4589 = vmatprep.subr.bf16.mxu0 %v8808_v48  ;;  %v9526_v48 = vld [vmem:[%s9797_s2 + $0xa4] ss:$24 sps:$4 sm:$0xff]  }
 0x864   :  { %4503 = vmatpush1.bf16.msra.mxu1 %v9506_v22 }
 0x865   :  { %4504 = vmatprep.subr.bf16.mxu1 %v9512_v21  ;;  %4590 = vmatpush1.bf16.msra.mxu0 %v8816_v57  ;;  %v9534_v57 = vld [vmem:[%s9797_s2 + $0xa0] ss:$24 sps:$4 sm:$0xff]  }
 0x866   :  { %4591 = vmatprep.subr.bf16.mxu0 %v8822_v15  ;;  %v9540_v15 = vld [vmem:[%s9797_s2 + $0xd4] ss:$24 sps:$4 sm:$0xff]  }
 0x868   :  { %4505 = vmatpush1.bf16.msra.mxu1 %v9520_v23 }
 0x869   :  { %4506 = vmatprep.subr.bf16.mxu1 %v9526_v48  ;;  %4592 = vmatpush1.bf16.msra.mxu0 %v8830_v13  ;;  %v9548_v13 = vld [vmem:[%s9797_s2 + $0xd0] ss:$24 sps:$4 sm:$0xff]  }
 0x86a   :  { %4593 = vmatprep.subr.bf16.mxu0 %v8836_v63  ;;  %v9554_v63 = vld [vmem:[%s9797_s2 + $0x104] ss:$24 sps:$4 sm:$0xff]  }
 0x86c   :  { %4507 = vmatpush1.bf16.msra.mxu1 %v9534_v57 }
 0x86d   :  { %4508 = vmatprep.subr.bf16.mxu1 %v9540_v15  ;;  %4594 = vmatpush1.bf16.msra.mxu0 %v8844_v11  ;;  %v9562_v11 = vld [vmem:[%s9797_s2 + $0x100] ss:$24 sps:$4 sm:$0xff]  }
 0x86e   :  { %4595 = vmatprep.subr.bf16.mxu0 %v8850_v18  ;;  %v9568_v18 = vld [vmem:[%s9797_s2 + $0x134] ss:$24 sps:$4 sm:$0xff]  }
 0x870   :  { %4509 = vmatpush1.bf16.msra.mxu1 %v9548_v13 }
 0x871   :  { %4510 = vmatprep.subr.bf16.mxu1 %v9554_v63  ;;  %4596 = vmatpush1.bf16.msra.mxu0 %v8858_v37  ;;  %v9576_v37 = vld [vmem:[%s9797_s2 + $0x130] ss:$24 sps:$4 sm:$0xff]  }
 0x872   :  { %4597 = vmatprep.subr.bf16.mxu0 %v9127_v17  ;;  %v9582_v17 = vld [vmem:[%s9797_s2 + $0x164] ss:$24 sps:$4 sm:$0xff]  }
 0x874   :  { %4511 = vmatpush1.bf16.msra.mxu1 %v9562_v11 }
 0x875   :  { %4512 = vmatprep.subr.bf16.mxu1 %v9568_v18  ;;  %4598 = vmatpush1.bf16.msra.mxu0 %v8867_v42  ;;  %v9590_v42 = vld [vmem:[%s9797_s2 + $0x160] ss:$24 sps:$4 sm:$0xff]  }
 0x876   :  { %4599 = vmatprep.subr.bf16.mxu0 %v9136_v62  ;;  %v9596_v62 = vld [vmem:[%s9797_s2 + $0x194] ss:$24 sps:$4 sm:$0xff]  }
 0x878   :  { %4513 = vmatpush1.bf16.msra.mxu1 %v9576_v37 }
 0x879   :  { %4514 = vmatprep.subr.bf16.mxu1 %v9582_v17  ;;  %4600 = vmatpush1.bf16.msra.mxu0 %v9144_v51  ;;  %v9604_v51 = vld [vmem:[%s9797_s2 + $0x190] ss:$24 sps:$4 sm:$0xff]  }
 0x87a   :  { %4601 = vmatprep.subr.bf16.mxu0 %v9150_v1  ;;  %v9610_v1 = vld [vmem:[%s9797_s2 + $0x1c4] ss:$24 sps:$4 sm:$0xff]  }
 0x87c   :  { %4515 = vmatpush1.bf16.msra.mxu1 %v9590_v42 }
 0x87d   :  { %4516 = vmatprep.subr.bf16.mxu1 %v9596_v62  ;;  %4602 = vmatpush1.bf16.msra.mxu0 %v9158_v59  ;;  %v9618_v59 = vld [vmem:[%s9797_s2 + $0x1c0] ss:$24 sps:$4 sm:$0xff]  }
 0x87e   :  { %4603 = vmatprep.subr.bf16.mxu0 %v9164_v36  ;;  %v9624_v36 = vld [vmem:[%s9797_s2 + $0x1f4] ss:$24 sps:$4 sm:$0xff]  }
 0x880   :  { %4517 = vmatpush1.bf16.msra.mxu1 %v9604_v51 }
 0x881   :  { %4518 = vmatprep.subr.bf16.mxu1 %v9610_v1  ;;  %4604 = vmatpush1.bf16.msra.mxu0 %v9172_v41  ;;  %v9632_v41 = vld [vmem:[%s9797_s2 + $0x1f0] ss:$24 sps:$4 sm:$0xff]  }
 0x882   :  { %4605 = vmatprep.subr.bf16.mxu0 %v9178_v61  ;;  %v9638_v61 = vld [vmem:[%s9797_s2 + $0x224] ss:$24 sps:$4 sm:$0xff]  }
 0x884   :  { %4519 = vmatpush1.bf16.msra.mxu1 %v9618_v59 }
 0x885   :  { %4520 = vmatprep.subr.bf16.mxu1 %v9624_v36  ;;  %4606 = vmatpush1.bf16.msra.mxu0 %v9186_v52  ;;  %v9646_v52 = vld [vmem:[%s9797_s2 + $0x220] ss:$24 sps:$4 sm:$0xff]  }
 0x886   :  { %4607 = vmatprep.subr.bf16.mxu0 %v9192_v53  ;;  %v9652_v53 = vld [vmem:[%s9797_s2 + $0x254] ss:$24 sps:$4 sm:$0xff]  }
 0x888   :  { %4521 = vmatpush1.bf16.msra.mxu1 %v9632_v41 }
 0x889   :  { %4522 = vmatprep.subr.bf16.mxu1 %v9638_v61  ;;  %4608 = vmatpush1.bf16.msra.mxu0 %v9200_v20  ;;  %v9660_v20 = vld [vmem:[%s9797_s2 + $0x250] ss:$24 sps:$4 sm:$0xff]  }
 0x88a   :  { %4609 = vmatprep.subr.bf16.mxu0 %v9206_v31  ;;  %v9666_v31 = vld [vmem:[%s9797_s2 + $0x284] ss:$24 sps:$4 sm:$0xff]  }
 0x88c   :  { %4523 = vmatpush1.bf16.msra.mxu1 %v9646_v52 }
 0x88d   :  { %4524 = vmatprep.subr.bf16.mxu1 %v9652_v53  ;;  %4610 = vmatpush1.bf16.msra.mxu0 %v9214_v2  ;;  %v9674_v2 = vld [vmem:[%s9797_s2 + $0x280] ss:$24 sps:$4 sm:$0xff]  }
 0x88e   :  { %4611 = vmatprep.subr.bf16.mxu0 %v9220_v33  ;;  %v6273_v33 = vld [vmem:[%s9797_s2 + $0x14] ss:$24 sps:$4 sm:$0xff]  }
 0x890   :  { %4525 = vmatpush1.bf16.msra.mxu1 %v9660_v20 }
 0x891   :  { %4526 = vmatprep.subr.bf16.mxu1 %v9666_v31  ;;  %4612 = vmatpush1.bf16.msra.mxu0 %v9228_v43  ;;  %v10376_v43 = vld [vmem:[#allocation47_spill] sm:$0xff] }
 0x892   :  { %4613 = vmatprep.subr.bf16.mxu0 %v9234_v26  ;;  %v10377_v26 = vld [vmem:[#allocation48_spill] sm:$0xff] }
 0x894   :  { %4527 = vmatpush1.bf16.msra.mxu1 %v9674_v2 }
 0x895   :  { %4528 = vmatprep.subr.bf16.mxu1 %v10336_v45  ;;  %4614 = vmatpush1.bf16.msra.mxu0 %v9242_v58  ;;  %v10378_v45 = vld [vmem:[#allocation57_spill] sm:$0xff]  ;;  %v10379_v58 = vld [vmem:[#allocation67_spill] sm:$0xff] }
 0x896   :  { %4615 = vmatprep.subr.bf16.mxu0 %v9248_v16  ;;  %v10380_v16 = vld [vmem:[#allocation68_spill] sm:$0xff] }
 0x898   :  { %4529 = vmatpush1.bf16.msra.mxu1 %v10337_v5  ;;  %v10381_v5 = vld [vmem:[#allocation5_spill] sm:$0xff] }
 0x899   :  { %4530 = vmatprep.subr.bf16.mxu1 %v10338_v8  ;;  %4616 = vmatpush1.bf16.msra.mxu0 %v9256_v0  ;;  %v10382_v8 = vld [vmem:[#allocation6_spill] sm:$0xff]  ;;  %v10383_v0 = vld [vmem:[#allocation69_spill] sm:$0xff] }
 0x89a   :  { %4617 = vmatprep.subr.bf16.mxu0 %v9262_v19  ;;  %v10384_v19 = vld [vmem:[#allocation70_spill] sm:$0xff] }
 0x89c   :  { %4531 = vmatpush1.bf16.msra.mxu1 %v10339_v34  ;;  %v10385_v34 = vld [vmem:[#allocation36_spill] sm:$0xff] }
 0x89d   :  { %4628 = vmatprep.subr.bf16.mxu1 %v9269_v24  ;;  %4618 = vmatpush1.bf16.msra.mxu0 %v9275_v6  ;;  %v10386_v24 = vld [vmem:[#allocation37_spill] sm:$0xff]  ;;  %v10387_v6 = vld [vmem:[#allocation71_spill] sm:$0xff] }
 0x89e   :  { %4669 = vmatprep.subr.bf16.mxu0 %v6273_v33 }
 0x89f   :  { %4533 = vmatmul.mubr.bf16.vlgmr.msra.gmra.mrb[60].mxu1 %v9485_v12  ;;  %v10407_v12 = vld [vmem:[#allocation53_spill] sm:$0xff] }
 0x8a0   :  { %4629 = vmatpush1.bf16.msra.mxu1 %v10376_v43  ;;  %v4410_v33 = vunpack.c.l.bf16 %v10407_v12  ;;  %v10408_v43 = vld [vmem:[#allocation54_spill] sm:$0xff] }
 0x8a1   :  { %4630 = vmatprep.subr.bf16.mxu1 %v10377_v26  ;;  %v4412_v26 = vunpack.c.l.bf16 %v10408_v43 }
 0x8a4   :  { %4631 = vmatpush1.bf16.msra.mxu1 %v10378_v45 }
 0x8a5   :  { %4632 = vmatprep.subr.bf16.mxu1 %v10379_v58 }
 0x8a8   :  { %4633 = vmatpush1.bf16.msra.mxu1 %v10380_v16  ;;  %v4411_v16 = vunpack.c.h.bf16 %v10407_v12  ;;  %v10409_v12 = vld [vmem:[#allocation60_spill] sm:$0xff] }
 0x8a9   :  { %4634 = vmatprep.subr.bf16.mxu1 %v10381_v5  ;;  %v4413_v5 = vunpack.c.h.bf16 %v10408_v43 }
 0x8ac   :  { %4635 = vmatpush1.bf16.msra.mxu1 %v10382_v8 }
 0x8ad   :  { %4636 = vmatprep.subr.bf16.mxu1 %v10383_v0 }
 0x8b0   :  { %4637 = vmatpush1.bf16.msra.mxu1 %v10384_v19 }
 0x8b1   :  { %4638 = vmatprep.subr.bf16.mxu1 %v10385_v34 }
 0x8b4   :  { %4639 = vmatpush1.bf16.msra.mxu1 %v10386_v24 }
 0x8b5   :  { %4640 = vmatprep.subr.bf16.mxu1 %v10387_v6 }
 0x8b8   :  { %4641 = vmatpush1.bf16.msra.mxu1 %v10388_v10 }
 0x8b9   :  { %4642 = vmatprep.subr.bf16.mxu1 %v10389_v40 }
 0x8bc   :  { %4643 = vmatpush1.bf16.msra.mxu1 %v10390_v32 }
 0x8bd   :  { %4644 = vmatprep.subr.bf16.mxu1 %v10391_v55 }
 0x8c0   :  { %4645 = vmatpush1.bf16.msra.mxu1 %v10392_v46 }
 0x8c1   :  { %4646 = vmatprep.subr.bf16.mxu1 %v10393_v60 }
 0x8c4   :  { %4647 = vmatpush1.bf16.msra.mxu1 %v10394_v39 }
 0x8c5   :  { %4648 = vmatprep.subr.bf16.mxu1 %v10395_v56 }
 0x8c8   :  { %4649 = vmatpush1.bf16.msra.mxu1 %v10396_v54 }
 0x8c9   :  { %4650 = vmatprep.subr.bf16.mxu1 %v10397_v29 }
 0x8cc   :  { %4651 = vmatpush1.bf16.msra.mxu1 %v10398_v9 }
 0x8cd   :  { %4652 = vmatprep.subr.bf16.mxu1 %v10399_v49 }
 0x8d0   :  { %4653 = vmatpush1.bf16.msra.mxu1 %v10400_v7 }
 0x8d1   :  { %4654 = vmatprep.subr.bf16.mxu1 %v10401_v14 }
 0x8d4   :  { %4655 = vmatpush1.bf16.msra.mxu1 %v10402_v27 }
 0x8d5   :  { %4656 = vmatprep.subr.bf16.mxu1 %v10403_v4 }
 0x8d8   :  { %4657 = vmatpush1.bf16.msra.mxu1 %v10404_v28 }
 0x8d9   :  { %4658 = vmatprep.subr.bf16.mxu1 %v10405_v47 }
 0x8dc   :  { %4659 = vmatpush1.bf16.msra.mxu1 %v10406_v44 }
 0x932   :  { %v4452_v45 = vpop.f32.mrb[56].mxu1  ;;  %v4493_v58 = vpop.f32.mrb[64].mxu0 }
 0x933   :  { %v4541_v8 = vadd.f32 %v4452_v45, %v4410_v33  ;;  %v4543_v0 = vadd.f32 %v4493_v58, %v4412_v26  ;;  %v4454_v19 = vpop.f32.mrb[57].mxu1  ;;  %v4495_v34 = vpop.f32.mrb[65].mxu0  ;;  %v4414_v33 = vunpack.c.l.bf16 %v10409_v12  ;;  %v4415_v45 = vunpack.c.h.bf16 %v10409_v12 }
 0x934   :  { %v4542_v24 = vadd.f32 %v4454_v19, %v4411_v16  ;;  %v4544_v6 = vadd.f32 %v4495_v34, %v4413_v5  ;;  %v4456_v10 = vpop.f32.mrb[58].mxu1  ;;  %v4497_v40 = vpop.f32.mrb[66].mxu0 }
 0x935   :  { %v4457_v32 = vpop.f32.mrb[59].mxu1  ;;  %v4498_v55 = vpop.f32.mrb[67].mxu0  ;;  %v4545_v46 = vmul.f32 0.5, %v4541_v8  ;;  %v4547_v29 = vmul.f32 0.5, %v4543_v0 }
 0x936   :  { %v4546_v60 = vmul.f32 0.5, %v4542_v24  ;;  %v4548_v49 = vmul.f32 0.5, %v4544_v6 }
 0x937   :  { %6040 = vtanh.f32 %v4545_v46 }
 0x938   :  { %6042 = vtanh.f32 %v4546_v60 }
 0x939   :  { %6044 = vtanh.f32 %v4547_v29 }
 0x93a   :  { %6046 = vtanh.f32 %v4548_v49 }
 0x941   :  { %v6041_v39 = vpop.eup %6040 }
 0x942   :  { %v6043_v56 = vpop.eup %6042  ;;  %v4553_v54 = vadd.f32 1.0, %v6041_v39 }
 0x943   :  { %v4554_v9 = vadd.f32 1.0, %v6043_v56  ;;  %v6045_v8 = vpop.eup %6044 }
 0x944   :  { %v4557_v14 = vmul.f32 0.5, %v4553_v54  ;;  %v6047_v0 = vpop.eup %6046  ;;  %v4555_v19 = vadd.f32 1.0, %v6045_v8 }
 0x945   :  { %v4558_v28 = vmul.f32 0.5, %v4554_v9  ;;  %v4556_v34 = vadd.f32 1.0, %v6047_v0 }
 0x946   :  { %v4559_v10 = vmul.f32 0.5, %v4555_v19 }
 0x947   :  { %v4560_v32 = vmul.f32 0.5, %v4556_v34 }
 0x972   :  { %v4534_v7 = vpop.f32.mrb[60].mxu1 }
 0x973   :  { %v4561_v27 = vadd.f32 %v4534_v7, %v8096_v35  ;;  %v4536_v4 = vpop.f32.mrb[61].mxu1 }
 0x974   :  { %v4562_v47 = vadd.f32 %v4536_v4, %v8103_v38  ;;  %v4538_v44 = vpop.f32.mrb[62].mxu1 }
 0x975   :  { %v4563_v43 = vmul.f32 %v4561_v27, %v4557_v14  ;;  %v4539_v26 = vpop.f32.mrb[63].mxu1  ;;  %v10412_v44 = vld [vmem:[#allocation61_spill] sm:$0xff] }
 0x976   :  { %v4564_v58 = vmul.f32 %v4562_v47, %v4558_v28  ;;  %v4583_v12 = vunpack.c.l.bf16 %v10412_v44  ;;  %v4584_v26 = vunpack.c.h.bf16 %v10412_v44 }
 0x977   :  { %v4565_v16 = vadd.f32 %v4563_v43, %v4414_v33 }
 0x978   :  { %v4566_v5 = vadd.f32 %v4564_v58, %v4415_v45 }
 0x979   :  { %6048 = vtanh.f32 %v4565_v16 }
 0x97a   :  { %6050 = vtanh.f32 %v4566_v5 }
 0x983   :  { %v6049_v24 = vpop.eup %6048 }
 0x984   :  { %v6051_v6 = vpop.eup %6050  ;;  %v4569_v40 = vsub.f32 %v9477_v50, %v6049_v24  ;;  %v6274_v50 = vld [vmem:[%s9797_s2 + $0x2b4] ss:$24 sps:$4 sm:$0xff]  }
 0x985   :  { %v4570_v55 = vsub.f32 %v9479_v30, %v6051_v6  ;;  %v6275_v30 = vld [vmem:[%s9797_s2 + $0x2b0] ss:$24 sps:$4 sm:$0xff]  }
 0x986   :  { %v4571_v46 = vmul.f32 %v4569_v40, %v4559_v10 }
 0x987   :  { %v4572_v60 = vmul.f32 %v4570_v55, %v4560_v32 }
 0x988   :  { %v9732_v39 = vadd.f32 %v6049_v24, %v4571_v46 }
 0x989   :  { %v9734_v56 = vadd.f32 %v6051_v6, %v4572_v60 }
 0x98a   :  { %v4585_v29 = vpack.c.bf16 %v9732_v39, %v9732_v39 }
 0x98b   :  { %v4586_v54 = vpack.c.bf16 %v9734_v56, %v9734_v56 }
 0x98d   :  { %4619 = vmatprep.mubr.bf16.mxu0 %v4586_v54  ;;  %4660 = vmatprep.mubr.bf16.mxu1 %v4586_v54 }
 0x98e   :  { %4620 = vmatmul.mubr.bf16.vlgmr.msra.gmra.mrb[68].mxu0 %v4585_v29  ;;  %4661 = vmatmul.mubr.bf16.vlgmr.msra.gmra.mrb[64].mxu1 %v4585_v29 }
 0x98f   :  { %4670 = vmatpush1.bf16.msra.mxu0 %v9492_v25  ;;  %4701 = vmatprep.mubr.bf16.mxu0 %v4586_v54  ;;  %v6276_v25 = vld [vmem:[%s9797_s2 + $0x2e4] ss:$24 sps:$4 sm:$0xff]  }
 0x990   :  { %4671 = vmatprep.subr.bf16.mxu0 %v9498_v3  ;;  %v6277_v3 = vld [vmem:[%s9797_s2 + $0x2e0] ss:$24 sps:$4 sm:$0xff]  }
 0x993   :  { %4672 = vmatpush1.bf16.msra.mxu0 %v9506_v22  ;;  %v10410_v22 = vld [vmem:[#allocation55_spill] sm:$0xff] }
 0x994   :  { %4673 = vmatprep.subr.bf16.mxu0 %v9512_v21  ;;  %v4579_v21 = vunpack.c.l.bf16 %v10410_v22 }
 0x997   :  { %4674 = vmatpush1.bf16.msra.mxu0 %v9520_v23  ;;  %v10411_v23 = vld [vmem:[#allocation56_spill] sm:$0xff] }
 0x998   :  { %4675 = vmatprep.subr.bf16.mxu0 %v9526_v48  ;;  %v4581_v48 = vunpack.c.l.bf16 %v10411_v23 }
 0x99b   :  { %4676 = vmatpush1.bf16.msra.mxu0 %v9534_v57 }
 0x99c   :  { %4677 = vmatprep.subr.bf16.mxu0 %v9540_v15 }
 0x99f   :  { %4678 = vmatpush1.bf16.msra.mxu0 %v9548_v13  ;;  %v4580_v13 = vunpack.c.h.bf16 %v10410_v22 }
 0x9a0   :  { %4679 = vmatprep.subr.bf16.mxu0 %v9554_v63  ;;  %v4582_v63 = vunpack.c.h.bf16 %v10411_v23 }
 0x9a3   :  { %4680 = vmatpush1.bf16.msra.mxu0 %v9562_v11 }
 0x9a4   :  { %4681 = vmatprep.subr.bf16.mxu0 %v9568_v18 }
 0x9a7   :  { %4682 = vmatpush1.bf16.msra.mxu0 %v9576_v37 }
 0x9a8   :  { %4683 = vmatprep.subr.bf16.mxu0 %v9582_v17 }
 0x9ab   :  { %4684 = vmatpush1.bf16.msra.mxu0 %v9590_v42 }
 0x9ac   :  { %4685 = vmatprep.subr.bf16.mxu0 %v9596_v62 }
 0x9af   :  { %4686 = vmatpush1.bf16.msra.mxu0 %v9604_v51 }
 0x9b0   :  { %4687 = vmatprep.subr.bf16.mxu0 %v9610_v1 }
 0x9b3   :  { %4688 = vmatpush1.bf16.msra.mxu0 %v9618_v59 }
 0x9b4   :  { %4689 = vmatprep.subr.bf16.mxu0 %v9624_v36 }
 0x9b7   :  { %4690 = vmatpush1.bf16.msra.mxu0 %v9632_v41 }
 0x9b8   :  { %4691 = vmatprep.subr.bf16.mxu0 %v9638_v61 }
 0x9bb   :  { %4692 = vmatpush1.bf16.msra.mxu0 %v9646_v52 }
 0x9bc   :  { %4693 = vmatprep.subr.bf16.mxu0 %v9652_v53 }
 0x9bf   :  { %4694 = vmatpush1.bf16.msra.mxu0 %v9660_v20 }
 0x9c0   :  { %4695 = vmatprep.subr.bf16.mxu0 %v9666_v31 }
 0x9c3   :  { %4696 = vmatpush1.bf16.msra.mxu0 %v9674_v2 }
 0x9c4   :  { %4697 = vmatprep.subr.bf16.mxu0 %v6274_v50 }
 0x9c7   :  { %4698 = vmatpush1.bf16.msra.mxu0 %v6275_v30 }
 0x9c8   :  { %4699 = vmatprep.subr.bf16.mxu0 %v6276_v25 }
 0x9cb   :  { %4700 = vmatpush1.bf16.msra.mxu0 %v6277_v3 }
 0x9ce   :  { %4702 = vmatmul.mubr.bf16.vlgmr.msra.gmra.mrb[72].mxu0 %v4585_v29 }
 0xa61   :  { %v4621_v57 = vpop.f32.mrb[68].mxu0  ;;  %v4662_v15 = vpop.f32.mrb[64].mxu1 }
 0xa62   :  { %v4710_v11 = vadd.f32 %v4621_v57, %v4579_v21  ;;  %v4712_v18 = vadd.f32 %v4662_v15, %v4581_v48  ;;  %v4623_v37 = vpop.f32.mrb[69].mxu0  ;;  %v4664_v17 = vpop.f32.mrb[65].mxu1 }
 0xa63   :  { %v4711_v42 = vadd.f32 %v4623_v37, %v4580_v13  ;;  %v4713_v62 = vadd.f32 %v4664_v17, %v4582_v63  ;;  %v4625_v51 = vpop.f32.mrb[70].mxu0  ;;  %v4666_v1 = vpop.f32.mrb[66].mxu1 }
 0xa64   :  { %v4626_v59 = vpop.f32.mrb[71].mxu0  ;;  %v4667_v36 = vpop.f32.mrb[67].mxu1  ;;  %v4714_v41 = vmul.f32 0.5, %v4710_v11  ;;  %v4716_v31 = vmul.f32 0.5, %v4712_v18 }
 0xa65   :  { %v4715_v61 = vmul.f32 0.5, %v4711_v42  ;;  %v4717_v9 = vmul.f32 0.5, %v4713_v62 }
 0xa66   :  { %6052 = vtanh.f32 %v4714_v41 }
 0xa67   :  { %6054 = vtanh.f32 %v4715_v61 }
 0xa68   :  { %6056 = vtanh.f32 %v4716_v31 }
 0xa69   :  { %6058 = vtanh.f32 %v4717_v9 }
 0xa70   :  { %v6053_v52 = vpop.eup %6052 }
 0xa71   :  { %v6055_v53 = vpop.eup %6054  ;;  %v4722_v20 = vadd.f32 1.0, %v6053_v52 }
 0xa72   :  { %v4723_v2 = vadd.f32 1.0, %v6055_v53  ;;  %v6057_v5 = vpop.eup %6056 }
 0xa73   :  { %v4726_v7 = vmul.f32 0.5, %v4722_v20  ;;  %v6059_v8 = vpop.eup %6058 }
 0xa74   :  { %v4727_v4 = vmul.f32 0.5, %v4723_v2  ;;  %v4725_v0 = vadd.f32 1.0, %v6059_v8 }
 0xa76   :  { %v4729_v6 = vmul.f32 0.5, %v4725_v0 }
 0xaa1   :  { %v4703_v49 = vpop.f32.mrb[72].mxu0 }
 0xaa2   :  { %v4730_v14 = vadd.f32 %v4703_v49, %v8096_v35  ;;  %v4705_v27 = vpop.f32.mrb[73].mxu0  ;;  %v4724_v35 = vadd.f32 1.0, %v6057_v5 }
 0xaa3   :  { %v4731_v28 = vadd.f32 %v4705_v27, %v8103_v38  ;;  %v4707_v47 = vpop.f32.mrb[74].mxu0 }
 0xaa4   :  { %v4732_v33 = vmul.f32 %v4730_v14, %v4726_v7  ;;  %v4708_v43 = vpop.f32.mrb[75].mxu0  ;;  %v4728_v24 = vmul.f32 0.5, %v4724_v35 }
 0xaa5   :  { %v4733_v45 = vmul.f32 %v4731_v28, %v4727_v4 }
 0xaa6   :  { %v4734_v58 = vadd.f32 %v4732_v33, %v4583_v12 }
 0xaa7   :  { %v4735_v16 = vadd.f32 %v4733_v45, %v4584_v26 }
 0xaa8   :  { %6060 = vtanh.f32 %v4734_v58 }
 0xaa9   :  { %6062 = vtanh.f32 %v4735_v16 }
 0xab2   :  { %v6061_v19 = vpop.eup %6060 }
 0xab3   :  { %v6063_v34 = vpop.eup %6062  ;;  %v4738_v38 = vsub.f32 %v9732_v39, %v6061_v19 }
 0xab4   :  { %v4739_v10 = vsub.f32 %v9734_v56, %v6063_v34 }
 0xab5   :  { %v4740_v40 = vmul.f32 %v4738_v38, %v4728_v24 }
 0xab6   :  { %v4741_v32 = vmul.f32 %v4739_v10, %v4729_v6 }
 0xab7   :  { %v4742_v55 = vadd.f32 %v6061_v19, %v4740_v40 }
 0xab8   :  { %v4743_v46 = vadd.f32 %v6063_v34, %v4741_v32 }
 0xab9   :  { %4749 = vst [vmem:[%s9800_s5] sm:$0xff] %v4742_v55 }
 0xaba   :  { %4750 = vst [vmem:[%s9800_s5 + $0x8] sm:$0xff] %v4743_v46 }

</bundles_post_ra>
